<compile_context>
chip_gen: v6e
topology: v6e:2x2x1
jax: 0.10.0
libtpu: 0.0.40
codegen_flags: <defaults>
</compile_context>

<pallas_src>
import functools

import jax
import jax.numpy as jnp
from jax.experimental import pallas as pl
from jax.experimental.pallas import tpu as pltpu


# ----------------------------------------------------------------------------
# One-time weight packing: kernel-ready, tap-folded (K, Cout) bf16 matrices.
# ----------------------------------------------------------------------------
def _pack_down_weight(w):
    # Conv2d(4,4,s2,p1) weights (Co, Ci, 4, 4) -> (16*Ci, Co).
    # Row order = [tap (a,b), s2d-channel (r,c,ci)] matching the kernel slab.
    Co, Ci = w.shape[0], w.shape[1]
    wr = w.reshape(Co, Ci, 2, 2, 2, 2)                 # [co, ci, a, r, b, c]
    return jnp.transpose(wr, (2, 4, 3, 5, 1, 0)).reshape(16 * Ci, Co)


def _pack_same_weight(w):
    # Conv2d(3,3,s1,p1) weights (Co, Ci, 3, 3) -> (9*Ci, Co); row = (kh,kw,ci).
    Co, Ci = w.shape[0], w.shape[1]
    return jnp.transpose(w, (2, 3, 1, 0)).reshape(9 * Ci, Co)


def _pack_up_weight_parities(w):
    # ConvTranspose2d(4,4,s2,p1) weights (Ci, Co, 4, 4) -> (2, 6*Ci, 2*Co).
    # Sub-pixel decomposition, split by output ROW parity r so the kernel's
    # depth-to-space needs no transpose.  Within parity r:
    #   slab row  = (a*3 + dx)*Ci + ci   for tap (dy=r+a, dx) of pad1(h)
    #   out col   = c*Co + co            (column parity c, channel co)
    # value = flip(w)[ci, co, ky=2a+r, kx=2b+c] where b = dx - c in {0,1}.
    Ci, Co = w.shape[0], w.shape[1]
    wf = jnp.flip(w, axis=(2, 3))                      # [ci, co, ky, kx]
    packed = jnp.zeros((2, 2, 3, Ci, 2, Co), w.dtype)  # [r, a, dx, ci, c, co]
    for r in range(2):
        for a in range(2):
            for c in range(2):
                for b in range(2):
                    dx = c + b
                    packed = packed.at[r, a, dx, :, c, :].set(
                        wf[:, :, 2 * a + r, 2 * b + c])
    return packed.reshape(2, 6 * Ci, 2 * Co)


# ----------------------------------------------------------------------------
# Cheap XLA layout glue on the INPUT only (one pass over x; intermediates
# never leave VMEM).
# ----------------------------------------------------------------------------
def _pad1(x):
    return jnp.pad(x, ((0, 0), (1, 1), (1, 1), (0, 0)))


def _space_to_depth2(x):    # (N,H,W,C) -> (N,H/2,W/2,4C), channel = (r,c,ci)
    N, H, W, C = x.shape
    x = x.reshape(N, H // 2, 2, W // 2, 2, C)
    return jnp.transpose(x, (0, 1, 3, 2, 4, 5)).reshape(N, H // 2, W // 2, 4 * C)


# ----------------------------------------------------------------------------
# Fused kernel: one image per grid step, everything between HBM input and
# HBM output stays in VMEM.
# ----------------------------------------------------------------------------
def _unet_innermost_kernel(xs_ref, x_ref, wd_ref, ws_ref, wu_ref, o_ref,
                           pad_ref, slab_d, slab_s, slab_u, *,
                           h2, w2, cin, inner, cout, neg_slope):
    M = h2 * w2
    c4 = 4 * cin

    # ---- down: LeakyReLU(0.2) + Conv2d(4,4,s2,p1) as one tap-folded GEMM on
    #      the space-to-depth input.  Activation + bf16 cast hoisted (once per
    #      block, not per tap; lrelu(0)=0 so pre-padding stays valid).
    a0 = xs_ref[0]                                           # (h2+1,w2+1,4cin)
    a0 = jnp.where(a0 >= 0, a0, a0 * neg_slope).astype(jnp.bfloat16)
    for t, (a, b) in enumerate(((0, 0), (0, 1), (1, 0), (1, 1))):
        slab_d[:, t * c4:(t + 1) * c4] = a0[a:a + h2, b:b + w2, :].reshape(M, c4)
    h = jnp.dot(slab_d[...], wd_ref[...],
                preferred_element_type=jnp.float32)          # (M, inner) f32

    # Padded activation buffer shared by both 3x3 convs and the up-conv;
    # zeroed once per image so the 1-pixel border stays zero (fused padding).
    pad_ref[...] = jnp.zeros(pad_ref.shape, pad_ref.dtype)

    def write_act(v):         # ReLU + bf16 cast hoisted, interior write only.
        pad_ref[1:1 + h2, 1:1 + w2, :] = (
            jnp.maximum(v, 0.0).reshape(h2, w2, inner).astype(jnp.bfloat16))

    def same_conv(v):         # ReLU + Conv2d(3,3,s1,p1): single GEMM, K=9*Cin.
        write_act(v)
        for t in range(9):
            dy, dx = t // 3, t % 3
            slab_s[:, t * inner:(t + 1) * inner] = (
                pad_ref[dy:dy + h2, dx:dx + w2, :].reshape(M, inner))
        return jnp.dot(slab_s[...], ws_ref[...],
                       preferred_element_type=jnp.float32)

    h = same_conv(h)          # shared weights, applied twice (as in the spec)
    h = same_conv(h)

    # ---- up: ReLU + ConvTranspose2d(4,4,s2,p1).  One GEMM per output-row
    #      parity (K=6*Cin, lane-dense (M, 2*Co) result); depth-to-space via
    #      contiguous reshapes / leading-dim stacks only.
    write_act(h)
    rows = []
    for r in range(2):
        t = 0
        for a in range(2):
            for dx in range(3):
                slab_u[:, t * inner:(t + 1) * inner] = (
                    pad_ref[r + a:r + a + h2, dx:dx + w2, :].reshape(M, inner))
                t += 1
        yr = jnp.dot(slab_u[...], wu_ref[r],
                     preferred_element_type=jnp.float32)     # (M, 2*cout)
        cols = [yr[:, c * cout:(c + 1) * cout].reshape(h2, w2, cout)
                for c in range(2)]
        rows.append(jnp.stack(cols, axis=2).reshape(h2, 2 * w2, cout))
    y = jnp.stack(rows, axis=1).reshape(2 * h2, 2 * w2, cout)  # (H, W, cout)

    # ---- skip connection fused into the output store: out = [x | model(x)].
    o_ref[0, :, :, :cin] = x_ref[0]
    o_ref[0, :, :, cin:] = y.astype(o_ref.dtype)


def _forward_pallas(xs, x_nhwc, wd, ws, wu, *, h2, w2, cin, inner, cout):
    N = x_nhwc.shape[0]
    H, W = 2 * h2, 2 * w2
    M = h2 * w2
    kernel = functools.partial(_unet_innermost_kernel, h2=h2, w2=w2, cin=cin,
                               inner=inner, cout=cout, neg_slope=0.2)
    return pl.pallas_call(
        kernel,
        out_shape=jax.ShapeDtypeStruct((N, H, W, cin + cout), jnp.float32),
        grid_spec=pltpu.PrefetchScalarGridSpec(
            num_scalar_prefetch=0,
            grid=(N,),
            in_specs=[
                pl.BlockSpec((1, h2 + 1, w2 + 1, 4 * cin),
                             lambda n: (n, 0, 0, 0)),
                pl.BlockSpec((1, H, W, cin), lambda n: (n, 0, 0, 0)),
                # Grid-invariant index_maps -> weight tiles stay resident.
                pl.BlockSpec((16 * cin, inner), lambda n: (0, 0)),
                pl.BlockSpec((9 * inner, inner), lambda n: (0, 0)),
                pl.BlockSpec((2, 6 * inner, 2 * cout), lambda n: (0, 0, 0)),
            ],
            out_specs=pl.BlockSpec((1, H, W, cin + cout),
                                   lambda n: (n, 0, 0, 0)),
            scratch_shapes=[
                pltpu.VMEM((h2 + 2, w2 + 2, inner), jnp.bfloat16),  # padded act
                pltpu.VMEM((M, 16 * cin), jnp.bfloat16),            # down slab
                pltpu.VMEM((M, 9 * inner), jnp.bfloat16),           # same slab
                pltpu.VMEM((M, 6 * inner), jnp.bfloat16),           # up slab
            ]),
        compiler_params=pltpu.CompilerParams(
            dimension_semantics=("parallel",)),
    )(xs, x_nhwc, wd, ws, wu)


# ----------------------------------------------------------------------------
# The module (innermost U-Net skip block).
# ----------------------------------------------------------------------------
class UnetSkipConnectionBlockInnermost:
    """UnetSkipConnectionBlock(outer_nc, inner_nc, innermost=True,
    norm_layer=False, use_dropout=False, deformable=False):
    forward(x) = cat([x, up(relu(same(relu(same(relu(down(lrelu(x))))))))], C)
    with `same` applied twice using SHARED weights; all convs bias-free."""
    # TODO(synk): outermost / intermediate / deformable variants need a
    # recursive `submodule`; only the self-contained innermost config is built.

    def __init__(self, outer_nc, inner_nc, input_nc=None, *, key):
        if input_nc is None:
            input_nc = outer_nc
        self.outer_nc, self.inner_nc, self.input_nc = outer_nc, inner_nc, input_nc
        k0, k1, k2 = jax.random.split(key, 3)
        s = 0.1
        # PyTorch-layout f32 master weights (also used by the XLA reference).
        self.w_down = jax.random.normal(k0, (inner_nc, input_nc, 4, 4),
                                        jnp.float32) * s
        self.w_same = jax.random.normal(k1, (inner_nc, inner_nc, 3, 3),
                                        jnp.float32) * s
        self.w_up = jax.random.normal(k2, (inner_nc, outer_nc, 4, 4),
                                      jnp.float32) * s
        # Kernel-ready bf16 tap-folded weights, computed once (not per call).
        self.wk_down = _pack_down_weight(self.w_down).astype(jnp.bfloat16)
        self.wk_same = _pack_same_weight(self.w_same).astype(jnp.bfloat16)
        self.wk_up = _pack_up_weight_parities(self.w_up).astype(jnp.bfloat16)

    def __call__(self, x_nchw):
        N, C, H, W = x_nchw.shape
        h2, w2 = H // 2, W // 2
        x = jnp.transpose(x_nchw, (0, 2, 3, 1))                       # NHWC
        xs = _space_to_depth2(_pad1(x))            # (N, h2+1, w2+1, 4*input_nc)
        y = _forward_pallas(xs, x, self.wk_down, self.wk_same, self.wk_up,
                            h2=h2, w2=w2, cin=self.input_nc,
                            inner=self.inner_nc, cout=self.outer_nc)
        return jnp.transpose(y, (0, 3, 1, 2))                         # NCHW


# Pure-JAX (XLA conv) reference of the same forward, for a numerical check.
def _reference_forward(x_nchw, blk):
    def conv(x, w_oikk, stride, pad, lhs_dil=1):
        rhs = jnp.transpose(w_oikk, (2, 3, 1, 0))  # HWIO
        return jax.lax.conv_general_dilated(
            x, rhs, window_strides=(stride, stride),
            padding=[(pad, pad), (pad, pad)],
            lhs_dilation=(lhs_dil, lhs_dil),
            dimension_numbers=("NHWC", "HWIO", "NHWC"))

    lrelu = lambda v: jnp.where(v >= 0, v, 0.2 * v)
    relu = lambda v: jnp.maximum(v, 0.0)
    x = jnp.transpose(x_nchw, (0, 2, 3, 1))
    y = conv(lrelu(x), blk.w_down, 2, 1)
    y = conv(relu(y), blk.w_same, 1, 1)
    y = conv(relu(y), blk.w_same, 1, 1)
    w_eq = jnp.transpose(jnp.flip(blk.w_up, (2, 3)), (1, 0, 2, 3))
    y = conv(relu(y), w_eq, 1, 2, lhs_dil=2)   # ConvTranspose2d(4, s=2, p=1)
    return jnp.concatenate([x_nchw, jnp.transpose(y, (0, 3, 1, 2))], axis=1)


def _check(block, x):
    out = jax.block_until_ready(jax.jit(block.__call__)(x))
    N, C, H, W = x.shape
    assert out.shape == (N, C + block.outer_nc, H, W), out.shape
    ref = jax.block_until_ready(_reference_forward(x, block))
    # bf16 GEMM operands with f32 accumulation -> loosened tolerance vs f32 ref.
    assert jnp.allclose(out, ref, rtol=5e-2, atol=2e-2), (
        float(jnp.max(jnp.abs(out - ref))))


if __name__ == "__main__":
    key = jax.random.PRNGKey(0)
    k_x, k_p, k_x2, k_p2 = jax.random.split(key, 4)

    # Main demo config.
    batch, outer_nc, inner_nc, spatial = 2, 4, 8, 16
    x = jax.random.normal(k_x, (batch, outer_nc, spatial, spatial), jnp.float32)
    block = UnetSkipConnectionBlockInnermost(outer_nc, inner_nc, key=k_p)
    _check(block, x)

    # Generality check: input_nc != outer_nc, non-square H/W.
    x2 = jax.random.normal(k_x2, (1, 4, 16, 32), jnp.float32)
    block2 = UnetSkipConnectionBlockInnermost(8, 16, input_nc=4, key=k_p2)
    _check(block2, x2)

    print("KERNEL_OK")
</pallas_src>

<mosaic_0001>
module attributes {stable_mosaic.version = 11 : i64} {
  func.func @_unet_innermost_kernel(%arg0: i32, %arg1: memref<1x9x9x16xf32, #tpu.memory_space<vmem>>, %arg2: memref<1x16x16x4xf32, #tpu.memory_space<vmem>>, %arg3: memref<64x8xbf16, #tpu.memory_space<vmem>>, %arg4: memref<72x8xbf16, #tpu.memory_space<vmem>>, %arg5: memref<2x48x8xbf16, #tpu.memory_space<vmem>>, %arg6: memref<1x16x16x8xf32, #tpu.memory_space<vmem>>, %arg7: memref<10x10x8xbf16, #tpu.memory_space<vmem>>, %arg8: memref<64x64xbf16, #tpu.memory_space<vmem>>, %arg9: memref<64x72xbf16, #tpu.memory_space<vmem>>, %arg10: memref<64x48xbf16, #tpu.memory_space<vmem>>) attributes {dimension_semantics = [#tpu.dimension_semantics<parallel>], iteration_bounds = array<i64: 2>, scalar_prefetch = 0 : i64, scratch_operands = 4 : i64, tpu.core_type = #tpu.core_type<tc>, window_params = [{transform_indices = @transform_0, window_bounds = array<i64: 1, 9, 9, 16>}, {transform_indices = @transform_1, window_bounds = array<i64: 1, 16, 16, 4>}, {pipeline_mode = #tpu.pipeline_mode<synchronous>, transform_indices = @transform_2, window_bounds = array<i64: 64, 8>}, {pipeline_mode = #tpu.pipeline_mode<synchronous>, transform_indices = @transform_3, window_bounds = array<i64: 72, 8>}, {pipeline_mode = #tpu.pipeline_mode<synchronous>, transform_indices = @transform_4, window_bounds = array<i64: 2, 48, 8>}, {transform_indices = @transform_5, window_bounds = array<i64: 1, 16, 16, 8>}]} {
    %c0 = arith.constant 0 : index
    %c0_0 = arith.constant 0 : index
    %c0_1 = arith.constant 0 : index
    %c0_2 = arith.constant 0 : index
    %0 = vector.load %arg1[%c0, %c0_0, %c0_1, %c0_2] : memref<1x9x9x16xf32, #tpu.memory_space<vmem>>, vector<1x9x9x16xf32>
    %1 = vector.shape_cast %0 : vector<1x9x9x16xf32> to vector<9x9x16xf32>
    %cst = arith.constant 0.000000e+00 : f32
    %2 = vector.broadcast %cst : f32 to vector<9x9x16xf32>
    %3 = arith.cmpf oge, %1, %2 : vector<9x9x16xf32>
    %cst_3 = arith.constant 2.000000e-01 : f32
    %4 = vector.broadcast %cst_3 : f32 to vector<9x9x16xf32>
    %5 = arith.mulf %1, %4 : vector<9x9x16xf32>
    %6 = arith.select %3, %1, %5 : vector<9x9x16xi1>, vector<9x9x16xf32>
    %7 = arith.truncf %6 : vector<9x9x16xf32> to vector<9x9x16xbf16>
    %8 = vector.extract_strided_slice %7 {offsets = [0, 0, 0], sizes = [8, 8, 16], strides = [1, 1, 1]} : vector<9x9x16xbf16> to vector<8x8x16xbf16>
    %9 = vector.shape_cast %8 : vector<8x8x16xbf16> to vector<64x16xbf16>
    %c0_4 = arith.constant 0 : index
    %c0_5 = arith.constant 0 : index
    %10 = vector.load %arg8[%c0_4, %c0_5] : memref<64x64xbf16, #tpu.memory_space<vmem>>, vector<64x16xbf16>
    tpu.vector_store %arg8[%c0_4, %c0_5], %9 {strides = array<i32>} : memref<64x64xbf16, #tpu.memory_space<vmem>>, vector<64x16xbf16>,
    %11 = vector.extract_strided_slice %7 {offsets = [0, 1, 0], sizes = [8, 8, 16], strides = [1, 1, 1]} : vector<9x9x16xbf16> to vector<8x8x16xbf16>
    %12 = vector.shape_cast %11 : vector<8x8x16xbf16> to vector<64x16xbf16>
    %c0_6 = arith.constant 0 : index
    %c16 = arith.constant 16 : index
    %13 = vector.load %arg8[%c0_6, %c16] : memref<64x64xbf16, #tpu.memory_space<vmem>>, vector<64x16xbf16>
    tpu.vector_store %arg8[%c0_6, %c16], %12 {strides = array<i32>} : memref<64x64xbf16, #tpu.memory_space<vmem>>, vector<64x16xbf16>,
    %14 = vector.extract_strided_slice %7 {offsets = [1, 0, 0], sizes = [8, 8, 16], strides = [1, 1, 1]} : vector<9x9x16xbf16> to vector<8x8x16xbf16>
    %15 = vector.shape_cast %14 : vector<8x8x16xbf16> to vector<64x16xbf16>
    %c0_7 = arith.constant 0 : index
    %c32 = arith.constant 32 : index
    %16 = vector.load %arg8[%c0_7, %c32] : memref<64x64xbf16, #tpu.memory_space<vmem>>, vector<64x16xbf16>
    tpu.vector_store %arg8[%c0_7, %c32], %15 {strides = array<i32>} : memref<64x64xbf16, #tpu.memory_space<vmem>>, vector<64x16xbf16>,
    %17 = vector.extract_strided_slice %7 {offsets = [1, 1, 0], sizes = [8, 8, 16], strides = [1, 1, 1]} : vector<9x9x16xbf16> to vector<8x8x16xbf16>
    %18 = vector.shape_cast %17 : vector<8x8x16xbf16> to vector<64x16xbf16>
    %c0_8 = arith.constant 0 : index
    %c48 = arith.constant 48 : index
    %19 = vector.load %arg8[%c0_8, %c48] : memref<64x64xbf16, #tpu.memory_space<vmem>>, vector<64x16xbf16>
    tpu.vector_store %arg8[%c0_8, %c48], %18 {strides = array<i32>} : memref<64x64xbf16, #tpu.memory_space<vmem>>, vector<64x16xbf16>,
    %c0_9 = arith.constant 0 : index
    %c0_10 = arith.constant 0 : index
    %20 = vector.load %arg8[%c0_9, %c0_10] : memref<64x64xbf16, #tpu.memory_space<vmem>>, vector<64x64xbf16>
    %c0_11 = arith.constant 0 : index
    %c0_12 = arith.constant 0 : index
    %21 = vector.load %arg3[%c0_11, %c0_12] : memref<64x8xbf16, #tpu.memory_space<vmem>>, vector<64x8xbf16>
    %cst_13 = arith.constant dense<0.000000e+00> : vector<64x8xf32>
    %22 = tpu.matmul %20, %21, %cst_13 {dimension_numbers = #tpu.dot_dimension_numbers<[1], [0], [0], [1], [0, 0, 1, 1], [], []>} : vector<64x64xbf16>, vector<64x8xbf16>, vector<64x8xf32> -> vector<64x8xf32>
    %cst_14 = arith.constant 0.000000e+00 : bf16
    %23 = vector.broadcast %cst_14 : bf16 to vector<10x10x8xbf16>
    %c0_15 = arith.constant 0 : index
    %c0_16 = arith.constant 0 : index
    %c0_17 = arith.constant 0 : index
    %24 = vector.load %arg7[%c0_15, %c0_16, %c0_17] : memref<10x10x8xbf16, #tpu.memory_space<vmem>>, vector<10x10x8xbf16>
    tpu.vector_store %arg7[%c0_15, %c0_16, %c0_17], %23 {strides = array<i32>} : memref<10x10x8xbf16, #tpu.memory_space<vmem>>, vector<10x10x8xbf16>,
    %cst_18 = arith.constant 0.000000e+00 : f32
    %25 = vector.broadcast %cst_18 : f32 to vector<64x8xf32>
    %26 = arith.maximumf %22, %25 : vector<64x8xf32>
    %27 = vector.shape_cast %26 : vector<64x8xf32> to vector<8x8x8xf32>
    %28 = arith.truncf %27 : vector<8x8x8xf32> to vector<8x8x8xbf16>
    %c1 = arith.constant 1 : index
    %c1_19 = arith.constant 1 : index
    %c0_20 = arith.constant 0 : index
    %29 = vector.load %arg7[%c1, %c1_19, %c0_20] : memref<10x10x8xbf16, #tpu.memory_space<vmem>>, vector<8x8x8xbf16>
    tpu.vector_store %arg7[%c1, %c1_19, %c0_20], %28 {strides = array<i32>} : memref<10x10x8xbf16, #tpu.memory_space<vmem>>, vector<8x8x8xbf16>,
    %c0_21 = arith.constant 0 : index
    %c0_22 = arith.constant 0 : index
    %c0_23 = arith.constant 0 : index
    %30 = vector.load %arg7[%c0_21, %c0_22, %c0_23] : memref<10x10x8xbf16, #tpu.memory_space<vmem>>, vector<8x8x8xbf16>
    %31 = vector.shape_cast %30 : vector<8x8x8xbf16> to vector<64x8xbf16>
    %c0_24 = arith.constant 0 : index
    %c0_25 = arith.constant 0 : index
    %32 = vector.load %arg9[%c0_24, %c0_25] : memref<64x72xbf16, #tpu.memory_space<vmem>>, vector<64x8xbf16>
    tpu.vector_store %arg9[%c0_24, %c0_25], %31 {strides = array<i32>} : memref<64x72xbf16, #tpu.memory_space<vmem>>, vector<64x8xbf16>,
    %c0_26 = arith.constant 0 : index
    %c1_27 = arith.constant 1 : index
    %c0_28 = arith.constant 0 : index
    %33 = vector.load %arg7[%c0_26, %c1_27, %c0_28] : memref<10x10x8xbf16, #tpu.memory_space<vmem>>, vector<8x8x8xbf16>
    %34 = vector.shape_cast %33 : vector<8x8x8xbf16> to vector<64x8xbf16>
    %c0_29 = arith.constant 0 : index
    %c8 = arith.constant 8 : index
    %35 = vector.load %arg9[%c0_29, %c8] : memref<64x72xbf16, #tpu.memory_space<vmem>>, vector<64x8xbf16>
    tpu.vector_store %arg9[%c0_29, %c8], %34 {strides = array<i32>} : memref<64x72xbf16, #tpu.memory_space<vmem>>, vector<64x8xbf16>,
    %c0_30 = arith.constant 0 : index
    %c2 = arith.constant 2 : index
    %c0_31 = arith.constant 0 : index
    %36 = vector.load %arg7[%c0_30, %c2, %c0_31] : memref<10x10x8xbf16, #tpu.memory_space<vmem>>, vector<8x8x8xbf16>
    %37 = vector.shape_cast %36 : vector<8x8x8xbf16> to vector<64x8xbf16>
    %c0_32 = arith.constant 0 : index
    %c16_33 = arith.constant 16 : index
    %38 = vector.load %arg9[%c0_32, %c16_33] : memref<64x72xbf16, #tpu.memory_space<vmem>>, vector<64x8xbf16>
    tpu.vector_store %arg9[%c0_32, %c16_33], %37 {strides = array<i32>} : memref<64x72xbf16, #tpu.memory_space<vmem>>, vector<64x8xbf16>,
    %c1_34 = arith.constant 1 : index
    %c0_35 = arith.constant 0 : index
    %c0_36 = arith.constant 0 : index
    %39 = vector.load %arg7[%c1_34, %c0_35, %c0_36] : memref<10x10x8xbf16, #tpu.memory_space<vmem>>, vector<8x8x8xbf16>
    %40 = vector.shape_cast %39 : vector<8x8x8xbf16> to vector<64x8xbf16>
    %c0_37 = arith.constant 0 : index
    %c24 = arith.constant 24 : index
    %41 = vector.load %arg9[%c0_37, %c24] : memref<64x72xbf16, #tpu.memory_space<vmem>>, vector<64x8xbf16>
    tpu.vector_store %arg9[%c0_37, %c24], %40 {strides = array<i32>} : memref<64x72xbf16, #tpu.memory_space<vmem>>, vector<64x8xbf16>,
    %c1_38 = arith.constant 1 : index
    %c1_39 = arith.constant 1 : index
    %c0_40 = arith.constant 0 : index
    %42 = vector.load %arg7[%c1_38, %c1_39, %c0_40] : memref<10x10x8xbf16, #tpu.memory_space<vmem>>, vector<8x8x8xbf16>
    %43 = vector.shape_cast %42 : vector<8x8x8xbf16> to vector<64x8xbf16>
    %c0_41 = arith.constant 0 : index
    %c32_42 = arith.constant 32 : index
    %44 = vector.load %arg9[%c0_41, %c32_42] : memref<64x72xbf16, #tpu.memory_space<vmem>>, vector<64x8xbf16>
    tpu.vector_store %arg9[%c0_41, %c32_42], %43 {strides = array<i32>} : memref<64x72xbf16, #tpu.memory_space<vmem>>, vector<64x8xbf16>,
    %c1_43 = arith.constant 1 : index
    %c2_44 = arith.constant 2 : index
    %c0_45 = arith.constant 0 : index
    %45 = vector.load %arg7[%c1_43, %c2_44, %c0_45] : memref<10x10x8xbf16, #tpu.memory_space<vmem>>, vector<8x8x8xbf16>
    %46 = vector.shape_cast %45 : vector<8x8x8xbf16> to vector<64x8xbf16>
    %c0_46 = arith.constant 0 : index
    %c40 = arith.constant 40 : index
    %47 = vector.load %arg9[%c0_46, %c40] : memref<64x72xbf16, #tpu.memory_space<vmem>>, vector<64x8xbf16>
    tpu.vector_store %arg9[%c0_46, %c40], %46 {strides = array<i32>} : memref<64x72xbf16, #tpu.memory_space<vmem>>, vector<64x8xbf16>,
    %c2_47 = arith.constant 2 : index
    %c0_48 = arith.constant 0 : index
    %c0_49 = arith.constant 0 : index
    %48 = vector.load %arg7[%c2_47, %c0_48, %c0_49] : memref<10x10x8xbf16, #tpu.memory_space<vmem>>, vector<8x8x8xbf16>
    %49 = vector.shape_cast %48 : vector<8x8x8xbf16> to vector<64x8xbf16>
    %c0_50 = arith.constant 0 : index
    %c48_51 = arith.constant 48 : index
    %50 = vector.load %arg9[%c0_50, %c48_51] : memref<64x72xbf16, #tpu.memory_space<vmem>>, vector<64x8xbf16>
    tpu.vector_store %arg9[%c0_50, %c48_51], %49 {strides = array<i32>} : memref<64x72xbf16, #tpu.memory_space<vmem>>, vector<64x8xbf16>,
    %c2_52 = arith.constant 2 : index
    %c1_53 = arith.constant 1 : index
    %c0_54 = arith.constant 0 : index
    %51 = vector.load %arg7[%c2_52, %c1_53, %c0_54] : memref<10x10x8xbf16, #tpu.memory_space<vmem>>, vector<8x8x8xbf16>
    %52 = vector.shape_cast %51 : vector<8x8x8xbf16> to vector<64x8xbf16>
    %c0_55 = arith.constant 0 : index
    %c56 = arith.constant 56 : index
    %53 = vector.load %arg9[%c0_55, %c56] : memref<64x72xbf16, #tpu.memory_space<vmem>>, vector<64x8xbf16>
    tpu.vector_store %arg9[%c0_55, %c56], %52 {strides = array<i32>} : memref<64x72xbf16, #tpu.memory_space<vmem>>, vector<64x8xbf16>,
    %c2_56 = arith.constant 2 : index
    %c2_57 = arith.constant 2 : index
    %c0_58 = arith.constant 0 : index
    %54 = vector.load %arg7[%c2_56, %c2_57, %c0_58] : memref<10x10x8xbf16, #tpu.memory_space<vmem>>, vector<8x8x8xbf16>
    %55 = vector.shape_cast %54 : vector<8x8x8xbf16> to vector<64x8xbf16>
    %c0_59 = arith.constant 0 : index
    %c64 = arith.constant 64 : index
    %56 = vector.load %arg9[%c0_59, %c64] : memref<64x72xbf16, #tpu.memory_space<vmem>>, vector<64x8xbf16>
    tpu.vector_store %arg9[%c0_59, %c64], %55 {strides = array<i32>} : memref<64x72xbf16, #tpu.memory_space<vmem>>, vector<64x8xbf16>,
    %c0_60 = arith.constant 0 : index
    %c0_61 = arith.constant 0 : index
    %57 = vector.load %arg9[%c0_60, %c0_61] : memref<64x72xbf16, #tpu.memory_space<vmem>>, vector<64x72xbf16>
    %c0_62 = arith.constant 0 : index
    %c0_63 = arith.constant 0 : index
    %58 = vector.load %arg4[%c0_62, %c0_63] : memref<72x8xbf16, #tpu.memory_space<vmem>>, vector<72x8xbf16>
    %cst_64 = arith.constant dense<0.000000e+00> : vector<64x8xf32>
    %59 = tpu.matmul %57, %58, %cst_64 {dimension_numbers = #tpu.dot_dimension_numbers<[1], [0], [0], [1], [0, 0, 1, 1], [], []>} : vector<64x72xbf16>, vector<72x8xbf16>, vector<64x8xf32> -> vector<64x8xf32>
    %cst_65 = arith.constant 0.000000e+00 : f32
    %60 = vector.broadcast %cst_65 : f32 to vector<64x8xf32>
    %61 = arith.maximumf %59, %60 : vector<64x8xf32>
    %62 = vector.shape_cast %61 : vector<64x8xf32> to vector<8x8x8xf32>
    %63 = arith.truncf %62 : vector<8x8x8xf32> to vector<8x8x8xbf16>
    %c1_66 = arith.constant 1 : index
    %c1_67 = arith.constant 1 : index
    %c0_68 = arith.constant 0 : index
    %64 = vector.load %arg7[%c1_66, %c1_67, %c0_68] : memref<10x10x8xbf16, #tpu.memory_space<vmem>>, vector<8x8x8xbf16>
    tpu.vector_store %arg7[%c1_66, %c1_67, %c0_68], %63 {strides = array<i32>} : memref<10x10x8xbf16, #tpu.memory_space<vmem>>, vector<8x8x8xbf16>,
    %c0_69 = arith.constant 0 : index
    %c0_70 = arith.constant 0 : index
    %c0_71 = arith.constant 0 : index
    %65 = vector.load %arg7[%c0_69, %c0_70, %c0_71] : memref<10x10x8xbf16, #tpu.memory_space<vmem>>, vector<8x8x8xbf16>
    %66 = vector.shape_cast %65 : vector<8x8x8xbf16> to vector<64x8xbf16>
    %c0_72 = arith.constant 0 : index
    %c0_73 = arith.constant 0 : index
    %67 = vector.load %arg9[%c0_72, %c0_73] : memref<64x72xbf16, #tpu.memory_space<vmem>>, vector<64x8xbf16>
    tpu.vector_store %arg9[%c0_72, %c0_73], %66 {strides = array<i32>} : memref<64x72xbf16, #tpu.memory_space<vmem>>, vector<64x8xbf16>,
    %c0_74 = arith.constant 0 : index
    %c1_75 = arith.constant 1 : index
    %c0_76 = arith.constant 0 : index
    %68 = vector.load %arg7[%c0_74, %c1_75, %c0_76] : memref<10x10x8xbf16, #tpu.memory_space<vmem>>, vector<8x8x8xbf16>
    %69 = vector.shape_cast %68 : vector<8x8x8xbf16> to vector<64x8xbf16>
    %c0_77 = arith.constant 0 : index
    %c8_78 = arith.constant 8 : index
    %70 = vector.load %arg9[%c0_77, %c8_78] : memref<64x72xbf16, #tpu.memory_space<vmem>>, vector<64x8xbf16>
    tpu.vector_store %arg9[%c0_77, %c8_78], %69 {strides = array<i32>} : memref<64x72xbf16, #tpu.memory_space<vmem>>, vector<64x8xbf16>,
    %c0_79 = arith.constant 0 : index
    %c2_80 = arith.constant 2 : index
    %c0_81 = arith.constant 0 : index
    %71 = vector.load %arg7[%c0_79, %c2_80, %c0_81] : memref<10x10x8xbf16, #tpu.memory_space<vmem>>, vector<8x8x8xbf16>
    %72 = vector.shape_cast %71 : vector<8x8x8xbf16> to vector<64x8xbf16>
    %c0_82 = arith.constant 0 : index
    %c16_83 = arith.constant 16 : index
    %73 = vector.load %arg9[%c0_82, %c16_83] : memref<64x72xbf16, #tpu.memory_space<vmem>>, vector<64x8xbf16>
    tpu.vector_store %arg9[%c0_82, %c16_83], %72 {strides = array<i32>} : memref<64x72xbf16, #tpu.memory_space<vmem>>, vector<64x8xbf16>,
    %c1_84 = arith.constant 1 : index
    %c0_85 = arith.constant 0 : index
    %c0_86 = arith.constant 0 : index
    %74 = vector.load %arg7[%c1_84, %c0_85, %c0_86] : memref<10x10x8xbf16, #tpu.memory_space<vmem>>, vector<8x8x8xbf16>
    %75 = vector.shape_cast %74 : vector<8x8x8xbf16> to vector<64x8xbf16>
    %c0_87 = arith.constant 0 : index
    %c24_88 = arith.constant 24 : index
    %76 = vector.load %arg9[%c0_87, %c24_88] : memref<64x72xbf16, #tpu.memory_space<vmem>>, vector<64x8xbf16>
    tpu.vector_store %arg9[%c0_87, %c24_88], %75 {strides = array<i32>} : memref<64x72xbf16, #tpu.memory_space<vmem>>, vector<64x8xbf16>,
    %c1_89 = arith.constant 1 : index
    %c1_90 = arith.constant 1 : index
    %c0_91 = arith.constant 0 : index
    %77 = vector.load %arg7[%c1_89, %c1_90, %c0_91] : memref<10x10x8xbf16, #tpu.memory_space<vmem>>, vector<8x8x8xbf16>
    %78 = vector.shape_cast %77 : vector<8x8x8xbf16> to vector<64x8xbf16>
    %c0_92 = arith.constant 0 : index
    %c32_93 = arith.constant 32 : index
    %79 = vector.load %arg9[%c0_92, %c32_93] : memref<64x72xbf16, #tpu.memory_space<vmem>>, vector<64x8xbf16>
    tpu.vector_store %arg9[%c0_92, %c32_93], %78 {strides = array<i32>} : memref<64x72xbf16, #tpu.memory_space<vmem>>, vector<64x8xbf16>,
    %c1_94 = arith.constant 1 : index
    %c2_95 = arith.constant 2 : index
    %c0_96 = arith.constant 0 : index
    %80 = vector.load %arg7[%c1_94, %c2_95, %c0_96] : memref<10x10x8xbf16, #tpu.memory_space<vmem>>, vector<8x8x8xbf16>
    %81 = vector.shape_cast %80 : vector<8x8x8xbf16> to vector<64x8xbf16>
    %c0_97 = arith.constant 0 : index
    %c40_98 = arith.constant 40 : index
    %82 = vector.load %arg9[%c0_97, %c40_98] : memref<64x72xbf16, #tpu.memory_space<vmem>>, vector<64x8xbf16>
    tpu.vector_store %arg9[%c0_97, %c40_98], %81 {strides = array<i32>} : memref<64x72xbf16, #tpu.memory_space<vmem>>, vector<64x8xbf16>,
    %c2_99 = arith.constant 2 : index
    %c0_100 = arith.constant 0 : index
    %c0_101 = arith.constant 0 : index
    %83 = vector.load %arg7[%c2_99, %c0_100, %c0_101] : memref<10x10x8xbf16, #tpu.memory_space<vmem>>, vector<8x8x8xbf16>
    %84 = vector.shape_cast %83 : vector<8x8x8xbf16> to vector<64x8xbf16>
    %c0_102 = arith.constant 0 : index
    %c48_103 = arith.constant 48 : index
    %85 = vector.load %arg9[%c0_102, %c48_103] : memref<64x72xbf16, #tpu.memory_space<vmem>>, vector<64x8xbf16>
    tpu.vector_store %arg9[%c0_102, %c48_103], %84 {strides = array<i32>} : memref<64x72xbf16, #tpu.memory_space<vmem>>, vector<64x8xbf16>,
    %c2_104 = arith.constant 2 : index
    %c1_105 = arith.constant 1 : index
    %c0_106 = arith.constant 0 : index
    %86 = vector.load %arg7[%c2_104, %c1_105, %c0_106] : memref<10x10x8xbf16, #tpu.memory_space<vmem>>, vector<8x8x8xbf16>
    %87 = vector.shape_cast %86 : vector<8x8x8xbf16> to vector<64x8xbf16>
    %c0_107 = arith.constant 0 : index
    %c56_108 = arith.constant 56 : index
    %88 = vector.load %arg9[%c0_107, %c56_108] : memref<64x72xbf16, #tpu.memory_space<vmem>>, vector<64x8xbf16>
    tpu.vector_store %arg9[%c0_107, %c56_108], %87 {strides = array<i32>} : memref<64x72xbf16, #tpu.memory_space<vmem>>, vector<64x8xbf16>,
    %c2_109 = arith.constant 2 : index
    %c2_110 = arith.constant 2 : index
    %c0_111 = arith.constant 0 : index
    %89 = vector.load %arg7[%c2_109, %c2_110, %c0_111] : memref<10x10x8xbf16, #tpu.memory_space<vmem>>, vector<8x8x8xbf16>
    %90 = vector.shape_cast %89 : vector<8x8x8xbf16> to vector<64x8xbf16>
    %c0_112 = arith.constant 0 : index
    %c64_113 = arith.constant 64 : index
    %91 = vector.load %arg9[%c0_112, %c64_113] : memref<64x72xbf16, #tpu.memory_space<vmem>>, vector<64x8xbf16>
    tpu.vector_store %arg9[%c0_112, %c64_113], %90 {strides = array<i32>} : memref<64x72xbf16, #tpu.memory_space<vmem>>, vector<64x8xbf16>,
    %c0_114 = arith.constant 0 : index
    %c0_115 = arith.constant 0 : index
    %92 = vector.load %arg9[%c0_114, %c0_115] : memref<64x72xbf16, #tpu.memory_space<vmem>>, vector<64x72xbf16>
    %c0_116 = arith.constant 0 : index
    %c0_117 = arith.constant 0 : index
    %93 = vector.load %arg4[%c0_116, %c0_117] : memref<72x8xbf16, #tpu.memory_space<vmem>>, vector<72x8xbf16>
    %cst_118 = arith.constant dense<0.000000e+00> : vector<64x8xf32>
    %94 = tpu.matmul %92, %93, %cst_118 {dimension_numbers = #tpu.dot_dimension_numbers<[1], [0], [0], [1], [0, 0, 1, 1], [], []>} : vector<64x72xbf16>, vector<72x8xbf16>, vector<64x8xf32> -> vector<64x8xf32>
    %cst_119 = arith.constant 0.000000e+00 : f32
    %95 = vector.broadcast %cst_119 : f32 to vector<64x8xf32>
    %96 = arith.maximumf %94, %95 : vector<64x8xf32>
    %97 = vector.shape_cast %96 : vector<64x8xf32> to vector<8x8x8xf32>
    %98 = arith.truncf %97 : vector<8x8x8xf32> to vector<8x8x8xbf16>
    %c1_120 = arith.constant 1 : index
    %c1_121 = arith.constant 1 : index
    %c0_122 = arith.constant 0 : index
    %99 = vector.load %arg7[%c1_120, %c1_121, %c0_122] : memref<10x10x8xbf16, #tpu.memory_space<vmem>>, vector<8x8x8xbf16>
    tpu.vector_store %arg7[%c1_120, %c1_121, %c0_122], %98 {strides = array<i32>} : memref<10x10x8xbf16, #tpu.memory_space<vmem>>, vector<8x8x8xbf16>,
    %c0_123 = arith.constant 0 : index
    %c0_124 = arith.constant 0 : index
    %c0_125 = arith.constant 0 : index
    %100 = vector.load %arg7[%c0_123, %c0_124, %c0_125] : memref<10x10x8xbf16, #tpu.memory_space<vmem>>, vector<8x8x8xbf16>
    %101 = vector.shape_cast %100 : vector<8x8x8xbf16> to vector<64x8xbf16>
    %c0_126 = arith.constant 0 : index
    %c0_127 = arith.constant 0 : index
    %102 = vector.load %arg10[%c0_126, %c0_127] : memref<64x48xbf16, #tpu.memory_space<vmem>>, vector<64x8xbf16>
    tpu.vector_store %arg10[%c0_126, %c0_127], %101 {strides = array<i32>} : memref<64x48xbf16, #tpu.memory_space<vmem>>, vector<64x8xbf16>,
    %c0_128 = arith.constant 0 : index
    %c1_129 = arith.constant 1 : index
    %c0_130 = arith.constant 0 : index
    %103 = vector.load %arg7[%c0_128, %c1_129, %c0_130] : memref<10x10x8xbf16, #tpu.memory_space<vmem>>, vector<8x8x8xbf16>
    %104 = vector.shape_cast %103 : vector<8x8x8xbf16> to vector<64x8xbf16>
    %c0_131 = arith.constant 0 : index
    %c8_132 = arith.constant 8 : index
    %105 = vector.load %arg10[%c0_131, %c8_132] : memref<64x48xbf16, #tpu.memory_space<vmem>>, vector<64x8xbf16>
    tpu.vector_store %arg10[%c0_131, %c8_132], %104 {strides = array<i32>} : memref<64x48xbf16, #tpu.memory_space<vmem>>, vector<64x8xbf16>,
    %c0_133 = arith.constant 0 : index
    %c2_134 = arith.constant 2 : index
    %c0_135 = arith.constant 0 : index
    %106 = vector.load %arg7[%c0_133, %c2_134, %c0_135] : memref<10x10x8xbf16, #tpu.memory_space<vmem>>, vector<8x8x8xbf16>
    %107 = vector.shape_cast %106 : vector<8x8x8xbf16> to vector<64x8xbf16>
    %c0_136 = arith.constant 0 : index
    %c16_137 = arith.constant 16 : index
    %108 = vector.load %arg10[%c0_136, %c16_137] : memref<64x48xbf16, #tpu.memory_space<vmem>>, vector<64x8xbf16>
    tpu.vector_store %arg10[%c0_136, %c16_137], %107 {strides = array<i32>} : memref<64x48xbf16, #tpu.memory_space<vmem>>, vector<64x8xbf16>,
    %c1_138 = arith.constant 1 : index
    %c0_139 = arith.constant 0 : index
    %c0_140 = arith.constant 0 : index
    %109 = vector.load %arg7[%c1_138, %c0_139, %c0_140] : memref<10x10x8xbf16, #tpu.memory_space<vmem>>, vector<8x8x8xbf16>
    %110 = vector.shape_cast %109 : vector<8x8x8xbf16> to vector<64x8xbf16>
    %c0_141 = arith.constant 0 : index
    %c24_142 = arith.constant 24 : index
    %111 = vector.load %arg10[%c0_141, %c24_142] : memref<64x48xbf16, #tpu.memory_space<vmem>>, vector<64x8xbf16>
    tpu.vector_store %arg10[%c0_141, %c24_142], %110 {strides = array<i32>} : memref<64x48xbf16, #tpu.memory_space<vmem>>, vector<64x8xbf16>,
    %c1_143 = arith.constant 1 : index
    %c1_144 = arith.constant 1 : index
    %c0_145 = arith.constant 0 : index
    %112 = vector.load %arg7[%c1_143, %c1_144, %c0_145] : memref<10x10x8xbf16, #tpu.memory_space<vmem>>, vector<8x8x8xbf16>
    %113 = vector.shape_cast %112 : vector<8x8x8xbf16> to vector<64x8xbf16>
    %c0_146 = arith.constant 0 : index
    %c32_147 = arith.constant 32 : index
    %114 = vector.load %arg10[%c0_146, %c32_147] : memref<64x48xbf16, #tpu.memory_space<vmem>>, vector<64x8xbf16>
    tpu.vector_store %arg10[%c0_146, %c32_147], %113 {strides = array<i32>} : memref<64x48xbf16, #tpu.memory_space<vmem>>, vector<64x8xbf16>,
    %c1_148 = arith.constant 1 : index
    %c2_149 = arith.constant 2 : index
    %c0_150 = arith.constant 0 : index
    %115 = vector.load %arg7[%c1_148, %c2_149, %c0_150] : memref<10x10x8xbf16, #tpu.memory_space<vmem>>, vector<8x8x8xbf16>
    %116 = vector.shape_cast %115 : vector<8x8x8xbf16> to vector<64x8xbf16>
    %c0_151 = arith.constant 0 : index
    %c40_152 = arith.constant 40 : index
    %117 = vector.load %arg10[%c0_151, %c40_152] : memref<64x48xbf16, #tpu.memory_space<vmem>>, vector<64x8xbf16>
    tpu.vector_store %arg10[%c0_151, %c40_152], %116 {strides = array<i32>} : memref<64x48xbf16, #tpu.memory_space<vmem>>, vector<64x8xbf16>,
    %c0_153 = arith.constant 0 : index
    %c0_154 = arith.constant 0 : index
    %118 = vector.load %arg10[%c0_153, %c0_154] : memref<64x48xbf16, #tpu.memory_space<vmem>>, vector<64x48xbf16>
    %c0_155 = arith.constant 0 : index
    %c0_156 = arith.constant 0 : index
    %c0_157 = arith.constant 0 : index
    %119 = vector.load %arg5[%c0_155, %c0_156, %c0_157] : memref<2x48x8xbf16, #tpu.memory_space<vmem>>, vector<1x48x8xbf16>
    %120 = vector.shape_cast %119 : vector<1x48x8xbf16> to vector<48x8xbf16>
    %cst_158 = arith.constant dense<0.000000e+00> : vector<64x8xf32>
    %121 = tpu.matmul %118, %120, %cst_158 {dimension_numbers = #tpu.dot_dimension_numbers<[1], [0], [0], [1], [0, 0, 1, 1], [], []>} : vector<64x48xbf16>, vector<48x8xbf16>, vector<64x8xf32> -> vector<64x8xf32>
    %122 = vector.extract_strided_slice %121 {offsets = [0, 0], sizes = [64, 4], strides = [1, 1]} : vector<64x8xf32> to vector<64x4xf32>
    %123 = vector.shape_cast %122 : vector<64x4xf32> to vector<8x8x4xf32>
    %124 = vector.extract_strided_slice %121 {offsets = [0, 4], sizes = [64, 4], strides = [1, 1]} : vector<64x8xf32> to vector<64x4xf32>
    %125 = vector.shape_cast %124 : vector<64x4xf32> to vector<8x8x4xf32>
    %126 = vector.shape_cast %123 : vector<8x8x4xf32> to vector<8x8x1x4xf32>
    %127 = vector.shape_cast %125 : vector<8x8x4xf32> to vector<8x8x1x4xf32>
    %128 = tpu.concatenate %126, %127 in 2 : vector<8x8x1x4xf32>, vector<8x8x1x4xf32> -> vector<8x8x2x4xf32>
    %129 = vector.shape_cast %128 : vector<8x8x2x4xf32> to vector<8x16x4xf32>
    %c1_159 = arith.constant 1 : index
    %c0_160 = arith.constant 0 : index
    %c0_161 = arith.constant 0 : index
    %130 = vector.load %arg7[%c1_159, %c0_160, %c0_161] : memref<10x10x8xbf16, #tpu.memory_space<vmem>>, vector<8x8x8xbf16>
    %131 = vector.shape_cast %130 : vector<8x8x8xbf16> to vector<64x8xbf16>
    %c0_162 = arith.constant 0 : index
    %c0_163 = arith.constant 0 : index
    %132 = vector.load %arg10[%c0_162, %c0_163] : memref<64x48xbf16, #tpu.memory_space<vmem>>, vector<64x8xbf16>
    tpu.vector_store %arg10[%c0_162, %c0_163], %131 {strides = array<i32>} : memref<64x48xbf16, #tpu.memory_space<vmem>>, vector<64x8xbf16>,
    %c1_164 = arith.constant 1 : index
    %c1_165 = arith.constant 1 : index
    %c0_166 = arith.constant 0 : index
    %133 = vector.load %arg7[%c1_164, %c1_165, %c0_166] : memref<10x10x8xbf16, #tpu.memory_space<vmem>>, vector<8x8x8xbf16>
    %134 = vector.shape_cast %133 : vector<8x8x8xbf16> to vector<64x8xbf16>
    %c0_167 = arith.constant 0 : index
    %c8_168 = arith.constant 8 : index
    %135 = vector.load %arg10[%c0_167, %c8_168] : memref<64x48xbf16, #tpu.memory_space<vmem>>, vector<64x8xbf16>
    tpu.vector_store %arg10[%c0_167, %c8_168], %134 {strides = array<i32>} : memref<64x48xbf16, #tpu.memory_space<vmem>>, vector<64x8xbf16>,
    %c1_169 = arith.constant 1 : index
    %c2_170 = arith.constant 2 : index
    %c0_171 = arith.constant 0 : index
    %136 = vector.load %arg7[%c1_169, %c2_170, %c0_171] : memref<10x10x8xbf16, #tpu.memory_space<vmem>>, vector<8x8x8xbf16>
    %137 = vector.shape_cast %136 : vector<8x8x8xbf16> to vector<64x8xbf16>
    %c0_172 = arith.constant 0 : index
    %c16_173 = arith.constant 16 : index
    %138 = vector.load %arg10[%c0_172, %c16_173] : memref<64x48xbf16, #tpu.memory_space<vmem>>, vector<64x8xbf16>
    tpu.vector_store %arg10[%c0_172, %c16_173], %137 {strides = array<i32>} : memref<64x48xbf16, #tpu.memory_space<vmem>>, vector<64x8xbf16>,
    %c2_174 = arith.constant 2 : index
    %c0_175 = arith.constant 0 : index
    %c0_176 = arith.constant 0 : index
    %139 = vector.load %arg7[%c2_174, %c0_175, %c0_176] : memref<10x10x8xbf16, #tpu.memory_space<vmem>>, vector<8x8x8xbf16>
    %140 = vector.shape_cast %139 : vector<8x8x8xbf16> to vector<64x8xbf16>
    %c0_177 = arith.constant 0 : index
    %c24_178 = arith.constant 24 : index
    %141 = vector.load %arg10[%c0_177, %c24_178] : memref<64x48xbf16, #tpu.memory_space<vmem>>, vector<64x8xbf16>
    tpu.vector_store %arg10[%c0_177, %c24_178], %140 {strides = array<i32>} : memref<64x48xbf16, #tpu.memory_space<vmem>>, vector<64x8xbf16>,
    %c2_179 = arith.constant 2 : index
    %c1_180 = arith.constant 1 : index
    %c0_181 = arith.constant 0 : index
    %142 = vector.load %arg7[%c2_179, %c1_180, %c0_181] : memref<10x10x8xbf16, #tpu.memory_space<vmem>>, vector<8x8x8xbf16>
    %143 = vector.shape_cast %142 : vector<8x8x8xbf16> to vector<64x8xbf16>
    %c0_182 = arith.constant 0 : index
    %c32_183 = arith.constant 32 : index
    %144 = vector.load %arg10[%c0_182, %c32_183] : memref<64x48xbf16, #tpu.memory_space<vmem>>, vector<64x8xbf16>
    tpu.vector_store %arg10[%c0_182, %c32_183], %143 {strides = array<i32>} : memref<64x48xbf16, #tpu.memory_space<vmem>>, vector<64x8xbf16>,
    %c2_184 = arith.constant 2 : index
    %c2_185 = arith.constant 2 : index
    %c0_186 = arith.constant 0 : index
    %145 = vector.load %arg7[%c2_184, %c2_185, %c0_186] : memref<10x10x8xbf16, #tpu.memory_space<vmem>>, vector<8x8x8xbf16>
    %146 = vector.shape_cast %145 : vector<8x8x8xbf16> to vector<64x8xbf16>
    %c0_187 = arith.constant 0 : index
    %c40_188 = arith.constant 40 : index
    %147 = vector.load %arg10[%c0_187, %c40_188] : memref<64x48xbf16, #tpu.memory_space<vmem>>, vector<64x8xbf16>
    tpu.vector_store %arg10[%c0_187, %c40_188], %146 {strides = array<i32>} : memref<64x48xbf16, #tpu.memory_space<vmem>>, vector<64x8xbf16>,
    %c0_189 = arith.constant 0 : index
    %c0_190 = arith.constant 0 : index
    %148 = vector.load %arg10[%c0_189, %c0_190] : memref<64x48xbf16, #tpu.memory_space<vmem>>, vector<64x48xbf16>
    %c1_191 = arith.constant 1 : index
    %c0_192 = arith.constant 0 : index
    %c0_193 = arith.constant 0 : index
    %149 = vector.load %arg5[%c1_191, %c0_192, %c0_193] : memref<2x48x8xbf16, #tpu.memory_space<vmem>>, vector<1x48x8xbf16>
    %150 = vector.shape_cast %149 : vector<1x48x8xbf16> to vector<48x8xbf16>
    %cst_194 = arith.constant dense<0.000000e+00> : vector<64x8xf32>
    %151 = tpu.matmul %148, %150, %cst_194 {dimension_numbers = #tpu.dot_dimension_numbers<[1], [0], [0], [1], [0, 0, 1, 1], [], []>} : vector<64x48xbf16>, vector<48x8xbf16>, vector<64x8xf32> -> vector<64x8xf32>
    %152 = vector.extract_strided_slice %151 {offsets = [0, 0], sizes = [64, 4], strides = [1, 1]} : vector<64x8xf32> to vector<64x4xf32>
    %153 = vector.shape_cast %152 : vector<64x4xf32> to vector<8x8x4xf32>
    %154 = vector.extract_strided_slice %151 {offsets = [0, 4], sizes = [64, 4], strides = [1, 1]} : vector<64x8xf32> to vector<64x4xf32>
    %155 = vector.shape_cast %154 : vector<64x4xf32> to vector<8x8x4xf32>
    %156 = vector.shape_cast %153 : vector<8x8x4xf32> to vector<8x8x1x4xf32>
    %157 = vector.shape_cast %155 : vector<8x8x4xf32> to vector<8x8x1x4xf32>
    %158 = tpu.concatenate %156, %157 in 2 : vector<8x8x1x4xf32>, vector<8x8x1x4xf32> -> vector<8x8x2x4xf32>
    %159 = vector.shape_cast %158 : vector<8x8x2x4xf32> to vector<8x16x4xf32>
    %160 = vector.shape_cast %129 : vector<8x16x4xf32> to vector<8x1x16x4xf32>
    %161 = vector.shape_cast %159 : vector<8x16x4xf32> to vector<8x1x16x4xf32>
    %162 = tpu.concatenate %160, %161 in 1 : vector<8x1x16x4xf32>, vector<8x1x16x4xf32> -> vector<8x2x16x4xf32>
    %163 = vector.shape_cast %162 : vector<8x2x16x4xf32> to vector<16x16x4xf32>
    %c0_195 = arith.constant 0 : index
    %c0_196 = arith.constant 0 : index
    %c0_197 = arith.constant 0 : index
    %c0_198 = arith.constant 0 : index
    %164 = vector.load %arg2[%c0_195, %c0_196, %c0_197, %c0_198] : memref<1x16x16x4xf32, #tpu.memory_space<vmem>>, vector<1x16x16x4xf32>
    %165 = vector.shape_cast %164 : vector<1x16x16x4xf32> to vector<16x16x4xf32>
    %c0_199 = arith.constant 0 : index
    %c0_200 = arith.constant 0 : index
    %c0_201 = arith.constant 0 : index
    %c0_202 = arith.constant 0 : index
    %166 = vector.load %arg6[%c0_199, %c0_200, %c0_201, %c0_202] : memref<1x16x16x8xf32, #tpu.memory_space<vmem>>, vector<1x16x16x4xf32>
    %167 = vector.shape_cast %166 : vector<1x16x16x4xf32> to vector<16x16x4xf32>
    %168 = vector.shape_cast %165 : vector<16x16x4xf32> to vector<1x16x16x4xf32>
    tpu.vector_store %arg6[%c0_199, %c0_200, %c0_201, %c0_202], %168 {strides = array<i32>} : memref<1x16x16x8xf32, #tpu.memory_space<vmem>>, vector<1x16x16x4xf32>,
    %c0_203 = arith.constant 0 : index
    %c0_204 = arith.constant 0 : index
    %c0_205 = arith.constant 0 : index
    %c4 = arith.constant 4 : index
    %169 = vector.load %arg6[%c0_203, %c0_204, %c0_205, %c4] : memref<1x16x16x8xf32, #tpu.memory_space<vmem>>, vector<1x16x16x4xf32>
    %170 = vector.shape_cast %169 : vector<1x16x16x4xf32> to vector<16x16x4xf32>
    %171 = vector.shape_cast %163 : vector<16x16x4xf32> to vector<1x16x16x4xf32>
    tpu.vector_store %arg6[%c0_203, %c0_204, %c0_205, %c4], %171 {strides = array<i32>} : memref<1x16x16x8xf32, #tpu.memory_space<vmem>>, vector<1x16x16x4xf32>,
    return
  }
  func.func @transform_0(%arg0: i32) -> (i32, i32, i32, i32) {
    %c0_i32 = arith.constant 0 : i32
    %c0_i32_0 = arith.constant 0 : i32
    %c0_i32_1 = arith.constant 0 : i32
    %c0_i32_2 = arith.constant 0 : i32
    return %arg0, %c0_i32, %c0_i32_0, %c0_i32_1 : i32, i32, i32, i32
  }
  func.func @transform_1(%arg0: i32) -> (i32, i32, i32, i32) {
    %c0_i32 = arith.constant 0 : i32
    %c0_i32_0 = arith.constant 0 : i32
    %c0_i32_1 = arith.constant 0 : i32
    %c0_i32_2 = arith.constant 0 : i32
    return %arg0, %c0_i32, %c0_i32_0, %c0_i32_1 : i32, i32, i32, i32
  }
  func.func @transform_2(%arg0: i32) -> (i32, i32) {
    %c0_i32 = arith.constant 0 : i32
    %c0_i32_0 = arith.constant 0 : i32
    %c0_i32_1 = arith.constant 0 : i32
    return %c0_i32, %c0_i32_0 : i32, i32
  }
  func.func @transform_3(%arg0: i32) -> (i32, i32) {
    %c0_i32 = arith.constant 0 : i32
    %c0_i32_0 = arith.constant 0 : i32
    %c0_i32_1 = arith.constant 0 : i32
    return %c0_i32, %c0_i32_0 : i32, i32
  }
  func.func @transform_4(%arg0: i32) -> (i32, i32, i32) {
    %c0_i32 = arith.constant 0 : i32
    %c0_i32_0 = arith.constant 0 : i32
    %c0_i32_1 = arith.constant 0 : i32
    %c0_i32_2 = arith.constant 0 : i32
    return %c0_i32, %c0_i32_0, %c0_i32_1 : i32, i32, i32
  }
  func.func @transform_5(%arg0: i32) -> (i32, i32, i32, i32) {
    %c0_i32 = arith.constant 0 : i32
    %c0_i32_0 = arith.constant 0 : i32
    %c0_i32_1 = arith.constant 0 : i32
    %c0_i32_2 = arith.constant 0 : i32
    return %arg0, %c0_i32, %c0_i32_0, %c0_i32_1 : i32, i32, i32, i32
  }
}

</mosaic_0001>

<bundles_post_ra>
// kernel: a_call__.1
= control target key start
LH: loop header
LB: loop body
LE: loop exit
PB: predicated region body
PF: predicated region fallthrough
CT: control target
= control target key end

     0   :  { %s8121_s18 = smov 0   ;;  %s11162_s0 = inlined_call_operand.vmem [shape: f32[2,9,9,16], index: 0, kind: input, shape index: {}]   ;;  %s11163_s1 = inlined_call_operand.vmem [shape: f32[2,16,16,4], index: 1, kind: input, shape index: {}]   ;;  %s11164_s2 = inlined_call_operand.vmem [shape: bf16[64,8], index: 2, kind: input, shape index: {}]   ;;  %s11165_s3 = inlined_call_operand.vmem [shape: bf16[72,8], index: 3, kind: input, shape index: {}]   ;;  %s11166_s4 = inlined_call_operand.vmem [shape: bf16[2,48,8], index: 4, kind: input, shape index: {}]   ;;  %s11167_s5 = inlined_call_operand.vmem [shape: f32[2,16,16,8], index: 5, kind: output, shape index: {}]  }
   0x1 LB: > { %s7640_s19 = sadd.s32 4294967295, %s8076_s18   ;;  %p7644_p0 = scmp.ge.s32.totalorder %s8076_s18, 1  ;;  %s8076_s18 = sphi %s8121_s18, %s15_s18  }
   0x2   : > { %p197_p1 = scmp.lt.s32.totalorder %s8076_s18, 3 }
   0x4   : > { %p198_p2 = pnand %p7644_p0, %p197_p1 }
   0x6   : > { %201 = sbr.rel (%p198_p2) target bundleno = 2177 (0x881), region = 40 }
   0xb   : > { %p230_p3 = scmp.lt.s32.totalorder %s7640_s19, 1  ;;  %vm327_vm0 = vcmask 125952   ;;  %vm376_vm5 = vsmask.f32 3328  ;;  %vm377_vm6 = vsmask.f32 7440 }
   0xc   : > { %s8078_s24 = smov 32   ;;  %vm8160_vm13 = vmor %vm376_vm5, %vm377_vm6  ;;  %s8079_s25 = smov 16  }
   0xd   : > { %s11550_s19 = smov (!%p230_p3, %s7640_s19), 1  ;;  %s8080_s7 = smov 48  }
   0xe   : > { %s8012_s20 = smul.u32 144, %s11550_s19  ;;  %s8082_s10 = smov 8  }
   0xf   : > { %s8083_s11 = smov 56   ;;  %s8084_s12 = smov 24  }
  0x10   : > { %s8135_s23 = scalar_lea.vmem %s11162_s0, %s8012_s20  ;;  %s8085_s13 = smov 64  }
  0x11   : > { %v250_v0 = vld [vmem:[%s8135_s23 + $0x20] sm:$0xff]  ;;  %v251_v1 = vld [vmem:[%s8135_s23 + $0x28] sm:$0x1]  ;;  %v248_v2 = vld [vmem:[%s8135_s23 + $0x10] sm:$0xff]  ;;  %s8086_s14 = smov 40   ;;  %s8090_s15 = smov 4  }
  0x12   : > { %vm268_vm1 = vcmp.ge.f32.partialorder %v250_v0, 0.0  ;;  %vm269_vm2 = vcmp.ge.f32.partialorder %v251_v1, 0.0  ;;  %v286_v3 = vmul.f32 0.2, %v250_v0  ;;  %v287_v4 = vmul.f32 0.2, %v251_v1 }
  0x13   : > { %v249_v5 = vld [vmem:[%s8135_s23 + $0x18] sm:$0x1]  ;;  %vm266_vm3 = vcmp.ge.f32.partialorder %v248_v2, 0.0  ;;  %v284_v6 = vmul.f32 0.2, %v248_v2  ;;  %v254_v7 = vld [vmem:[%s8135_s23 + $0x40] sm:$0xff] }
  0x14   : > { %v304_v8 = vsel %vm268_vm1, %v250_v0, %v286_v3  ;;  %v305_v9 = vsel %vm269_vm2, %v251_v1, %v287_v4  ;;  %vm267_vm4 = vcmp.ge.f32.partialorder %v249_v5, 0.0  ;;  %v285_v10 = vmul.f32 0.2, %v249_v5  ;;  %v255_v11 = vld [vmem:[%s8135_s23 + $0x48] sm:$0x1]  ;;  %v252_v22 = vld [vmem:[%s8135_s23 + $0x30] sm:$0xff] }
  0x15   : > { %v320_v12 = vpack.c.bf16 %v305_v9, %v304_v8  ;;  %v7846_v13 = vpack.c.bf16 %v304_v8, %v304_v8  ;;  %v7847_v14 = vpack.c.bf16 %v305_v9, %v305_v9  ;;  %v302_v15 = vsel %vm266_vm3, %v248_v2, %v284_v6  ;;  %v253_v27 = vld [vmem:[%s8135_s23 + $0x38] sm:$0x1]  ;;  %v246_v36 = vld [vmem:[%s8135_s23] sm:$0xff]  ;;  %v247_v37 = vld [vmem:[%s8135_s23 + $0x8] sm:$0x1] }
  0x16   : > { %v303_v16 = vsel %vm267_vm4, %v249_v5, %v285_v10  ;;  %v7844_v17 = vpack.c.bf16 %v302_v15, %v302_v15  ;;  %vm272_vm7 = vcmp.ge.f32.partialorder %v254_v7, 0.0  ;;  %vm273_vm8 = vcmp.ge.f32.partialorder %v255_v11, 0.0  ;;  %v256_v3 = vld [vmem:[%s8135_s23 + $0x50] sm:$0xff]  ;;  %v257_v4 = vld [vmem:[%s8135_s23 + $0x58] sm:$0x1] }
  0x17   : > { %v408_v18 = vshrl.u32 %v7846_v13, 16  ;;  %v411_v19 = vshll.u32 %v7846_v13, 16  ;;  %v417_v20 = vshll.u32 %v7847_v14, 16  ;;  %527 = vrot.lane.b32.xlu1 %v320_v12, %s8078_s24  ;;  %330 = vst.msk [vmem:[#allocation3 + $0x8] sm:$0xf] %vm327_vm0, %v320_v12  ;;  %v319_v21 = vpack.c.bf16 %v303_v16, %v302_v15  ;;  %v8034_v13 = vld [vmem:[%s11164_s2 + $0x18] sm:$0xff]  }
  0x18   : > { %v7845_v23 = vpack.c.bf16 %v303_v16, %v303_v16  ;;  %v394_v24 = vshrl.u32 %v7844_v17, 16  ;;  %v397_v25 = vshll.u32 %v7844_v17, 16  ;;  %v290_v26 = vmul.f32 0.2, %v254_v7  ;;  %v261_v12 = vld [vmem:[%s8135_s23 + $0x78] sm:$0x1]  ;;  %7924 = vmatprep.subr.bf16.mxu0 %v8034_v13 }
  0x19   : > { %v410_v28 = vrot.slane %v408_v18, 4  ;;  %v413_v29 = vrot.slane %v411_v19, 5  ;;  %v419_v30 = vrot.slane %v417_v20, 5  ;;  %525 = vrot.lane.b32.xlu0 %v319_v21, %s8078_s24  ;;  %329 = vst.msk [vmem:[#allocation3 + $0x4] sm:$0xf] %vm327_vm0, %v319_v21  ;;  %vm270_vm9 = vcmp.ge.f32.partialorder %v252_v22, 0.0  ;;  %7925 = vmatpush3.bf16.msra.mxu0 %v8034_v13 }
  0x1a   : > { %v291_v31 = vmul.f32 0.2, %v255_v11  ;;  %v396_v32 = vrot.slane %v394_v24, 4  ;;  %v399_v33 = vrot.slane %v397_v25, 5  ;;  %v403_v34 = vshll.u32 %v7845_v23, 16  ;;  %v260_v18 = vld [vmem:[%s8135_s23 + $0x70] sm:$0xff] }
  0x1b   : > { %v308_v35 = vsel %vm272_vm7, %v254_v7, %v290_v26  ;;  %vm271_vm10 = vcmp.ge.f32.partialorder %v253_v27, 0.0  ;;  %v288_v43 = vmul.f32 0.2, %v252_v22  ;;  %v289_v46 = vmul.f32 0.2, %v253_v27 }
  0x1c   : > { %v309_v38 = vsel %vm273_vm8, %v255_v11, %v291_v31  ;;  %v7850_v39 = vpack.c.bf16 %v308_v35, %v308_v35  ;;  %v405_v40 = vrot.slane %v403_v34, 5  ;;  %v414_v47 = vor.u32 %v413_v29, %v410_v28  ;;  %v259_v26 = vld [vmem:[%s8135_s23 + $0x68] sm:$0x1] }
  0x1d   : > { %v322_v41 = vpack.c.bf16 %v309_v38, %v308_v35  ;;  %v7851_v42 = vpack.c.bf16 %v309_v38, %v309_v38  ;;  %v306_v49 = vsel %vm270_vm9, %v252_v22, %v288_v43  ;;  %vm264_vm11 = vcmp.ge.f32.partialorder %v246_v36, 0.0  ;;  %v258_v22 = vld [vmem:[%s8135_s23 + $0x60] sm:$0xff]  ;;  %v263_v13 = vld [vmem:[%s8135_s23 + $0x88] sm:$0x1] }
  0x1e   : > { %v436_v44 = vshrl.u32 %v7850_v39, 16  ;;  %v439_v45 = vshll.u32 %v7850_v39, 16  ;;  %vm265_vm12 = vcmp.ge.f32.partialorder %v247_v37, 0.0  ;;  %v307_v52 = vsel %vm271_vm10, %v253_v27, %v289_v46 }
  0x1f   : > { %v8153_v48 = vshll.u32 %v7851_v42, 16  ;;  %531 = vrot.lane.b32.xlu1 %v322_v41, %s8078_s24  ;;  %332 = vst.msk [vmem:[#allocation3 + $0x10] sm:$0xf] %vm327_vm0, %v322_v41  ;;  %v7848_v53 = vpack.c.bf16 %v306_v49, %v306_v49  ;;  %v321_v55 = vpack.c.bf16 %v307_v52, %v306_v49  ;;  %v7849_v56 = vpack.c.bf16 %v307_v52, %v307_v52 }
  0x20   : > { %v438_v50 = vrot.slane %v436_v44, 4  ;;  %v441_v51 = vrot.slane %v439_v45, 5  ;;  %v415_v57 = vrot.slane %v414_v47, 4  ;;  %v282_v58 = vmul.f32 0.2, %v246_v36  ;;  %v8036_v44 = vld [vmem:[%s11164_s2 + $0x8] sm:$0xff]  }
  0x21   : > { %v422_v59 = vshrl.u32 %v7848_v53, 16  ;;  %v425_v60 = vshll.u32 %v7848_v53, 16  ;;  %v283_v61 = vmul.f32 0.2, %v247_v37  ;;  %v400_v62 = vor.u32 %v399_v33, %v396_v32  ;;  %529 = vrot.lane.b32.xlu0 %v321_v55, %s8078_s24  ;;  %331 = vst.msk [vmem:[#allocation3 + $0xc] sm:$0xf] %vm327_vm0, %v321_v55 }
  0x22   : > { %v431_v63 = vshll.u32 %v7849_v56, 16  ;;  %v8168_v0 = vsel %vm8160_vm13, %v415_v57, %v419_v30  ;;  %v8171_v1 = vsel %vm264_vm11, %v246_v36, %v282_v58  ;;  %v442_v2 = vor.u32 %v441_v51, %v438_v50  ;;  %v8035_v33 = vld [vmem:[%s11164_s2 + $0x10] sm:$0xff]  }
  0x23   : > { %v424_v5 = vrot.slane %v422_v59, 4  ;;  %v427_v6 = vrot.slane %v425_v60, 5  ;;  %495 = vrot.lane.b32.xlu1 %v8168_v0, %s8079_s25  ;;  %v8178_v7 = vsel %vm265_vm12, %v247_v37, %v283_v61  ;;  %v7842_v8 = vpack.c.bf16 %v8171_v1, %v8171_v1  ;;  %7926 = vmatprep.subr.bf16.mxu0 %v8035_v33 }
  0x24   : > { %v7843_v9 = vpack.c.bf16 %v8178_v7, %v8178_v7  ;;  %v433_v10 = vrot.slane %v431_v63, 5  ;;  %v401_v11 = vrot.slane %v400_v62, 4  ;;  %v443_v17 = vrot.slane %v442_v2, 4  ;;  %7927 = vmatpush3.bf16.msra.mxu0 %v8035_v33  ;;  %v262_v62 = vld [vmem:[%s8135_s23 + $0x80] sm:$0xff] }
  0x25   : > { %v380_v14 = vshrl.u32 %v7842_v8, 16  ;;  %v383_v15 = vshll.u32 %v7842_v8, 16  ;;  %v428_v16 = vor.u32 %v427_v6, %v424_v5  ;;  %v447_v21 = vrot.slane %v8153_v48, 5  ;;  %7928 = vmatprep.subr.bf16.mxu0 %v8036_v44  ;;  %v8037_v63 = vld [vmem:[%s11164_s2] sm:$0xff]  }
  0x26   : > { %v389_v19 = vshll.u32 %v7843_v9, 16  ;;  %v8191_v20 = vsel %vm8160_vm13, %v401_v11, %v405_v40  ;;  %vm274_vm14 = vcmp.ge.f32.partialorder %v256_v3, 0.0  ;;  %vm275_vm15 = vcmp.ge.f32.partialorder %v257_v4, 0.0 }
  0x27   : > { %v382_v23 = vrot.slane %v380_v14, 4  ;;  %v385_v24 = vrot.slane %v383_v15, 5  ;;  %v429_v25 = vrot.slane %v428_v16, 4  ;;  %v292_v28 = vmul.f32 0.2, %v256_v3 }
  0x28   : > { %v391_v27 = vrot.slane %v389_v19, 5  ;;  %v293_v29 = vmul.f32 0.2, %v257_v4  ;;  %vm278_vm1 = vcmp.ge.f32.partialorder %v260_v18, 0.0  ;;  %vm279_vm2 = vcmp.ge.f32.partialorder %v261_v12, 0.0  ;;  %7929 = vmatpush3.bf16.msra.mxu0 %v8036_v44 }
  0x29   : > { %v386_v30 = vor.u32 %v385_v24, %v382_v23  ;;  %v8198_v31 = vsel %vm8160_vm13, %v429_v25, %v433_v10  ;;  %v296_v32 = vmul.f32 0.2, %v260_v18  ;;  %v310_v34 = vsel %vm274_vm14, %v256_v3, %v292_v28  ;;  %7930 = vmatprep.subr.bf16.mxu0 %v8037_v63 }
  0x2a   : > { %497 = vrot.lane.b32.xlu1 %v8198_v31, %s8079_s25  ;;  %v311_v35 = vsel %vm275_vm15, %v257_v4, %v293_v29  ;;  %v297_v36 = vmul.f32 0.2, %v261_v12  ;;  %vm276_vm3 = vcmp.ge.f32.partialorder %v258_v22, 0.0  ;;  %v7852_v38 = vpack.c.bf16 %v310_v34, %v310_v34 }
  0x2b   : > { %v387_v37 = vrot.slane %v386_v30, 4  ;;  %v7853_v39 = vpack.c.bf16 %v311_v35, %v311_v35  ;;  %v8206_v40 = vsel %vm278_vm1, %v260_v18, %v296_v32  ;;  %vm277_vm4 = vcmp.ge.f32.partialorder %v259_v26, 0.0 }
  0x2c   : > { %v315_v41 = vsel %vm279_vm2, %v261_v12, %v297_v36  ;;  %v7856_v42 = vpack.c.bf16 %v8206_v40, %v8206_v40  ;;  %v294_v43 = vmul.f32 0.2, %v258_v22  ;;  %v450_v46 = vshrl.u32 %v7852_v38, 16  ;;  %7931 = vmatpush3.bf16.msra.mxu0 %v8037_v63 }
  0x2d   : > { %v392_v45 = vsel %vm8160_vm13, %v387_v37, %v391_v27  ;;  %v453_v47 = vshll.u32 %v7852_v38, 16  ;;  %v459_v48 = vshll.u32 %v7853_v39, 16  ;;  %v7857_v49 = vpack.c.bf16 %v315_v41, %v315_v41 }
  0x2e   : > { %491 = vrot.lane.b32.xlu0 %v392_v45, %s8079_s25  ;;  %578 = vrot.lane.b32.xlu1 %v8168_v0, %s8080_s7  ;;  %v478_v50 = vshrl.u32 %v7856_v42, 16  ;;  %v481_v51 = vshll.u32 %v7856_v42, 16  ;;  %v295_v52 = vmul.f32 0.2, %v259_v26  ;;  %v448_v53 = vsel %vm8160_vm13, %v443_v17, %v447_v21 }
  0x2f   : > { %v452_v55 = vrot.slane %v450_v46, 4  ;;  %v455_v56 = vrot.slane %v453_v47, 5  ;;  %v312_v57 = vsel %vm276_vm3, %v258_v22, %v294_v43  ;;  %v487_v60 = vshll.u32 %v7857_v49, 16 }
  0x30   : > { %v480_v58 = vrot.slane %v478_v50, 4  ;;  %v483_v59 = vrot.slane %v481_v51, 5  ;;  %v313_v61 = vsel %vm277_vm4, %v259_v26, %v295_v52  ;;  %v461_v2 = vrot.slane %v459_v48, 5 }
  0x31   : > { %v456_v0 = vor.u32 %v455_v56, %v452_v55  ;;  %v7854_v3 = vpack.c.bf16 %v312_v57, %v312_v57  ;;  %v324_v4 = vpack.c.bf16 %v313_v61, %v312_v57  ;;  %v489_v6 = vrot.slane %v487_v60, 5 }
  0x32   : > { %493 = vrot.lane.b32.xlu0 %v8191_v20, %s8079_s25  ;;  %582 = vrot.lane.b32.xlu1 %v448_v53, %s8080_s7  ;;  %v484_v5 = vor.u32 %v483_v59, %v480_v58  ;;  %v7855_v8 = vpack.c.bf16 %v313_v61, %v313_v61  ;;  %v323_v9 = vpack.c.bf16 %v311_v35, %v310_v34  ;;  %vm280_vm5 = vcmp.ge.f32.partialorder %v262_v62, 0.0 }
  0x33   : > { %v457_v10 = vrot.slane %v456_v0, 4  ;;  %v464_v11 = vshrl.u32 %v7854_v3, 16  ;;  %v467_v12 = vshll.u32 %v7854_v3, 16  ;;  %334 = vst.msk [vmem:[#allocation3 + $0x18] sm:$0xf] %vm327_vm0, %v324_v4  ;;  %vm281_vm6 = vcmp.ge.f32.partialorder %v263_v13, 0.0 }
  0x34   : > { %v485_v14 = vrot.slane %v484_v5, 4  ;;  %333 = vst.msk [vmem:[#allocation3 + $0x14] sm:$0xf] %vm327_vm0, %v323_v9  ;;  %v298_v15 = vmul.f32 0.2, %v262_v62  ;;  %v473_v19 = vshll.u32 %v7855_v8, 16  ;;  %v325_v26 = vpack.c.bf16 %v315_v41, %v8206_v40 }
  0x35   : > { %v462_v16 = vsel %vm8160_vm13, %v457_v10, %v461_v2  ;;  %v466_v17 = vrot.slane %v464_v11, 4  ;;  %v469_v18 = vrot.slane %v467_v12, 5  ;;  %v299_v21 = vmul.f32 0.2, %v263_v13 }
  0x36   : > { %576 = vrot.lane.b32.xlu0 %v8191_v20, %s8080_s7  ;;  %501 = vrot.lane.b32.xlu1 %v462_v16, %s8079_s25  ;;  %v316_v22 = vsel %vm280_vm5, %v262_v62, %v298_v15  ;;  %v490_v23 = vsel %vm8160_vm13, %v485_v14, %v489_v6  ;;  %v318_v27 = vpack.c.bf16 %v8178_v7, %v8171_v1  ;;  %v475_v20 = vrot.slane %v473_v19, 5 }
  0x37   : > { %v470_v24 = vor.u32 %v469_v18, %v466_v17  ;;  %v7858_v25 = vpack.c.bf16 %v316_v22, %v316_v22  ;;  %v317_v30 = vsel %vm281_vm6, %v263_v13, %v299_v21  ;;  %335 = vst.msk [vmem:[#allocation3 + $0x1c] sm:$0xf] %vm327_vm0, %v325_v26  ;;  %vm549_vm7 = vcmask 388352  }
  0x38   : > { %328 = vst.msk [vmem:[#allocation3] sm:$0xf] %vm327_vm0, %v318_v27  ;;  %v7859_v33 = vpack.c.bf16 %v317_v30, %v317_v30  ;;  %v326_v1 = vpack.c.bf16 %v317_v30, %v316_v22  ;;  %vm515_vm0 = vcmask 257152   ;;  %vm600_vm8 = vcmask 519552  }
  0x39   : > { %v563_v28 = vshrl.u32 %v7858_v25, 16  ;;  %v566_v29 = vshll.u32 %v7858_v25, 16  ;;  %v471_v32 = vrot.slane %v470_v24, 4  ;;  %vm669_vm9 = vcmask 523264  }
  0x3a   : > { %580 = vrot.lane.b32.xlu0 %v8198_v31, %s8080_s7  ;;  %505 = vrot.lane.b32.xlu1 %v490_v23, %s8079_s25  ;;  %v572_v31 = vshll.u32 %v7859_v33, 16  ;;  %vm747_vm10 = vcmask 60416   ;;  %v8081_v6 = vmov 0   ;;  %vm749_vm11 = vcmask 57344  }
  0x3b   : > { %v565_v34 = vrot.slane %v563_v28, 4  ;;  %v568_v35 = vrot.slane %v566_v29, 5  ;;  %v476_v7 = vsel %vm8160_vm13, %v471_v32, %v475_v20  ;;  %755 = vst.msk [vmem:[#allocation2 + $0x18] sm:$0xf] %vm747_vm10, %v8081_v6  ;;  %748 = vst.msk [vmem:[#allocation2] sm:$0xf] %vm747_vm10, %v8081_v6 }
  0x3c   : > { %v574_v38 = vrot.slane %v572_v31, 5  ;;  %751 = vst.msk [vmem:[#allocation2 + $0x8] sm:$0xf] %vm747_vm10, %v8081_v6  ;;  %753 = vst.msk [vmem:[#allocation2 + $0x10] sm:$0xf] %vm747_vm10, %v8081_v6  ;;  %vm1153_vm12 = vcmask 1042432  }
  0x3d   : > { %v569_v36 = vor.u32 %v568_v35, %v565_v34  ;;  %757 = vst.msk [vmem:[#allocation2 + $0x20] sm:$0xf] %vm747_vm10, %v8081_v6  ;;  %759 = vst.msk [vmem:[#allocation2 + $0x28] sm:$0xf] %vm747_vm10, %v8081_v6  ;;  %vm1154_vm14 = vcmask 1046532   ;;  %vm1112_vm1 = vcmask 126016  }
  0x3e   : > { %499 = vrot.lane.b32.xlu0 %v448_v53, %s8079_s25  ;;  %535 = vrot.lane.b32.xlu1 %v324_v4, %s8078_s24  ;;  %761 = vst.msk [vmem:[#allocation2 + $0x30] sm:$0xf] %vm747_vm10, %v8081_v6  ;;  %763 = vst.msk [vmem:[#allocation2 + $0x38] sm:$0xf] %vm747_vm10, %v8081_v6  ;;  %vm1212_vm2 = vcmask 191616  }
  0x3f   : > { %v570_v37 = vrot.slane %v569_v36, 4  ;;  %765 = vst.msk [vmem:[#allocation2 + $0x40] sm:$0xf] %vm747_vm10, %v8081_v6  ;;  %767 = vst.msk [vmem:[#allocation2 + $0x48] sm:$0xf] %vm747_vm10, %v8081_v6 }
  0x40   : > { %756 = vst.msk [vmem:[#allocation2 + $0x1c] sm:$0x1] %vm749_vm11, %v8081_v6  ;;  %750 = vst.msk [vmem:[#allocation2 + $0x4] sm:$0x1] %vm749_vm11, %v8081_v6  ;;  %vm891_vm3 = vsmask.f32 7938 }
  0x41   : > { %v575_v39 = vsel %vm8160_vm13, %v570_v37, %v574_v38  ;;  %752 = vst.msk [vmem:[#allocation2 + $0xc] sm:$0x1] %vm749_vm11, %v8081_v6  ;;  %754 = vst.msk [vmem:[#allocation2 + $0x14] sm:$0x1] %vm749_vm11, %v8081_v6  ;;  %vm897_vm4 = vsmask.f32 256 }
  0x42   : > { %503 = vrot.lane.b32.xlu0 %v476_v7, %s8079_s25  ;;  %539 = vrot.lane.b32.xlu1 %v326_v1, %s8078_s24  ;;  %758 = vst.msk [vmem:[#allocation2 + $0x24] sm:$0x1] %vm749_vm11, %v8081_v6  ;;  %760 = vst.msk [vmem:[#allocation2 + $0x2c] sm:$0x1] %vm749_vm11, %v8081_v6  ;;  %v960_v8 = vld [vmem:[#allocation2] sm:$0xf] }
  0x43   : > { %762 = vst.msk [vmem:[#allocation2 + $0x34] sm:$0x1] %vm749_vm11, %v8081_v6  ;;  %764 = vst.msk [vmem:[#allocation2 + $0x3c] sm:$0x1] %vm749_vm11, %v8081_v6  ;;  %v980_v10 = vshll.u32 %v960_v8, 16 }
  0x44   : > { %766 = vst.msk [vmem:[#allocation2 + $0x44] sm:$0x1] %vm749_vm11, %v8081_v6  ;;  %768 = vst.msk [vmem:[#allocation2 + $0x4c] sm:$0x1] %vm749_vm11, %v8081_v6  ;;  %v1121_v29 = vld [vmem:[#allocation2] sm:$0xe] }
  0x45   : > { %v982_v12 = vrot.slane %v980_v10, 5  ;;  %v7688_v32 = vrot.slane %v1121_v29, 9  ;;  %vm8313_vm15 = vmor %vm1153_vm12, %vm1154_vm14  ;;  %v944_v31 = vld [vmem:[#allocation2] sm:$0xf]  ;;  %vm1730_vm12 = vcmask 519616   ;;  %vm1827_vm14 = vcmask 585216  }
  0x46   : > { %533 = vrot.lane.b32.xlu0 %v323_v9, %s8078_s24  ;;  %586 = vrot.lane.b32.xlu1 %v476_v7, %s8080_s7  ;;  %v977_v9 = vshrl.u32 %v960_v8, 16  ;;  %v1592_v14 = vld [vmem:[#allocation2 + $0x48] sm:$0xf]  ;;  %952 = vst.msk [vmem:[#allocation4] sm:$0xf] %vm747_vm10, %v944_v31  ;;  %vm8327_vm5 = vmand %vm747_vm10, %vm891_vm3  ;;  %vm1900_vm3 = vcmask 588800  }
  0x47   : > { %v961_v13 = vld [vmem:[#allocation2 + $0x4] sm:$0x1]  ;;  %v1693_v17 = vshrl.u32 %v1592_v14, 16  ;;  %v1696_v18 = vshll.u32 %v1592_v14, 16  ;;  %v1536_v25 = vld [vmem:[#allocation2 + $0x48] sm:$0xf]  ;;  %vm8332_vm6 = vmand %vm749_vm11, %vm897_vm4 }
  0x48   : > { %v979_v11 = vrot.slane %v977_v9, 4  ;;  %v1122_v20 = vld [vmem:[#allocation2 + $0x4] sm:$0x1]  ;;  %vm1569_vm11 = vcmask 454016  }
  0x49   : > { %v1695_v22 = vrot.slane %v1693_v17, 4  ;;  %v1158_v35 = vrot.slane %v1122_v20, 5  ;;  %v917_v14 = vld [vmem:[#allocation2 + $0x24] sm:$0x1] }
  0x4a   : > { %537 = vrot.lane.b32.xlu0 %v325_v26, %s8078_s24  ;;  %590 = vrot.lane.b32.xlu1 %v575_v39, %s8080_s7  ;;  %v983_v15 = vor.u32 %v982_v12, %v979_v11 }
  0x4b   : > { %v1593_v24 = vld [vmem:[#allocation2 + $0x4c] sm:$0x1]  ;;  %v1159_v7 = vsel %vm8313_vm15, %v7688_v32, %v1158_v35 }
  0x4c   : > { %v984_v19 = vrot.slane %v983_v15, 4  ;;  %v1702_v28 = vshll.u32 %v1593_v24, 16 }
  0x4e   : > { %584 = vrot.lane.b32.xlu0 %v462_v16, %s8080_s7  ;;  %v986_v16 = vshll.u32 %v961_v13, 16  ;;  %1559 = vrot.lane.b32.xlu1 %v1536_v25, %s8080_s7  ;;  %v1704_v33 = vrot.slane %v1702_v28, 5  ;;  %v914_v13 = vld [vmem:[#allocation2 + $0x20] sm:$0xf] }
  0x50   : > { %v988_v21 = vrot.slane %v986_v16, 5 }
  0x52   : > { %588 = vrot.lane.b32.xlu0 %v490_v23, %s8080_s7  ;;  %v1698_v23 = vrot.slane %v1696_v18, 5  ;;  %v989_v26 = vsel %vm8160_vm13, %v984_v19, %v988_v21  ;;  %v902_v19 = vld [vmem:[#allocation2 + $0x10] sm:$0xf]  ;;  %v905_v21 = vld [vmem:[#allocation2 + $0x14] sm:$0x1] }
  0x54   : > { %v1699_v27 = vor.u32 %v1698_v23, %v1695_v22 }
  0x56   : > { %1088 = vrot.lane.b32.xlu0 %v989_v26, %s8082_s10  ;;  %v1700_v30 = vrot.slane %v1699_v27, 4 }
  0x58   : > { %v1705_v1 = vsel %vm8160_vm13, %v1700_v30, %v1704_v33 }
  0x59   : > { %1720 = vrot.lane.b32.xlu1 %v1705_v1, %s8083_s11 }
  0x5a   : > { %1188 = vrot.lane.b32.xlu0 %v1159_v7, %s8079_s25 }
  0x89   : > { %v528_v40 = vpop.permute.xlu1 %527 }
  0x8b   : > { %v526_v41 = vpop.permute.xlu0 %525 }
  0x91   : > { %v532_v42 = vpop.permute.xlu1 %531 }
  0x93   : > { %v530_v44 = vpop.permute.xlu0 %529 }
  0x95   : > { %v496_v43 = vpop.permute.xlu1 %495 }
  0x96   : > { %518 = vst.msk [vmem:[#allocation3 + $0x8] sm:$0xf] %vm515_vm0, %v496_v43 }
  0x97   : > { %552 = vst.msk [vmem:[#allocation3 + $0x8] sm:$0xf] %vm549_vm7, %v530_v44 }
  0x9c   : > { %v498_v45 = vpop.permute.xlu1 %497 }
  0x9d   : > { %519 = vst.msk [vmem:[#allocation3 + $0xc] sm:$0xf] %vm515_vm0, %v498_v45 }
  0x9e   : > { %553 = vst.msk [vmem:[#allocation3 + $0xc] sm:$0xf] %vm549_vm7, %v532_v42 }
  0xa0   : > { %v492_v46 = vpop.permute.xlu0 %491  ;;  %v579_v47 = vpop.permute.xlu1 %578 }
  0xa1   : > { %516 = vst.msk [vmem:[#allocation3] sm:$0xf] %vm515_vm0, %v492_v46 }
  0xa2   : > { %550 = vst.msk [vmem:[#allocation3] sm:$0xf] %vm549_vm7, %v526_v41 }
  0xa4   : > { %v494_v48 = vpop.permute.xlu0 %493  ;;  %v583_v49 = vpop.permute.xlu1 %582 }
  0xa5   : > { %517 = vst.msk [vmem:[#allocation3 + $0x4] sm:$0xf] %vm515_vm0, %v494_v48 }
  0xa6   : > { %604 = vst.msk [vmem:[#allocation3 + $0xc] sm:$0xf] %vm600_vm8, %v583_v49 }
  0xa7   : > { %551 = vst.msk [vmem:[#allocation3 + $0x4] sm:$0xf] %vm549_vm7, %v528_v40 }
  0xa8   : > { %602 = vst.msk [vmem:[#allocation3 + $0x4] sm:$0xf] %vm600_vm8, %v579_v47  ;;  %v577_v50 = vpop.permute.xlu0 %576  ;;  %v502_v51 = vpop.permute.xlu1 %501 }
  0xa9   : > { %601 = vst.msk [vmem:[#allocation3] sm:$0xf] %vm600_vm8, %v577_v50 }
  0xaa   : > { %521 = vst.msk [vmem:[#allocation3 + $0x14] sm:$0xf] %vm515_vm0, %v502_v51 }
  0xac   : > { %v581_v52 = vpop.permute.xlu0 %580  ;;  %v506_v53 = vpop.permute.xlu1 %505 }
  0xad   : > { %603 = vst.msk [vmem:[#allocation3 + $0x8] sm:$0xf] %vm600_vm8, %v581_v52 }
  0xae   : > { %523 = vst.msk [vmem:[#allocation3 + $0x1c] sm:$0xf] %vm515_vm0, %v506_v53 }
  0xb0   : > { %v500_v55 = vpop.permute.xlu0 %499  ;;  %v8038_v56 = vld [vmem:[#allocation3] sm:$0xff]   ;;  %v536_v57 = vpop.permute.xlu1 %535 }
  0xb1   : > { %520 = vst.msk [vmem:[#allocation3 + $0x10] sm:$0xf] %vm515_vm0, %v500_v55  ;;  %7932 = vmatprep.mubr.msk.bf16.mxu0 %vm669_vm9, %v8038_v56  ;;  %v908_v55 = vld [vmem:[#allocation2 + $0x18] sm:$0xf]  ;;  %v911_v56 = vld [vmem:[#allocation2 + $0x1c] sm:$0x1] }
  0xb2   : > { %555 = vst.msk [vmem:[#allocation3 + $0x14] sm:$0xf] %vm549_vm7, %v536_v57 }
  0xb4   : > { %v504_v58 = vpop.permute.xlu0 %503  ;;  %v8039_v59 = vld [vmem:[#allocation3 + $0x8] sm:$0xff]   ;;  %v540_v60 = vpop.permute.xlu1 %539 }
  0xb5   : > { %522 = vst.msk [vmem:[#allocation3 + $0x18] sm:$0xf] %vm515_vm0, %v504_v58  ;;  %7933 = vmatmul.mubr.msk.bf16.vlgmr.msra.gmra.mxu0 %vm669_vm9, %v8039_v59  ;;  %vm1913_vm0 = vcmask 1043456  }
  0xb6   : > { %557 = vst.msk [vmem:[#allocation3 + $0x1c] sm:$0xf] %vm549_vm7, %v540_v60 }
  0xb8   : > { %v534_v61 = vpop.permute.xlu0 %533  ;;  %v587_v62 = vpop.permute.xlu1 %586 }
  0xb9   : > { %554 = vst.msk [vmem:[#allocation3 + $0x10] sm:$0xf] %vm549_vm7, %v534_v61 }
  0xba   : > { %606 = vst.msk [vmem:[#allocation3 + $0x14] sm:$0xf] %vm600_vm8, %v587_v62 }
  0xbc   : > { %v538_v63 = vpop.permute.xlu0 %537  ;;  %v591_v0 = vpop.permute.xlu1 %590 }
  0xbd   : > { %556 = vst.msk [vmem:[#allocation3 + $0x18] sm:$0xf] %vm549_vm7, %v538_v63  ;;  %v893_v63 = vld [vmem:[#allocation2 + $0x8] sm:$0xf]  ;;  %vm1261_vm7 = vcmask 257216  }
  0xbe   : > { %608 = vst.msk [vmem:[#allocation3 + $0x1c] sm:$0xf] %vm600_vm8, %v591_v0  ;;  %v899_v0 = vld [vmem:[#allocation2 + $0xc] sm:$0x1] }
  0xc0   : > { %v585_v2 = vpop.permute.xlu0 %584 }
  0xc1   : > { %605 = vst.msk [vmem:[#allocation3 + $0x10] sm:$0xf] %vm600_vm8, %v585_v2 }
  0xc4   : > { %v589_v3 = vpop.permute.xlu0 %588 }
  0xc5   : > { %607 = vst.msk [vmem:[#allocation3 + $0x18] sm:$0xf] %vm600_vm8, %v589_v3  ;;  %vm1422_vm8 = vcmask 322816  }
  0xc8   : > { %v8040_v4 = vld [vmem:[#allocation3 + $0x10] sm:$0xff]   ;;  %v1089_v37 = vpop.permute.xlu0 %1088 }
  0xc9   : > { %7936 = vmatprep.mubr.msk.bf16.mxu0 %vm669_vm9, %v8040_v4  ;;  %1113 = vst.msk [vmem:[#allocation4] sm:$0xf] %vm1112_vm1, %v1089_v37 }
  0xcc   : > { %v8041_v5 = vld [vmem:[#allocation3 + $0x18] sm:$0xff]   ;;  %v1189_v46 = vpop.permute.xlu0 %1188 }
  0xcd   : > { %7937 = vmatmul.mubr.msk.bf16.gmra.mxu0 %vm669_vm9, %v8041_v5  ;;  %1213 = vst.msk [vmem:[#allocation4] sm:$0xf] %vm1212_vm2, %v1189_v46  ;;  %vm1519_vm9 = vcmask 388416  }
 0x175   : > { %v7934_v36 = vpop.f32.mrf.mxu0 }
 0x176   : > { %v771_v38 = vmax.f32 %v7934_v36, 0.0 }
 0x177   : > { %v716_v39 = vpop.f32.mrf.mxu0 }
 0x178   : > { %v7862_v40 = vpack.c.bf16 %v771_v38, %v771_v38  ;;  %v769_v41 = vmax.f32 %v716_v39, 0.0 }
 0x179   : > { %v7935_v42 = vpop.f32.mrf.mxu0 }
 0x17a   : > { %v826_v43 = vshrl.u32 %v7862_v40, 16  ;;  %v7860_v44 = vpack.c.bf16 %v769_v41, %v769_v41  ;;  %v772_v45 = vmax.f32 %v7935_v42, 0.0  ;;  %v829_v49 = vshll.u32 %v7862_v40, 16 }
 0x17b   : > { %v719_v47 = vpop.f32.mrf.mxu0 }
 0x17c   : > { %v828_v48 = vrot.slane %v826_v43, 7  ;;  %v810_v51 = vshrl.u32 %v7860_v44, 16  ;;  %v7863_v52 = vpack.c.bf16 %v772_v45, %v772_v45  ;;  %v813_v57 = vshll.u32 %v7860_v44, 16 }
 0x17d   : > { %v770_v58 = vmax.f32 %v719_v47, 0.0 }
 0x17e   : > { %v831_v59 = vor.u32 %v829_v49, %v828_v48  ;;  %v832_v60 = vrot.slane %v828_v48, 4  ;;  %v812_v61 = vrot.slane %v810_v51, 7  ;;  %v834_v62 = vshrl.u32 %v7863_v52, 16 }
 0x17f   : > { %v7861_v2 = vpack.c.bf16 %v770_v58, %v770_v58  ;;  %v837_v9 = vshll.u32 %v7863_v52, 16 }
 0x180   : > { %v909_v3 = vsel %vm8327_vm5, %v831_v59, %v908_v55  ;;  %v912_v4 = vsel %vm8332_vm6, %v832_v60, %v911_v56  ;;  %v815_v5 = vor.u32 %v813_v57, %v812_v61  ;;  %v816_v6 = vrot.slane %v812_v61, 4 }
 0x181   : > { %910 = vst [vmem:[#allocation2 + $0x18] sm:$0xf] %v909_v3  ;;  %913 = vst [vmem:[#allocation2 + $0x1c] sm:$0x1] %v912_v4  ;;  %v836_v8 = vrot.slane %v834_v62, 7  ;;  %v818_v10 = vshrl.u32 %v7861_v2, 16 }
 0x182   : > { %v894_v11 = vsel %vm8327_vm5, %v815_v5, %v893_v63  ;;  %v900_v12 = vsel %vm8332_vm6, %v816_v6, %v899_v0  ;;  %v821_v18 = vshll.u32 %v7861_v2, 16  ;;  %v932_v62 = vld [vmem:[#allocation2 + $0x38] sm:$0xf] }
 0x183   : > { %895 = vst [vmem:[#allocation2 + $0x8] sm:$0xf] %v894_v11  ;;  %901 = vst [vmem:[#allocation2 + $0xc] sm:$0x1] %v900_v12  ;;  %v839_v15 = vor.u32 %v837_v9, %v836_v8  ;;  %v840_v16 = vrot.slane %v836_v8, 4  ;;  %v820_v17 = vrot.slane %v818_v10, 7 }
 0x184   : > { %v935_v12 = vld [vmem:[#allocation2 + $0x3c] sm:$0x1] }
 0x185   : > { %v915_v22 = vsel %vm8327_vm5, %v839_v15, %v914_v13  ;;  %v918_v23 = vsel %vm8332_vm6, %v840_v16, %v917_v14  ;;  %v823_v24 = vor.u32 %v821_v18, %v820_v17  ;;  %v824_v25 = vrot.slane %v820_v17, 4  ;;  %v920_v13 = vld [vmem:[#allocation2 + $0x28] sm:$0xf]  ;;  %v923_v18 = vld [vmem:[#allocation2 + $0x2c] sm:$0x1] }
 0x186   : > { %916 = vst [vmem:[#allocation2 + $0x20] sm:$0xf] %v915_v22  ;;  %919 = vst [vmem:[#allocation2 + $0x24] sm:$0x1] %v918_v23 }
 0x187   : > { %v903_v26 = vsel %vm8327_vm5, %v823_v24, %v902_v19  ;;  %v906_v27 = vsel %vm8332_vm6, %v824_v25, %v905_v21 }
 0x188   : > { %904 = vst [vmem:[#allocation2 + $0x10] sm:$0xf] %v903_v26  ;;  %907 = vst [vmem:[#allocation2 + $0x14] sm:$0x1] %v906_v27  ;;  %v1530_v28 = vld [vmem:[#allocation2 + $0x18] sm:$0xf] }
 0x189   : > { %v1223_v29 = vld [vmem:[#allocation2 + $0x18] sm:$0xf]  ;;  %1547 = vrot.lane.b32.xlu1 %v1530_v28, %s8080_s7  ;;  %v1128_v30 = vld [vmem:[#allocation2 + $0x1c] sm:$0x1] }
 0x18a   : > { %v1127_v20 = vld [vmem:[#allocation2 + $0x18] sm:$0xe]  ;;  %1241 = vrot.lane.b32.xlu0 %v1223_v29, %s8084_s12  ;;  %v1170_v35 = vrot.slane %v1128_v30, 5  ;;  %v1742_v1 = vld [vmem:[#allocation2 + $0x1c] sm:$0x1] }
 0x18b   : > { %v7691_v32 = vrot.slane %v1127_v20, 9  ;;  %v1741_v33 = vld [vmem:[#allocation2 + $0x18] sm:$0xe]  ;;  %v1436_v36 = vld [vmem:[#allocation2 + $0x1c] sm:$0x1]  ;;  %v1777_v39 = vrot.slane %v1742_v1, 5 }
 0x18c   : > { %v7705_v7 = vrot.slane %v1741_v33, 9  ;;  %v1435_v31 = vld [vmem:[#allocation2 + $0x18] sm:$0xe]  ;;  %v1221_v38 = vld [vmem:[#allocation2 + $0x8] sm:$0xf]  ;;  %v1473_v41 = vrot.slane %v1436_v36, 5 }
 0x18d   : > { %v1171_v37 = vsel %vm8313_vm15, %v7691_v32, %v1170_v35  ;;  %v7698_v40 = vrot.slane %v1435_v31, 9  ;;  %v7938_v42 = vpop.f32.mrf.mxu0  ;;  %v1431_v45 = vld [vmem:[#allocation2 + $0x8] sm:$0xe]  ;;  %v1432_v46 = vld [vmem:[#allocation2 + $0xc] sm:$0x1] }
 0x18e   : > { %1194 = vrot.lane.b32.xlu1 %v1171_v37, %s8079_s25  ;;  %1237 = vrot.lane.b32.xlu0 %v1221_v38, %s8084_s12  ;;  %v775_v43 = vmax.f32 %v7938_v42, 0.0  ;;  %v1778_v49 = vsel %vm8313_vm15, %v7705_v7, %v1777_v39  ;;  %v1123_v52 = vld [vmem:[#allocation2 + $0x8] sm:$0xe]  ;;  %v1124_v55 = vld [vmem:[#allocation2 + $0xc] sm:$0x1]  ;;  %v7696_v2 = vrot.slane %v1431_v45, 9 }
 0x18f   : > { %v732_v44 = vpop.f32.mrf.mxu0  ;;  %v1474_v51 = vsel %vm8313_vm15, %v7698_v40, %v1473_v41  ;;  %v1531_v61 = vld [vmem:[#allocation2 + $0x20] sm:$0xf]  ;;  %v1465_v3 = vrot.slane %v1432_v46, 5  ;;  %v7689_v4 = vrot.slane %v1123_v52, 9  ;;  %v1162_v5 = vrot.slane %v1124_v55, 5 }
 0x190   : > { %v7866_v47 = vpack.c.bf16 %v775_v43, %v775_v43  ;;  %v773_v48 = vmax.f32 %v732_v44, 0.0  ;;  %v1224_v0 = vld [vmem:[#allocation2 + $0x20] sm:$0xf]  ;;  %v966_v11 = vld [vmem:[#allocation2 + $0x18] sm:$0xf] }
 0x191   : > { %v7939_v56 = vpop.f32.mrf.mxu0  ;;  %v1466_v22 = vsel %vm8313_vm15, %v7696_v2, %v1465_v3  ;;  %v1163_v23 = vsel %vm8313_vm15, %v7689_v4, %v1162_v5  ;;  %v1743_v24 = vld [vmem:[#allocation2 + $0x20] sm:$0xe]  ;;  %v1744_v25 = vld [vmem:[#allocation2 + $0x24] sm:$0x1]  ;;  %v1019_v26 = vshrl.u32 %v966_v11, 16  ;;  %v1022_v36 = vshll.u32 %v966_v11, 16 }
 0x192   : > { %1805 = vrot.lane.b32.xlu1 %v1778_v49, %s8085_s13  ;;  %1499 = vrot.lane.b32.xlu0 %v1474_v51, %s8086_s14  ;;  %v858_v57 = vshrl.u32 %v7866_v47, 16  ;;  %v861_v58 = vshll.u32 %v7866_v47, 16  ;;  %v7864_v59 = vpack.c.bf16 %v773_v48, %v773_v48  ;;  %v776_v60 = vmax.f32 %v7939_v56, 0.0  ;;  %v938_v30 = vld [vmem:[#allocation2 + $0x40] sm:$0xf] }
 0x193   : > { %v735_v63 = vpop.f32.mrf.mxu0  ;;  %v941_v32 = vld [vmem:[#allocation2 + $0x44] sm:$0x1]  ;;  %v1437_v33 = vld [vmem:[#allocation2 + $0x20] sm:$0xe]  ;;  %v926_v39 = vld [vmem:[#allocation2 + $0x30] sm:$0xf] }
 0x194   : > { %v860_v6 = vrot.slane %v858_v57, 7  ;;  %v842_v8 = vshrl.u32 %v7864_v59, 16  ;;  %v845_v9 = vshll.u32 %v7864_v59, 16  ;;  %v7867_v10 = vpack.c.bf16 %v776_v60, %v776_v60  ;;  %v1438_v31 = vld [vmem:[#allocation2 + $0x24] sm:$0x1] }
 0x195   : > { %v774_v14 = vmax.f32 %v735_v63, 0.0  ;;  %v929_v40 = vld [vmem:[#allocation2 + $0x34] sm:$0x1]  ;;  %v1529_v41 = vld [vmem:[#allocation2 + $0x10] sm:$0xf]  ;;  %v7706_v42 = vrot.slane %v1743_v24, 9 }
 0x196   : > { %1549 = vrot.lane.b32.xlu0 %v1531_v61, %s8080_s7  ;;  %1243 = vrot.lane.b32.xlu1 %v1224_v0, %s8084_s12  ;;  %v863_v15 = vor.u32 %v861_v58, %v860_v6  ;;  %v864_v16 = vrot.slane %v860_v6, 4  ;;  %v844_v17 = vrot.slane %v842_v8, 7  ;;  %v866_v19 = vshrl.u32 %v7867_v10, 16  ;;  %v1222_v48 = vld [vmem:[#allocation2 + $0x10] sm:$0xf] }
 0x197   : > { %v7865_v21 = vpack.c.bf16 %v774_v14, %v774_v14  ;;  %v869_v1 = vshll.u32 %v7867_v10, 16  ;;  %v1781_v43 = vrot.slane %v1744_v25, 5  ;;  %v7699_v49 = vrot.slane %v1437_v33, 9  ;;  %v1580_v56 = vld [vmem:[#allocation2 + $0x18] sm:$0xf] }
 0x198   : > { %v933_v27 = vsel %vm8327_vm5, %v863_v15, %v932_v62  ;;  %v936_v28 = vsel %vm8332_vm6, %v864_v16, %v935_v12  ;;  %v847_v29 = vor.u32 %v845_v9, %v844_v17  ;;  %v848_v20 = vrot.slane %v844_v17, 4  ;;  %v1129_v61 = vld [vmem:[#allocation2 + $0x20] sm:$0xe]  ;;  %v1130_v62 = vld [vmem:[#allocation2 + $0x24] sm:$0x1] }
 0x199   : > { %934 = vst [vmem:[#allocation2 + $0x38] sm:$0xf] %v933_v27  ;;  %937 = vst [vmem:[#allocation2 + $0x3c] sm:$0x1] %v936_v28  ;;  %v868_v35 = vrot.slane %v866_v19, 7  ;;  %v850_v7 = vshrl.u32 %v7865_v21, 16  ;;  %v1782_v63 = vsel %vm8313_vm15, %v7706_v42, %v1781_v43 }
 0x19a   : > { %1495 = vrot.lane.b32.xlu0 %v1466_v22, %s8086_s14  ;;  %1190 = vrot.lane.b32.xlu1 %v1163_v23, %s8079_s25  ;;  %v921_v37 = vsel %vm8327_vm5, %v847_v29, %v920_v13  ;;  %v924_v38 = vsel %vm8332_vm6, %v848_v20, %v923_v18  ;;  %v853_v47 = vshll.u32 %v7865_v21, 16  ;;  %v1477_v51 = vrot.slane %v1438_v31, 5  ;;  %v1274_v0 = vld [vmem:[#allocation2 + $0x18] sm:$0xf]  ;;  %v967_v4 = vld [vmem:[#allocation2 + $0x1c] sm:$0x1] }
 0x19b   : > { %922 = vst [vmem:[#allocation2 + $0x28] sm:$0xf] %v921_v37  ;;  %925 = vst [vmem:[#allocation2 + $0x2c] sm:$0x1] %v924_v38  ;;  %v871_v44 = vor.u32 %v869_v1, %v868_v35  ;;  %v872_v45 = vrot.slane %v868_v35, 4  ;;  %v852_v46 = vrot.slane %v850_v7, 7 }
 0x19c   : > { %v1021_v52 = vrot.slane %v1019_v26, 4  ;;  %v1024_v55 = vrot.slane %v1022_v36, 5  ;;  %v1609_v5 = vshrl.u32 %v1580_v56, 16  ;;  %v1612_v6 = vshll.u32 %v1580_v56, 16  ;;  %v1433_v12 = vld [vmem:[#allocation2 + $0x10] sm:$0xe] }
 0x19d   : > { %v939_v57 = vsel %vm8327_vm5, %v871_v44, %v938_v30  ;;  %v942_v58 = vsel %vm8332_vm6, %v872_v45, %v941_v32  ;;  %v855_v59 = vor.u32 %v853_v47, %v852_v46  ;;  %v856_v60 = vrot.slane %v852_v46, 4  ;;  %v1434_v16 = vld [vmem:[#allocation2 + $0x14] sm:$0x1]  ;;  %v1125_v17 = vld [vmem:[#allocation2 + $0x10] sm:$0xe] }
 0x19e   : > { %1545 = vrot.lane.b32.xlu0 %v1529_v41, %s8080_s7  ;;  %1239 = vrot.lane.b32.xlu1 %v1222_v48, %s8084_s12  ;;  %940 = vst [vmem:[#allocation2 + $0x40] sm:$0xf] %v939_v57  ;;  %943 = vst [vmem:[#allocation2 + $0x44] sm:$0x1] %v942_v58  ;;  %v1478_v8 = vsel %vm8313_vm15, %v7699_v49, %v1477_v51  ;;  %v7692_v9 = vrot.slane %v1129_v61, 9  ;;  %v1174_v10 = vrot.slane %v1130_v62, 5 }
 0x19f   : > { %v927_v2 = vsel %vm8327_vm5, %v855_v59, %v926_v39  ;;  %v930_v3 = vsel %vm8332_vm6, %v856_v60, %v929_v40  ;;  %v1025_v11 = vor.u32 %v1024_v55, %v1021_v52  ;;  %v1315_v13 = vshrl.u32 %v1274_v0, 16  ;;  %v1126_v18 = vld [vmem:[#allocation2 + $0x14] sm:$0x1]  ;;  %v962_v22 = vld [vmem:[#allocation2 + $0x8] sm:$0xf] }
 0x1a0   : > { %928 = vst [vmem:[#allocation2 + $0x30] sm:$0xf] %v927_v2  ;;  %931 = vst [vmem:[#allocation2 + $0x34] sm:$0x1] %v930_v3  ;;  %v1318_v14 = vshll.u32 %v1274_v0, 16  ;;  %v1028_v15 = vshll.u32 %v967_v4, 16  ;;  %v1175_v23 = vsel %vm8313_vm15, %v7692_v9, %v1174_v10 }
 0x1a1   : > { %v1611_v19 = vrot.slane %v1609_v5, 4  ;;  %v1614_v21 = vrot.slane %v1612_v6, 5  ;;  %v1534_v24 = vld [vmem:[#allocation2 + $0x38] sm:$0xf]  ;;  %v1026_v25 = vrot.slane %v1025_v11, 4  ;;  %v1317_v26 = vrot.slane %v1315_v13, 4 }
 0x1a2   : > { %1807 = vrot.lane.b32.xlu0 %v1782_v63, %s8085_s13  ;;  %1501 = vrot.lane.b32.xlu1 %v1478_v8, %s8086_s14  ;;  %v1320_v27 = vrot.slane %v1318_v14, 5  ;;  %v1030_v28 = vrot.slane %v1028_v15, 5  ;;  %v7697_v29 = vrot.slane %v1433_v12, 9  ;;  %v1469_v20 = vrot.slane %v1434_v16, 5  ;;  %v1581_v30 = vld [vmem:[#allocation2 + $0x1c] sm:$0x1] }
 0x1a3   : > { %v7690_v32 = vrot.slane %v1125_v17, 9  ;;  %v1166_v33 = vrot.slane %v1126_v18, 5  ;;  %v1615_v35 = vor.u32 %v1614_v21, %v1611_v19  ;;  %v1275_v1 = vld [vmem:[#allocation2 + $0x1c] sm:$0x1]  ;;  %v991_v7 = vshrl.u32 %v962_v22, 16 }
 0x1a4   : > { %v1031_v31 = vsel %vm8160_vm13, %v1026_v25, %v1030_v28  ;;  %v1227_v36 = vld [vmem:[#allocation2 + $0x38] sm:$0xf]  ;;  %v1321_v37 = vor.u32 %v1320_v27, %v1317_v26  ;;  %v994_v38 = vshll.u32 %v962_v22, 16  ;;  %v1618_v39 = vshll.u32 %v1581_v30, 16  ;;  %v1270_v40 = vld [vmem:[#allocation2 + $0x8] sm:$0xf] }
 0x1a5   : > { %v1324_v41 = vshll.u32 %v1275_v1, 16  ;;  %v1470_v42 = vsel %vm8313_vm15, %v7697_v29, %v1469_v20  ;;  %v1167_v43 = vsel %vm8313_vm15, %v7690_v32, %v1166_v33  ;;  %v1616_v44 = vrot.slane %v1615_v35, 4  ;;  %v1739_v45 = vld [vmem:[#allocation2 + $0x10] sm:$0xe]  ;;  %v1740_v48 = vld [vmem:[#allocation2 + $0x14] sm:$0x1] }
 0x1a6   : > { %1196 = vrot.lane.b32.xlu0 %v1175_v23, %s8079_s25  ;;  %1555 = vrot.lane.b32.xlu1 %v1534_v24, %s8080_s7  ;;  %v993_v46 = vrot.slane %v991_v7, 4  ;;  %v1322_v47 = vrot.slane %v1321_v37, 4  ;;  %v996_v49 = vrot.slane %v994_v38, 5  ;;  %v1287_v51 = vshrl.u32 %v1270_v40, 16  ;;  %v963_v60 = vld [vmem:[#allocation2 + $0xc] sm:$0x1] }
 0x1a7   : > { %v1290_v52 = vshll.u32 %v1270_v40, 16  ;;  %v1620_v55 = vrot.slane %v1618_v39, 5  ;;  %v1326_v56 = vrot.slane %v1324_v41, 5  ;;  %v7704_v58 = vrot.slane %v1739_v45, 9  ;;  %v1276_v2 = vld [vmem:[#allocation2 + $0x20] sm:$0xf] }
 0x1a8   : > { %v1773_v59 = vrot.slane %v1740_v48, 5  ;;  %v997_v62 = vor.u32 %v996_v49, %v993_v46  ;;  %v1289_v63 = vrot.slane %v1287_v51, 4  ;;  %v1000_v3 = vshll.u32 %v963_v60, 16  ;;  %v1271_v4 = vld [vmem:[#allocation2 + $0xc] sm:$0x1] }
 0x1a9   : > { %v1621_v57 = vsel %vm8160_vm13, %v1616_v44, %v1620_v55  ;;  %v1327_v61 = vsel %vm8160_vm13, %v1322_v47, %v1326_v56  ;;  %v1292_v0 = vrot.slane %v1290_v52, 5  ;;  %v1532_v6 = vld [vmem:[#allocation2 + $0x28] sm:$0xf]  ;;  %v1135_v8 = vld [vmem:[#allocation2 + $0x38] sm:$0xe]  ;;  %v1329_v12 = vshrl.u32 %v1276_v2, 16 }
 0x1aa   : > { %1094 = vrot.lane.b32.xlu1 %v1031_v31, %s8082_s10  ;;  %1249 = vrot.lane.b32.xlu0 %v1227_v36, %s8084_s12  ;;  %v1774_v5 = vsel %vm8313_vm15, %v7704_v58, %v1773_v59  ;;  %v1136_v9 = vld [vmem:[#allocation2 + $0x3c] sm:$0x1]  ;;  %v998_v10 = vrot.slane %v997_v62, 4  ;;  %v1332_v13 = vshll.u32 %v1276_v2, 16  ;;  %v1582_v14 = vld [vmem:[#allocation2 + $0x20] sm:$0xf] }
 0x1ab   : > { %v1293_v11 = vor.u32 %v1292_v0, %v1289_v63  ;;  %v1002_v15 = vrot.slane %v1000_v3, 5  ;;  %v7695_v16 = vrot.slane %v1135_v8, 9  ;;  %v1186_v17 = vrot.slane %v1136_v9, 5  ;;  %v1225_v19 = vld [vmem:[#allocation2 + $0x28] sm:$0xf] }
 0x1ac   : > { %v1296_v18 = vshll.u32 %v1271_v4, 16  ;;  %v1443_v21 = vld [vmem:[#allocation2 + $0x38] sm:$0xe]  ;;  %v1623_v22 = vshrl.u32 %v1582_v14, 16  ;;  %v1626_v23 = vshll.u32 %v1582_v14, 16  ;;  %v1331_v27 = vrot.slane %v1329_v12, 4 }
 0x1ad   : > { %v1003_v24 = vsel %vm8160_vm13, %v998_v10, %v1002_v15  ;;  %v1294_v25 = vrot.slane %v1293_v11, 4  ;;  %v1444_v26 = vld [vmem:[#allocation2 + $0x3c] sm:$0x1]  ;;  %v1334_v28 = vrot.slane %v1332_v13, 5  ;;  %v968_v29 = vld [vmem:[#allocation2 + $0x20] sm:$0xf]  ;;  %v1187_v20 = vsel %vm8313_vm15, %v7695_v16, %v1186_v17 }
 0x1ae   : > { %1497 = vrot.lane.b32.xlu1 %v1470_v42, %s8086_s14  ;;  %1192 = vrot.lane.b32.xlu0 %v1167_v43, %s8079_s25  ;;  %v1298_v30 = vrot.slane %v1296_v18, 5  ;;  %v7702_v32 = vrot.slane %v1443_v21, 9  ;;  %v1489_v33 = vrot.slane %v1444_v26, 5  ;;  %v1277_v35 = vld [vmem:[#allocation2 + $0x24] sm:$0x1]  ;;  %v1625_v1 = vrot.slane %v1623_v22, 4 }
 0x1af   : > { %v1628_v7 = vrot.slane %v1626_v23, 5  ;;  %v1335_v36 = vor.u32 %v1334_v28, %v1331_v27  ;;  %v1033_v37 = vshrl.u32 %v968_v29, 16  ;;  %v1036_v38 = vshll.u32 %v968_v29, 16  ;;  %v1583_v40 = vld [vmem:[#allocation2 + $0x24] sm:$0x1] }
 0x1b0   : > { %v1299_v31 = vsel %vm8160_vm13, %v1294_v25, %v1298_v30  ;;  %v1338_v39 = vshll.u32 %v1277_v35, 16  ;;  %v1490_v41 = vsel %vm8313_vm15, %v7702_v32, %v1489_v33  ;;  %v1228_v42 = vld [vmem:[#allocation2 + $0x40] sm:$0xf]  ;;  %v1745_v43 = vld [vmem:[#allocation2 + $0x28] sm:$0xe]  ;;  %v1632_v51 = vshll.u32 %v1583_v40, 16 }
 0x1b1   : > { %v1746_v44 = vld [vmem:[#allocation2 + $0x2c] sm:$0x1]  ;;  %v1336_v45 = vrot.slane %v1335_v36, 4  ;;  %v1629_v46 = vor.u32 %v1628_v7, %v1625_v1  ;;  %v1035_v47 = vrot.slane %v1033_v37, 4  ;;  %v1038_v48 = vrot.slane %v1036_v38, 5 }
 0x1b2   : > { %1708 = vrot.lane.b32.xlu1 %v1621_v57, %s8083_s11  ;;  %1402 = vrot.lane.b32.xlu0 %v1327_v61, %s8078_s24  ;;  %v1272_v49 = vld [vmem:[#allocation2 + $0x10] sm:$0xf]  ;;  %v969_v52 = vld [vmem:[#allocation2 + $0x24] sm:$0x1]  ;;  %v1340_v55 = vrot.slane %v1338_v39, 5  ;;  %v7707_v56 = vrot.slane %v1745_v43, 9 }
 0x1b3   : > { %v1785_v57 = vrot.slane %v1746_v44, 5  ;;  %v1301_v58 = vshrl.u32 %v1272_v49, 16  ;;  %v1304_v59 = vshll.u32 %v1272_v49, 16  ;;  %v964_v60 = vld [vmem:[#allocation2 + $0x10] sm:$0xf]  ;;  %v1630_v63 = vrot.slane %v1629_v46, 4 }
 0x1b4   : > { %v1535_v61 = vld [vmem:[#allocation2 + $0x40] sm:$0xf]  ;;  %v1341_v62 = vsel %vm8160_vm13, %v1336_v45, %v1340_v55  ;;  %v1039_v0 = vor.u32 %v1038_v48, %v1035_v47  ;;  %v1042_v2 = vshll.u32 %v969_v52, 16  ;;  %v1131_v3 = vld [vmem:[#allocation2 + $0x28] sm:$0xe]  ;;  %v1634_v4 = vrot.slane %v1632_v51, 5 }
 0x1b5   : > { %v1005_v8 = vshrl.u32 %v964_v60, 16  ;;  %v1008_v9 = vshll.u32 %v964_v60, 16  ;;  %v1578_v10 = vld [vmem:[#allocation2 + $0x10] sm:$0xf]  ;;  %v1786_v11 = vsel %vm8313_vm15, %v7707_v56, %v1785_v57  ;;  %v7693_v12 = vrot.slane %v1131_v3, 9 }
 0x1b6   : > { %1803 = vrot.lane.b32.xlu0 %v1774_v5, %s8085_s13  ;;  %1551 = vrot.lane.b32.xlu1 %v1532_v6, %s8080_s7  ;;  %v1132_v5 = vld [vmem:[#allocation2 + $0x2c] sm:$0x1]  ;;  %v1439_v6 = vld [vmem:[#allocation2 + $0x28] sm:$0xe]  ;;  %v1303_v14 = vrot.slane %v1301_v58, 4  ;;  %v1306_v15 = vrot.slane %v1304_v59, 5  ;;  %v1635_v16 = vsel %vm8160_vm13, %v1630_v63, %v1634_v4 }
 0x1b7   : > { %v1440_v13 = vld [vmem:[#allocation2 + $0x2c] sm:$0x1]  ;;  %v1040_v17 = vrot.slane %v1039_v0, 4  ;;  %v1044_v18 = vrot.slane %v1042_v2, 5  ;;  %v974_v21 = vld [vmem:[#allocation2 + $0x38] sm:$0xf] }
 0x1b8   : > { %v1273_v22 = vld [vmem:[#allocation2 + $0x14] sm:$0x1]  ;;  %v1598_v25 = vshll.u32 %v1578_v10, 16  ;;  %v7700_v26 = vrot.slane %v1439_v6, 9  ;;  %v1481_v27 = vrot.slane %v1440_v13, 5  ;;  %v1007_v28 = vrot.slane %v1005_v8, 4 }
 0x1b9   : > { %v965_v23 = vld [vmem:[#allocation2 + $0x14] sm:$0x1]  ;;  %v1010_v29 = vrot.slane %v1008_v9, 5  ;;  %v1075_v30 = vshrl.u32 %v974_v21, 16  ;;  %v1078_v32 = vshll.u32 %v974_v21, 16  ;;  %v1045_v33 = vsel %vm8160_vm13, %v1040_v17, %v1044_v18 }
 0x1ba   : > { %1090 = vrot.lane.b32.xlu1 %v1003_v24, %s8082_s10  ;;  %1245 = vrot.lane.b32.xlu0 %v1225_v19, %s8084_s12  ;;  %v1178_v19 = vrot.slane %v1132_v5, 5  ;;  %v1595_v24 = vshrl.u32 %v1578_v10, 16  ;;  %v1310_v1 = vshll.u32 %v1273_v22, 16  ;;  %v1014_v7 = vshll.u32 %v965_v23, 16  ;;  %v1445_v36 = vld [vmem:[#allocation2 + $0x40] sm:$0xe] }
 0x1bb   : > { %v1600_v38 = vrot.slane %v1598_v25, 5  ;;  %v975_v39 = vld [vmem:[#allocation2 + $0x3c] sm:$0x1]  ;;  %v1482_v40 = vsel %vm8313_vm15, %v7700_v26, %v1481_v27  ;;  %v1446_v44 = vld [vmem:[#allocation2 + $0x44] sm:$0x1]  ;;  %v1077_v46 = vrot.slane %v1075_v30, 4 }
 0x1bc   : > { %v1179_v35 = vsel %vm8313_vm15, %v7693_v12, %v1178_v19  ;;  %v1597_v37 = vrot.slane %v1595_v24, 4  ;;  %v1080_v47 = vrot.slane %v1078_v32, 5  ;;  %v1312_v48 = vrot.slane %v1310_v1, 5  ;;  %v1588_v55 = vld [vmem:[#allocation2 + $0x38] sm:$0xf] }
 0x1bd   : > { %v1016_v49 = vrot.slane %v1014_v7, 5  ;;  %v7703_v51 = vrot.slane %v1445_v36, 9  ;;  %v1084_v52 = vshll.u32 %v975_v39, 16  ;;  %v1282_v57 = vld [vmem:[#allocation2 + $0x38] sm:$0xf]  ;;  %v1665_v5 = vshrl.u32 %v1588_v55, 16 }
 0x1be   : > { %1202 = vrot.lane.b32.xlu1 %v1187_v20, %s8079_s25  ;;  %1398 = vrot.lane.b32.xlu0 %v1299_v31, %s8078_s24  ;;  %v1307_v20 = vor.u32 %v1306_v15, %v1303_v14  ;;  %v1579_v31 = vld [vmem:[#allocation2 + $0x14] sm:$0x1]  ;;  %v1601_v56 = vor.u32 %v1600_v38, %v1597_v37  ;;  %v1584_v58 = vld [vmem:[#allocation2 + $0x28] sm:$0xf]  ;;  %v947_v59 = vld [vmem:[#allocation2 + $0x18] sm:$0xf]  ;;  %v1081_v4 = vor.u32 %v1080_v47, %v1077_v46 }
 0x1bf   : > { %v1604_v45 = vshll.u32 %v1579_v31, 16  ;;  %955 = vst.msk [vmem:[#allocation4 + $0xc] sm:$0xf] %vm747_vm10, %v947_v59  ;;  %v945_v63 = vld [vmem:[#allocation2 + $0x8] sm:$0xf]  ;;  %v1668_v8 = vshll.u32 %v1588_v55, 16 }
 0x1c0   : > { %v1308_v43 = vrot.slane %v1307_v20, 4  ;;  %v1533_v0 = vld [vmem:[#allocation2 + $0x30] sm:$0xf]  ;;  %953 = vst.msk [vmem:[#allocation4 + $0x4] sm:$0xf] %vm747_vm10, %v945_v63  ;;  %v1371_v9 = vshrl.u32 %v1282_v57, 16 }
 0x1c1   : > { %v8459_v3 = vrot.slane %v1604_v45, 5  ;;  %v948_v6 = vld [vmem:[#allocation2 + $0x20] sm:$0xf]  ;;  %v1374_v10 = vshll.u32 %v1282_v57, 16  ;;  %v946_v12 = vld [vmem:[#allocation2 + $0x10] sm:$0xf] }
 0x1c2   : > { %1507 = vrot.lane.b32.xlu0 %v1490_v41, %s8086_s14  ;;  %1251 = vrot.lane.b32.xlu1 %v1228_v42, %s8084_s12  ;;  %v1226_v41 = vld [vmem:[#allocation2 + $0x30] sm:$0xf]  ;;  %v1011_v42 = vor.u32 %v1010_v29, %v1007_v28  ;;  %v1313_v2 = vsel %vm8160_vm13, %v1308_v43, %v1312_v48  ;;  %956 = vst.msk [vmem:[#allocation4 + $0x10] sm:$0xf] %vm747_vm10, %v948_v6  ;;  %v1602_v13 = vrot.slane %v1601_v56, 4  ;;  %v1086_v14 = vrot.slane %v1084_v52, 5 }
 0x1c3   : > { %v8465_v15 = vld [vmem:[#allocation2 + $0x34] sm:$0x1]  ;;  %v1640_v17 = vshll.u32 %v1584_v58, 16  ;;  %954 = vst.msk [vmem:[#allocation4 + $0x8] sm:$0xf] %vm747_vm10, %v946_v12  ;;  %v1082_v28 = vrot.slane %v1081_v4, 4 }
 0x1c4   : > { %v1012_v60 = vrot.slane %v1011_v42, 4  ;;  %v951_v18 = vld [vmem:[#allocation2 + $0x38] sm:$0xf]  ;;  %v8469_v19 = vld [vmem:[#allocation2 + $0x30] sm:$0xe]  ;;  %v1667_v29 = vrot.slane %v1665_v5, 4 }
 0x1c5   : > { %v8471_v21 = vld [vmem:[#allocation2 + $0x34] sm:$0x1]  ;;  %v1589_v22 = vld [vmem:[#allocation2 + $0x3c] sm:$0x1]  ;;  %v970_v23 = vld [vmem:[#allocation2 + $0x28] sm:$0xf] }
 0x1c6   : > { %1557 = vrot.lane.b32.xlu0 %v1535_v61, %s8080_s7  ;;  %1404 = vrot.lane.b32.xlu1 %v1341_v62, %s8078_s24  ;;  %v1493_v61 = vrot.slane %v1446_v44, 5  ;;  %v8454_v62 = vld [vmem:[#allocation2 + $0x30] sm:$0xe]  ;;  %959 = vst.msk [vmem:[#allocation4 + $0x1c] sm:$0xf] %vm747_vm10, %v951_v18  ;;  %v1017_v26 = vsel %vm8160_vm13, %v1012_v60, %v1016_v49  ;;  %v1670_v32 = vrot.slane %v1668_v8, 5  ;;  %v1607_v44 = vsel %vm8160_vm13, %v1602_v13, %v8459_v3 }
 0x1c7   : > { %v8042_v24 = vld [vmem:[%s11165_s3 + $0x20] ss:$0 sps:$4 sm:$0xff]   ;;  %v949_v25 = vld [vmem:[#allocation2 + $0x28] sm:$0xf]  ;;  %v950_v30 = vld [vmem:[#allocation2 + $0x30] sm:$0xf]  ;;  %v1087_v49 = vsel %vm8160_vm13, %v1082_v28, %v1086_v14 }
 0x1c8   : > { %v1494_v27 = vsel %vm8313_vm15, %v7703_v51, %v1493_v61  ;;  %v1278_v20 = vld [vmem:[#allocation2 + $0x28] sm:$0xf]  ;;  %957 = vst.msk [vmem:[#allocation4 + $0x14] sm:$0xf] %vm747_vm10, %v949_v25  ;;  %v8043_v7 = vld [vmem:[%s11165_s3 + $0x18] sm:$0xff]   ;;  %v1642_v36 = vrot.slane %v1640_v17, 5  ;;  %8010 = vmatprep.subr.msk.bf16.mxu1 %vm1913_vm0, %v8042_v24  ;;  %v1671_v51 = vor.u32 %v1670_v32, %v1667_v29 }
 0x1c9   : > { %958 = vst.msk [vmem:[#allocation4 + $0x18] sm:$0xf] %vm747_vm10, %v950_v30  ;;  %v1283_v31 = vld [vmem:[#allocation2 + $0x3c] sm:$0x1]  ;;  %v1047_v37 = vshrl.u32 %v970_v23, 16  ;;  %v1050_v38 = vshll.u32 %v970_v23, 16 }
 0x1ca   : > { %1710 = vrot.lane.b32.xlu0 %v1635_v16, %s8083_s11  ;;  %1809 = vrot.lane.b32.xlu1 %v1786_v11, %s8085_s13  ;;  %v1637_v11 = vshrl.u32 %v1584_v58, 16  ;;  %v7701_v16 = vrot.slane %v8454_v62, 9  ;;  %v1485_v39 = vrot.slane %v8465_v15, 5  ;;  %v1346_v42 = vshll.u32 %v1278_v20, 16  ;;  %v1284_v48 = vld [vmem:[#allocation2 + $0x40] sm:$0xf] }
 0x1cb   : > { %v1915_v43 = vsel %vm1913_vm0, %v8042_v24, 0  ;;  %v7694_v45 = vrot.slane %v8469_v19, 9  ;;  %v1182_v46 = vrot.slane %v8471_v21, 5  ;;  %v1674_v47 = vshll.u32 %v1589_v22, 16  ;;  %v1590_v56 = vld [vmem:[#allocation2 + $0x40] sm:$0xf] }
 0x1cc   : > { %v1639_v1 = vrot.slane %v1637_v11, 4  ;;  %7941 = vmatpush3.bf16.msra.mxu1 %v1915_v43  ;;  %v1380_v55 = vshll.u32 %v1283_v31, 16  ;;  %v8044_v57 = vld [vmem:[%s11165_s3 + $0x10] sm:$0xff]   ;;  %v1049_v61 = vrot.slane %v1047_v37, 4  ;;  %v1052_v63 = vrot.slane %v1050_v38, 5  ;;  %v8046_v17 = vld [vmem:[%s11165_s3 + $0x8] sm:$0xff]  }
 0x1cd   : > { %7942 = vmatprep.subr.bf16.mxu1 %v8043_v7  ;;  %v1747_v60 = vld [vmem:[#allocation2 + $0x30] sm:$0xe]  ;;  %v1348_v3 = vrot.slane %v1346_v42, 5  ;;  %v1385_v4 = vshrl.u32 %v1284_v48, 16  ;;  %v1388_v5 = vshll.u32 %v1284_v48, 16  ;;  %v1486_v6 = vsel %vm8313_vm15, %v7701_v16, %v1485_v39 }
 0x1ce   : > { %1096 = vrot.lane.b32.xlu0 %v1045_v33, %s8082_s10  ;;  %1198 = vrot.lane.b32.xlu1 %v1179_v35, %s8079_s25  ;;  %v1373_v33 = vrot.slane %v1371_v9, 4  ;;  %v1376_v35 = vrot.slane %v1374_v10, 5  ;;  %v1643_v58 = vor.u32 %v1642_v36, %v1639_v1  ;;  %v1676_v8 = vrot.slane %v1674_v47, 5  ;;  %v1280_v15 = vld [vmem:[#allocation2 + $0x30] sm:$0xf] }
 0x1cf   : > { %v1679_v9 = vshrl.u32 %v1590_v56, 16  ;;  %v1682_v10 = vshll.u32 %v1590_v56, 16  ;;  %v1183_v11 = vsel %vm8313_vm15, %v7694_v45, %v1182_v46  ;;  %v1672_v12 = vrot.slane %v1671_v51, 4  ;;  %v972_v21 = vld [vmem:[#allocation2 + $0x30] sm:$0xf] }
 0x1d0   : > { %v1377_v52 = vor.u32 %v1376_v35, %v1373_v33  ;;  %7943 = vmatpush3.bf16.msra.mxu1 %v8043_v7  ;;  %v1382_v14 = vrot.slane %v1380_v55, 5  ;;  %v1644_v62 = vrot.slane %v1643_v58, 4  ;;  %v7708_v18 = vrot.slane %v1747_v60, 9  ;;  %v971_v22 = vld [vmem:[#allocation2 + $0x2c] sm:$0x1]  ;;  %v8047_v7 = vld [vmem:[%s11165_s3] sm:$0xff]  }
 0x1d1   : > { %7944 = vmatprep.subr.bf16.mxu1 %v8044_v57  ;;  %v1053_v23 = vor.u32 %v1052_v63, %v1049_v61  ;;  %v1279_v24 = vld [vmem:[#allocation2 + $0x2c] sm:$0x1]  ;;  %v1681_v28 = vrot.slane %v1679_v9, 4  ;;  %v1684_v29 = vrot.slane %v1682_v10, 5  ;;  %v1360_v30 = vshll.u32 %v1280_v15, 16 }
 0x1d2   : > { %1503 = vrot.lane.b32.xlu0 %v1482_v40, %s8086_s14  ;;  %1247 = vrot.lane.b32.xlu1 %v1226_v41, %s8084_s12  ;;  %v1585_v40 = vld [vmem:[#allocation2 + $0x2c] sm:$0x1]  ;;  %v1343_v41 = vshrl.u32 %v1278_v20, 16  ;;  %v1378_v13 = vrot.slane %v1377_v52, 4  ;;  %v1357_v20 = vshrl.u32 %v1280_v15, 16  ;;  %v1677_v32 = vsel %vm8160_vm13, %v1672_v12, %v1676_v8 }
 0x1d3   : > { %v1646_v59 = vshll.u32 %v1585_v40, 16  ;;  %v1061_v35 = vshrl.u32 %v972_v21, 16  ;;  %v1064_v1 = vshll.u32 %v972_v21, 16  ;;  %v1056_v31 = vshll.u32 %v971_v22, 16  ;;  %v1586_v37 = vld [vmem:[#allocation2 + $0x30] sm:$0xf] }
 0x1d4   : > { %7945 = vmatpush3.bf16.msra.mxu1 %v8044_v57  ;;  %v1383_v33 = vsel %vm8160_vm13, %v1378_v13, %v1382_v14  ;;  %v1352_v36 = vshll.u32 %v1279_v24, 16  ;;  %v1054_v40 = vrot.slane %v1053_v23, 4  ;;  %v1285_v42 = vld [vmem:[#allocation2 + $0x44] sm:$0x1]  ;;  %v1685_v45 = vor.u32 %v1684_v29, %v1681_v28  ;;  %v8537_v13 = vpop.permute.xlu1 %1559  ;;  %v1587_v14 = vld [vmem:[#allocation2 + $0x34] sm:$0x1] }
 0x1d5   : > { %v1648_v16 = vrot.slane %v1646_v59, 5  ;;  %7946 = vmatprep.subr.bf16.mxu1 %v8046_v17  ;;  %v1359_v46 = vrot.slane %v1357_v20, 4  ;;  %v1362_v47 = vrot.slane %v1360_v30, 5  ;;  %v1063_v48 = vrot.slane %v1061_v35, 4 }
 0x1d6   : > { %1553 = vrot.lane.b32.xlu0 %v1533_v0, %s8080_s7  ;;  %1400 = vrot.lane.b32.xlu1 %v1313_v2, %s8078_s24  ;;  %v1748_v0 = vld [vmem:[#allocation2 + $0x34] sm:$0x1]  ;;  %v1345_v2 = vrot.slane %v1343_v41, 4  ;;  %v1651_v51 = vshrl.u32 %v1586_v37, 16  ;;  %v1654_v52 = vshll.u32 %v1586_v37, 16  ;;  %v1058_v55 = vrot.slane %v1056_v31, 5 }
 0x1d7   : > { %v1789_v19 = vrot.slane %v1748_v0, 5  ;;  %v1649_v38 = vsel %vm8160_vm13, %v1644_v62, %v1648_v16  ;;  %v1354_v56 = vrot.slane %v1352_v36, 5  ;;  %v1394_v57 = vshll.u32 %v1285_v42, 16  ;;  %v1281_v0 = vld [vmem:[#allocation2 + $0x34] sm:$0x1] }
 0x1d8   : > { %v1349_v25 = vor.u32 %v1348_v3, %v1345_v2  ;;  %7947 = vmatpush3.bf16.msra.mxu1 %v8046_v17  ;;  %v1059_v59 = vsel %vm8160_vm13, %v1054_v40, %v1058_v55  ;;  %v1686_v63 = vrot.slane %v1685_v45, 4  ;;  %v973_v2 = vld [vmem:[#allocation2 + $0x34] sm:$0x1]  ;;  %v1363_v3 = vor.u32 %v1362_v47, %v1359_v46  ;;  %v1749_v16 = vld [vmem:[#allocation2 + $0x38] sm:$0xe]  ;;  %v8549_v30 = vpop.permute.xlu1 %1720 }
 0x1d9   : > { %v1790_v39 = vsel %vm8313_vm15, %v7708_v18, %v1789_v19  ;;  %7948 = vmatprep.subr.bf16.mxu1 %v8047_v7  ;;  %v1396_v8 = vrot.slane %v1394_v57, 5  ;;  %v1366_v10 = vshll.u32 %v1281_v0, 16  ;;  %v1750_v19 = vld [vmem:[#allocation2 + $0x3c] sm:$0x1]  ;;  %v1660_v23 = vshll.u32 %v1587_v14, 16 }
 0x1da   : > { %1092 = vrot.lane.b32.xlu0 %v1017_v26, %s8082_s10  ;;  %1509 = vrot.lane.b32.xlu1 %v1494_v27, %s8086_s14  ;;  %v1387_v26 = vrot.slane %v1385_v4, 4  ;;  %v1390_v27 = vrot.slane %v1388_v5, 5  ;;  %v1350_v41 = vrot.slane %v1349_v25, 4  ;;  %v1653_v5 = vrot.slane %v1651_v51, 4  ;;  %v1753_v25 = vld [vmem:[#allocation2 + $0x48] sm:$0xe] }
 0x1db   : > { %v1364_v17 = vrot.slane %v1363_v3, 4  ;;  %v1368_v21 = vrot.slane %v1366_v10, 5  ;;  %v7709_v24 = vrot.slane %v1749_v16, 9  ;;  %v1793_v29 = vrot.slane %v1750_v19, 5 }
 0x1dc   : > { %v1391_v43 = vor.u32 %v1390_v27, %v1387_v26  ;;  %v1355_v60 = vsel %vm8160_vm13, %v1350_v41, %v1354_v56  ;;  %7949 = vmatpush3.bf16.msra.mxu1 %v8047_v7  ;;  %v1754_v26 = vld [vmem:[#allocation2 + $0x4c] sm:$0x1]  ;;  %v1662_v35 = vrot.slane %v1660_v23, 5 }
 0x1dd   : > { %v1369_v27 = vsel %vm8160_vm13, %v1364_v17, %v1368_v21  ;;  %v1801_v7 = vrot.slane %v1754_v26, 5  ;;  %v1794_v31 = vsel %vm8313_vm15, %v7709_v24, %v1793_v29 }
 0x1de   : > { %1706 = vrot.lane.b32.xlu0 %v1607_v44, %s8083_s11  ;;  %1102 = vrot.lane.b32.xlu1 %v1087_v49, %s8082_s10  ;;  %v1591_v44 = vld [vmem:[#allocation2 + $0x44] sm:$0x1]  ;;  %v1066_v49 = vrot.slane %v1064_v1, 5  ;;  %v1392_v61 = vrot.slane %v1391_v43, 4  ;;  %v7711_v1 = vrot.slane %v1753_v25, 9 }
 0x1df   : > { %v1688_v58 = vshll.u32 %v1591_v44, 16 }
 0x1e0   : > { %v1067_v4 = vor.u32 %v1066_v49, %v1063_v48  ;;  %v1397_v12 = vsel %vm8160_vm13, %v1392_v61, %v1396_v8 }
 0x1e1   : > { %v1690_v9 = vrot.slane %v1688_v58, 5 }
 0x1e2   : > { %1505 = vrot.lane.b32.xlu1 %v1486_v6, %s8086_s14  ;;  %1200 = vrot.lane.b32.xlu0 %v1183_v11, %s8079_s25  ;;  %v1656_v6 = vrot.slane %v1654_v52, 5  ;;  %v1070_v11 = vshll.u32 %v973_v2, 16  ;;  %v1068_v62 = vrot.slane %v1067_v4, 4 }
 0x1e3   : > { %v1691_v15 = vsel %vm8160_vm13, %v1686_v63, %v1690_v9 }
 0x1e4   : > { %v1657_v18 = vor.u32 %v1656_v6, %v1653_v5  ;;  %v1072_v22 = vrot.slane %v1070_v11, 5 }
 0x1e6   : > { %1716 = vrot.lane.b32.xlu1 %v1677_v32, %s8083_s11  ;;  %1410 = vrot.lane.b32.xlu0 %v1383_v33, %s8078_s24  ;;  %v1073_v28 = vsel %vm8160_vm13, %v1068_v62, %v1072_v22  ;;  %v1658_v20 = vrot.slane %v1657_v18, 4  ;;  %v1751_v32 = vld [vmem:[#allocation2 + $0x40] sm:$0xe]  ;;  %v1752_v33 = vld [vmem:[#allocation2 + $0x44] sm:$0x1] }
 0x1e7   : > { %v7710_v37 = vrot.slane %v1751_v32, 9 }
 0x1e8   : > { %v1663_v36 = vsel %vm8160_vm13, %v1658_v20, %v1662_v35 }
 0x1ea   : > { %1712 = vrot.lane.b32.xlu1 %v1649_v38, %s8083_s11  ;;  %1811 = vrot.lane.b32.xlu0 %v1790_v39, %s8085_s13  ;;  %v1797_v38 = vrot.slane %v1752_v33, 5  ;;  %v1802_v39 = vsel %vm8313_vm15, %v7711_v1, %v1801_v7 }
 0x1ec   : > { %v1798_v42 = vsel %vm8313_vm15, %v7710_v37, %v1797_v38 }
 0x1ee   : > { %1098 = vrot.lane.b32.xlu1 %v1059_v59, %s8082_s10  ;;  %1406 = vrot.lane.b32.xlu0 %v1355_v60, %s8078_s24 }
 0x1f2   : > { %1412 = vrot.lane.b32.xlu1 %v1397_v12, %s8078_s24  ;;  %1718 = vrot.lane.b32.xlu0 %v1691_v15, %s8083_s11 }
 0x1f6   : > { %1408 = vrot.lane.b32.xlu1 %v1369_v27, %s8078_s24  ;;  %1100 = vrot.lane.b32.xlu0 %v1073_v28, %s8082_s10 }
 0x1fa   : > { %1813 = vrot.lane.b32.xlu1 %v1794_v31, %s8085_s13  ;;  %1714 = vrot.lane.b32.xlu0 %v1663_v36, %s8083_s11 }
 0x1fb   : > { %v8559_v40 = vpop.permute.xlu1 %1547 }
 0x1fc   : > { %v8561_v41 = vpop.permute.xlu0 %1241 }
 0x1fe   : > { %1817 = vrot.lane.b32.xlu1 %v1802_v39, %s8085_s13  ;;  %1815 = vrot.lane.b32.xlu0 %v1798_v42, %s8085_s13 }
 0x200   : > { %v1195_v43 = vpop.permute.xlu1 %1194  ;;  %v1238_v44 = vpop.permute.xlu0 %1237 }
 0x201   : > { %1262 = vst.msk [vmem:[#allocation4] sm:$0xf] %vm1261_vm7, %v1238_v44 }
 0x204   : > { %v1806_v45 = vpop.permute.xlu1 %1805  ;;  %v8568_v46 = vpop.permute.xlu0 %1499 }
 0x208   : > { %v8570_v47 = vpop.permute.xlu0 %1549  ;;  %v1244_v48 = vpop.permute.xlu1 %1243 }
 0x20c   : > { %v1496_v49 = vpop.permute.xlu0 %1495  ;;  %v1191_v51 = vpop.permute.xlu1 %1190 }
 0x210   : > { %v1546_v52 = vpop.permute.xlu0 %1545  ;;  %v1240_v55 = vpop.permute.xlu1 %1239 }
 0x214   : > { %v8572_v56 = vpop.permute.xlu0 %1807  ;;  %v1502_v57 = vpop.permute.xlu1 %1501 }
 0x218   : > { %v1197_v58 = vpop.permute.xlu0 %1196  ;;  %v8574_v59 = vpop.permute.xlu1 %1555 }
 0x21c   : > { %v1095_v60 = vpop.permute.xlu1 %1094  ;;  %v8576_v61 = vpop.permute.xlu0 %1249 }
 0x21d   : > { %1116 = vst.msk [vmem:[#allocation4 + $0xc] sm:$0xf] %vm1112_vm1, %v1095_v60 }
 0x21e   : > { %1216 = vst.msk [vmem:[#allocation4 + $0xc] sm:$0xf] %vm1212_vm2, %v1195_v43 }
 0x21f   : > { %1265 = vst.msk [vmem:[#allocation4 + $0xc] sm:$0xf] %vm1261_vm7, %v1244_v48 }
 0x220   : > { %v1498_v63 = vpop.permute.xlu1 %1497  ;;  %v1193_v0 = vpop.permute.xlu0 %1192 }
 0x224   : > { %v1709_v2 = vpop.permute.xlu1 %1708  ;;  %v1403_v3 = vpop.permute.xlu0 %1402 }
 0x228   : > { %v1804_v4 = vpop.permute.xlu0 %1803  ;;  %v1552_v5 = vpop.permute.xlu1 %1551 }
 0x22c   : > { %v1091_v6 = vpop.permute.xlu1 %1090  ;;  %v1246_v8 = vpop.permute.xlu0 %1245 }
 0x22d   : > { %1114 = vst.msk [vmem:[#allocation4 + $0x4] sm:$0xf] %vm1112_vm1, %v1091_v6 }
 0x22e   : > { %1214 = vst.msk [vmem:[#allocation4 + $0x4] sm:$0xf] %vm1212_vm2, %v1191_v51 }
 0x22f   : > { %1263 = vst.msk [vmem:[#allocation4 + $0x4] sm:$0xf] %vm1261_vm7, %v1240_v55  ;;  %v2789_v55 = vld [vmem:[#allocation2 + $0x4c] sm:$0x1] }
 0x230   : > { %v1203_v9 = vpop.permute.xlu1 %1202  ;;  %v1399_v10 = vpop.permute.xlu0 %1398  ;;  %v2898_v60 = vshll.u32 %v2789_v55, 16  ;;  %v2120_v55 = vld [vmem:[#allocation2 + $0x20] sm:$0xf] }
 0x231   : > { %1423 = vst.msk [vmem:[#allocation4] sm:$0xf] %vm1422_vm8, %v1399_v10 }
 0x232   : > { %1520 = vst.msk [vmem:[#allocation4] sm:$0xf] %vm1519_vm9, %v1496_v49  ;;  %v2900_v6 = vrot.slane %v2898_v60, 5 }
 0x233   : > { %1570 = vst.msk [vmem:[#allocation4] sm:$0xf] %vm1569_vm11, %v1546_v52  ;;  %v2788_v52 = vld [vmem:[#allocation2 + $0x48] sm:$0xf] }
 0x234   : > { %v8587_v11 = vpop.permute.xlu0 %1507  ;;  %v1252_v12 = vpop.permute.xlu1 %1251 }
 0x238   : > { %v8589_v14 = vpop.permute.xlu0 %1557  ;;  %v1405_v15 = vpop.permute.xlu1 %1404 }
 0x239   : > { %1426 = vst.msk [vmem:[#allocation4 + $0xc] sm:$0xf] %vm1422_vm8, %v1405_v15 }
 0x23a   : > { %1523 = vst.msk [vmem:[#allocation4 + $0xc] sm:$0xf] %vm1519_vm9, %v1502_v57  ;;  %v2892_v57 = vshll.u32 %v2788_v52, 16 }
 0x23b   : > { %1573 = vst.msk [vmem:[#allocation4 + $0xc] sm:$0xf] %vm1569_vm11, %v1552_v5 }
 0x23c   : > { %v1711_v17 = vpop.permute.xlu0 %1710  ;;  %v1810_v62 = vpop.permute.xlu1 %1809 }
 0x240   : > { %v1097_v16 = vpop.permute.xlu0 %1096  ;;  %v1199_v18 = vpop.permute.xlu1 %1198 }
 0x241   : > { %1117 = vst.msk [vmem:[#allocation4 + $0x10] sm:$0xf] %vm1112_vm1, %v1097_v16 }
 0x242   : > { %1217 = vst.msk [vmem:[#allocation4 + $0x10] sm:$0xf] %vm1212_vm2, %v1197_v58 }
 0x243   : > { %1266 = vst.msk [vmem:[#allocation4 + $0x10] sm:$0xf] %vm1261_vm7, %v1246_v8 }
 0x244   : > { %v1504_v19 = vpop.permute.xlu0 %1503  ;;  %v1248_v21 = vpop.permute.xlu1 %1247 }
 0x248   : > { %v1554_v22 = vpop.permute.xlu0 %1553  ;;  %v1401_v23 = vpop.permute.xlu1 %1400 }
 0x249   : > { %1424 = vst.msk [vmem:[#allocation4 + $0x4] sm:$0xf] %vm1422_vm8, %v1401_v23 }
 0x24a   : > { %1521 = vst.msk [vmem:[#allocation4 + $0x4] sm:$0xf] %vm1519_vm9, %v1498_v63  ;;  %v2894_v63 = vrot.slane %v2892_v57, 5 }
 0x24b   : > { %1571 = vst.msk [vmem:[#allocation4 + $0x4] sm:$0xf] %vm1569_vm11, %v8559_v40 }
 0x24c   : > { %1732 = vst.msk [vmem:[#allocation4 + $0x4] sm:$0xf] %vm1730_vm12, %v1709_v2  ;;  %v1093_v24 = vpop.permute.xlu0 %1092  ;;  %v1510_v25 = vpop.permute.xlu1 %1509  ;;  %v2327_v2 = vld [vmem:[#allocation2 + $0x4] sm:$0x1] }
 0x24d   : > { %1829 = vst.msk [vmem:[#allocation4 + $0x4] sm:$0xf] %vm1827_vm14, %v1806_v45  ;;  %v2733_v45 = vld [vmem:[#allocation2 + $0x48] sm:$0xf]  ;;  %v2360_v10 = vrot.slane %v2327_v2, 5 }
 0x24e   : > { %1115 = vst.msk [vmem:[#allocation4 + $0x8] sm:$0xf] %vm1112_vm1, %v1093_v24  ;;  %2756 = vrot.lane.b32.xlu1 %v2733_v45, %s8080_s7 }
 0x24f   : > { %1215 = vst.msk [vmem:[#allocation4 + $0x8] sm:$0xf] %vm1212_vm2, %v1193_v0  ;;  %v2326_v0 = vld [vmem:[#allocation2] sm:$0xe] }
 0x250   : > { %1264 = vst.msk [vmem:[#allocation4 + $0x8] sm:$0xf] %vm1261_vm7, %v8561_v41  ;;  %v1707_v26 = vpop.permute.xlu0 %1706  ;;  %v1103_v27 = vpop.permute.xlu1 %1102 }
 0x251   : > { %1425 = vst.msk [vmem:[#allocation4 + $0x8] sm:$0xf] %vm1422_vm8, %v1403_v3 }
 0x252   : > { %1522 = vst.msk [vmem:[#allocation4 + $0x8] sm:$0xf] %vm1519_vm9, %v8568_v46  ;;  %v2166_v46 = vld [vmem:[#allocation2] sm:$0xf] }
 0x253   : > { %1731 = vst.msk [vmem:[#allocation4] sm:$0xf] %vm1730_vm12, %v1707_v26  ;;  %v2183_v48 = vshrl.u32 %v2166_v46, 16  ;;  %v2186_v49 = vshll.u32 %v2166_v46, 16 }
 0x254   : > { %1120 = vst.msk [vmem:[#allocation4 + $0x1c] sm:$0xf] %vm1112_vm1, %v1103_v27  ;;  %v1506_v28 = vpop.permute.xlu1 %1505  ;;  %v1201_v29 = vpop.permute.xlu0 %1200 }
 0x255   : > { %1572 = vst.msk [vmem:[#allocation4 + $0x8] sm:$0xf] %vm1569_vm11, %v8570_v47  ;;  %v2167_v47 = vld [vmem:[#allocation2 + $0x4] sm:$0x1]  ;;  %v2185_v58 = vrot.slane %v2183_v48, 4 }
 0x256   : > { %1828 = vst.msk [vmem:[#allocation4] sm:$0xf] %vm1827_vm14, %v1804_v4  ;;  %v2192_v51 = vshll.u32 %v2167_v47, 16 }
 0x257   : > { %1220 = vst.msk [vmem:[#allocation4 + $0x1c] sm:$0xf] %vm1212_vm2, %v1203_v9  ;;  %v7733_v9 = vrot.slane %v2326_v0, 9  ;;  %v2111_v0 = vld [vmem:[#allocation2 + $0x14] sm:$0x1] }
 0x258   : > { %1733 = vst.msk [vmem:[#allocation4 + $0x8] sm:$0xf] %vm1730_vm12, %v1711_v17  ;;  %v1717_v20 = vpop.permute.xlu1 %1716  ;;  %v1411_v32 = vpop.permute.xlu0 %1410  ;;  %v2194_v4 = vrot.slane %v2192_v51, 5  ;;  %v2150_v17 = vld [vmem:[#allocation2] sm:$0xf] }
 0x259   : > { %1269 = vst.msk [vmem:[#allocation4 + $0x1c] sm:$0xf] %vm1261_vm7, %v1252_v12  ;;  %v2361_v15 = vsel %vm8313_vm15, %v7733_v9, %v2360_v10 }
 0x25a   : > { %1830 = vst.msk [vmem:[#allocation4 + $0x8] sm:$0xf] %vm1827_vm14, %v8572_v56  ;;  %v2889_v56 = vshrl.u32 %v2788_v52, 16 }
 0x25c   : > { %v1713_v35 = vpop.permute.xlu1 %1712  ;;  %v1812_v1 = vpop.permute.xlu0 %1811 }
 0x25d   : > { %v8045_v33 = vld [vmem:[#allocation4] sm:$0xff]   ;;  %1734 = vst.msk [vmem:[#allocation4 + $0xc] sm:$0xf] %vm1730_vm12, %v1713_v35 }
 0x25e   : > { %7950 = vmatprep.mubr.msk.bf16.mxu1 %vm1900_vm3, %v8045_v33  ;;  %1831 = vst.msk [vmem:[#allocation4 + $0xc] sm:$0xf] %vm1827_vm14, %v1810_v62 }
 0x25f   : > { %2158 = vst.msk [vmem:[#allocation4] sm:$0xf] %vm747_vm10, %v2150_v17 }
 0x260   : > { %v1099_v7 = vpop.permute.xlu1 %1098  ;;  %v1407_v31 = vpop.permute.xlu0 %1406 }
 0x261   : > { %1118 = vst.msk [vmem:[#allocation4 + $0x14] sm:$0xf] %vm1112_vm1, %v1099_v7 }
 0x262   : > { %1427 = vst.msk [vmem:[#allocation4 + $0x10] sm:$0xf] %vm1422_vm8, %v1407_v31 }
 0x263   : > { %1218 = vst.msk [vmem:[#allocation4 + $0x14] sm:$0xf] %vm1212_vm2, %v1199_v18 }
 0x264   : > { %1524 = vst.msk [vmem:[#allocation4 + $0x10] sm:$0xf] %vm1519_vm9, %v1504_v19  ;;  %v1413_v36 = vpop.permute.xlu1 %1412  ;;  %v1719_v37 = vpop.permute.xlu0 %1718 }
 0x265   : > { %1267 = vst.msk [vmem:[#allocation4 + $0x14] sm:$0xf] %vm1261_vm7, %v1248_v21  ;;  %v8048_v38 = vld [vmem:[#allocation4 + $0x8] sm:$0xff]  }
 0x266   : > { %1574 = vst.msk [vmem:[#allocation4 + $0x10] sm:$0xf] %vm1569_vm11, %v1554_v22  ;;  %7951 = vmatmul.mubr.msk.bf16.vlgmr.msra.gmra.mxu1 %vm1900_vm3, %v8048_v38 }
 0x267   : > { %1430 = vst.msk [vmem:[#allocation4 + $0x1c] sm:$0xf] %vm1422_vm8, %v1413_v36  ;;  %v2114_v36 = vld [vmem:[#allocation2 + $0x18] sm:$0xf] }
 0x268   : > { %1527 = vst.msk [vmem:[#allocation4 + $0x1c] sm:$0xf] %vm1519_vm9, %v1510_v25  ;;  %v1409_v39 = vpop.permute.xlu1 %1408  ;;  %v1101_v40 = vpop.permute.xlu0 %1100 }
 0x269   : > { %1577 = vst.msk [vmem:[#allocation4 + $0x1c] sm:$0xf] %vm1569_vm11, %v8537_v13 }
 0x26a   : > { %1738 = vst.msk [vmem:[#allocation4 + $0x1c] sm:$0xf] %vm1730_vm12, %v8549_v30 }
 0x26b   : > { %1428 = vst.msk [vmem:[#allocation4 + $0x14] sm:$0xf] %vm1422_vm8, %v1409_v39 }
 0x26c   : > { %1119 = vst.msk [vmem:[#allocation4 + $0x18] sm:$0xf] %vm1112_vm1, %v1101_v40  ;;  %v1814_v13 = vpop.permute.xlu1 %1813  ;;  %v1715_v30 = vpop.permute.xlu0 %1714 }
 0x26d   : > { %1525 = vst.msk [vmem:[#allocation4 + $0x14] sm:$0xf] %vm1519_vm9, %v1506_v28 }
 0x26e   : > { %1219 = vst.msk [vmem:[#allocation4 + $0x18] sm:$0xf] %vm1212_vm2, %v1201_v29 }
 0x26f   : > { %1575 = vst.msk [vmem:[#allocation4 + $0x14] sm:$0xf] %vm1569_vm11, %v8574_v59  ;;  %v2188_v59 = vrot.slane %v2186_v49, 5 }
 0x270   : > { %1268 = vst.msk [vmem:[#allocation4 + $0x18] sm:$0xf] %vm1261_vm7, %v8576_v61  ;;  %v1818_v41 = vpop.permute.xlu1 %1817  ;;  %v1816_v42 = vpop.permute.xlu0 %1815  ;;  %v2891_v61 = vrot.slane %v2889_v56, 4  ;;  %v2123_v56 = vld [vmem:[#allocation2 + $0x24] sm:$0x1] }
 0x271   : > { %1429 = vst.msk [vmem:[#allocation4 + $0x18] sm:$0xf] %vm1422_vm8, %v1411_v32  ;;  %v2189_v3 = vor.u32 %v2188_v59, %v2185_v58 }
 0x272   : > { %1736 = vst.msk [vmem:[#allocation4 + $0x14] sm:$0xf] %vm1730_vm12, %v1717_v20  ;;  %1735 = vst.msk [vmem:[#allocation4 + $0x10] sm:$0xf] %vm1730_vm12, %v1715_v30  ;;  %v2895_v5 = vor.u32 %v2894_v63, %v2891_v61  ;;  %v2108_v63 = vld [vmem:[#allocation2 + $0x10] sm:$0xf] }
 0x273   : > { %1526 = vst.msk [vmem:[#allocation4 + $0x18] sm:$0xf] %vm1519_vm9, %v8587_v11  ;;  %v2190_v8 = vrot.slane %v2189_v3, 4 }
 0x274   : > { %1833 = vst.msk [vmem:[#allocation4 + $0x14] sm:$0xf] %vm1827_vm14, %v1814_v13  ;;  %1832 = vst.msk [vmem:[#allocation4 + $0x10] sm:$0xf] %vm1827_vm14, %v1812_v1  ;;  %v2896_v11 = vrot.slane %v2895_v5, 4 }
 0x275   : > { %1576 = vst.msk [vmem:[#allocation4 + $0x18] sm:$0xf] %vm1569_vm11, %v8589_v14  ;;  %v2195_v12 = vsel %vm8160_vm13, %v2190_v8, %v2194_v4 }
 0x276   : > { %1737 = vst.msk [vmem:[#allocation4 + $0x18] sm:$0xf] %vm1730_vm12, %v1719_v37  ;;  %2294 = vrot.lane.b32.xlu0 %v2195_v12, %s8082_s10  ;;  %v2901_v14 = vsel %vm8160_vm13, %v2896_v11, %v2900_v6  ;;  %v2117_v37 = vld [vmem:[#allocation2 + $0x1c] sm:$0x1] }
 0x277   : > { %1835 = vst.msk [vmem:[#allocation4 + $0x1c] sm:$0xf] %vm1827_vm14, %v1818_v41  ;;  %1834 = vst.msk [vmem:[#allocation4 + $0x18] sm:$0xf] %vm1827_vm14, %v1816_v42  ;;  %2916 = vrot.lane.b32.xlu1 %v2901_v14, %s8083_s11  ;;  %v2102_v41 = vld [vmem:[#allocation2 + $0x8] sm:$0xf] }
 0x278   : > { %v2105_v42 = vld [vmem:[#allocation2 + $0xc] sm:$0x1] }
 0x27a   : > { %2390 = vrot.lane.b32.xlu0 %v2361_v15, %s8079_s25 }
 0x27b   : > { %v8049_v43 = vld [vmem:[#allocation4 + $0x10] sm:$0xff]  }
 0x27c   : > { %7954 = vmatprep.mubr.msk.bf16.mxu1 %vm1900_vm3, %v8049_v43 }
 0x27e   : > { %v8050_v44 = vld [vmem:[#allocation4 + $0x18] sm:$0xff]  }
 0x27f   : > { %7955 = vmatmul.mubr.msk.bf16.gmra.mxu1 %vm1900_vm3, %v8050_v44 }
 0x2e8   : > { %v2295_v57 = vpop.permute.xlu0 %2294 }
 0x2e9   : > { %2318 = vst.msk [vmem:[#allocation4] sm:$0xf] %vm1112_vm1, %v2295_v57 }
 0x2ec   : > { %v2391_v9 = vpop.permute.xlu0 %2390 }
 0x2ed   : > { %2414 = vst.msk [vmem:[#allocation4] sm:$0xf] %vm1212_vm2, %v2391_v9 }
 0x326   : > { %v7952_v62 = vpop.f32.mrf.mxu1 }
 0x327   : > { %v1984_v16 = vmax.f32 %v7952_v62, 0.0 }
 0x328   : > { %v1951_v18 = vpop.f32.mrf.mxu1 }
 0x329   : > { %v7870_v19 = vpack.c.bf16 %v1984_v16, %v1984_v16  ;;  %v1982_v21 = vmax.f32 %v1951_v18, 0.0 }
 0x32a   : > { %v7953_v22 = vpop.f32.mrf.mxu1 }
 0x32b   : > { %v2039_v23 = vshrl.u32 %v7870_v19, 16  ;;  %v7868_v24 = vpack.c.bf16 %v1982_v21, %v1982_v21  ;;  %v1985_v25 = vmax.f32 %v7953_v22, 0.0  ;;  %v2042_v28 = vshll.u32 %v7870_v19, 16 }
 0x32c   : > { %v1954_v26 = vpop.f32.mrf.mxu1 }
 0x32d   : > { %v2041_v27 = vrot.slane %v2039_v23, 7  ;;  %v2023_v29 = vshrl.u32 %v7868_v24, 16  ;;  %v7871_v20 = vpack.c.bf16 %v1985_v25, %v1985_v25  ;;  %v2026_v32 = vshll.u32 %v7868_v24, 16 }
 0x32e   : > { %v1983_v33 = vmax.f32 %v1954_v26, 0.0 }
 0x32f   : > { %v2044_v35 = vor.u32 %v2042_v28, %v2041_v27  ;;  %v2045_v1 = vrot.slane %v2041_v27, 4  ;;  %v2025_v7 = vrot.slane %v2023_v29, 7  ;;  %v2047_v31 = vshrl.u32 %v7871_v20, 16 }
 0x330   : > { %v7869_v38 = vpack.c.bf16 %v1983_v33, %v1983_v33  ;;  %v2050_v44 = vshll.u32 %v7871_v20, 16 }
 0x331   : > { %v2115_v39 = vsel %vm8327_vm5, %v2044_v35, %v2114_v36  ;;  %v2118_v40 = vsel %vm8332_vm6, %v2045_v1, %v2117_v37  ;;  %v2028_v13 = vor.u32 %v2026_v32, %v2025_v7  ;;  %v2029_v30 = vrot.slane %v2025_v7, 4 }
 0x332   : > { %2119 = vst [vmem:[#allocation2 + $0x1c] sm:$0x1] %v2118_v40  ;;  %2116 = vst [vmem:[#allocation2 + $0x18] sm:$0xf] %v2115_v39  ;;  %v2049_v43 = vrot.slane %v2047_v31, 7  ;;  %v2031_v45 = vshrl.u32 %v7869_v38, 16 }
 0x333   : > { %v2103_v46 = vsel %vm8327_vm5, %v2028_v13, %v2102_v41  ;;  %v2106_v47 = vsel %vm8332_vm6, %v2029_v30, %v2105_v42  ;;  %v2034_v52 = vshll.u32 %v7869_v38, 16  ;;  %v2138_v13 = vld [vmem:[#allocation2 + $0x38] sm:$0xf] }
 0x334   : > { %2107 = vst [vmem:[#allocation2 + $0xc] sm:$0x1] %v2106_v47  ;;  %2104 = vst [vmem:[#allocation2 + $0x8] sm:$0xf] %v2103_v46  ;;  %v2052_v48 = vor.u32 %v2050_v44, %v2049_v43  ;;  %v2053_v49 = vrot.slane %v2049_v43, 4  ;;  %v2033_v51 = vrot.slane %v2031_v45, 7 }
 0x335   : > { %v2141_v46 = vld [vmem:[#allocation2 + $0x3c] sm:$0x1] }
 0x336   : > { %v2121_v58 = vsel %vm8327_vm5, %v2052_v48, %v2120_v55  ;;  %v2124_v59 = vsel %vm8332_vm6, %v2053_v49, %v2123_v56  ;;  %v2036_v60 = vor.u32 %v2034_v52, %v2033_v51  ;;  %v2037_v61 = vrot.slane %v2033_v51, 4  ;;  %v2126_v49 = vld [vmem:[#allocation2 + $0x28] sm:$0xf] }
 0x337   : > { %2125 = vst [vmem:[#allocation2 + $0x24] sm:$0x1] %v2124_v59  ;;  %2122 = vst [vmem:[#allocation2 + $0x20] sm:$0xf] %v2121_v58 }
 0x338   : > { %v2109_v2 = vsel %vm8327_vm5, %v2036_v60, %v2108_v63  ;;  %v2112_v3 = vsel %vm8332_vm6, %v2037_v61, %v2111_v0  ;;  %v2129_v61 = vld [vmem:[#allocation2 + $0x2c] sm:$0x1] }
 0x339   : > { %2113 = vst [vmem:[#allocation2 + $0x14] sm:$0x1] %v2112_v3  ;;  %2110 = vst [vmem:[#allocation2 + $0x10] sm:$0xf] %v2109_v2  ;;  %v2727_v5 = vld [vmem:[#allocation2 + $0x18] sm:$0xf] }
 0x33a   : > { %v2424_v6 = vld [vmem:[#allocation2 + $0x18] sm:$0xf]  ;;  %2744 = vrot.lane.b32.xlu1 %v2727_v5, %s8080_s7  ;;  %v2333_v11 = vld [vmem:[#allocation2 + $0x1c] sm:$0x1] }
 0x33b   : > { %v2332_v8 = vld [vmem:[#allocation2 + $0x18] sm:$0xe]  ;;  %2442 = vrot.lane.b32.xlu0 %v2424_v6, %s8084_s12  ;;  %v2372_v17 = vrot.slane %v2333_v11, 5  ;;  %v2937_v62 = vld [vmem:[#allocation2 + $0x1c] sm:$0x1] }
 0x33c   : > { %v7736_v12 = vrot.slane %v2332_v8, 9  ;;  %v2936_v14 = vld [vmem:[#allocation2 + $0x18] sm:$0xe]  ;;  %v2972_v21 = vrot.slane %v2937_v62, 5  ;;  %v2635_v23 = vld [vmem:[#allocation2 + $0x1c] sm:$0x1] }
 0x33d   : > { %v7750_v16 = vrot.slane %v2936_v14, 9  ;;  %v2634_v22 = vld [vmem:[#allocation2 + $0x18] sm:$0xe]  ;;  %v2422_v26 = vld [vmem:[#allocation2 + $0x8] sm:$0xf]  ;;  %v2672_v28 = vrot.slane %v2635_v23, 5 }
 0x33e   : > { %v2373_v25 = vsel %vm8313_vm15, %v7736_v12, %v2372_v17  ;;  %v7743_v27 = vrot.slane %v2634_v22, 9  ;;  %v2328_v33 = vld [vmem:[#allocation2 + $0x8] sm:$0xe]  ;;  %v2329_v7 = vld [vmem:[#allocation2 + $0xc] sm:$0x1] }
 0x33f   : > { %v7956_v4 = vpop.f32.mrf.mxu1  ;;  %2396 = vrot.lane.b32.xlu1 %v2373_v25, %s8079_s25  ;;  %2438 = vrot.lane.b32.xlu0 %v2422_v26, %s8084_s12  ;;  %v2973_v38 = vsel %vm8313_vm15, %v7750_v16, %v2972_v21  ;;  %v2630_v39 = vld [vmem:[#allocation2 + $0x8] sm:$0xe]  ;;  %v2631_v40 = vld [vmem:[#allocation2 + $0xc] sm:$0x1]  ;;  %v7734_v43 = vrot.slane %v2328_v33, 9  ;;  %v2364_v52 = vrot.slane %v2329_v7, 5 }
 0x340   : > { %v1988_v10 = vmax.f32 %v7956_v4, 0.0  ;;  %v2673_v42 = vsel %vm8313_vm15, %v7743_v27, %v2672_v28  ;;  %v7741_v55 = vrot.slane %v2630_v39, 9  ;;  %v2664_v56 = vrot.slane %v2631_v40, 5  ;;  %v2425_v63 = vld [vmem:[#allocation2 + $0x20] sm:$0xf] }
 0x341   : > { %v1967_v15 = vpop.f32.mrf.mxu1  ;;  %v2728_v4 = vld [vmem:[#allocation2 + $0x20] sm:$0xf]  ;;  %v2172_v9 = vld [vmem:[#allocation2 + $0x18] sm:$0xf]  ;;  %v2147_v12 = vld [vmem:[#allocation2 + $0x44] sm:$0x1]  ;;  %v2365_v17 = vsel %vm8313_vm15, %v7734_v43, %v2364_v52 }
 0x342   : > { %v7874_v18 = vpack.c.bf16 %v1988_v10, %v1988_v10  ;;  %v1986_v19 = vmax.f32 %v1967_v15, 0.0  ;;  %v2144_v8 = vld [vmem:[#allocation2 + $0x40] sm:$0xf]  ;;  %v2665_v62 = vsel %vm8313_vm15, %v7741_v55, %v2664_v56  ;;  %v2132_v25 = vld [vmem:[#allocation2 + $0x30] sm:$0xf] }
 0x343   : > { %v7957_v24 = vpop.f32.mrf.mxu1  ;;  %3000 = vrot.lane.b32.xlu1 %v2973_v38, %s8085_s13  ;;  %2698 = vrot.lane.b32.xlu0 %v2673_v42, %s8086_s14  ;;  %v2636_v16 = vld [vmem:[#allocation2 + $0x20] sm:$0xe]  ;;  %v2135_v26 = vld [vmem:[#allocation2 + $0x34] sm:$0x1]  ;;  %v2939_v28 = vld [vmem:[#allocation2 + $0x24] sm:$0x1] }
 0x344   : > { %v2071_v29 = vshrl.u32 %v7874_v18, 16  ;;  %v7872_v20 = vpack.c.bf16 %v1986_v19, %v1986_v19  ;;  %v1989_v32 = vmax.f32 %v7957_v24, 0.0  ;;  %v2074_v35 = vshll.u32 %v7874_v18, 16  ;;  %v2637_v18 = vld [vmem:[#allocation2 + $0x24] sm:$0x1] }
 0x345   : > { %v1970_v1 = vpop.f32.mrf.mxu1  ;;  %v2225_v19 = vshrl.u32 %v2172_v9, 16  ;;  %v2938_v27 = vld [vmem:[#allocation2 + $0x20] sm:$0xe]  ;;  %v2423_v33 = vld [vmem:[#allocation2 + $0x10] sm:$0xf]  ;;  %v2976_v38 = vrot.slane %v2939_v28, 5 }
 0x346   : > { %v2073_v31 = vrot.slane %v2071_v29, 7  ;;  %v2055_v36 = vshrl.u32 %v7872_v20, 16  ;;  %v7875_v37 = vpack.c.bf16 %v1989_v32, %v1989_v32  ;;  %v2058_v30 = vshll.u32 %v7872_v20, 16  ;;  %v2726_v7 = vld [vmem:[#allocation2 + $0x10] sm:$0xf] }
 0x347   : > { %v1987_v41 = vmax.f32 %v1970_v1, 0.0  ;;  %2444 = vrot.lane.b32.xlu1 %v2425_v63, %s8084_s12  ;;  %2746 = vrot.lane.b32.xlu0 %v2728_v4, %s8080_s7  ;;  %v2228_v29 = vshll.u32 %v2172_v9, 16  ;;  %v2676_v1 = vrot.slane %v2637_v18, 5  ;;  %v2227_v39 = vrot.slane %v2225_v19, 4  ;;  %v2632_v52 = vld [vmem:[#allocation2 + $0x10] sm:$0xe] }
 0x348   : > { %v2076_v44 = vor.u32 %v2074_v35, %v2073_v31  ;;  %v2077_v45 = vrot.slane %v2073_v31, 4  ;;  %v2057_v47 = vrot.slane %v2055_v36, 7  ;;  %v2079_v48 = vshrl.u32 %v7875_v37, 16  ;;  %v2334_v31 = vld [vmem:[#allocation2 + $0x20] sm:$0xe] }
 0x349   : > { %v7873_v51 = vpack.c.bf16 %v1987_v41, %v1987_v41  ;;  %v2082_v2 = vshll.u32 %v7875_v37, 16  ;;  %v7744_v35 = vrot.slane %v2636_v16, 9  ;;  %v2335_v36 = vld [vmem:[#allocation2 + $0x24] sm:$0x1]  ;;  %v7751_v37 = vrot.slane %v2938_v27, 9 }
 0x34a   : > { %v2139_v57 = vsel %vm8327_vm5, %v2076_v44, %v2138_v13  ;;  %v2142_v58 = vsel %vm8332_vm6, %v2077_v45, %v2141_v46  ;;  %v2060_v59 = vor.u32 %v2058_v30, %v2057_v47  ;;  %v2061_v60 = vrot.slane %v2057_v47, 4  ;;  %v2776_v13 = vld [vmem:[#allocation2 + $0x18] sm:$0xf]  ;;  %v2173_v44 = vld [vmem:[#allocation2 + $0x1c] sm:$0x1] }
 0x34b   : > { %2143 = vst [vmem:[#allocation2 + $0x3c] sm:$0x1] %v2142_v58  ;;  %2140 = vst [vmem:[#allocation2 + $0x38] sm:$0xf] %v2139_v57  ;;  %v2081_v0 = vrot.slane %v2079_v48, 7  ;;  %v2063_v3 = vshrl.u32 %v7873_v51, 16  ;;  %2392 = vrot.lane.b32.xlu1 %v2365_v17, %s8079_s25  ;;  %2694 = vrot.lane.b32.xlu0 %v2665_v62, %s8086_s14  ;;  %v2677_v41 = vsel %vm8313_vm15, %v7744_v35, %v2676_v1 }
 0x34c   : > { %v2127_v5 = vsel %vm8327_vm5, %v2060_v59, %v2126_v49  ;;  %v2130_v6 = vsel %vm8332_vm6, %v2061_v60, %v2129_v61  ;;  %v2066_v15 = vshll.u32 %v7873_v51, 16  ;;  %v2230_v40 = vrot.slane %v2228_v29, 5  ;;  %v2474_v30 = vld [vmem:[#allocation2 + $0x18] sm:$0xf]  ;;  %v2633_v56 = vld [vmem:[#allocation2 + $0x14] sm:$0x1] }
 0x34d   : > { %2131 = vst [vmem:[#allocation2 + $0x2c] sm:$0x1] %v2130_v6  ;;  %2128 = vst [vmem:[#allocation2 + $0x28] sm:$0xf] %v2127_v5  ;;  %v2084_v10 = vor.u32 %v2082_v2, %v2081_v0  ;;  %v2085_v11 = vrot.slane %v2081_v0, 4  ;;  %v2065_v14 = vrot.slane %v2063_v3, 7  ;;  %v2977_v47 = vsel %vm8313_vm15, %v7751_v37, %v2976_v38 }
 0x34e   : > { %v7737_v42 = vrot.slane %v2334_v31, 9  ;;  %v2376_v43 = vrot.slane %v2335_v36, 5  ;;  %v2805_v45 = vshrl.u32 %v2776_v13, 16  ;;  %v2808_v46 = vshll.u32 %v2776_v13, 16  ;;  %v2330_v57 = vld [vmem:[#allocation2 + $0x10] sm:$0xe] }
 0x34f   : > { %v2145_v21 = vsel %vm8327_vm5, %v2084_v10, %v2144_v8  ;;  %v2148_v22 = vsel %vm8332_vm6, %v2085_v11, %v2147_v12  ;;  %v2068_v23 = vor.u32 %v2066_v15, %v2065_v14  ;;  %v2069_v24 = vrot.slane %v2065_v14, 4  ;;  %2440 = vrot.lane.b32.xlu1 %v2423_v33, %s8084_s12  ;;  %2742 = vrot.lane.b32.xlu0 %v2726_v7, %s8080_s7  ;;  %v2331_v59 = vld [vmem:[#allocation2 + $0x14] sm:$0x1]  ;;  %v2168_v4 = vld [vmem:[#allocation2 + $0x8] sm:$0xf] }
 0x350   : > { %2146 = vst [vmem:[#allocation2 + $0x40] sm:$0xf] %v2145_v21  ;;  %2149 = vst [vmem:[#allocation2 + $0x44] sm:$0x1] %v2148_v22  ;;  %v2231_v48 = vor.u32 %v2230_v40, %v2227_v39  ;;  %v2515_v49 = vshrl.u32 %v2474_v30, 16  ;;  %v2518_v51 = vshll.u32 %v2474_v30, 16  ;;  %v2377_v63 = vsel %vm8313_vm15, %v7737_v42, %v2376_v43 }
 0x351   : > { %v2133_v20 = vsel %vm8327_vm5, %v2068_v23, %v2132_v25  ;;  %v2136_v32 = vsel %vm8332_vm6, %v2069_v24, %v2135_v26  ;;  %v2234_v55 = vshll.u32 %v2173_v44, 16  ;;  %v2807_v60 = vrot.slane %v2805_v45, 4  ;;  %v2777_v9 = vld [vmem:[#allocation2 + $0x1c] sm:$0x1]  ;;  %v2470_v21 = vld [vmem:[#allocation2 + $0x8] sm:$0xf] }
 0x352   : > { %2137 = vst [vmem:[#allocation2 + $0x34] sm:$0x1] %v2136_v32  ;;  %2134 = vst [vmem:[#allocation2 + $0x30] sm:$0xf] %v2133_v20  ;;  %v2731_v58 = vld [vmem:[#allocation2 + $0x38] sm:$0xf] }
 0x353   : > { %2700 = vrot.lane.b32.xlu1 %v2677_v41, %s8086_s14  ;;  %3002 = vrot.lane.b32.xlu0 %v2977_v47, %s8085_s13  ;;  %v2810_v61 = vrot.slane %v2808_v46, 5  ;;  %v2232_v0 = vrot.slane %v2231_v48, 4  ;;  %v2517_v2 = vrot.slane %v2515_v49, 4  ;;  %v2520_v3 = vrot.slane %v2518_v51, 5  ;;  %v2475_v14 = vld [vmem:[#allocation2 + $0x1c] sm:$0x1] }
 0x354   : > { %v2236_v5 = vrot.slane %v2234_v55, 5  ;;  %v7742_v6 = vrot.slane %v2632_v52, 9  ;;  %v2668_v8 = vrot.slane %v2633_v56, 5  ;;  %v7735_v10 = vrot.slane %v2330_v57, 9  ;;  %v2428_v62 = vld [vmem:[#allocation2 + $0x38] sm:$0xf] }
 0x355   : > { %v2368_v11 = vrot.slane %v2331_v59, 5  ;;  %v2811_v12 = vor.u32 %v2810_v61, %v2807_v60  ;;  %v2197_v15 = vshrl.u32 %v2168_v4, 16  ;;  %v2521_v16 = vor.u32 %v2520_v3, %v2517_v2  ;;  %v2934_v26 = vld [vmem:[#allocation2 + $0x10] sm:$0xe]  ;;  %v2935_v29 = vld [vmem:[#allocation2 + $0x14] sm:$0x1] }
 0x356   : > { %v2237_v17 = vsel %vm8160_vm13, %v2232_v0, %v2236_v5  ;;  %v2200_v18 = vshll.u32 %v2168_v4, 16  ;;  %v2814_v19 = vshll.u32 %v2777_v9, 16  ;;  %v2524_v22 = vshll.u32 %v2475_v14, 16  ;;  %v2169_v37 = vld [vmem:[#allocation2 + $0xc] sm:$0x1] }
 0x357   : > { %2398 = vrot.lane.b32.xlu0 %v2377_v63, %s8079_s25  ;;  %2752 = vrot.lane.b32.xlu1 %v2731_v58, %s8080_s7  ;;  %v2669_v23 = vsel %vm8313_vm15, %v7742_v6, %v2668_v8  ;;  %v2369_v24 = vsel %vm8313_vm15, %v7735_v10, %v2368_v11  ;;  %v2812_v25 = vrot.slane %v2811_v12, 4  ;;  %v2199_v27 = vrot.slane %v2197_v15, 4  ;;  %v2476_v30 = vld [vmem:[#allocation2 + $0x20] sm:$0xf]  ;;  %v2340_v42 = vld [vmem:[#allocation2 + $0x38] sm:$0xe] }
 0x358   : > { %v2522_v28 = vrot.slane %v2521_v16, 4  ;;  %v2202_v20 = vrot.slane %v2200_v18, 5  ;;  %v2487_v32 = vshrl.u32 %v2470_v21, 16  ;;  %v2490_v33 = vshll.u32 %v2470_v21, 16  ;;  %v2341_v43 = vld [vmem:[#allocation2 + $0x3c] sm:$0x1] }
 0x359   : > { %v2816_v35 = vrot.slane %v2814_v19, 5  ;;  %v2526_v1 = vrot.slane %v2524_v22, 5  ;;  %v7749_v31 = vrot.slane %v2934_v26, 9  ;;  %v2968_v36 = vrot.slane %v2935_v29, 5  ;;  %v2471_v44 = vld [vmem:[#allocation2 + $0xc] sm:$0x1] }
 0x35a   : > { %v2203_v39 = vor.u32 %v2202_v20, %v2199_v27  ;;  %v2489_v40 = vrot.slane %v2487_v32, 4  ;;  %v2492_v13 = vrot.slane %v2490_v33, 5  ;;  %v2206_v41 = vshll.u32 %v2169_v37, 16  ;;  %v2729_v48 = vld [vmem:[#allocation2 + $0x28] sm:$0xf] }
 0x35b   : > { %2300 = vrot.lane.b32.xlu1 %v2237_v17, %s8082_s10  ;;  %2450 = vrot.lane.b32.xlu0 %v2428_v62, %s8084_s12  ;;  %v2817_v7 = vsel %vm8160_vm13, %v2812_v25, %v2816_v35  ;;  %v2527_v38 = vsel %vm8160_vm13, %v2522_v28, %v2526_v1  ;;  %v2529_v45 = vshrl.u32 %v2476_v30, 16  ;;  %v2532_v46 = vshll.u32 %v2476_v30, 16  ;;  %v2778_v52 = vld [vmem:[#allocation2 + $0x20] sm:$0xf]  ;;  %v2426_v59 = vld [vmem:[#allocation2 + $0x28] sm:$0xf] }
 0x35c   : > { %v2969_v47 = vsel %vm8313_vm15, %v7749_v31, %v2968_v36  ;;  %v2204_v49 = vrot.slane %v2203_v39, 4  ;;  %v2493_v51 = vor.u32 %v2492_v13, %v2489_v40  ;;  %v2208_v55 = vrot.slane %v2206_v41, 5  ;;  %v2642_v3 = vld [vmem:[#allocation2 + $0x38] sm:$0xe]  ;;  %v2643_v4 = vld [vmem:[#allocation2 + $0x3c] sm:$0x1] }
 0x35d   : > { %v7740_v56 = vrot.slane %v2340_v42, 9  ;;  %v2388_v57 = vrot.slane %v2341_v43, 5  ;;  %v2496_v58 = vshll.u32 %v2471_v44, 16  ;;  %v2531_v60 = vrot.slane %v2529_v45, 4  ;;  %v2174_v6 = vld [vmem:[#allocation2 + $0x20] sm:$0xf] }
 0x35e   : > { %v2534_v61 = vrot.slane %v2532_v46, 5  ;;  %v2819_v63 = vshrl.u32 %v2778_v52, 16  ;;  %v2209_v0 = vsel %vm8160_vm13, %v2204_v49, %v2208_v55  ;;  %v2494_v2 = vrot.slane %v2493_v51, 4  ;;  %v2477_v12 = vld [vmem:[#allocation2 + $0x24] sm:$0x1] }
 0x35f   : > { %2696 = vrot.lane.b32.xlu1 %v2669_v23, %s8086_s14  ;;  %2394 = vrot.lane.b32.xlu0 %v2369_v24, %s8079_s25  ;;  %v2822_v5 = vshll.u32 %v2778_v52, 16  ;;  %v2389_v8 = vsel %vm8313_vm15, %v7740_v56, %v2388_v57  ;;  %v2498_v9 = vrot.slane %v2496_v58, 5  ;;  %v7747_v10 = vrot.slane %v2642_v3, 9  ;;  %v2429_v22 = vld [vmem:[#allocation2 + $0x40] sm:$0xf] }
 0x360   : > { %v2688_v11 = vrot.slane %v2643_v4, 5  ;;  %v2535_v14 = vor.u32 %v2534_v61, %v2531_v60  ;;  %v2821_v15 = vrot.slane %v2819_v63, 4  ;;  %v2239_v16 = vshrl.u32 %v2174_v6, 16  ;;  %v2779_v23 = vld [vmem:[#allocation2 + $0x24] sm:$0x1] }
 0x361   : > { %v2499_v17 = vsel %vm8160_vm13, %v2494_v2, %v2498_v9  ;;  %v2824_v62 = vrot.slane %v2822_v5, 5  ;;  %v2242_v18 = vshll.u32 %v2174_v6, 16  ;;  %v2538_v19 = vshll.u32 %v2477_v12, 16  ;;  %v2940_v24 = vld [vmem:[#allocation2 + $0x28] sm:$0xe] }
 0x362   : > { %v2689_v21 = vsel %vm8313_vm15, %v7747_v10, %v2688_v11  ;;  %v2536_v25 = vrot.slane %v2535_v14, 4  ;;  %v2241_v27 = vrot.slane %v2239_v16, 4  ;;  %v2472_v29 = vld [vmem:[#allocation2 + $0x10] sm:$0xf]  ;;  %v2941_v20 = vld [vmem:[#allocation2 + $0x2c] sm:$0x1] }
 0x363   : > { %2904 = vrot.lane.b32.xlu1 %v2817_v7, %s8083_s11  ;;  %2602 = vrot.lane.b32.xlu0 %v2527_v38, %s8078_s24  ;;  %v2825_v26 = vor.u32 %v2824_v62, %v2821_v15  ;;  %v2244_v28 = vrot.slane %v2242_v18, 5  ;;  %v2540_v32 = vrot.slane %v2538_v19, 5  ;;  %v2828_v33 = vshll.u32 %v2779_v23, 16  ;;  %v2175_v1 = vld [vmem:[#allocation2 + $0x24] sm:$0x1] }
 0x364   : > { %v7752_v35 = vrot.slane %v2940_v24, 9  ;;  %v2336_v7 = vld [vmem:[#allocation2 + $0x28] sm:$0xe]  ;;  %v2501_v31 = vshrl.u32 %v2472_v29, 16  ;;  %v2504_v36 = vshll.u32 %v2472_v29, 16  ;;  %v2980_v13 = vrot.slane %v2941_v20, 5 }
 0x365   : > { %v2170_v37 = vld [vmem:[#allocation2 + $0x10] sm:$0xf]  ;;  %v2732_v38 = vld [vmem:[#allocation2 + $0x40] sm:$0xf]  ;;  %v2541_v39 = vsel %vm8160_vm13, %v2536_v25, %v2540_v32  ;;  %v2826_v40 = vrot.slane %v2825_v26, 4  ;;  %v2245_v30 = vor.u32 %v2244_v28, %v2241_v27  ;;  %v2248_v41 = vshll.u32 %v2175_v1, 16 }
 0x366   : > { %v2337_v42 = vld [vmem:[#allocation2 + $0x2c] sm:$0x1]  ;;  %v2830_v43 = vrot.slane %v2828_v33, 5  ;;  %v7738_v44 = vrot.slane %v2336_v7, 9  ;;  %v2638_v45 = vld [vmem:[#allocation2 + $0x28] sm:$0xe]  ;;  %v2981_v56 = vsel %vm8313_vm15, %v7752_v35, %v2980_v13 }
 0x367   : > { %2998 = vrot.lane.b32.xlu0 %v2969_v47, %s8085_s13  ;;  %2748 = vrot.lane.b32.xlu1 %v2729_v48, %s8080_s7  ;;  %v2211_v46 = vshrl.u32 %v2170_v37, 16  ;;  %v2214_v47 = vshll.u32 %v2170_v37, 16  ;;  %v2473_v48 = vld [vmem:[#allocation2 + $0x14] sm:$0x1]  ;;  %v2503_v49 = vrot.slane %v2501_v31, 4  ;;  %v2506_v51 = vrot.slane %v2504_v36, 5 }
 0x368   : > { %v2171_v52 = vld [vmem:[#allocation2 + $0x14] sm:$0x1]  ;;  %v2831_v55 = vsel %vm8160_vm13, %v2826_v40, %v2830_v43  ;;  %v2246_v57 = vrot.slane %v2245_v30, 4  ;;  %v2380_v58 = vrot.slane %v2337_v42, 5  ;;  %v2774_v60 = vld [vmem:[#allocation2 + $0x10] sm:$0xf] }
 0x369   : > { %v2250_v61 = vrot.slane %v2248_v41, 5  ;;  %v7745_v63 = vrot.slane %v2638_v45, 9  ;;  %v2510_v2 = vshll.u32 %v2473_v48, 16  ;;  %v2213_v3 = vrot.slane %v2211_v46, 4  ;;  %v8779_v6 = vld [vmem:[#allocation2 + $0x40] sm:$0xe] }
 0x36a   : > { %v2216_v4 = vrot.slane %v2214_v47, 5  ;;  %v2220_v5 = vshll.u32 %v2171_v52, 16  ;;  %v2507_v9 = vor.u32 %v2506_v51, %v2503_v49  ;;  %v8781_v10 = vld [vmem:[#allocation2 + $0x44] sm:$0x1]  ;;  %v2791_v11 = vshrl.u32 %v2774_v60, 16  ;;  %v8052_v49 = vld [vmem:[%s11165_s3 + $0x18] sm:$0xff]  }
 0x36b   : > { %2296 = vrot.lane.b32.xlu1 %v2209_v0, %s8082_s10  ;;  %2446 = vrot.lane.b32.xlu0 %v2426_v59, %s8084_s12  ;;  %v2639_v59 = vld [vmem:[#allocation2 + $0x2c] sm:$0x1]  ;;  %v2180_v0 = vld [vmem:[#allocation2 + $0x38] sm:$0xf]  ;;  %v2794_v12 = vshll.u32 %v2774_v60, 16  ;;  %v2251_v14 = vsel %vm8160_vm13, %v2246_v57, %v2250_v61  ;;  %v2381_v15 = vsel %vm8313_vm15, %v7738_v44, %v2380_v58  ;;  %v7748_v18 = vrot.slane %v8779_v6, 9 }
 0x36c   : > { %v2281_v62 = vshrl.u32 %v2180_v0, 16  ;;  %v2284_v16 = vshll.u32 %v2180_v0, 16  ;;  %v2512_v19 = vrot.slane %v2510_v2, 5  ;;  %v2692_v23 = vrot.slane %v8781_v10, 5  ;;  %v2427_v24 = vld [vmem:[#allocation2 + $0x30] sm:$0xf] }
 0x36d   : > { %v2508_v25 = vrot.slane %v2507_v9, 4  ;;  %v2793_v26 = vrot.slane %v2791_v11, 4  ;;  %v2796_v27 = vrot.slane %v2794_v12, 5  ;;  %v2784_v33 = vld [vmem:[#allocation2 + $0x38] sm:$0xf] }
 0x36e   : > { %v2283_v20 = vrot.slane %v2281_v62, 4  ;;  %v2286_v32 = vrot.slane %v2284_v16, 5  ;;  %v2153_v35 = vld [vmem:[#allocation2 + $0x18] sm:$0xf]  ;;  %v2181_v1 = vld [vmem:[#allocation2 + $0x3c] sm:$0x1] }
 0x36f   : > { %2404 = vrot.lane.b32.xlu1 %v2389_v8, %s8079_s25  ;;  %2598 = vrot.lane.b32.xlu0 %v2499_v17, %s8078_s24  ;;  %v2680_v8 = vrot.slane %v2639_v59, 5  ;;  %v2775_v17 = vld [vmem:[#allocation2 + $0x14] sm:$0x1]  ;;  %v2482_v7 = vld [vmem:[#allocation2 + $0x38] sm:$0xf]  ;;  %v2513_v40 = vsel %vm8160_vm13, %v2508_v25, %v2512_v19  ;;  %v2797_v30 = vor.u32 %v2796_v27, %v2793_v26  ;;  %v2861_v41 = vshrl.u32 %v2784_v33, 16 }
 0x370   : > { %v2800_v28 = vshll.u32 %v2775_v17, 16  ;;  %2161 = vst.msk [vmem:[#allocation4 + $0xc] sm:$0xf] %vm747_vm10, %v2153_v35  ;;  %v2151_v31 = vld [vmem:[#allocation2 + $0x8] sm:$0xf]  ;;  %v2287_v44 = vor.u32 %v2286_v32, %v2283_v20  ;;  %v2864_v45 = vshll.u32 %v2784_v33, 16 }
 0x371   : > { %v2681_v29 = vsel %vm8313_vm15, %v7745_v63, %v2680_v8  ;;  %v2730_v36 = vld [vmem:[#allocation2 + $0x30] sm:$0xf]  ;;  %2159 = vst.msk [vmem:[#allocation4 + $0x4] sm:$0xf] %vm747_vm10, %v2151_v31  ;;  %v2157_v43 = vld [vmem:[#allocation2 + $0x38] sm:$0xf] }
 0x372   : > { %v8798_v37 = vld [vmem:[#allocation2 + $0x30] sm:$0xe]  ;;  %v2571_v46 = vshrl.u32 %v2482_v7, 16  ;;  %v2574_v47 = vshll.u32 %v2482_v7, 16  ;;  %2165 = vst.msk [vmem:[#allocation4 + $0x1c] sm:$0xf] %vm747_vm10, %v2157_v43 }
 0x373   : > { %2706 = vrot.lane.b32.xlu0 %v2689_v21, %s8086_s14  ;;  %2452 = vrot.lane.b32.xlu1 %v2429_v22, %s8084_s12  ;;  %v2217_v21 = vor.u32 %v2216_v4, %v2213_v3  ;;  %v8790_v22 = vrot.slane %v2220_v5, 5  ;;  %v2152_v42 = vld [vmem:[#allocation2 + $0x10] sm:$0xf]  ;;  %v8051_v48 = vld [vmem:[%s11165_s3 + $0x20] ss:$0 sps:$4 sm:$0xff]   ;;  %v2802_v51 = vrot.slane %v2800_v28, 5  ;;  %v2693_v5 = vsel %vm8313_vm15, %v7748_v18, %v2692_v23 }
 0x374   : > { %2160 = vst.msk [vmem:[#allocation4 + $0x8] sm:$0xf] %vm747_vm10, %v2152_v42  ;;  %v2290_v52 = vshll.u32 %v2181_v1, 16  ;;  %v2155_v58 = vld [vmem:[#allocation2 + $0x28] sm:$0xf]  ;;  %v7746_v59 = vrot.slane %v8798_v37, 9  ;;  %8011 = vmatprep.subr.msk.bf16.mxu0 %vm1913_vm0, %v8051_v48 }
 0x375   : > { %v2218_v13 = vrot.slane %v2217_v21, 4  ;;  %v8817_v60 = vld [vmem:[#allocation2 + $0x30] sm:$0xe]  ;;  %v8819_v61 = vld [vmem:[#allocation2 + $0x34] sm:$0x1]  ;;  %v3107_v2 = vsel %vm1913_vm0, %v8051_v48, 0 }
 0x376   : > { %v2785_v63 = vld [vmem:[#allocation2 + $0x3c] sm:$0x1]  ;;  %v2176_v0 = vld [vmem:[#allocation2 + $0x28] sm:$0xf]  ;;  %2163 = vst.msk [vmem:[#allocation4 + $0x14] sm:$0xf] %vm747_vm10, %v2155_v58  ;;  %7959 = vmatpush3.bf16.msra.mxu0 %v3107_v2 }
 0x377   : > { %2754 = vrot.lane.b32.xlu0 %v2732_v38, %s8080_s7  ;;  %2604 = vrot.lane.b32.xlu1 %v2541_v39, %s8078_s24  ;;  %v2780_v38 = vld [vmem:[#allocation2 + $0x28] sm:$0xf]  ;;  %v2154_v39 = vld [vmem:[#allocation2 + $0x20] sm:$0xf]  ;;  %v2156_v3 = vld [vmem:[#allocation2 + $0x30] sm:$0xf]  ;;  %v2223_v4 = vsel %vm8160_vm13, %v2218_v13, %v8790_v22 }
 0x378   : > { %2162 = vst.msk [vmem:[#allocation4 + $0x10] sm:$0xf] %vm747_vm10, %v2154_v39  ;;  %v2836_v57 = vshll.u32 %v2780_v38, 16  ;;  %v2798_v6 = vrot.slane %v2797_v30, 4  ;;  %v2863_v8 = vrot.slane %v2861_v41, 4  ;;  %v2288_v11 = vrot.slane %v2287_v44, 4  ;;  %7960 = vmatprep.subr.bf16.mxu0 %v8052_v49 }
 0x379   : > { %v2483_v9 = vld [vmem:[#allocation2 + $0x3c] sm:$0x1]  ;;  %v2478_v10 = vld [vmem:[#allocation2 + $0x28] sm:$0xf]  ;;  %2164 = vst.msk [vmem:[#allocation4 + $0x18] sm:$0xf] %vm747_vm10, %v2156_v3 }
 0x37a   : > { %v2866_v12 = vrot.slane %v2864_v45, 5  ;;  %v8053_v17 = vld [vmem:[%s11165_s3 + $0x10] sm:$0xff]   ;;  %v2838_v16 = vrot.slane %v2836_v57, 5  ;;  %v2253_v18 = vshrl.u32 %v2176_v0, 16  ;;  %v2256_v19 = vshll.u32 %v2176_v0, 16  ;;  %7961 = vmatpush3.bf16.msra.mxu0 %v8052_v49  ;;  %v8055_v13 = vld [vmem:[%s11165_s3 + $0x8] sm:$0xff]  }
 0x37b   : > { %2906 = vrot.lane.b32.xlu0 %v2831_v55, %s8083_s11  ;;  %3004 = vrot.lane.b32.xlu1 %v2981_v56, %s8085_s13  ;;  %v8814_v55 = vld [vmem:[#allocation2 + $0x34] sm:$0x1]  ;;  %v2833_v56 = vshrl.u32 %v2780_v38, 16  ;;  %v2292_v21 = vrot.slane %v2290_v52, 5  ;;  %v2781_v23 = vld [vmem:[#allocation2 + $0x2c] sm:$0x1]  ;;  %v2803_v32 = vsel %vm8160_vm13, %v2798_v6, %v2802_v51 }
 0x37c   : > { %v2684_v22 = vrot.slane %v8814_v55, 5  ;;  %v2546_v25 = vshll.u32 %v2478_v10, 16  ;;  %v7739_v26 = vrot.slane %v8817_v60, 9  ;;  %v2384_v27 = vrot.slane %v8819_v61, 5  ;;  %v2484_v20 = vld [vmem:[#allocation2 + $0x40] sm:$0xf]  ;;  %7962 = vmatprep.subr.bf16.mxu0 %v8053_v17 }
 0x37d   : > { %v2835_v62 = vrot.slane %v2833_v56, 4  ;;  %v2870_v28 = vshll.u32 %v2785_v63, 16  ;;  %v2293_v33 = vsel %vm8160_vm13, %v2288_v11, %v2292_v21  ;;  %v2867_v35 = vor.u32 %v2866_v12, %v2863_v8  ;;  %v2786_v7 = vld [vmem:[#allocation2 + $0x40] sm:$0xf]  ;;  %v2942_v38 = vld [vmem:[#allocation2 + $0x30] sm:$0xe] }
 0x37e   : > { %v2255_v39 = vrot.slane %v2253_v18, 4  ;;  %v2943_v30 = vld [vmem:[#allocation2 + $0x34] sm:$0x1]  ;;  %v2548_v42 = vrot.slane %v2546_v25, 5  ;;  %v2585_v43 = vshrl.u32 %v2484_v20, 16  ;;  %v2588_v44 = vshll.u32 %v2484_v20, 16  ;;  %7963 = vmatpush3.bf16.msra.mxu0 %v8053_v17 }
 0x37f   : > { %2302 = vrot.lane.b32.xlu0 %v2251_v14, %s8082_s10  ;;  %2400 = vrot.lane.b32.xlu1 %v2381_v15, %s8079_s25  ;;  %v2573_v14 = vrot.slane %v2571_v46, 4  ;;  %v2576_v15 = vrot.slane %v2574_v47, 5  ;;  %v2839_v31 = vor.u32 %v2838_v16, %v2835_v62  ;;  %v2872_v45 = vrot.slane %v2870_v28, 5  ;;  %v2177_v56 = vld [vmem:[#allocation2 + $0x2c] sm:$0x1] }
 0x380   : > { %v2875_v47 = vshrl.u32 %v2786_v7, 16  ;;  %v2878_v48 = vshll.u32 %v2786_v7, 16  ;;  %v2685_v49 = vsel %vm8313_vm15, %v7746_v59, %v2684_v22  ;;  %v2385_v51 = vsel %vm8313_vm15, %v7739_v26, %v2384_v27  ;;  %v2480_v57 = vld [vmem:[#allocation2 + $0x30] sm:$0xf]  ;;  %7964 = vmatprep.subr.bf16.mxu0 %v8055_v13  ;;  %v2479_v2 = vld [vmem:[#allocation2 + $0x2c] sm:$0x1] }
 0x381   : > { %v2577_v1 = vor.u32 %v2576_v15, %v2573_v14  ;;  %v2868_v52 = vrot.slane %v2867_v35, 4  ;;  %v2840_v58 = vrot.slane %v2839_v31, 4  ;;  %v7753_v61 = vrot.slane %v2942_v38, 9  ;;  %v2178_v37 = vld [vmem:[#allocation2 + $0x30] sm:$0xf] }
 0x382   : > { %v2984_v63 = vrot.slane %v2943_v30, 5  ;;  %v2587_v3 = vrot.slane %v2585_v43, 4  ;;  %v2877_v6 = vrot.slane %v2875_v47, 4  ;;  %v2880_v8 = vrot.slane %v2878_v48, 5  ;;  %7965 = vmatpush3.bf16.msra.mxu0 %v8055_v13  ;;  %v2782_v16 = vld [vmem:[#allocation2 + $0x30] sm:$0xf] }
 0x383   : > { %2702 = vrot.lane.b32.xlu0 %v2681_v29, %s8086_s14  ;;  %2448 = vrot.lane.b32.xlu1 %v2427_v24, %s8084_s12  ;;  %v2543_v24 = vshrl.u32 %v2478_v10, 16  ;;  %v2580_v29 = vshll.u32 %v2483_v9, 16  ;;  %v2578_v55 = vrot.slane %v2577_v1, 4  ;;  %v2557_v9 = vshrl.u32 %v2480_v57, 16  ;;  %v2485_v22 = vld [vmem:[#allocation2 + $0x44] sm:$0x1] }
 0x384   : > { %v2560_v10 = vshll.u32 %v2480_v57, 16  ;;  %v2873_v11 = vsel %vm8160_vm13, %v2868_v52, %v2872_v45  ;;  %v2267_v14 = vshrl.u32 %v2178_v37, 16  ;;  %v2270_v15 = vshll.u32 %v2178_v37, 16  ;;  %v2787_v25 = vld [vmem:[#allocation2 + $0x44] sm:$0x1] }
 0x385   : > { %v2545_v41 = vrot.slane %v2543_v24, 4  ;;  %v2582_v46 = vrot.slane %v2580_v29, 5  ;;  %v2262_v17 = vshll.u32 %v2177_v56, 16  ;;  %v2552_v62 = vshll.u32 %v2479_v2, 16  ;;  %v2481_v13 = vld [vmem:[#allocation2 + $0x34] sm:$0x1] }
 0x386   : > { %v2881_v26 = vor.u32 %v2880_v8, %v2877_v6  ;;  %v2559_v27 = vrot.slane %v2557_v9, 4  ;;  %v2562_v28 = vrot.slane %v2560_v10, 5  ;;  %v2269_v29 = vrot.slane %v2267_v14, 4  ;;  %v2179_v30 = vld [vmem:[#allocation2 + $0x34] sm:$0x1] }
 0x387   : > { %2750 = vrot.lane.b32.xlu0 %v2730_v36, %s8080_s7  ;;  %2600 = vrot.lane.b32.xlu1 %v2513_v40, %s8078_s24  ;;  %v2842_v36 = vshll.u32 %v2781_v23, 16  ;;  %v2258_v40 = vrot.slane %v2256_v19, 5  ;;  %v2549_v59 = vor.u32 %v2548_v42, %v2545_v41  ;;  %v2583_v12 = vsel %vm8160_vm13, %v2578_v55, %v2582_v46  ;;  %v2783_v52 = vld [vmem:[#allocation2 + $0x34] sm:$0x1]  ;;  %v2946_v10 = vld [vmem:[#allocation2 + $0x40] sm:$0xe] }
 0x388   : > { %v2985_v19 = vsel %vm8313_vm15, %v7753_v61, %v2984_v63  ;;  %v2272_v20 = vrot.slane %v2270_v15, 5  ;;  %v2264_v35 = vrot.slane %v2262_v17, 5  ;;  %v2554_v1 = vrot.slane %v2552_v62, 5  ;;  %v2945_v61 = vld [vmem:[#allocation2 + $0x3c] sm:$0x1] }
 0x389   : > { %v2844_v60 = vrot.slane %v2842_v36, 5  ;;  %v2259_v0 = vor.u32 %v2258_v40, %v2255_v39  ;;  %v2550_v24 = vrot.slane %v2549_v59, 4  ;;  %v2594_v7 = vshll.u32 %v2485_v22, 16  ;;  %v2948_v59 = vld [vmem:[#allocation2 + $0x48] sm:$0xe] }
 0x38a   : > { %v2884_v31 = vshll.u32 %v2787_v25, 16  ;;  %v2882_v40 = vrot.slane %v2881_v26, 4  ;;  %v2563_v41 = vor.u32 %v2562_v28, %v2559_v27  ;;  %v2273_v42 = vor.u32 %v2272_v20, %v2269_v29 }
 0x38b   : > { %2298 = vrot.lane.b32.xlu0 %v2223_v4, %s8082_s10  ;;  %2708 = vrot.lane.b32.xlu1 %v2693_v5, %s8086_s14  ;;  %v2590_v4 = vrot.slane %v2588_v44, 5  ;;  %v8056_v5 = vld [vmem:[%s11165_s3] sm:$0xff]   ;;  %v2845_v18 = vsel %vm8160_vm13, %v2840_v58, %v2844_v60  ;;  %v2260_v21 = vrot.slane %v2259_v0, 4  ;;  %v2555_v38 = vsel %vm8160_vm13, %v2550_v24, %v2554_v1  ;;  %v2944_v58 = vld [vmem:[#allocation2 + $0x38] sm:$0xe] }
 0x38c   : > { %7966 = vmatprep.subr.bf16.mxu0 %v8056_v5  ;;  %v2596_v45 = vrot.slane %v2594_v7, 5  ;;  %v2886_v46 = vrot.slane %v2884_v31, 5  ;;  %v2566_v47 = vshll.u32 %v2481_v13, 16  ;;  %v2276_v48 = vshll.u32 %v2179_v30, 16 }
 0x38d   : > { %v2591_v23 = vor.u32 %v2590_v4, %v2587_v3  ;;  %7967 = vmatpush3.bf16.msra.mxu0 %v8056_v5  ;;  %v2265_v36 = vsel %vm8160_vm13, %v2260_v21, %v2264_v35  ;;  %v2564_v56 = vrot.slane %v2563_v41, 4  ;;  %v2274_v57 = vrot.slane %v2273_v42, 4  ;;  %v2949_v3 = vld [vmem:[#allocation2 + $0x4c] sm:$0x1] }
 0x38e   : > { %v2887_v55 = vsel %vm8160_vm13, %v2882_v40, %v2886_v46  ;;  %v2568_v63 = vrot.slane %v2566_v47, 5  ;;  %v2278_v37 = vrot.slane %v2276_v48, 5  ;;  %v2856_v0 = vshll.u32 %v2783_v52, 16 }
 0x38f   : > { %2902 = vrot.lane.b32.xlu0 %v2803_v32, %s8083_s11  ;;  %2308 = vrot.lane.b32.xlu1 %v2293_v33, %s8082_s10  ;;  %v2847_v32 = vshrl.u32 %v2782_v16, 16  ;;  %v2850_v33 = vshll.u32 %v2782_v16, 16  ;;  %v2592_v39 = vrot.slane %v2591_v23, 4  ;;  %v7754_v2 = vrot.slane %v2944_v58, 9 }
 0x390   : > { %v2569_v4 = vsel %vm8160_vm13, %v2564_v56, %v2568_v63  ;;  %v2279_v5 = vsel %vm8160_vm13, %v2274_v57, %v2278_v37  ;;  %v2988_v6 = vrot.slane %v2945_v61, 5  ;;  %v7756_v14 = vrot.slane %v2948_v59, 9 }
 0x391   : > { %v2849_v43 = vrot.slane %v2847_v32, 4  ;;  %v2852_v44 = vrot.slane %v2850_v33, 5  ;;  %v2996_v15 = vrot.slane %v2949_v3, 5  ;;  %v7755_v16 = vrot.slane %v2946_v10, 9 }
 0x392   : > { %v2989_v17 = vsel %vm8313_vm15, %v7754_v2, %v2988_v6 }
 0x393   : > { %2704 = vrot.lane.b32.xlu1 %v2685_v49, %s8086_s14  ;;  %2402 = vrot.lane.b32.xlu0 %v2385_v51, %s8079_s25  ;;  %v2597_v49 = vsel %vm8160_vm13, %v2592_v39, %v2596_v45  ;;  %v8878_v51 = vpop.permute.xlu1 %2756  ;;  %v2853_v60 = vor.u32 %v2852_v44, %v2849_v43 }
 0x395   : > { %v2854_v8 = vrot.slane %v2853_v60, 4 }
 0x397   : > { %2912 = vrot.lane.b32.xlu1 %v2873_v11, %s8083_s11  ;;  %2610 = vrot.lane.b32.xlu0 %v2583_v12, %s8078_s24  ;;  %v8890_v9 = vpop.permute.xlu1 %2916  ;;  %v2947_v11 = vld [vmem:[#allocation2 + $0x44] sm:$0x1]  ;;  %v2858_v12 = vrot.slane %v2856_v0, 5 }
 0x399   : > { %v2859_v62 = vsel %vm8160_vm13, %v2854_v8, %v2858_v12 }
 0x39b   : > { %2908 = vrot.lane.b32.xlu1 %v2845_v18, %s8083_s11  ;;  %3006 = vrot.lane.b32.xlu0 %v2985_v19, %s8085_s13  ;;  %v2992_v18 = vrot.slane %v2947_v11, 5  ;;  %v2997_v19 = vsel %vm8313_vm15, %v7756_v14, %v2996_v15 }
 0x39d   : > { %v2993_v23 = vsel %vm8313_vm15, %v7755_v16, %v2992_v18 }
 0x39f   : > { %2304 = vrot.lane.b32.xlu1 %v2265_v36, %s8082_s10  ;;  %2606 = vrot.lane.b32.xlu0 %v2555_v38, %s8078_s24 }
 0x3a3   : > { %2612 = vrot.lane.b32.xlu1 %v2597_v49, %s8078_s24  ;;  %2914 = vrot.lane.b32.xlu0 %v2887_v55, %s8083_s11 }
 0x3a7   : > { %2608 = vrot.lane.b32.xlu1 %v2569_v4, %s8078_s24  ;;  %2306 = vrot.lane.b32.xlu0 %v2279_v5, %s8082_s10 }
 0x3ab   : > { %3008 = vrot.lane.b32.xlu1 %v2989_v17, %s8085_s13  ;;  %2910 = vrot.lane.b32.xlu0 %v2859_v62, %s8083_s11 }
 0x3ac   : > { %v2745_v21 = vpop.permute.xlu1 %2744 }
 0x3ad   : > { %v8900_v22 = vpop.permute.xlu0 %2442 }
 0x3af   : > { %3012 = vrot.lane.b32.xlu1 %v2997_v19, %s8085_s13  ;;  %3010 = vrot.lane.b32.xlu0 %v2993_v23, %s8085_s13 }
 0x3b1   : > { %v2397_v24 = vpop.permute.xlu1 %2396  ;;  %v2439_v25 = vpop.permute.xlu0 %2438 }
 0x3b2   : > { %2462 = vst.msk [vmem:[#allocation4] sm:$0xf] %vm1261_vm7, %v2439_v25 }
 0x3b5   : > { %v3001_v26 = vpop.permute.xlu1 %3000  ;;  %v8907_v27 = vpop.permute.xlu0 %2698 }
 0x3b9   : > { %v2445_v28 = vpop.permute.xlu1 %2444  ;;  %v8909_v29 = vpop.permute.xlu0 %2746 }
 0x3bd   : > { %v2393_v20 = vpop.permute.xlu1 %2392  ;;  %v2695_v32 = vpop.permute.xlu0 %2694 }
 0x3c1   : > { %v2441_v33 = vpop.permute.xlu1 %2440  ;;  %v2743_v35 = vpop.permute.xlu0 %2742 }
 0x3c5   : > { %v2701_v1 = vpop.permute.xlu1 %2700  ;;  %v8911_v7 = vpop.permute.xlu0 %3002 }
 0x3c9   : > { %v2399_v31 = vpop.permute.xlu0 %2398  ;;  %v8913_v36 = vpop.permute.xlu1 %2752 }
 0x3cd   : > { %v2301_v38 = vpop.permute.xlu1 %2300  ;;  %v8915_v39 = vpop.permute.xlu0 %2450 }
 0x3ce   : > { %2321 = vst.msk [vmem:[#allocation4 + $0xc] sm:$0xf] %vm1112_vm1, %v2301_v38 }
 0x3cf   : > { %2417 = vst.msk [vmem:[#allocation4 + $0xc] sm:$0xf] %vm1212_vm2, %v2397_v24 }
 0x3d0   : > { %2465 = vst.msk [vmem:[#allocation4 + $0xc] sm:$0xf] %vm1261_vm7, %v2445_v28  ;;  %v3359_v28 = vld [vmem:[#allocation2 + $0x4] sm:$0x1] }
 0x3d1   : > { %v2697_v40 = vpop.permute.xlu1 %2696  ;;  %v2395_v13 = vpop.permute.xlu0 %2394 }
 0x3d5   : > { %v2905_v30 = vpop.permute.xlu1 %2904  ;;  %v2603_v41 = vpop.permute.xlu0 %2602 }
 0x3d9   : > { %v2999_v42 = vpop.permute.xlu0 %2998  ;;  %v2749_v43 = vpop.permute.xlu1 %2748 }
 0x3dd   : > { %v2297_v44 = vpop.permute.xlu1 %2296  ;;  %v2447_v45 = vpop.permute.xlu0 %2446 }
 0x3de   : > { %2319 = vst.msk [vmem:[#allocation4 + $0x4] sm:$0xf] %vm1112_vm1, %v2297_v44 }
 0x3df   : > { %2415 = vst.msk [vmem:[#allocation4 + $0x4] sm:$0xf] %vm1212_vm2, %v2393_v20 }
 0x3e0   : > { %2463 = vst.msk [vmem:[#allocation4 + $0x4] sm:$0xf] %vm1261_vm7, %v2441_v33  ;;  %v5359_v33 = vld [vmem:[#allocation2 + $0x48] sm:$0xf] }
 0x3e1   : > { %v2405_v46 = vpop.permute.xlu1 %2404  ;;  %v2599_v47 = vpop.permute.xlu0 %2598 }
 0x3e2   : > { %2622 = vst.msk [vmem:[#allocation4] sm:$0xf] %vm1422_vm8, %v2599_v47 }
 0x3e3   : > { %2718 = vst.msk [vmem:[#allocation4] sm:$0xf] %vm1519_vm9, %v2695_v32  ;;  %v3384_v32 = vshll.u32 %v3359_v28, 16 }
 0x3e4   : > { %2766 = vst.msk [vmem:[#allocation4] sm:$0xf] %vm1569_vm11, %v2743_v35  ;;  %v5360_v35 = vld [vmem:[#allocation2 + $0x4c] sm:$0x1] }
 0x3e5   : > { %v8926_v48 = vpop.permute.xlu0 %2706  ;;  %v2453_v49 = vpop.permute.xlu1 %2452  ;;  %v5469_v38 = vshll.u32 %v5360_v35, 16  ;;  %v3312_v35 = vld [vmem:[#allocation2 + $0x20] sm:$0xf] }
 0x3e7   : > { %v5471_v44 = vrot.slane %v5469_v38, 5 }
 0x3e9   : > { %v8928_v52 = vpop.permute.xlu0 %2754  ;;  %v2605_v55 = vpop.permute.xlu1 %2604 }
 0x3ea   : > { %2625 = vst.msk [vmem:[#allocation4 + $0xc] sm:$0xf] %vm1422_vm8, %v2605_v55 }
 0x3eb   : > { %2721 = vst.msk [vmem:[#allocation4 + $0xc] sm:$0xf] %vm1519_vm9, %v2701_v1  ;;  %v5460_v1 = vshrl.u32 %v5359_v33, 16 }
 0x3ec   : > { %2769 = vst.msk [vmem:[#allocation4 + $0xc] sm:$0xf] %vm1569_vm11, %v2749_v43 }
 0x3ed   : > { %v2907_v56 = vpop.permute.xlu0 %2906  ;;  %v3005_v57 = vpop.permute.xlu1 %3004 }
 0x3f1   : > { %v2303_v58 = vpop.permute.xlu0 %2302  ;;  %v2401_v60 = vpop.permute.xlu1 %2400 }
 0x3f2   : > { %2322 = vst.msk [vmem:[#allocation4 + $0x10] sm:$0xf] %vm1112_vm1, %v2303_v58 }
 0x3f3   : > { %2418 = vst.msk [vmem:[#allocation4 + $0x10] sm:$0xf] %vm1212_vm2, %v2399_v31 }
 0x3f4   : > { %2466 = vst.msk [vmem:[#allocation4 + $0x10] sm:$0xf] %vm1261_vm7, %v2447_v45 }
 0x3f5   : > { %v2703_v61 = vpop.permute.xlu0 %2702  ;;  %v2449_v63 = vpop.permute.xlu1 %2448 }
 0x3f9   : > { %v2751_v37 = vpop.permute.xlu0 %2750  ;;  %v2601_v0 = vpop.permute.xlu1 %2600 }
 0x3fa   : > { %2623 = vst.msk [vmem:[#allocation4 + $0x4] sm:$0xf] %vm1422_vm8, %v2601_v0 }
 0x3fb   : > { %2719 = vst.msk [vmem:[#allocation4 + $0x4] sm:$0xf] %vm1519_vm9, %v2697_v40 }
 0x3fc   : > { %2767 = vst.msk [vmem:[#allocation4 + $0x4] sm:$0xf] %vm1569_vm11, %v2745_v21 }
 0x3fd   : > { %2927 = vst.msk [vmem:[#allocation4 + $0x4] sm:$0xf] %vm1730_vm12, %v2905_v30  ;;  %v2299_v2 = vpop.permute.xlu0 %2298  ;;  %v2709_v59 = vpop.permute.xlu1 %2708  ;;  %v3519_v30 = vld [vmem:[#allocation2 + $0x4] sm:$0x1] }
 0x3fe   : > { %3023 = vst.msk [vmem:[#allocation4 + $0x4] sm:$0xf] %vm1827_vm14, %v3001_v26  ;;  %v5304_v26 = vld [vmem:[#allocation2 + $0x48] sm:$0xf]  ;;  %v3552_v47 = vrot.slane %v3519_v30, 5 }
 0x3ff   : > { %2320 = vst.msk [vmem:[#allocation4 + $0x8] sm:$0xf] %vm1112_vm1, %v2299_v2  ;;  %5327 = vrot.lane.b32.xlu1 %v5304_v26, %s8084_s12 }
 0x400   : > { %2416 = vst.msk [vmem:[#allocation4 + $0x8] sm:$0xf] %vm1212_vm2, %v2395_v13  ;;  %v3518_v13 = vld [vmem:[#allocation2] sm:$0xe] }
 0x401   : > { %2464 = vst.msk [vmem:[#allocation4 + $0x8] sm:$0xf] %vm1261_vm7, %v8900_v22  ;;  %v2903_v3 = vpop.permute.xlu0 %2902  ;;  %v2309_v4 = vpop.permute.xlu1 %2308 }
 0x402   : > { %2624 = vst.msk [vmem:[#allocation4 + $0x8] sm:$0xf] %vm1422_vm8, %v2603_v41 }
 0x403   : > { %2720 = vst.msk [vmem:[#allocation4 + $0x8] sm:$0xf] %vm1519_vm9, %v8907_v27  ;;  %v3358_v27 = vld [vmem:[#allocation2] sm:$0xf] }
 0x404   : > { %2926 = vst.msk [vmem:[#allocation4] sm:$0xf] %vm1730_vm12, %v2903_v3  ;;  %v3378_v20 = vshll.u32 %v3358_v27, 16 }
 0x405   : > { %2325 = vst.msk [vmem:[#allocation4 + $0x1c] sm:$0xf] %vm1112_vm1, %v2309_v4  ;;  %v2705_v5 = vpop.permute.xlu1 %2704  ;;  %v2403_v6 = vpop.permute.xlu0 %2402 }
 0x406   : > { %2768 = vst.msk [vmem:[#allocation4 + $0x8] sm:$0xf] %vm1569_vm11, %v8909_v29  ;;  %v3375_v29 = vshrl.u32 %v3358_v27, 16 }
 0x407   : > { %3022 = vst.msk [vmem:[#allocation4] sm:$0xf] %vm1827_vm14, %v2999_v42  ;;  %v3386_v42 = vrot.slane %v3384_v32, 5 }
 0x408   : > { %2421 = vst.msk [vmem:[#allocation4 + $0x1c] sm:$0xf] %vm1212_vm2, %v2405_v46  ;;  %v3377_v31 = vrot.slane %v3375_v29, 4  ;;  %v7778_v46 = vrot.slane %v3518_v13, 9  ;;  %v3303_v13 = vld [vmem:[#allocation2 + $0x14] sm:$0x1] }
 0x409   : > { %2928 = vst.msk [vmem:[#allocation4 + $0x8] sm:$0xf] %vm1730_vm12, %v2907_v56  ;;  %v2913_v8 = vpop.permute.xlu1 %2912  ;;  %v2611_v10 = vpop.permute.xlu0 %2610  ;;  %v3342_v56 = vld [vmem:[#allocation2] sm:$0xf] }
 0x40a   : > { %2469 = vst.msk [vmem:[#allocation4 + $0x1c] sm:$0xf] %vm1261_vm7, %v2453_v49  ;;  %v3553_v55 = vsel %vm8313_vm15, %v7778_v46, %v3552_v47 }
 0x40b   : > { %3024 = vst.msk [vmem:[#allocation4 + $0x8] sm:$0xf] %vm1827_vm14, %v8911_v7  ;;  %v5463_v7 = vshll.u32 %v5359_v33, 16 }
 0x40c   : > { %3350 = vst.msk [vmem:[#allocation5] sm:$0xf] %vm747_vm10, %v3342_v56 }
 0x40d   : > { %v2909_v12 = vpop.permute.xlu1 %2908  ;;  %v3007_v14 = vpop.permute.xlu0 %3006  ;;  %v5465_v40 = vrot.slane %v5463_v7, 5 }
 0x40e   : > { %v8054_v11 = vld [vmem:[#allocation4] sm:$0xff]   ;;  %2929 = vst.msk [vmem:[#allocation4 + $0xc] sm:$0xf] %vm1730_vm12, %v2909_v12 }
 0x40f   : > { %7968 = vmatprep.mubr.msk.bf16.mxu0 %vm1900_vm3, %v8054_v11  ;;  %3025 = vst.msk [vmem:[#allocation4 + $0xc] sm:$0xf] %vm1827_vm14, %v3005_v57 }
 0x411   : > { %v2305_v15 = vpop.permute.xlu1 %2304  ;;  %v2607_v17 = vpop.permute.xlu0 %2606 }
 0x412   : > { %2323 = vst.msk [vmem:[#allocation4 + $0x14] sm:$0xf] %vm1112_vm1, %v2305_v15 }
 0x413   : > { %2626 = vst.msk [vmem:[#allocation4 + $0x10] sm:$0xf] %vm1422_vm8, %v2607_v17 }
 0x414   : > { %2419 = vst.msk [vmem:[#allocation4 + $0x14] sm:$0xf] %vm1212_vm2, %v2401_v60 }
 0x415   : > { %2722 = vst.msk [vmem:[#allocation4 + $0x10] sm:$0xf] %vm1519_vm9, %v2703_v61  ;;  %v2613_v62 = vpop.permute.xlu1 %2612  ;;  %v2915_v16 = vpop.permute.xlu0 %2914 }
 0x416   : > { %2467 = vst.msk [vmem:[#allocation4 + $0x14] sm:$0xf] %vm1261_vm7, %v2449_v63  ;;  %v8057_v18 = vld [vmem:[#allocation4 + $0x8] sm:$0xff]  }
 0x417   : > { %2770 = vst.msk [vmem:[#allocation4 + $0x10] sm:$0xf] %vm1569_vm11, %v2751_v37  ;;  %7969 = vmatmul.mubr.msk.bf16.vlgmr.msra.gmra.mxu0 %vm1900_vm3, %v8057_v18 }
 0x418   : > { %2629 = vst.msk [vmem:[#allocation4 + $0x1c] sm:$0xf] %vm1422_vm8, %v2613_v62  ;;  %v3306_v62 = vld [vmem:[#allocation2 + $0x18] sm:$0xf] }
 0x419   : > { %2725 = vst.msk [vmem:[#allocation4 + $0x1c] sm:$0xf] %vm1519_vm9, %v2709_v59  ;;  %v2609_v19 = vpop.permute.xlu1 %2608  ;;  %v2307_v21 = vpop.permute.xlu0 %2306 }
 0x41a   : > { %2773 = vst.msk [vmem:[#allocation4 + $0x1c] sm:$0xf] %vm1569_vm11, %v8878_v51 }
 0x41b   : > { %2933 = vst.msk [vmem:[#allocation4 + $0x1c] sm:$0xf] %vm1730_vm12, %v8890_v9 }
 0x41c   : > { %2627 = vst.msk [vmem:[#allocation4 + $0x14] sm:$0xf] %vm1422_vm8, %v2609_v19 }
 0x41d   : > { %2324 = vst.msk [vmem:[#allocation4 + $0x18] sm:$0xf] %vm1112_vm1, %v2307_v21  ;;  %v3009_v51 = vpop.permute.xlu1 %3008  ;;  %v2911_v9 = vpop.permute.xlu0 %2910 }
 0x41e   : > { %2723 = vst.msk [vmem:[#allocation4 + $0x14] sm:$0xf] %vm1519_vm9, %v2705_v5 }
 0x41f   : > { %2420 = vst.msk [vmem:[#allocation4 + $0x18] sm:$0xf] %vm1212_vm2, %v2403_v6 }
 0x420   : > { %2771 = vst.msk [vmem:[#allocation4 + $0x14] sm:$0xf] %vm1569_vm11, %v8913_v36  ;;  %v3380_v36 = vrot.slane %v3378_v20, 5 }
 0x421   : > { %2468 = vst.msk [vmem:[#allocation4 + $0x18] sm:$0xf] %vm1261_vm7, %v8915_v39  ;;  %v3013_v22 = vpop.permute.xlu1 %3012  ;;  %v3011_v23 = vpop.permute.xlu0 %3010  ;;  %v5462_v39 = vrot.slane %v5460_v1, 4  ;;  %v3315_v1 = vld [vmem:[#allocation2 + $0x24] sm:$0x1] }
 0x422   : > { %2628 = vst.msk [vmem:[#allocation4 + $0x18] sm:$0xf] %vm1422_vm8, %v2611_v10  ;;  %v3381_v41 = vor.u32 %v3380_v36, %v3377_v31 }
 0x423   : > { %2931 = vst.msk [vmem:[#allocation4 + $0x14] sm:$0xf] %vm1730_vm12, %v2913_v8  ;;  %2930 = vst.msk [vmem:[#allocation4 + $0x10] sm:$0xf] %vm1730_vm12, %v2911_v9  ;;  %v5466_v43 = vor.u32 %v5465_v40, %v5462_v39  ;;  %v3300_v40 = vld [vmem:[#allocation2 + $0x10] sm:$0xf] }
 0x424   : > { %2724 = vst.msk [vmem:[#allocation4 + $0x18] sm:$0xf] %vm1519_vm9, %v8926_v48  ;;  %v3382_v45 = vrot.slane %v3381_v41, 4 }
 0x425   : > { %3027 = vst.msk [vmem:[#allocation4 + $0x14] sm:$0xf] %vm1827_vm14, %v3009_v51  ;;  %3026 = vst.msk [vmem:[#allocation4 + $0x10] sm:$0xf] %vm1827_vm14, %v3007_v14  ;;  %v5467_v48 = vrot.slane %v5466_v43, 4 }
 0x426   : > { %2772 = vst.msk [vmem:[#allocation4 + $0x18] sm:$0xf] %vm1569_vm11, %v8928_v52  ;;  %v3387_v49 = vsel %vm8160_vm13, %v3382_v45, %v3386_v42 }
 0x427   : > { %2932 = vst.msk [vmem:[#allocation4 + $0x18] sm:$0xf] %vm1730_vm12, %v2915_v16  ;;  %3486 = vrot.lane.b32.xlu0 %v3387_v49, %s8082_s10  ;;  %v5472_v52 = vsel %vm8160_vm13, %v5467_v48, %v5471_v44  ;;  %v3309_v16 = vld [vmem:[#allocation2 + $0x1c] sm:$0x1] }
 0x428   : > { %3029 = vst.msk [vmem:[#allocation4 + $0x1c] sm:$0xf] %vm1827_vm14, %v3013_v22  ;;  %3028 = vst.msk [vmem:[#allocation4 + $0x18] sm:$0xf] %vm1827_vm14, %v3011_v23  ;;  %5487 = vrot.lane.b32.xlu1 %v5472_v52, %s8078_s24  ;;  %v3294_v22 = vld [vmem:[#allocation2 + $0x8] sm:$0xf] }
 0x429   : > { %v3297_v23 = vld [vmem:[#allocation2 + $0xc] sm:$0x1] }
 0x42b   : > { %3582 = vrot.lane.b32.xlu0 %v3553_v55, %s8079_s25 }
 0x42c   : > { %v8058_v24 = vld [vmem:[#allocation4 + $0x10] sm:$0xff]  }
 0x42d   : > { %7972 = vmatprep.mubr.msk.bf16.mxu0 %vm1900_vm3, %v8058_v24 }
 0x42f   : > { %v8059_v25 = vld [vmem:[#allocation4 + $0x18] sm:$0xff]  }
 0x430   : > { %7973 = vmatmul.mubr.msk.bf16.gmra.mxu0 %vm1900_vm3, %v8059_v25 }
 0x499   : > { %v3487_v7 = vpop.permute.xlu0 %3486 }
 0x49a   : > { %3510 = vst.msk [vmem:[#allocation5] sm:$0xf] %vm1112_vm1, %v3487_v7 }
 0x49d   : > { %v3583_v46 = vpop.permute.xlu0 %3582 }
 0x49e   : > { %3606 = vst.msk [vmem:[#allocation5] sm:$0xf] %vm1212_vm2, %v3583_v46 }
 0x4d7   : > { %v7970_v57 = vpop.f32.mrf.mxu0 }
 0x4d8   : > { %v3176_v58 = vmax.f32 %v7970_v57, 0.0 }
 0x4d9   : > { %v3143_v60 = vpop.f32.mrf.mxu0 }
 0x4da   : > { %v7878_v61 = vpack.c.bf16 %v3176_v58, %v3176_v58  ;;  %v3174_v63 = vmax.f32 %v3143_v60, 0.0 }
 0x4db   : > { %v7971_v37 = vpop.f32.mrf.mxu0 }
 0x4dc   : > { %v3231_v0 = vshrl.u32 %v7878_v61, 16  ;;  %v7876_v2 = vpack.c.bf16 %v3174_v63, %v3174_v63  ;;  %v3177_v59 = vmax.f32 %v7971_v37, 0.0  ;;  %v3234_v5 = vshll.u32 %v7878_v61, 16 }
 0x4dd   : > { %v3146_v3 = vpop.f32.mrf.mxu0 }
 0x4de   : > { %v3233_v4 = vrot.slane %v3231_v0, 7  ;;  %v3215_v6 = vshrl.u32 %v7876_v2, 16  ;;  %v7879_v8 = vpack.c.bf16 %v3177_v59, %v3177_v59  ;;  %v3218_v10 = vshll.u32 %v7876_v2, 16 }
 0x4df   : > { %v3175_v11 = vmax.f32 %v3146_v3, 0.0 }
 0x4e0   : > { %v3236_v12 = vor.u32 %v3234_v5, %v3233_v4  ;;  %v3237_v14 = vrot.slane %v3233_v4, 4  ;;  %v3217_v15 = vrot.slane %v3215_v6, 7  ;;  %v3239_v17 = vshrl.u32 %v7879_v8, 16 }
 0x4e1   : > { %v7877_v18 = vpack.c.bf16 %v3175_v11, %v3175_v11  ;;  %v3242_v25 = vshll.u32 %v7879_v8, 16 }
 0x4e2   : > { %v3307_v19 = vsel %vm8327_vm5, %v3236_v12, %v3306_v62  ;;  %v3310_v21 = vsel %vm8332_vm6, %v3237_v14, %v3309_v16  ;;  %v3220_v51 = vor.u32 %v3218_v10, %v3217_v15  ;;  %v3221_v9 = vrot.slane %v3217_v15, 4 }
 0x4e3   : > { %3308 = vst [vmem:[#allocation2 + $0x18] sm:$0xf] %v3307_v19  ;;  %3311 = vst [vmem:[#allocation2 + $0x1c] sm:$0x1] %v3310_v21  ;;  %v3241_v24 = vrot.slane %v3239_v17, 7  ;;  %v3223_v26 = vshrl.u32 %v7877_v18, 16 }
 0x4e4   : > { %v3295_v27 = vsel %vm8327_vm5, %v3220_v51, %v3294_v22  ;;  %v3298_v28 = vsel %vm8332_vm6, %v3221_v9, %v3297_v23  ;;  %v3226_v33 = vshll.u32 %v7877_v18, 16  ;;  %v3330_v51 = vld [vmem:[#allocation2 + $0x38] sm:$0xf] }
 0x4e5   : > { %3296 = vst [vmem:[#allocation2 + $0x8] sm:$0xf] %v3295_v27  ;;  %3299 = vst [vmem:[#allocation2 + $0xc] sm:$0x1] %v3298_v28  ;;  %v3244_v29 = vor.u32 %v3242_v25, %v3241_v24  ;;  %v3245_v20 = vrot.slane %v3241_v24, 4  ;;  %v3225_v32 = vrot.slane %v3223_v26, 7 }
 0x4e6   : > { %v3333_v27 = vld [vmem:[#allocation2 + $0x3c] sm:$0x1] }
 0x4e7   : > { %v3313_v31 = vsel %vm8327_vm5, %v3244_v29, %v3312_v35  ;;  %v3316_v36 = vsel %vm8332_vm6, %v3245_v20, %v3315_v1  ;;  %v3228_v38 = vor.u32 %v3226_v33, %v3225_v32  ;;  %v3229_v39 = vrot.slane %v3225_v32, 4  ;;  %v3318_v20 = vld [vmem:[#allocation2 + $0x28] sm:$0xf]  ;;  %v3321_v32 = vld [vmem:[#allocation2 + $0x2c] sm:$0x1] }
 0x4e8   : > { %3314 = vst [vmem:[#allocation2 + $0x20] sm:$0xf] %v3313_v31  ;;  %3317 = vst [vmem:[#allocation2 + $0x24] sm:$0x1] %v3316_v36 }
 0x4e9   : > { %v3301_v30 = vsel %vm8327_vm5, %v3228_v38, %v3300_v40  ;;  %v3304_v41 = vsel %vm8332_vm6, %v3229_v39, %v3303_v13 }
 0x4ea   : > { %3302 = vst [vmem:[#allocation2 + $0x10] sm:$0xf] %v3301_v30  ;;  %3305 = vst [vmem:[#allocation2 + $0x14] sm:$0x1] %v3304_v41  ;;  %v5298_v43 = vld [vmem:[#allocation2 + $0x18] sm:$0xf] }
 0x4eb   : > { %v3616_v44 = vld [vmem:[#allocation2 + $0x18] sm:$0xf]  ;;  %5315 = vrot.lane.b32.xlu1 %v5298_v43, %s8084_s12  ;;  %v3525_v48 = vld [vmem:[#allocation2 + $0x1c] sm:$0x1] }
 0x4ec   : > { %v3524_v45 = vld [vmem:[#allocation2 + $0x18] sm:$0xe]  ;;  %3634 = vrot.lane.b32.xlu0 %v3616_v44, %s8084_s12  ;;  %v3564_v56 = vrot.slane %v3525_v48, 5  ;;  %v3827_v57 = vld [vmem:[#allocation2 + $0x1c] sm:$0x1] }
 0x4ed   : > { %v7781_v49 = vrot.slane %v3524_v45, 9  ;;  %v3826_v52 = vld [vmem:[#allocation2 + $0x18] sm:$0xe]  ;;  %v3864_v63 = vrot.slane %v3827_v57, 5  ;;  %v5206_v0 = vld [vmem:[#allocation2 + $0x1c] sm:$0x1] }
 0x4ee   : > { %v7788_v58 = vrot.slane %v3826_v52, 9  ;;  %v5205_v37 = vld [vmem:[#allocation2 + $0x18] sm:$0xe]  ;;  %v3614_v3 = vld [vmem:[#allocation2 + $0x8] sm:$0xf]  ;;  %v5243_v5 = vrot.slane %v5206_v0, 5 }
 0x4ef   : > { %v3565_v59 = vsel %vm8313_vm15, %v7781_v49, %v3564_v56  ;;  %v7807_v4 = vrot.slane %v5205_v37, 9  ;;  %v3520_v11 = vld [vmem:[#allocation2 + $0x8] sm:$0xe]  ;;  %v3521_v15 = vld [vmem:[#allocation2 + $0xc] sm:$0x1] }
 0x4f0   : > { %v7974_v42 = vpop.f32.mrf.mxu0  ;;  %3588 = vrot.lane.b32.xlu1 %v3565_v59, %s8079_s25  ;;  %3630 = vrot.lane.b32.xlu0 %v3614_v3, %s8084_s12  ;;  %v3865_v18 = vsel %vm8313_vm15, %v7788_v58, %v3864_v63  ;;  %v5201_v19 = vld [vmem:[#allocation2 + $0x8] sm:$0xe]  ;;  %v5202_v21 = vld [vmem:[#allocation2 + $0xc] sm:$0x1]  ;;  %v7779_v24 = vrot.slane %v3520_v11, 9  ;;  %v3556_v1 = vrot.slane %v3521_v15, 5 }
 0x4f1   : > { %v3180_v47 = vmax.f32 %v7974_v42, 0.0  ;;  %v5244_v23 = vsel %vm8313_vm15, %v7807_v4, %v5243_v5  ;;  %v3617_v35 = vld [vmem:[#allocation2 + $0x20] sm:$0xf]  ;;  %v7805_v7 = vrot.slane %v5201_v19, 9  ;;  %v5235_v31 = vrot.slane %v5202_v21, 5 }
 0x4f2   : > { %v3159_v55 = vpop.f32.mrf.mxu0  ;;  %v5299_v13 = vld [vmem:[#allocation2 + $0x20] sm:$0xf]  ;;  %v3822_v30 = vld [vmem:[#allocation2 + $0x8] sm:$0xe]  ;;  %v3823_v44 = vld [vmem:[#allocation2 + $0xc] sm:$0x1]  ;;  %v3557_v57 = vsel %vm8313_vm15, %v7779_v24, %v3556_v1 }
 0x4f3   : > { %v7882_v60 = vpack.c.bf16 %v3180_v47, %v3180_v47  ;;  %v3178_v61 = vmax.f32 %v3159_v55, 0.0  ;;  %v3336_v47 = vld [vmem:[#allocation2 + $0x40] sm:$0xf]  ;;  %v3339_v52 = vld [vmem:[#allocation2 + $0x44] sm:$0x1]  ;;  %v5236_v58 = vsel %vm8313_vm15, %v7805_v7, %v5235_v31 }
 0x4f4   : > { %v7975_v2 = vpop.f32.mrf.mxu0  ;;  %3890 = vrot.lane.b32.xlu1 %v3865_v18, %s8086_s14  ;;  %5269 = vrot.lane.b32.xlu0 %v5244_v23, %s8079_s25  ;;  %v3526_v63 = vld [vmem:[#allocation2 + $0x20] sm:$0xe]  ;;  %v3527_v37 = vld [vmem:[#allocation2 + $0x24] sm:$0x1]  ;;  %v3324_v4 = vld [vmem:[#allocation2 + $0x30] sm:$0xf] }
 0x4f5   : > { %v3263_v6 = vshrl.u32 %v7882_v60, 16  ;;  %v7880_v8 = vpack.c.bf16 %v3178_v61, %v3178_v61  ;;  %v3181_v10 = vmax.f32 %v7975_v2, 0.0  ;;  %v3266_v12 = vshll.u32 %v7882_v60, 16  ;;  %v3327_v5 = vld [vmem:[#allocation2 + $0x34] sm:$0x1] }
 0x4f6   : > { %v3162_v14 = vpop.f32.mrf.mxu0  ;;  %v7786_v60 = vrot.slane %v3822_v30, 9  ;;  %v3856_v61 = vrot.slane %v3823_v44, 5  ;;  %v7782_v11 = vrot.slane %v3526_v63, 9  ;;  %v5207_v15 = vld [vmem:[#allocation2 + $0x20] sm:$0xe] }
 0x4f7   : > { %v3265_v17 = vrot.slane %v3263_v6, 7  ;;  %v3247_v62 = vshrl.u32 %v7880_v8, 16  ;;  %v7883_v16 = vpack.c.bf16 %v3181_v10, %v3181_v10  ;;  %v3250_v9 = vshll.u32 %v7880_v8, 16  ;;  %v3364_v6 = vld [vmem:[#allocation2 + $0x18] sm:$0xf] }
 0x4f8   : > { %v3179_v22 = vmax.f32 %v3162_v14, 0.0  ;;  %3636 = vrot.lane.b32.xlu1 %v3617_v35, %s8084_s12  ;;  %5317 = vrot.lane.b32.xlu0 %v5299_v13, %s8084_s12  ;;  %v5297_v14 = vld [vmem:[#allocation2 + $0x10] sm:$0xf]  ;;  %v3420_v18 = vshll.u32 %v3364_v6, 16  ;;  %v3666_v19 = vld [vmem:[#allocation2 + $0x18] sm:$0xf] }
 0x4f9   : > { %v3268_v25 = vor.u32 %v3266_v12, %v3265_v17  ;;  %v3269_v26 = vrot.slane %v3265_v17, 4  ;;  %v3249_v28 = vrot.slane %v3247_v62, 7  ;;  %v3271_v29 = vshrl.u32 %v7883_v16, 16  ;;  %v5208_v62 = vld [vmem:[#allocation2 + $0x24] sm:$0x1] }
 0x4fa   : > { %v7881_v33 = vpack.c.bf16 %v3179_v22, %v3179_v22  ;;  %v3274_v42 = vshll.u32 %v7883_v16, 16  ;;  %v3568_v12 = vrot.slane %v3527_v37, 5  ;;  %v3857_v17 = vsel %vm8313_vm15, %v7786_v60, %v3856_v61  ;;  %v3828_v50 = vld [vmem:[#allocation2 + $0x20] sm:$0xe]  ;;  %v3829_v53 = vld [vmem:[#allocation2 + $0x24] sm:$0x1] }
 0x4fb   : > { %v3331_v36 = vsel %vm8327_vm5, %v3268_v25, %v3330_v51  ;;  %v3334_v38 = vsel %vm8332_vm6, %v3269_v26, %v3333_v27  ;;  %v3252_v39 = vor.u32 %v3250_v9, %v3249_v28  ;;  %v3253_v40 = vrot.slane %v3249_v28, 4  ;;  %v3615_v51 = vld [vmem:[#allocation2 + $0x10] sm:$0xf]  ;;  %v3667_v44 = vld [vmem:[#allocation2 + $0x1c] sm:$0x1] }
 0x4fc   : > { %3332 = vst [vmem:[#allocation2 + $0x38] sm:$0xf] %v3331_v36  ;;  %3335 = vst [vmem:[#allocation2 + $0x3c] sm:$0x1] %v3334_v38  ;;  %v3273_v41 = vrot.slane %v3271_v29, 7  ;;  %v3255_v43 = vshrl.u32 %v7881_v33, 16  ;;  %3584 = vrot.lane.b32.xlu1 %v3557_v57, %s8079_s25  ;;  %5265 = vrot.lane.b32.xlu0 %v5236_v58, %s8079_s25  ;;  %v3569_v21 = vsel %vm8313_vm15, %v7782_v11, %v3568_v12 }
 0x4fd   : > { %v3319_v45 = vsel %vm8327_vm5, %v3252_v39, %v3318_v20  ;;  %v3322_v46 = vsel %vm8332_vm6, %v3253_v40, %v3321_v32  ;;  %v3258_v56 = vshll.u32 %v7881_v33, 16  ;;  %v3417_v16 = vshrl.u32 %v3364_v6, 16  ;;  %v5347_v29 = vld [vmem:[#allocation2 + $0x18] sm:$0xf]  ;;  %v3365_v20 = vld [vmem:[#allocation2 + $0x1c] sm:$0x1] }
 0x4fe   : > { %3320 = vst [vmem:[#allocation2 + $0x28] sm:$0xf] %v3319_v45  ;;  %3323 = vst [vmem:[#allocation2 + $0x2c] sm:$0x1] %v3322_v46  ;;  %v3276_v48 = vor.u32 %v3274_v42, %v3273_v41  ;;  %v3277_v49 = vrot.slane %v3273_v41, 4  ;;  %v3257_v55 = vrot.slane %v3255_v43, 7 }
 0x4ff   : > { %v7808_v9 = vrot.slane %v5207_v15, 9  ;;  %v5247_v22 = vrot.slane %v5208_v62, 5  ;;  %v3707_v23 = vshrl.u32 %v3666_v19, 16  ;;  %v3710_v24 = vshll.u32 %v3666_v19, 16  ;;  %v3522_v32 = vld [vmem:[#allocation2 + $0x10] sm:$0xe] }
 0x500   : > { %v3337_v0 = vsel %vm8327_vm5, %v3276_v48, %v3336_v47  ;;  %v3340_v2 = vsel %vm8332_vm6, %v3277_v49, %v3339_v52  ;;  %v3260_v59 = vor.u32 %v3258_v56, %v3257_v55  ;;  %v3261_v3 = vrot.slane %v3257_v55, 4  ;;  %3886 = vrot.lane.b32.xlu1 %v3857_v17, %s8086_s14  ;;  %5313 = vrot.lane.b32.xlu0 %v5297_v14, %s8084_s12  ;;  %v3523_v39 = vld [vmem:[#allocation2 + $0x14] sm:$0x1]  ;;  %v5203_v30 = vld [vmem:[#allocation2 + $0x10] sm:$0xe] }
 0x501   : > { %3338 = vst [vmem:[#allocation2 + $0x40] sm:$0xf] %v3337_v0  ;;  %3341 = vst [vmem:[#allocation2 + $0x44] sm:$0x1] %v3340_v2  ;;  %v7789_v25 = vrot.slane %v3828_v50, 9  ;;  %v3868_v26 = vrot.slane %v3829_v53, 5  ;;  %v5248_v31 = vsel %vm8313_vm15, %v7808_v9, %v5247_v22 }
 0x502   : > { %v3325_v8 = vsel %vm8327_vm5, %v3260_v59, %v3324_v4  ;;  %v3328_v10 = vsel %vm8332_vm6, %v3261_v3, %v3327_v5  ;;  %v3419_v27 = vrot.slane %v3417_v16, 4  ;;  %v3422_v28 = vrot.slane %v3420_v18, 5  ;;  %v5045_v41 = vld [vmem:[#allocation2 + $0x18] sm:$0xf]  ;;  %v5204_v43 = vld [vmem:[#allocation2 + $0x14] sm:$0x1] }
 0x503   : > { %3326 = vst [vmem:[#allocation2 + $0x30] sm:$0xf] %v3325_v8  ;;  %3329 = vst [vmem:[#allocation2 + $0x34] sm:$0x1] %v3328_v10  ;;  %v3709_v33 = vrot.slane %v3707_v23, 4  ;;  %v3712_v35 = vrot.slane %v3710_v24, 5  ;;  %v3869_v36 = vsel %vm8313_vm15, %v7789_v25, %v3868_v26 }
 0x504   : > { %3632 = vrot.lane.b32.xlu1 %v3615_v51, %s8084_s12  ;;  %3590 = vrot.lane.b32.xlu0 %v3569_v21, %s8079_s25  ;;  %v5376_v1 = vshrl.u32 %v5347_v29, 16  ;;  %v5379_v7 = vshll.u32 %v5347_v29, 16  ;;  %v3423_v38 = vor.u32 %v3422_v28, %v3419_v27  ;;  %v3426_v40 = vshll.u32 %v3365_v20, 16  ;;  %v5302_v42 = vld [vmem:[#allocation2 + $0x38] sm:$0xf] }
 0x505   : > { %v7780_v13 = vrot.slane %v3522_v32, 9  ;;  %v3620_v45 = vld [vmem:[#allocation2 + $0x38] sm:$0xf]  ;;  %v3560_v46 = vrot.slane %v3523_v39, 5  ;;  %v3713_v47 = vor.u32 %v3712_v35, %v3709_v33  ;;  %v5086_v55 = vshrl.u32 %v5045_v41, 16 }
 0x506   : > { %v5378_v48 = vrot.slane %v5376_v1, 4  ;;  %v5381_v49 = vrot.slane %v5379_v7, 5  ;;  %v3424_v52 = vrot.slane %v3423_v38, 4  ;;  %v5089_v56 = vshll.u32 %v5045_v41, 16  ;;  %v3360_v57 = vld [vmem:[#allocation2 + $0x8] sm:$0xf] }
 0x507   : > { %v3716_v58 = vshll.u32 %v3667_v44, 16  ;;  %v3428_v60 = vrot.slane %v3426_v40, 5  ;;  %v7806_v61 = vrot.slane %v5203_v30, 9  ;;  %v5239_v63 = vrot.slane %v5204_v43, 5  ;;  %v5348_v37 = vld [vmem:[#allocation2 + $0x1c] sm:$0x1] }
 0x508   : > { %5271 = vrot.lane.b32.xlu1 %v5248_v31, %s8079_s25  ;;  %3892 = vrot.lane.b32.xlu0 %v3869_v36, %s8086_s14  ;;  %v3561_v0 = vsel %vm8313_vm15, %v7780_v13, %v3560_v46  ;;  %v3714_v2 = vrot.slane %v3713_v47, 4  ;;  %v5382_v59 = vor.u32 %v5381_v49, %v5378_v48  ;;  %v3824_v3 = vld [vmem:[#allocation2 + $0x10] sm:$0xe]  ;;  %v3389_v4 = vshrl.u32 %v3360_v57, 16  ;;  %v3825_v6 = vld [vmem:[#allocation2 + $0x14] sm:$0x1] }
 0x509   : > { %v3429_v5 = vsel %vm8160_vm13, %v3424_v52, %v3428_v60  ;;  %v5088_v8 = vrot.slane %v5086_v55, 4  ;;  %v5091_v10 = vrot.slane %v5089_v56, 5  ;;  %v3392_v11 = vshll.u32 %v3360_v57, 16  ;;  %v3662_v15 = vld [vmem:[#allocation2 + $0x8] sm:$0xf] }
 0x50a   : > { %v3718_v12 = vrot.slane %v3716_v58, 5  ;;  %v5385_v14 = vshll.u32 %v5348_v37, 16  ;;  %v5240_v17 = vsel %vm8313_vm15, %v7806_v61, %v5239_v63  ;;  %v7787_v62 = vrot.slane %v3824_v3, 9  ;;  %v5046_v50 = vld [vmem:[#allocation2 + $0x1c] sm:$0x1] }
 0x50b   : > { %v5383_v18 = vrot.slane %v5382_v59, 4  ;;  %v3860_v19 = vrot.slane %v3825_v6, 5  ;;  %v3391_v53 = vrot.slane %v3389_v4, 4  ;;  %v5092_v21 = vor.u32 %v5091_v10, %v5088_v8  ;;  %v3361_v27 = vld [vmem:[#allocation2 + $0xc] sm:$0x1] }
 0x50c   : > { %5323 = vrot.lane.b32.xlu1 %v5302_v42, %s8084_s12  ;;  %3642 = vrot.lane.b32.xlu0 %v3620_v45, %s8084_s12  ;;  %v3719_v16 = vsel %vm8160_vm13, %v3714_v2, %v3718_v12  ;;  %v3394_v51 = vrot.slane %v3392_v11, 5  ;;  %v3679_v9 = vshrl.u32 %v3662_v15, 16  ;;  %v3682_v22 = vshll.u32 %v3662_v15, 16  ;;  %v5041_v33 = vld [vmem:[#allocation2 + $0x8] sm:$0xf] }
 0x50d   : > { %v5387_v23 = vrot.slane %v5385_v14, 5  ;;  %v5095_v24 = vshll.u32 %v5046_v50, 16  ;;  %v3861_v26 = vsel %vm8313_vm15, %v7787_v62, %v3860_v19  ;;  %v5093_v28 = vrot.slane %v5092_v21, 4  ;;  %v5300_v7 = vld [vmem:[#allocation2 + $0x28] sm:$0xf] }
 0x50e   : > { %v3395_v29 = vor.u32 %v3394_v51, %v3391_v53  ;;  %v3681_v20 = vrot.slane %v3679_v9, 4  ;;  %v3684_v32 = vrot.slane %v3682_v22, 5  ;;  %v3398_v1 = vshll.u32 %v3361_v27, 16  ;;  %v3663_v31 = vld [vmem:[#allocation2 + $0xc] sm:$0x1] }
 0x50f   : > { %v5388_v25 = vsel %vm8160_vm13, %v5383_v18, %v5387_v23  ;;  %v5097_v35 = vrot.slane %v5095_v24, 5  ;;  %v5058_v36 = vshrl.u32 %v5041_v33, 16  ;;  %v5061_v38 = vshll.u32 %v5041_v33, 16  ;;  %v3532_v13 = vld [vmem:[#allocation2 + $0x38] sm:$0xe] }
 0x510   : > { %3492 = vrot.lane.b32.xlu1 %v3429_v5, %s8082_s10  ;;  %3586 = vrot.lane.b32.xlu0 %v3561_v0, %s8079_s25  ;;  %v3396_v40 = vrot.slane %v3395_v29, 4  ;;  %v3533_v30 = vld [vmem:[#allocation2 + $0x3c] sm:$0x1]  ;;  %v3685_v41 = vor.u32 %v3684_v32, %v3681_v20  ;;  %v3668_v42 = vld [vmem:[#allocation2 + $0x20] sm:$0xf]  ;;  %v3400_v43 = vrot.slane %v3398_v1, 5 }
 0x511   : > { %v5098_v39 = vsel %vm8160_vm13, %v5093_v28, %v5097_v35  ;;  %v3618_v44 = vld [vmem:[#allocation2 + $0x28] sm:$0xf]  ;;  %v3688_v45 = vshll.u32 %v3663_v31, 16  ;;  %v7785_v46 = vrot.slane %v3532_v13, 9  ;;  %v3580_v47 = vrot.slane %v3533_v30, 5 }
 0x512   : > { %v3834_v48 = vld [vmem:[#allocation2 + $0x38] sm:$0xe]  ;;  %v5060_v49 = vrot.slane %v5058_v36, 4  ;;  %v5063_v52 = vrot.slane %v5061_v38, 5  ;;  %v3401_v55 = vsel %vm8160_vm13, %v3396_v40, %v3400_v43  ;;  %v3686_v56 = vrot.slane %v3685_v41, 4 }
 0x513   : > { %v3721_v57 = vshrl.u32 %v3668_v42, 16  ;;  %v3724_v58 = vshll.u32 %v3668_v42, 16  ;;  %v5047_v60 = vld [vmem:[#allocation2 + $0x20] sm:$0xf]  ;;  %v3835_v61 = vld [vmem:[#allocation2 + $0x3c] sm:$0x1]  ;;  %v3581_v2 = vsel %vm8313_vm15, %v7785_v46, %v3580_v47 }
 0x514   : > { %5267 = vrot.lane.b32.xlu1 %v5240_v17, %s8079_s25  ;;  %3794 = vrot.lane.b32.xlu0 %v3719_v16, %s8078_s24  ;;  %v3690_v63 = vrot.slane %v3688_v45, 5  ;;  %v7792_v37 = vrot.slane %v3834_v48, 9  ;;  %v5042_v0 = vld [vmem:[#allocation2 + $0xc] sm:$0x1]  ;;  %v5064_v59 = vor.u32 %v5063_v52, %v5060_v49  ;;  %v3528_v3 = vld [vmem:[#allocation2 + $0x28] sm:$0xe] }
 0x515   : > { %v3529_v4 = vld [vmem:[#allocation2 + $0x2c] sm:$0x1]  ;;  %v5100_v5 = vshrl.u32 %v5047_v60, 16  ;;  %v5103_v6 = vshll.u32 %v5047_v60, 16  ;;  %v3880_v10 = vrot.slane %v3835_v61, 5  ;;  %v3723_v11 = vrot.slane %v3721_v57, 4 }
 0x516   : > { %v3691_v8 = vsel %vm8160_vm13, %v3686_v56, %v3690_v63  ;;  %v3726_v12 = vrot.slane %v3724_v58, 5  ;;  %v3366_v14 = vld [vmem:[#allocation2 + $0x20] sm:$0xf]  ;;  %v5067_v15 = vshll.u32 %v5042_v0, 16  ;;  %v7783_v17 = vrot.slane %v3528_v3, 9 }
 0x517   : > { %v3572_v62 = vrot.slane %v3529_v4, 5  ;;  %v5213_v16 = vld [vmem:[#allocation2 + $0x38] sm:$0xe]  ;;  %v5065_v18 = vrot.slane %v5064_v59, 4  ;;  %v3669_v19 = vld [vmem:[#allocation2 + $0x24] sm:$0x1]  ;;  %v3881_v51 = vsel %vm8313_vm15, %v7792_v37, %v3880_v10 }
 0x518   : > { %5475 = vrot.lane.b32.xlu1 %v5388_v25, %s8078_s24  ;;  %3888 = vrot.lane.b32.xlu0 %v3861_v26, %s8086_s14  ;;  %v5102_v50 = vrot.slane %v5100_v5, 4  ;;  %v5105_v53 = vrot.slane %v5103_v6, 5  ;;  %v3431_v21 = vshrl.u32 %v3366_v14, 16  ;;  %v3621_v9 = vld [vmem:[#allocation2 + $0x40] sm:$0xf]  ;;  %v3727_v23 = vor.u32 %v3726_v12, %v3723_v11 }
 0x519   : > { %v5214_v22 = vld [vmem:[#allocation2 + $0x3c] sm:$0x1]  ;;  %v3434_v24 = vshll.u32 %v3366_v14, 16  ;;  %v5069_v25 = vrot.slane %v5067_v15, 5  ;;  %v3664_v26 = vld [vmem:[#allocation2 + $0x10] sm:$0xf]  ;;  %v3573_v27 = vsel %vm8313_vm15, %v7783_v17, %v3572_v62 }
 0x51a   : > { %v7811_v28 = vrot.slane %v5213_v16, 9  ;;  %v3730_v29 = vshll.u32 %v3669_v19, 16  ;;  %v5259_v32 = vrot.slane %v5214_v22, 5  ;;  %v5048_v33 = vld [vmem:[#allocation2 + $0x24] sm:$0x1]  ;;  %v5106_v35 = vor.u32 %v5105_v53, %v5102_v50 }
 0x51b   : > { %v5070_v20 = vsel %vm8160_vm13, %v5065_v18, %v5069_v25  ;;  %v3433_v1 = vrot.slane %v3431_v21, 4  ;;  %v3367_v31 = vld [vmem:[#allocation2 + $0x24] sm:$0x1]  ;;  %v3436_v36 = vrot.slane %v3434_v24, 5  ;;  %v3693_v38 = vshrl.u32 %v3664_v26, 16 }
 0x51c   : > { %5173 = vrot.lane.b32.xlu0 %v5098_v39, %s8082_s10  ;;  %5319 = vrot.lane.b32.xlu1 %v5300_v7, %s8084_s12  ;;  %v3728_v7 = vrot.slane %v3727_v23, 4  ;;  %v3696_v39 = vshll.u32 %v3664_v26, 16  ;;  %v3732_v40 = vrot.slane %v3730_v29, 5  ;;  %v5109_v13 = vshll.u32 %v5048_v33, 16  ;;  %v5349_v30 = vld [vmem:[#allocation2 + $0x20] sm:$0xf] }
 0x51d   : > { %v5260_v41 = vsel %vm8313_vm15, %v7811_v28, %v5259_v32  ;;  %v5107_v42 = vrot.slane %v5106_v35, 4  ;;  %v3440_v43 = vshll.u32 %v3367_v31, 16  ;;  %v3437_v46 = vor.u32 %v3436_v36, %v3433_v1  ;;  %v3830_v47 = vld [vmem:[#allocation2 + $0x28] sm:$0xe]  ;;  %v3831_v48 = vld [vmem:[#allocation2 + $0x2c] sm:$0x1] }
 0x51e   : > { %v3733_v45 = vsel %vm8160_vm13, %v3728_v7, %v3732_v40  ;;  %v3695_v49 = vrot.slane %v3693_v38, 4  ;;  %v3698_v52 = vrot.slane %v3696_v39, 5  ;;  %v5390_v56 = vshrl.u32 %v5349_v30, 16  ;;  %v5209_v6 = vld [vmem:[#allocation2 + $0x28] sm:$0xe] }
 0x51f   : > { %v5393_v57 = vshll.u32 %v5349_v30, 16  ;;  %v5111_v58 = vrot.slane %v5109_v13, 5  ;;  %v3442_v63 = vrot.slane %v3440_v43, 5  ;;  %v7790_v37 = vrot.slane %v3830_v47, 9  ;;  %v3362_v11 = vld [vmem:[#allocation2 + $0x10] sm:$0xf] }
 0x520   : > { %3488 = vrot.lane.b32.xlu1 %v3401_v55, %s8082_s10  ;;  %3638 = vrot.lane.b32.xlu0 %v3618_v44, %s8084_s12  ;;  %v5043_v44 = vld [vmem:[#allocation2 + $0x10] sm:$0xf]  ;;  %v3665_v55 = vld [vmem:[#allocation2 + $0x14] sm:$0x1]  ;;  %v3872_v0 = vrot.slane %v3831_v48, 5  ;;  %v3438_v3 = vrot.slane %v3437_v46, 4  ;;  %v3699_v4 = vor.u32 %v3698_v52, %v3695_v49 }
 0x521   : > { %v5072_v60 = vshrl.u32 %v5043_v44, 16  ;;  %v5075_v61 = vshll.u32 %v5043_v44, 16  ;;  %v5112_v59 = vsel %vm8160_vm13, %v5107_v42, %v5111_v58  ;;  %v3702_v5 = vshll.u32 %v3665_v55, 16  ;;  %v3619_v12 = vld [vmem:[#allocation2 + $0x30] sm:$0xf] }
 0x522   : > { %v5395_v10 = vrot.slane %v5393_v57, 5  ;;  %v5210_v14 = vld [vmem:[#allocation2 + $0x2c] sm:$0x1]  ;;  %v3836_v15 = vld [vmem:[#allocation2 + $0x40] sm:$0xe]  ;;  %v3443_v50 = vsel %vm8160_vm13, %v3438_v3, %v3442_v63  ;;  %v3700_v53 = vrot.slane %v3699_v4, 4  ;;  %v3873_v1 = vsel %vm8313_vm15, %v7790_v37, %v3872_v0 }
 0x523   : > { %v5074_v17 = vrot.slane %v5072_v60, 4  ;;  %v5077_v62 = vrot.slane %v5075_v61, 5  ;;  %v3837_v16 = vld [vmem:[#allocation2 + $0x44] sm:$0x1]  ;;  %v3372_v19 = vld [vmem:[#allocation2 + $0x38] sm:$0xf] }
 0x524   : > { %3596 = vrot.lane.b32.xlu1 %v3581_v2, %s8079_s25  ;;  %3790 = vrot.lane.b32.xlu0 %v3691_v8, %s8078_s24  ;;  %v5303_v2 = vld [vmem:[#allocation2 + $0x40] sm:$0xf]  ;;  %v5392_v8 = vrot.slane %v5390_v56, 4  ;;  %v5350_v18 = vld [vmem:[#allocation2 + $0x24] sm:$0x1]  ;;  %v3704_v22 = vrot.slane %v3702_v5, 5 }
 0x525   : > { %v5044_v21 = vld [vmem:[#allocation2 + $0x14] sm:$0x1]  ;;  %v7809_v23 = vrot.slane %v5209_v6, 9  ;;  %v5251_v25 = vrot.slane %v5210_v14, 5  ;;  %v5078_v26 = vor.u32 %v5077_v62, %v5074_v17  ;;  %v3476_v28 = vshll.u32 %v3372_v19, 16 }
 0x526   : > { %v5396_v24 = vor.u32 %v5395_v10, %v5392_v8  ;;  %v7793_v29 = vrot.slane %v3836_v15, 9  ;;  %v5399_v32 = vshll.u32 %v5350_v18, 16  ;;  %v5081_v33 = vshll.u32 %v5044_v21, 16  ;;  %v3363_v35 = vld [vmem:[#allocation2 + $0x14] sm:$0x1] }
 0x527   : > { %v3705_v7 = vsel %vm8160_vm13, %v3700_v53, %v3704_v22  ;;  %v5215_v31 = vld [vmem:[#allocation2 + $0x40] sm:$0xe]  ;;  %v5345_v39 = vld [vmem:[#allocation2 + $0x10] sm:$0xf]  ;;  %v5216_v13 = vld [vmem:[#allocation2 + $0x44] sm:$0x1]  ;;  %v5252_v46 = vsel %vm8313_vm15, %v7809_v23, %v5251_v25 }
 0x528   : > { %3898 = vrot.lane.b32.xlu0 %v3881_v51, %s8086_s14  ;;  %3644 = vrot.lane.b32.xlu1 %v3621_v9, %s8084_s12  ;;  %v3403_v51 = vshrl.u32 %v3362_v11, 16  ;;  %v3406_v9 = vshll.u32 %v3362_v11, 16  ;;  %v5397_v40 = vrot.slane %v5396_v24, 4  ;;  %v3373_v30 = vld [vmem:[#allocation2 + $0x3c] sm:$0x1]  ;;  %v3412_v42 = vshll.u32 %v3363_v35, 16 }
 0x529   : > { %v3478_v44 = vrot.slane %v3476_v28, 5  ;;  %v5362_v48 = vshrl.u32 %v5345_v39, 16  ;;  %v5365_v49 = vshll.u32 %v5345_v39, 16  ;;  %v5401_v52 = vrot.slane %v5399_v32, 5  ;;  %v5355_v58 = vld [vmem:[#allocation2 + $0x38] sm:$0xf] }
 0x52a   : > { %v3405_v36 = vrot.slane %v3403_v51, 4  ;;  %v3408_v38 = vrot.slane %v3406_v9, 5  ;;  %v5083_v55 = vrot.slane %v5081_v33, 5  ;;  %v3482_v57 = vshll.u32 %v3373_v30, 16  ;;  %v8060_v60 = vld [vmem:[%s11166_s4 + $0x10] sm:$0xff]  }
 0x52b   : > { %v7812_v61 = vrot.slane %v5215_v31, 9  ;;  %v5263_v63 = vrot.slane %v5216_v13, 5  ;;  %v3674_v0 = vld [vmem:[#allocation2 + $0x38] sm:$0xf]  ;;  %v3414_v3 = vrot.slane %v3412_v42, 5  ;;  %7976 = vmatprep.subr.bf16.mxu1 %v8060_v60  ;;  %v5364_v6 = vrot.slane %v5362_v48, 4 }
 0x52c   : > { %5169 = vrot.lane.b32.xlu0 %v5070_v20, %s8082_s10  ;;  %3592 = vrot.lane.b32.xlu1 %v3573_v27, %s8079_s25  ;;  %v3473_v27 = vshrl.u32 %v3372_v19, 16  ;;  %v3884_v20 = vrot.slane %v3837_v16, 5  ;;  %v3409_v56 = vor.u32 %v3408_v38, %v3405_v36  ;;  %v9152_v5 = vld [vmem:[#allocation2 + $0x30] sm:$0xe]  ;;  %v5367_v8 = vrot.slane %v5365_v49, 5 }
 0x52d   : > { %v9154_v10 = vld [vmem:[#allocation2 + $0x34] sm:$0x1]  ;;  %v5432_v11 = vshrl.u32 %v5355_v58, 16  ;;  %7977 = vmatpush3.bf16.msra.mxu1 %v8060_v60  ;;  %v3484_v15 = vrot.slane %v3482_v57, 5  ;;  %v9156_v17 = vld [vmem:[#allocation2 + $0x30] sm:$0xe]  ;;  %v5264_v25 = vsel %vm8313_vm15, %v7812_v61, %v5263_v63 }
 0x52e   : > { %v3475_v43 = vrot.slane %v3473_v27, 4  ;;  %v3885_v47 = vsel %vm8313_vm15, %v7793_v29, %v3884_v20  ;;  %v3410_v14 = vrot.slane %v3409_v56, 4  ;;  %v3763_v62 = vshrl.u32 %v3674_v0, 16  ;;  %v5356_v53 = vld [vmem:[#allocation2 + $0x3c] sm:$0x1] }
 0x52f   : > { %v3766_v16 = vshll.u32 %v3674_v0, 16  ;;  %v7791_v19 = vrot.slane %v9152_v5, 9  ;;  %v3368_v21 = vld [vmem:[#allocation2 + $0x28] sm:$0xf]  ;;  %v5301_v51 = vld [vmem:[#allocation2 + $0x30] sm:$0xf] }
 0x530   : > { %5277 = vrot.lane.b32.xlu0 %v5260_v41, %s8079_s25  ;;  %3796 = vrot.lane.b32.xlu1 %v3733_v45, %s8078_s24  ;;  %v5079_v41 = vrot.slane %v5078_v26, 4  ;;  %v5346_v45 = vld [vmem:[#allocation2 + $0x14] sm:$0x1]  ;;  %v3479_v4 = vor.u32 %v3478_v44, %v3475_v43  ;;  %v3876_v22 = vrot.slane %v9154_v10, 5  ;;  %v9164_v23 = vld [vmem:[#allocation2 + $0x30] sm:$0xe]  ;;  %v5368_v26 = vor.u32 %v5367_v8, %v5364_v6 }
 0x531   : > { %v5371_v37 = vshll.u32 %v5346_v45, 16  ;;  %v5053_v24 = vld [vmem:[#allocation2 + $0x38] sm:$0xf]  ;;  %v9168_v27 = vld [vmem:[#allocation2 + $0x34] sm:$0x1]  ;;  %v5434_v28 = vrot.slane %v5432_v11, 4 }
 0x532   : > { %v3480_v9 = vrot.slane %v3479_v4, 4  ;;  %v3675_v20 = vld [vmem:[#allocation2 + $0x3c] sm:$0x1]  ;;  %v5441_v32 = vshll.u32 %v5356_v53, 16  ;;  %v3765_v33 = vrot.slane %v3763_v62, 4  ;;  %v3768_v35 = vrot.slane %v3766_v16, 5 }
 0x533   : > { %v5373_v18 = vrot.slane %v5371_v37, 5  ;;  %v7810_v31 = vrot.slane %v9156_v17, 9  ;;  %v3448_v36 = vshll.u32 %v3368_v21, 16  ;;  %v5142_v38 = vshrl.u32 %v5053_v24, 16  ;;  %v5351_v42 = vld [vmem:[#allocation2 + $0x28] sm:$0xf] }
 0x534   : > { %5325 = vrot.lane.b32.xlu0 %v5303_v2, %s8084_s12  ;;  %5175 = vrot.lane.b32.xlu1 %v5112_v59, %s8082_s10  ;;  %v5402_v2 = vsel %vm8160_vm13, %v5397_v40, %v5401_v52  ;;  %v5084_v59 = vsel %vm8160_vm13, %v5079_v41, %v5083_v55  ;;  %v5145_v39 = vshll.u32 %v5053_v24, 16  ;;  %v3415_v40 = vsel %vm8160_vm13, %v3410_v14, %v3414_v3  ;;  %v5054_v56 = vld [vmem:[#allocation2 + $0x3c] sm:$0x1]  ;;  %v3676_v5 = vld [vmem:[#allocation2 + $0x40] sm:$0xf]  ;;  %v8061_v6 = vld [vmem:[%s11166_s4 + $0x8] sm:$0xff]  }
 0x535   : > { %v7784_v30 = vrot.slane %v9164_v23, 9  ;;  %v3772_v41 = vshll.u32 %v3675_v20, 16  ;;  %v3485_v43 = vsel %vm8160_vm13, %v3480_v9, %v3484_v15  ;;  %v3576_v44 = vrot.slane %v9168_v27, 5  ;;  %v5049_v11 = vld [vmem:[#allocation2 + $0x28] sm:$0xf]  ;;  %7978 = vmatprep.subr.bf16.mxu1 %v8061_v6 }
 0x536   : > { %v5369_v48 = vrot.slane %v5368_v26, 4  ;;  %v9180_v49 = vrot.slane %v5441_v32, 5  ;;  %v3769_v52 = vor.u32 %v3768_v35, %v3765_v33  ;;  %v3450_v57 = vrot.slane %v3448_v36, 5  ;;  %v3343_v14 = vld [vmem:[#allocation2 + $0x8] sm:$0xf]  ;;  %7979 = vmatpush3.bf16.msra.mxu1 %v8061_v6 }
 0x537   : > { %v5147_v60 = vrot.slane %v5145_v39, 5  ;;  %v5404_v61 = vshrl.u32 %v5351_v42, 16  ;;  %v9184_v63 = vrot.slane %v3772_v41, 5  ;;  %v5407_v37 = vshll.u32 %v5351_v42, 16  ;;  %v5352_v16 = vld [vmem:[#allocation2 + $0x2c] sm:$0x1] }
 0x538   : > { %3494 = vrot.lane.b32.xlu0 %v3443_v50, %s8082_s10  ;;  %3640 = vrot.lane.b32.xlu1 %v3619_v12, %s8084_s12  ;;  %v5435_v12 = vshll.u32 %v5355_v58, 16  ;;  %v9161_v50 = vld [vmem:[#allocation2 + $0x34] sm:$0x1]  ;;  %v5144_v58 = vrot.slane %v5142_v38, 4  ;;  %v5151_v4 = vshll.u32 %v5054_v56, 16  ;;  %v5374_v8 = vsel %vm8160_vm13, %v5369_v48, %v5373_v18  ;;  %v8062_v18 = vld [vmem:[%s11166_s4] sm:$0xff]  }
 0x539   : > { %v5255_v13 = vrot.slane %v9161_v50, 5  ;;  %v3877_v10 = vsel %vm8313_vm15, %v7791_v19, %v3876_v22  ;;  %v3770_v15 = vrot.slane %v3769_v52, 4  ;;  %v5406_v50 = vrot.slane %v5404_v61, 4  ;;  %3351 = vst.msk [vmem:[#allocation5 + $0x4] sm:$0xf] %vm747_vm10, %v3343_v14  ;;  %v9204_v22 = vpop.permute.xlu1 %5327  ;;  %7980 = vmatprep.subr.bf16.mxu1 %v8062_v18 }
 0x53a   : > { %v5437_v29 = vrot.slane %v5435_v12, 5  ;;  %v3345_v12 = vld [vmem:[#allocation2 + $0x18] sm:$0xf]  ;;  %v5148_v62 = vor.u32 %v5147_v60, %v5144_v58  ;;  %v5409_v19 = vrot.slane %v5407_v37, 5  ;;  %v3671_v53 = vld [vmem:[#allocation2 + $0x2c] sm:$0x1]  ;;  %7981 = vmatpush3.bf16.msra.mxu1 %v8062_v18 }
 0x53b   : > { %3353 = vst.msk [vmem:[#allocation5 + $0xc] sm:$0xf] %vm747_vm10, %v3345_v12  ;;  %v3777_v9 = vshrl.u32 %v3676_v5, 16  ;;  %v3780_v23 = vshll.u32 %v3676_v5, 16  ;;  %v5114_v24 = vshrl.u32 %v5049_v11, 16  ;;  %v5256_v27 = vsel %vm8313_vm15, %v7810_v31, %v5255_v13 }
 0x53c   : > { %3894 = vrot.lane.b32.xlu0 %v3873_v1, %s8086_s14  ;;  %3792 = vrot.lane.b32.xlu1 %v3705_v7, %s8078_s24  ;;  %v3369_v1 = vld [vmem:[#allocation2 + $0x2c] sm:$0x1]  ;;  %v3445_v7 = vshrl.u32 %v3368_v21, 16  ;;  %v5438_v45 = vor.u32 %v5437_v29, %v5434_v28  ;;  %v3346_v26 = vld [vmem:[#allocation2 + $0x20] sm:$0xf]  ;;  %v3577_v28 = vsel %vm8313_vm15, %v7784_v30, %v3576_v44  ;;  %v5153_v29 = vrot.slane %v5151_v4, 5 }
 0x53d   : > { %v5117_v20 = vshll.u32 %v5049_v11, 16  ;;  %3354 = vst.msk [vmem:[#allocation5 + $0x10] sm:$0xf] %vm747_vm10, %v3346_v26  ;;  %v3344_v32 = vld [vmem:[#allocation2 + $0x10] sm:$0xf]  ;;  %v5413_v31 = vshll.u32 %v5352_v16, 16 }
 0x53e   : > { %v3447_v55 = vrot.slane %v3445_v7, 4  ;;  %v3349_v33 = vld [vmem:[#allocation2 + $0x38] sm:$0xf]  ;;  %v5357_v36 = vld [vmem:[#allocation2 + $0x40] sm:$0xf]  ;;  %v5149_v39 = vrot.slane %v5148_v62, 4 }
 0x53f   : > { %3352 = vst.msk [vmem:[#allocation5 + $0x8] sm:$0xf] %vm747_vm10, %v3344_v32  ;;  %3357 = vst.msk [vmem:[#allocation5 + $0x1c] sm:$0xf] %vm747_vm10, %v3349_v33  ;;  %v3347_v38 = vld [vmem:[#allocation2 + $0x28] sm:$0xf] }
 0x540   : > { %5273 = vrot.lane.b32.xlu0 %v5252_v46, %s8079_s25  ;;  %3900 = vrot.lane.b32.xlu1 %v3885_v47, %s8086_s14  ;;  %v3454_v46 = vshll.u32 %v3369_v1, 16  ;;  %v3670_v47 = vld [vmem:[#allocation2 + $0x28] sm:$0xf]  ;;  %v3451_v17 = vor.u32 %v3450_v57, %v3447_v55  ;;  %v3775_v1 = vsel %vm8160_vm13, %v3770_v15, %v9184_v63  ;;  %v3744_v30 = vshll.u32 %v3671_v53, 16  ;;  %3355 = vst.msk [vmem:[#allocation5 + $0x14] sm:$0xf] %vm747_vm10, %v3347_v38  ;;  %v9226_v55 = vpop.permute.xlu1 %5487 }
 0x541   : > { %v3735_v0 = vshrl.u32 %v3670_v47, 16  ;;  %v3348_v41 = vld [vmem:[#allocation2 + $0x30] sm:$0xf]  ;;  %v3779_v42 = vrot.slane %v3777_v9, 4  ;;  %v5116_v44 = vrot.slane %v5114_v24, 4  ;;  %v5446_v48 = vshrl.u32 %v5357_v36, 16 }
 0x542   : > { %v9188_v3 = vrot.slane %v3454_v46, 5  ;;  %v3452_v7 = vrot.slane %v3451_v17, 4  ;;  %3356 = vst.msk [vmem:[#allocation5 + $0x18] sm:$0xf] %vm747_vm10, %v3348_v41  ;;  %v5119_v46 = vrot.slane %v5117_v20, 5  ;;  %v5415_v57 = vrot.slane %v5413_v31, 5 }
 0x543   : > { %v3737_v21 = vrot.slane %v3735_v0, 4  ;;  %v3370_v52 = vld [vmem:[#allocation2 + $0x30] sm:$0xf]  ;;  %v5154_v58 = vsel %vm8160_vm13, %v5149_v39, %v5153_v29  ;;  %v3746_v63 = vrot.slane %v3744_v30, 5  ;;  %v3677_v37 = vld [vmem:[#allocation2 + $0x44] sm:$0x1] }
 0x544   : > { %5477 = vrot.lane.b32.xlu0 %v5402_v2, %s8078_s24  ;;  %5171 = vrot.lane.b32.xlu1 %v5084_v59, %s8082_s10  ;;  %v3738_v2 = vshll.u32 %v3670_v47, 16  ;;  %v9186_v59 = vrot.slane %v5438_v45, 4  ;;  %v3457_v56 = vsel %vm8160_vm13, %v3452_v7, %v9188_v3  ;;  %v3459_v4 = vshrl.u32 %v3370_v52, 16  ;;  %v3672_v12 = vld [vmem:[#allocation2 + $0x30] sm:$0xf] }
 0x545   : > { %v3462_v5 = vshll.u32 %v3370_v52, 16  ;;  %v5120_v6 = vor.u32 %v5119_v46, %v5116_v44  ;;  %v3786_v15 = vshll.u32 %v3677_v37, 16  ;;  %v5056_v62 = vld [vmem:[#allocation2 + $0x44] sm:$0x1]  ;;  %v3371_v20 = vld [vmem:[#allocation2 + $0x34] sm:$0x1] }
 0x546   : > { %v5444_v35 = vsel %vm8160_vm13, %v9186_v59, %v9180_v49  ;;  %v5449_v49 = vshll.u32 %v5357_v36, 16  ;;  %v5358_v18 = vld [vmem:[#allocation2 + $0x44] sm:$0x1]  ;;  %v3468_v30 = vshll.u32 %v3371_v20, 16  ;;  %v5051_v41 = vld [vmem:[#allocation2 + $0x30] sm:$0xf] }
 0x547   : > { %v3464_v53 = vrot.slane %v3462_v5, 5  ;;  %v3788_v26 = vrot.slane %v3786_v15, 5  ;;  %v5455_v29 = vshll.u32 %v5358_v18, 16  ;;  %v5516_v5 = vld [vmem:[#allocation2 + $0x3c] sm:$0x1] }
 0x548   : > { %5321 = vrot.lane.b32.xlu0 %v5301_v51, %s8084_s12  ;;  %5279 = vrot.lane.b32.xlu1 %v5264_v25, %s8079_s25  ;;  %v3740_v51 = vrot.slane %v3738_v2, 5  ;;  %v5055_v25 = vld [vmem:[#allocation2 + $0x40] sm:$0xf]  ;;  %v5050_v2 = vld [vmem:[#allocation2 + $0x2c] sm:$0x1]  ;;  %v5451_v11 = vrot.slane %v5449_v49, 5 }
 0x549   : > { %v5156_v45 = vshrl.u32 %v5055_v25, 16  ;;  %v5159_v47 = vshll.u32 %v5055_v25, 16  ;;  %v5123_v17 = vshll.u32 %v5050_v2, 16  ;;  %v3673_v49 = vld [vmem:[#allocation2 + $0x34] sm:$0x1]  ;;  %v3470_v37 = vrot.slane %v3468_v30, 5 }
 0x54a   : > { %v3741_v13 = vor.u32 %v3740_v51, %v3737_v21  ;;  %v3749_v21 = vshrl.u32 %v3672_v12, 16  ;;  %v3752_v51 = vshll.u32 %v3672_v12, 16  ;;  %v5514_v15 = vld [vmem:[#allocation2 + $0x34] sm:$0x1]  ;;  %v9300_v30 = vld [vmem:[%s11166_s4 + $0x20] sm:$0xff]  }
 0x54b   : > { %v5158_v59 = vrot.slane %v5156_v45, 4 }
 0x54c   : > { %3490 = vrot.lane.b32.xlu0 %v3415_v40, %s8082_s10  ;;  %3500 = vrot.lane.b32.xlu1 %v3485_v43, %s8082_s10  ;;  %v5410_v40 = vor.u32 %v5409_v19, %v5406_v50  ;;  %v3782_v43 = vrot.slane %v3780_v23, 5  ;;  %v3742_v61 = vrot.slane %v3741_v13, 4  ;;  %v3461_v19 = vrot.slane %v3459_v4, 4  ;;  %v5515_v4 = vld [vmem:[#allocation2 + $0x38] sm:$0xe] }
 0x54d   : > { %v5121_v23 = vrot.slane %v5120_v6, 4  ;;  %v3751_v31 = vrot.slane %v3749_v21, 4  ;;  %v3754_v36 = vrot.slane %v3752_v51, 5  ;;  %v7818_v21 = vrot.slane %v5515_v4, 9  ;;  %v5517_v4 = vld [vmem:[#allocation2 + $0x40] sm:$0xe] }
 0x54e   : > { %v5411_v60 = vrot.slane %v5410_v40, 4  ;;  %v3783_v0 = vor.u32 %v3782_v43, %v3779_v42  ;;  %v3747_v14 = vsel %vm8160_vm13, %v3742_v61, %v3746_v63  ;;  %v3465_v7 = vor.u32 %v3464_v53, %v3461_v19 }
 0x54f   : > { %v5457_v43 = vrot.slane %v5455_v29, 5  ;;  %v3755_v52 = vor.u32 %v3754_v36, %v3751_v31  ;;  %v5128_v61 = vshrl.u32 %v5051_v41, 16  ;;  %v5131_v63 = vshll.u32 %v5051_v41, 16  ;;  %v9287_v31 = vld [vmem:[%s11166_s4 + $0x28] sm:$0xff]  }
 0x550   : > { %5473 = vrot.lane.b32.xlu0 %v5374_v8, %s8078_s24  ;;  %3896 = vrot.lane.b32.xlu1 %v3877_v10, %s8086_s14  ;;  %v5161_v8 = vrot.slane %v5159_v47, 5  ;;  %v5448_v10 = vrot.slane %v5446_v48, 4  ;;  %v5416_v3 = vsel %vm8160_vm13, %v5411_v60, %v5415_v57  ;;  %v3784_v9 = vrot.slane %v3783_v0, 4  ;;  %v5506_v60 = vld [vmem:[#allocation2 + $0x14] sm:$0x1] }
 0x551   : > { %v3466_v48 = vrot.slane %v3465_v7, 4  ;;  %v5353_v0 = vld [vmem:[#allocation2 + $0x30] sm:$0xf]  ;;  %7990 = vmatprep.subr.bf16.mxu0 %v9287_v31  ;;  %8004 = vmatprep.subr.bf16.mxu1 %v9287_v31 }
 0x552   : > { %v5162_v24 = vor.u32 %v5161_v8, %v5158_v59  ;;  %v5452_v25 = vor.u32 %v5451_v11, %v5448_v10  ;;  %v3789_v38 = vsel %vm8160_vm13, %v3784_v9, %v3788_v26  ;;  %v3758_v59 = vshll.u32 %v3673_v49, 16  ;;  %7991 = vmatpush3.bf16.msra.mxu0 %v9287_v31 }
 0x553   : > { %v3471_v10 = vsel %vm8160_vm13, %v3466_v48, %v3470_v37  ;;  %v3756_v11 = vrot.slane %v3755_v52, 4  ;;  %v5418_v18 = vshrl.u32 %v5353_v0, 16  ;;  %v5421_v19 = vshll.u32 %v5353_v0, 16  ;;  %v5512_v48 = vld [vmem:[#allocation2 + $0x2c] sm:$0x1]  ;;  %7992 = vmatprep.subr.bf16.mxu0 %v9300_v30 }
 0x554   : > { %5275 = vrot.lane.b32.xlu1 %v5256_v27, %s8079_s25  ;;  %3594 = vrot.lane.b32.xlu0 %v3577_v28, %s8079_s25  ;;  %v5125_v27 = vrot.slane %v5123_v17, 5  ;;  %v5165_v28 = vshll.u32 %v5056_v62, 16  ;;  %v5163_v40 = vrot.slane %v5162_v24, 4  ;;  %v5453_v13 = vrot.slane %v5452_v25, 4 }
 0x555   : > { %v5130_v17 = vrot.slane %v5128_v61, 4  ;;  %v5133_v62 = vrot.slane %v5131_v63, 5  ;;  %v3760_v53 = vrot.slane %v3758_v59, 5  ;;  %v5559_v24 = vrot.slane %v5516_v5, 5  ;;  %v5520_v61 = vld [vmem:[#allocation2 + $0x4c] sm:$0x1] }
 0x556   : > { %v5126_v39 = vsel %vm8160_vm13, %v5121_v23, %v5125_v27  ;;  %v5167_v42 = vrot.slane %v5165_v28, 5  ;;  %v5458_v57 = vsel %vm8160_vm13, %v5453_v13, %v5457_v43  ;;  %v5555_v26 = vrot.slane %v5514_v15, 5  ;;  %v5052_v27 = vld [vmem:[#allocation2 + $0x34] sm:$0x1]  ;;  %v9313_v63 = vld [vmem:[%s11166_s4 + $0x18] sm:$0xff]   ;;  %7993 = vmatpush3.bf16.msra.mxu0 %v9300_v30 }
 0x557   : > { %v3761_v28 = vsel %vm8160_vm13, %v3756_v11, %v3760_v53  ;;  %v5134_v29 = vor.u32 %v5133_v62, %v5130_v17  ;;  %v5420_v20 = vrot.slane %v5418_v18, 4  ;;  %v5137_v7 = vshll.u32 %v5052_v27, 16  ;;  %v5354_v13 = vld [vmem:[#allocation2 + $0x34] sm:$0x1]  ;;  %v5518_v5 = vld [vmem:[#allocation2 + $0x44] sm:$0x1]  ;;  %7994 = vmatprep.subr.bf16.mxu0 %v9313_v63 }
 0x558   : > { %5483 = vrot.lane.b32.xlu1 %v5444_v35, %s8078_s24  ;;  %3802 = vrot.lane.b32.xlu0 %v3775_v1, %s8078_s24  ;;  %v5507_v35 = vld [vmem:[#allocation2 + $0x18] sm:$0xe]  ;;  %v5508_v1 = vld [vmem:[#allocation2 + $0x1c] sm:$0x1]  ;;  %v5427_v52 = vshll.u32 %v5354_v13, 16  ;;  %v7819_v62 = vrot.slane %v5517_v4, 9 }
 0x559   : > { %v7814_v44 = vrot.slane %v5507_v35, 9  ;;  %v5543_v45 = vrot.slane %v5508_v1, 5  ;;  %v5509_v35 = vld [vmem:[#allocation2 + $0x20] sm:$0xe]  ;;  %v5510_v1 = vld [vmem:[#allocation2 + $0x24] sm:$0x1] }
 0x55a   : > { %v5135_v41 = vrot.slane %v5134_v29, 4  ;;  %v5547_v43 = vrot.slane %v5510_v1, 5  ;;  %v5139_v49 = vrot.slane %v5137_v7, 5  ;;  %v5563_v18 = vrot.slane %v5518_v5, 5  ;;  %7995 = vmatpush3.bf16.msra.mxu0 %v9313_v63  ;;  %v5025_v13 = vld [vmem:[#allocation2 + $0x8] sm:$0xf] }
 0x55b   : > { %v5544_v2 = vsel %vm8313_vm15, %v7814_v44, %v5543_v45  ;;  %v5511_v44 = vld [vmem:[#allocation2 + $0x28] sm:$0xe] }
 0x55c   : > { %3496 = vrot.lane.b32.xlu1 %v3457_v56, %s8082_s10  ;;  %5181 = vrot.lane.b32.xlu0 %v5154_v58, %s8082_s10  ;;  %v5168_v56 = vsel %vm8160_vm13, %v5163_v40, %v5167_v42  ;;  %v5505_v58 = vld [vmem:[#allocation2 + $0x10] sm:$0xe]  ;;  %v7815_v42 = vrot.slane %v5509_v35, 9  ;;  %v5140_v37 = vsel %vm8160_vm13, %v5135_v41, %v5139_v49 }
 0x55d   : > { %v9239_v16 = vpop.permute.xlu1 %5315  ;;  %v7813_v12 = vrot.slane %v5505_v58, 9  ;;  %v7816_v58 = vrot.slane %v5511_v44, 9 }
 0x55e   : > { %v9241_v50 = vpop.permute.xlu0 %3634  ;;  %v5548_v0 = vsel %vm8313_vm15, %v7815_v42, %v5547_v43 }
 0x560   : > { %5479 = vrot.lane.b32.xlu1 %v5416_v3, %s8078_s24  ;;  %3798 = vrot.lane.b32.xlu0 %v3747_v14, %s8078_s24  ;;  %v5539_v3 = vrot.slane %v5506_v60, 5  ;;  %v5513_v14 = vld [vmem:[#allocation2 + $0x30] sm:$0xe]  ;;  %v5519_v60 = vld [vmem:[#allocation2 + $0x48] sm:$0xe] }
 0x561   : > { %v7817_v25 = vrot.slane %v5513_v14, 9  ;;  %v7820_v11 = vrot.slane %v5519_v60, 9  ;;  %v5026_v60 = vld [vmem:[#allocation2 + $0x10] sm:$0xf] }
 0x562   : > { %v9245_v32 = vpop.permute.xlu1 %3588  ;;  %v3631_v33 = vpop.permute.xlu0 %3630  ;;  %v5540_v23 = vsel %vm8313_vm15, %v7813_v12, %v5539_v3  ;;  %v5567_v12 = vrot.slane %v5520_v61, 5 }
 0x563   : > { %3654 = vst.msk [vmem:[#allocation5] sm:$0xf] %vm1261_vm7, %v3631_v33  ;;  %v5423_v33 = vrot.slane %v5421_v19, 5  ;;  %v5556_v40 = vsel %vm8313_vm15, %v7817_v25, %v5555_v26 }
 0x564   : > { %3804 = vrot.lane.b32.xlu1 %v3789_v38, %s8078_s24  ;;  %5177 = vrot.lane.b32.xlu0 %v5126_v39, %s8082_s10  ;;  %v5560_v39 = vsel %vm8313_vm15, %v7818_v21, %v5559_v24  ;;  %v5568_v19 = vsel %vm8313_vm15, %v7820_v11, %v5567_v12  ;;  %v5027_v11 = vld [vmem:[#allocation2 + $0x18] sm:$0xf] }
 0x565   : > { %v5424_v45 = vor.u32 %v5423_v33, %v5420_v20 }
 0x566   : > { %v9254_v46 = vpop.permute.xlu1 %3890  ;;  %v9256_v47 = vpop.permute.xlu0 %5269 }
 0x567   : > { %v5425_v59 = vrot.slane %v5424_v45, 4 }
 0x568   : > { %5183 = vrot.lane.b32.xlu1 %v5168_v56, %s8082_s10  ;;  %5485 = vrot.lane.b32.xlu0 %v5458_v57, %s8078_s24 }
 0x56a   : > { %v9266_v6 = vpop.permute.xlu1 %3636  ;;  %v9268_v8 = vpop.permute.xlu0 %5317 }
 0x56c   : > { %5571 = vrot.lane.b32.xlu1 %v5544_v2, %s8086_s14  ;;  %3498 = vrot.lane.b32.xlu0 %v3471_v10, %s8082_s10  ;;  %v5551_v2 = vrot.slane %v5512_v48, 5  ;;  %v5429_v10 = vrot.slane %v5427_v52, 5  ;;  %v5028_v48 = vld [vmem:[#allocation2 + $0x20] sm:$0xf] }
 0x56e   : > { %v9274_v51 = vpop.permute.xlu1 %3584  ;;  %v9276_v9 = vpop.permute.xlu0 %5265  ;;  %v5552_v15 = vsel %vm8313_vm15, %v7816_v58, %v5551_v2  ;;  %v5430_v17 = vsel %vm8160_vm13, %v5425_v59, %v5429_v10  ;;  %vm3970_vm13 = vcmask 392192  }
 0x570   : > { %3800 = vrot.lane.b32.xlu1 %v3761_v28, %s8078_s24  ;;  %5569 = vrot.lane.b32.xlu0 %v5540_v23, %s8086_s14  ;;  %v5564_v23 = vsel %vm8313_vm15, %v7819_v62, %v5563_v18  ;;  %vm6739_vm15 = vcmask 31744  }
 0x572   : > { %v9289_v36 = vpop.permute.xlu1 %3886  ;;  %v9291_v38 = vpop.permute.xlu0 %5313 }
 0x574   : > { %5579 = vrot.lane.b32.xlu1 %v5560_v39, %s8086_s14  ;;  %5577 = vrot.lane.b32.xlu0 %v5556_v40, %s8086_s14 }
 0x576   : > { %v3633_v56 = vpop.permute.xlu1 %3632  ;;  %v9307_v57 = vpop.permute.xlu0 %3590 }
 0x578   : > { %5179 = vrot.lane.b32.xlu1 %v5140_v37, %s8082_s10  ;;  %5573 = vrot.lane.b32.xlu0 %v5548_v0, %s8086_s14  ;;  %s7840_s10 = sshll.u32 %s11550_s19, 8 }
 0x579   : > { %s10529_s6 = scalar_lea.vmem %s11163_s1, %s7840_s10  ;;  %s10541_s9 = scalar_lea.vmem %s11167_s5, %s7840_s10 }
 0x57a   : > { %v5272_v3 = vpop.permute.xlu1 %5271  ;;  %v3893_v14 = vpop.permute.xlu0 %3892 }
 0x57c   : > { %5575 = vrot.lane.b32.xlu1 %v5552_v15, %s8086_s14  ;;  %5481 = vrot.lane.b32.xlu0 %v5430_v17, %s8078_s24  ;;  %s8088_s24 = smov 124  }
 0x57e   : > { %v9332_v53 = vpop.permute.xlu1 %5323  ;;  %v9334_v21 = vpop.permute.xlu0 %3642 }
 0x580   : > { %5583 = vrot.lane.b32.xlu1 %v5568_v19, %s8086_s14  ;;  %5581 = vrot.lane.b32.xlu0 %v5564_v23, %s8086_s14 }
 0x582   : > { %v3493_v54 = vpop.permute.xlu1 %3492  ;;  %v9340_v24 = vpop.permute.xlu0 %3586 }
 0x583   : > { %3513 = vst.msk [vmem:[#allocation5 + $0xc] sm:$0xf] %vm1112_vm1, %v3493_v54 }
 0x584   : > { %3609 = vst.msk [vmem:[#allocation5 + $0xc] sm:$0xf] %vm1212_vm2, %v9245_v32 }
 0x585   : > { %3657 = vst.msk [vmem:[#allocation5 + $0xc] sm:$0xf] %vm1261_vm7, %v9266_v6 }
 0x586   : > { %v5268_v25 = vpop.permute.xlu1 %5267  ;;  %v9347_v26 = vpop.permute.xlu0 %3794 }
 0x58a   : > { %v5476_v34 = vpop.permute.xlu1 %5475  ;;  %v3889_v27 = vpop.permute.xlu0 %3888 }
 0x58e   : > { %v9349_v28 = vpop.permute.xlu0 %5173  ;;  %v5320_v29 = vpop.permute.xlu1 %5319 }
 0x592   : > { %v3489_v20 = vpop.permute.xlu1 %3488  ;;  %v3639_v33 = vpop.permute.xlu0 %3638 }
 0x593   : > { %3511 = vst.msk [vmem:[#allocation5 + $0x4] sm:$0xf] %vm1112_vm1, %v3489_v20 }
 0x594   : > { %3607 = vst.msk [vmem:[#allocation5 + $0x4] sm:$0xf] %vm1212_vm2, %v9274_v51 }
 0x595   : > { %3655 = vst.msk [vmem:[#allocation5 + $0x4] sm:$0xf] %vm1261_vm7, %v3633_v56 }
 0x596   : > { %v3597_v32 = vpop.permute.xlu1 %3596  ;;  %v3791_v35 = vpop.permute.xlu0 %3790 }
 0x597   : > { %3814 = vst.msk [vmem:[#allocation5] sm:$0xf] %vm1422_vm8, %v3791_v35 }
 0x598   : > { %3910 = vst.msk [vmem:[#allocation5] sm:$0xf] %vm1519_vm9, %v9289_v36 }
 0x59a   : > { %v9358_v6 = vpop.permute.xlu0 %3898  ;;  %v3645_v1 = vpop.permute.xlu1 %3644 }
 0x59e   : > { %v5170_v7 = vpop.permute.xlu0 %5169  ;;  %v9360_v39 = vpop.permute.xlu1 %3592 }
 0x59f   : > { %v3918_v40 = vld [vmem:[#allocation5] sm:$0xf] }
 0x5a0   : > { %5033 = vst.msk [vmem:[#allocation5] sm:$0xf] %vm747_vm10, %v5025_v13 }
 0x5a1   : > { %5193 = vst.msk [vmem:[#allocation5] sm:$0xf] %vm1112_vm1, %v5170_v7 }
 0x5a2   : > { %5289 = vst.msk [vmem:[#allocation5] sm:$0xf] %vm1212_vm2, %v9276_v9  ;;  %v9366_v51 = vpop.permute.xlu0 %5277  ;;  %v3797_v41 = vpop.permute.xlu1 %3796 }
 0x5a3   : > { %5337 = vst.msk [vmem:[#allocation5] sm:$0xf] %vm1261_vm7, %v9291_v38 }
 0x5a4   : > { %3817 = vst.msk [vmem:[#allocation5 + $0xc] sm:$0xf] %vm1422_vm8, %v3797_v41 }
 0x5a5   : > { %3913 = vst.msk [vmem:[#allocation5 + $0xc] sm:$0xf] %vm1519_vm9, %v3893_v14 }
 0x5a6   : > { %v9372_v36 = vpop.permute.xlu0 %5325  ;;  %v5176_v42 = vpop.permute.xlu1 %5175 }
 0x5aa   : > { %v3495_v43 = vpop.permute.xlu0 %3494  ;;  %v3641_v44 = vpop.permute.xlu1 %3640 }
 0x5ab   : > { %3514 = vst.msk [vmem:[#allocation5 + $0x10] sm:$0xf] %vm1112_vm1, %v3495_v43 }
 0x5ac   : > { %v3921_v45 = vld [vmem:[#allocation5 + $0xc] sm:$0xf]  ;;  %3610 = vst.msk [vmem:[#allocation5 + $0x10] sm:$0xf] %vm1212_vm2, %v9307_v57 }
 0x5ad   : > { %5036 = vst.msk [vmem:[#allocation5 + $0xc] sm:$0xf] %vm747_vm10, %v5028_v48 }
 0x5ae   : > { %5196 = vst.msk [vmem:[#allocation5 + $0xc] sm:$0xf] %vm1112_vm1, %v5176_v42  ;;  %v3895_v9 = vpop.permute.xlu0 %3894  ;;  %v3793_v38 = vpop.permute.xlu1 %3792 }
 0x5af   : > { %3658 = vst.msk [vmem:[#allocation5 + $0x10] sm:$0xf] %vm1261_vm7, %v3639_v33 }
 0x5b0   : > { %5292 = vst.msk [vmem:[#allocation5 + $0xc] sm:$0xf] %vm1212_vm2, %v5272_v3 }
 0x5b1   : > { %5340 = vst.msk [vmem:[#allocation5 + $0xc] sm:$0xf] %vm1261_vm7, %v5320_v29 }
 0x5b2   : > { %3815 = vst.msk [vmem:[#allocation5 + $0x4] sm:$0xf] %vm1422_vm8, %v3793_v38  ;;  %v9384_v49 = vpop.permute.xlu0 %5273  ;;  %v3901_v52 = vpop.permute.xlu1 %3900 }
 0x5b3   : > { %3911 = vst.msk [vmem:[#allocation5 + $0x4] sm:$0xf] %vm1519_vm9, %v3889_v27  ;;  %v5031_v27 = vld [vmem:[#allocation2 + $0x38] sm:$0xf] }
 0x5b6   : > { %v5478_v56 = vpop.permute.xlu0 %5477  ;;  %v5172_v58 = vpop.permute.xlu1 %5171 }
 0x5ba   : > { %v3919_v57 = vld [vmem:[#allocation5 + $0x4] sm:$0xf]  ;;  %v5322_v37 = vpop.permute.xlu0 %5321  ;;  %v9390_v0 = vpop.permute.xlu1 %5279 }
 0x5bb   : > { %5034 = vst.msk [vmem:[#allocation5 + $0x4] sm:$0xf] %vm747_vm10, %v5026_v60  ;;  %v7794_v61 = vcombine.low %v3918_v40, %v3919_v57 }
 0x5bc   : > { %5194 = vst.msk [vmem:[#allocation5 + $0x4] sm:$0xf] %vm1112_vm1, %v5172_v58 }
 0x5bd   : > { %5290 = vst.msk [vmem:[#allocation5 + $0x4] sm:$0xf] %vm1212_vm2, %v5268_v25  ;;  %7982 = vmatprep.mubr.msk.bf16.mxu1 %vm3970_vm13, %v7794_v61 }
 0x5be   : > { %5338 = vst.msk [vmem:[#allocation5 + $0x4] sm:$0xf] %vm1261_vm7, %v9239_v16  ;;  %v3491_v2 = vpop.permute.xlu0 %3490  ;;  %v3501_v59 = vpop.permute.xlu1 %3500 }
 0x5bf   : > { %5498 = vst.msk [vmem:[#allocation5 + $0x4] sm:$0xf] %vm1422_vm8, %v5476_v34 }
 0x5c0   : > { %3512 = vst.msk [vmem:[#allocation5 + $0x8] sm:$0xf] %vm1112_vm1, %v3491_v2  ;;  %3517 = vst.msk [vmem:[#allocation5 + $0x1c] sm:$0xf] %vm1112_vm1, %v3501_v59 }
 0x5c1   : > { %3608 = vst.msk [vmem:[#allocation5 + $0x8] sm:$0xf] %vm1212_vm2, %v9340_v24  ;;  %3613 = vst.msk [vmem:[#allocation5 + $0x1c] sm:$0xf] %vm1212_vm2, %v3597_v32  ;;  %v5032_v24 = vld [vmem:[#allocation2 + $0x40] sm:$0xf] }
 0x5c2   : > { %3656 = vst.msk [vmem:[#allocation5 + $0x8] sm:$0xf] %vm1261_vm7, %v9241_v50  ;;  %3661 = vst.msk [vmem:[#allocation5 + $0x1c] sm:$0xf] %vm1261_vm7, %v3645_v1  ;;  %v5474_v16 = vpop.permute.xlu0 %5473  ;;  %v3897_v4 = vpop.permute.xlu1 %3896  ;;  %v5030_v32 = vld [vmem:[#allocation2 + $0x30] sm:$0xf] }
 0x5c3   : > { %3816 = vst.msk [vmem:[#allocation5 + $0x8] sm:$0xf] %vm1422_vm8, %v9347_v26  ;;  %5497 = vst.msk [vmem:[#allocation5] sm:$0xf] %vm1422_vm8, %v5474_v16 }
 0x5c4   : > { %3912 = vst.msk [vmem:[#allocation5 + $0x8] sm:$0xf] %vm1519_vm9, %v9254_v46 }
 0x5c6   : > { %v9408_v5 = vpop.permute.xlu1 %5275  ;;  %v3595_v10 = vpop.permute.xlu0 %3594 }
 0x5ca   : > { %v9410_v3 = vpop.permute.xlu1 %5483  ;;  %v3803_v50 = vpop.permute.xlu0 %3802 }
 0x5cb   : > { %v3920_v12 = vld [vmem:[#allocation5 + $0x8] sm:$0xf] }
 0x5cc   : > { %5035 = vst.msk [vmem:[#allocation5 + $0x8] sm:$0xf] %vm747_vm10, %v5027_v11  ;;  %v7795_v14 = vcombine.low %v3920_v12, %v3921_v45 }
 0x5cd   : > { %5195 = vst.msk [vmem:[#allocation5 + $0x8] sm:$0xf] %vm1112_vm1, %v9349_v28 }
 0x5ce   : > { %5291 = vst.msk [vmem:[#allocation5 + $0x8] sm:$0xf] %vm1212_vm2, %v9256_v47  ;;  %7983 = vmatmul.mubr.msk.bf16.vlgmr.msra.gmra.mxu1 %vm3970_vm13, %v7795_v14  ;;  %v3497_v46 = vpop.permute.xlu1 %3496  ;;  %v5182_v15 = vpop.permute.xlu0 %5181 }
 0x5cf   : > { %5339 = vst.msk [vmem:[#allocation5 + $0x8] sm:$0xf] %vm1261_vm7, %v9268_v8  ;;  %8007 = vmatpush3.bf16.msra.mxu1 %v9287_v31 }
 0x5d0   : > { %5499 = vst.msk [vmem:[#allocation5 + $0x8] sm:$0xf] %vm1422_vm8, %v5478_v56  ;;  %8005 = vmatprep.subr.bf16.mxu1 %v9300_v30 }
 0x5d1   : > { %3515 = vst.msk [vmem:[#allocation5 + $0x14] sm:$0xf] %vm1112_vm1, %v3497_v46 }
 0x5d2   : > { %3611 = vst.msk [vmem:[#allocation5 + $0x14] sm:$0xf] %vm1212_vm2, %v9360_v39  ;;  %v5480_v47 = vpop.permute.xlu1 %5479  ;;  %v3799_v17 = vpop.permute.xlu0 %3798 }
 0x5d3   : > { %3659 = vst.msk [vmem:[#allocation5 + $0x14] sm:$0xf] %vm1261_vm7, %v3641_v44  ;;  %8008 = vmatpush3.bf16.msra.mxu1 %v9300_v30  ;;  %v5029_v30 = vld [vmem:[#allocation2 + $0x28] sm:$0xf] }
 0x5d4   : > { %5500 = vst.msk [vmem:[#allocation5 + $0xc] sm:$0xf] %vm1422_vm8, %v5480_v47  ;;  %3818 = vst.msk [vmem:[#allocation5 + $0x10] sm:$0xf] %vm1422_vm8, %v3799_v17  ;;  %8006 = vmatprep.subr.bf16.mxu1 %v9313_v63 }
 0x5d5   : > { %3914 = vst.msk [vmem:[#allocation5 + $0x10] sm:$0xf] %vm1519_vm9, %v3895_v9 }
 0x5d6   : > { %v3805_v8 = vpop.permute.xlu1 %3804  ;;  %v5178_v31 = vpop.permute.xlu0 %5177 }
 0x5d7   : > { %8009 = vmatpush3.bf16.msra.mxu1 %v9313_v63  ;;  %3821 = vst.msk [vmem:[#allocation5 + $0x1c] sm:$0xf] %vm1422_vm8, %v3805_v8 }
 0x5d8   : > { %3917 = vst.msk [vmem:[#allocation5 + $0x1c] sm:$0xf] %vm1519_vm9, %v3901_v52 }
 0x5da   : > { %v5184_v62 = vpop.permute.xlu1 %5183  ;;  %v5486_v18 = vpop.permute.xlu0 %5485 }
 0x5dc   : > { %v3922_v19 = vld [vmem:[#allocation5 + $0x10] sm:$0xf] }
 0x5dd   : > { %5037 = vst.msk [vmem:[#allocation5 + $0x10] sm:$0xf] %vm747_vm10, %v5029_v30 }
 0x5de   : > { %5197 = vst.msk [vmem:[#allocation5 + $0x10] sm:$0xf] %vm1112_vm1, %v5178_v31  ;;  %v5572_v23 = vpop.permute.xlu1 %5571  ;;  %v3499_v54 = vpop.permute.xlu0 %3498 }
 0x5df   : > { %5293 = vst.msk [vmem:[#allocation5 + $0x10] sm:$0xf] %vm1212_vm2, %v9384_v49  ;;  %v3925_v63 = vld [vmem:[#allocation5 + $0x1c] sm:$0xf] }
 0x5e0   : > { %5341 = vst.msk [vmem:[#allocation5 + $0x10] sm:$0xf] %vm1261_vm7, %v5322_v37 }
 0x5e1   : > { %5594 = vst.msk [vmem:[#allocation5 + $0x4] sm:$0xf] %vm1519_vm9, %v5572_v23 }
 0x5e2   : > { %3516 = vst.msk [vmem:[#allocation5 + $0x18] sm:$0xf] %vm1112_vm1, %v3499_v54  ;;  %v3801_v25 = vpop.permute.xlu1 %3800  ;;  %v5570_v26 = vpop.permute.xlu0 %5569 }
 0x5e3   : > { %5040 = vst.msk [vmem:[#allocation5 + $0x1c] sm:$0xf] %vm747_vm10, %v5032_v24 }
 0x5e4   : > { %3612 = vst.msk [vmem:[#allocation5 + $0x18] sm:$0xf] %vm1212_vm2, %v3595_v10 }
 0x5e5   : > { %5200 = vst.msk [vmem:[#allocation5 + $0x1c] sm:$0xf] %vm1112_vm1, %v5184_v62 }
 0x5e6   : > { %3660 = vst.msk [vmem:[#allocation5 + $0x18] sm:$0xf] %vm1261_vm7, %v9334_v21  ;;  %v5580_v21 = vpop.permute.xlu1 %5579  ;;  %v5578_v34 = vpop.permute.xlu0 %5577 }
 0x5e7   : > { %5296 = vst.msk [vmem:[#allocation5 + $0x1c] sm:$0xf] %vm1212_vm2, %v9390_v0 }
 0x5e8   : > { %3820 = vst.msk [vmem:[#allocation5 + $0x18] sm:$0xf] %vm1422_vm8, %v3803_v50  ;;  %3819 = vst.msk [vmem:[#allocation5 + $0x14] sm:$0xf] %vm1422_vm8, %v3801_v25 }
 0x5e9   : > { %5344 = vst.msk [vmem:[#allocation5 + $0x1c] sm:$0xf] %vm1261_vm7, %v9204_v22 }
 0x5ea   : > { %3916 = vst.msk [vmem:[#allocation5 + $0x18] sm:$0xf] %vm1519_vm9, %v9358_v6  ;;  %5593 = vst.msk [vmem:[#allocation5] sm:$0xf] %vm1519_vm9, %v5570_v26  ;;  %v5180_v29 = vpop.permute.xlu1 %5179  ;;  %v5574_v20 = vpop.permute.xlu0 %5573 }
 0x5eb   : > { %5504 = vst.msk [vmem:[#allocation5 + $0x1c] sm:$0xf] %vm1422_vm8, %v9226_v55 }
 0x5ec   : > { %3915 = vst.msk [vmem:[#allocation5 + $0x14] sm:$0xf] %vm1519_vm9, %v3897_v4  ;;  %5595 = vst.msk [vmem:[#allocation5 + $0x8] sm:$0xf] %vm1519_vm9, %v5574_v20 }
 0x5ee   : > { %v5576_v6 = vpop.permute.xlu1 %5575  ;;  %v5482_v1 = vpop.permute.xlu0 %5481 }
 0x5ef   : > { %5596 = vst.msk [vmem:[#allocation5 + $0xc] sm:$0xf] %vm1519_vm9, %v5576_v6 }
 0x5f0   : > { %5501 = vst.msk [vmem:[#allocation5 + $0x10] sm:$0xf] %vm1422_vm8, %v5482_v1 }
 0x5f1   : > { %v3924_v28 = vld [vmem:[#allocation5 + $0x18] sm:$0xf]  ;;  %v8064_v33 = vld [vmem:[#allocation5] sm:$0xff]   ;;  %5597 = vst.msk [vmem:[#allocation5 + $0x10] sm:$0xf] %vm1519_vm9, %v5578_v34 }
 0x5f2   : > { %5039 = vst.msk [vmem:[#allocation5 + $0x18] sm:$0xf] %vm747_vm10, %v5031_v27  ;;  %7996 = vmatprep.mubr.msk.bf16.mxu0 %vm3970_vm13, %v8064_v33  ;;  %v7797_v35 = vcombine.low %v3924_v28, %v3925_v63  ;;  %v5584_v7 = vpop.permute.xlu1 %5583  ;;  %v5582_v39 = vpop.permute.xlu0 %5581 }
 0x5f3   : > { %v3923_v22 = vld [vmem:[#allocation5 + $0x14] sm:$0xf]  ;;  %5199 = vst.msk [vmem:[#allocation5 + $0x18] sm:$0xf] %vm1112_vm1, %v5182_v15 }
 0x5f4   : > { %5038 = vst.msk [vmem:[#allocation5 + $0x14] sm:$0xf] %vm747_vm10, %v5030_v32  ;;  %v7796_v55 = vcombine.low %v3922_v19, %v3923_v22  ;;  %vm4960_vm10 = vcmask 1040384  }
 0x5f5   : > { %5295 = vst.msk [vmem:[#allocation5 + $0x18] sm:$0xf] %vm1212_vm2, %v9366_v51  ;;  %v8087_v51 = vmov 1966171168  }
 0x5f6   : > { %5198 = vst.msk [vmem:[#allocation5 + $0x14] sm:$0xf] %vm1112_vm1, %v5180_v29  ;;  %7986 = vmatprep.mubr.msk.bf16.mxu1 %vm3970_vm13, %v7796_v55  ;;  %v4058_v41 = vunpack.c.l.s4 %v8087_v51  ;;  %vm7540_vm1 = vcmask 64544  }
 0x5f7   : > { %5343 = vst.msk [vmem:[#allocation5 + $0x18] sm:$0xf] %vm1261_vm7, %v9372_v36  ;;  %7987 = vmatmul.mubr.msk.bf16.gmra.mxu1 %vm3970_vm13, %v7797_v35  ;;  %v4060_v36 = vlaneseq }
 0x5f8   : > { %5294 = vst.msk [vmem:[#allocation5 + $0x14] sm:$0xf] %vm1212_vm2, %v9408_v5  ;;  %v4059_v42 = vunpack.c.0.s8 %v4058_v41 }
 0x5f9   : > { %5503 = vst.msk [vmem:[#allocation5 + $0x18] sm:$0xf] %vm1422_vm8, %v5486_v18  ;;  %v9487_v43 = vshrl.u32 %v4060_v36, 7 }
 0x5fa   : > { %5342 = vst.msk [vmem:[#allocation5 + $0x14] sm:$0xf] %vm1261_vm7, %v9332_v53  ;;  %v8067_v53 = vld [vmem:[#allocation5 + $0x8] sm:$0xff]  }
 0x5fb   : > { %5502 = vst.msk [vmem:[#allocation5 + $0x14] sm:$0xf] %vm1422_vm8, %v9410_v3  ;;  %7997 = vmatmul.mubr.msk.bf16.vlgmr.msra.gmra.mxu0 %vm3970_vm13, %v8067_v53  ;;  %v9490_v44 = vsub.s32 %v4059_v42, %v9487_v43  ;;  %v9498_v56 = vsub.s32 0, %v9487_v43 }
 0x5fc   : > { %5598 = vst.msk [vmem:[#allocation5 + $0x14] sm:$0xf] %vm1519_vm9, %v5580_v21  ;;  %5600 = vst.msk [vmem:[#allocation5 + $0x1c] sm:$0xf] %vm1519_vm9, %v5584_v7 }
 0x5fd   : > { %5599 = vst.msk [vmem:[#allocation5 + $0x18] sm:$0xf] %vm1519_vm9, %v5582_v39 }
 0x603   : > { %v8068_v40 = vld [vmem:[#allocation5 + $0x10] sm:$0xff]  }
 0x604   : > { %8000 = vmatprep.mubr.msk.bf16.mxu1 %vm3970_vm13, %v8068_v40  ;;  %v8069_v13 = vld [vmem:[#allocation5 + $0x18] sm:$0xff]  }
 0x605   : > { %8001 = vmatmul.mubr.msk.bf16.vlgmr.msra.gmra.mxu1 %vm3970_vm13, %v8069_v13 }
 0x68e   : > { %v7984_v45 = vpop.f32.mrf.mxu1 }
 0x68f   : > { %v4161_v48 = vrot.slane %v7984_v45, %v9490_v44  ;;  %v4154_v58 = vcombine.high %v7984_v45, %v7984_v45 }
 0x690   : > { %v4017_v9 = vpop.f32.mrf.mxu1 }
 0x691   : > { %v4169_v38 = vcombine.high %v4161_v48, %v4161_v48  ;;  %v4063_v49 = vrot.slane %v4017_v9, %v9490_v44  ;;  %v9495_v52 = vrot.slane %v4161_v48, %v9490_v44  ;;  %v4168_v0 = vrot.slane %v4154_v58, %v9490_v44 }
 0x692   : > { %v4056_v10 = vcombine.high %v4017_v9, %v4017_v9  ;;  %v7985_v19 = vpop.f32.mrf.mxu1 }
 0x693   : > { %v9501_v57 = vrot.slane %v4169_v38, %v9490_v44  ;;  %v4071_v60 = vcombine.high %v4063_v49, %v4063_v49  ;;  %v9504_v61 = vrot.slane %v4063_v49, %v9490_v44  ;;  %v4579_v37 = vrot.slane %v9495_v52, %v9498_v56 }
 0x694   : > { %v9517_v16 = vcombine.high %v9495_v52, %v9495_v52  ;;  %v4170_v5 = vcombine.high %v4168_v0, %v4168_v0  ;;  %v9530_v3 = vrot.slane %v4168_v0, %v9490_v44  ;;  %v4070_v46 = vrot.slane %v4056_v10, %v9490_v44  ;;  %v4020_v28 = vpop.f32.mrf.mxu1 }
 0x695   : > { %4800 = vrot.lane.b32.xlu0 %v4579_v37, %s8088_s24  ;;  %v9511_v2 = vrot.slane %v4071_v60, %v9490_v44  ;;  %v4583_v59 = vrot.slane %v9501_v57, %v9498_v56  ;;  %v4515_v4 = vrot.slane %v9504_v61, %v9498_v56  ;;  %v9527_v12 = vcombine.high %v9501_v57, %v9501_v57 }
 0x696   : > { %v4587_v50 = vrot.slane %v9517_v16, %v9498_v56  ;;  %v9537_v14 = vrot.slane %v4170_v5, %v9490_v44  ;;  %v9544_v47 = vcombine.high %v9504_v61, %v9504_v61  ;;  %v4595_v17 = vrot.slane %v9530_v3, %v9498_v56 }
 0x697   : > { %4802 = vrot.lane.b32.xlu1 %v4583_v59, %s8088_s24  ;;  %v4519_v11 = vrot.slane %v9511_v2, %v9498_v56  ;;  %v4591_v15 = vrot.slane %v9527_v12, %v9498_v56  ;;  %v4072_v8 = vcombine.high %v4070_v46, %v4070_v46  ;;  %v9554_v62 = vcombine.high %v9511_v2, %v9511_v2 }
 0x698   : > { %v4599_v31 = vrot.slane %v9537_v14, %v9498_v56  ;;  %v9557_v18 = vrot.slane %v4070_v46, %v9490_v44  ;;  %v4523_v30 = vrot.slane %v9544_v47, %v9498_v56  ;;  %v4210_v54 = vrot.slane %v7985_v19, %v9490_v44 }
 0x699   : > { %4768 = vrot.lane.b32.xlu0 %v4515_v4, %s8088_s24  ;;  %v9564_v23 = vrot.slane %v4072_v8, %v9490_v44  ;;  %v4527_v63 = vrot.slane %v9554_v62, %v9498_v56  ;;  %v9573_v25 = vcombine.high %v9530_v3, %v9530_v3  ;;  %v9581_v34 = vcombine.high %v9537_v14, %v9537_v14 }
 0x69a   : > { %v4531_v24 = vrot.slane %v9557_v18, %v9498_v56  ;;  %v4218_v26 = vcombine.high %v4210_v54, %v4210_v54  ;;  %v9584_v27 = vrot.slane %v4210_v54, %v9490_v44  ;;  %v4112_v33 = vrot.slane %v4020_v28, %v9490_v44 }
 0x69b   : > { %4770 = vrot.lane.b32.xlu1 %v4519_v11, %s8088_s24  ;;  %v4535_v21 = vrot.slane %v9564_v23, %v9498_v56  ;;  %v4603_v29 = vrot.slane %v9573_v25, %v9498_v56  ;;  %v4607_v22 = vrot.slane %v9581_v34, %v9498_v56  ;;  %v9600_v55 = vcombine.high %v9557_v18, %v9557_v18 }
 0x69c   : > { %v9591_v20 = vrot.slane %v4218_v26, %v9490_v44  ;;  %v4611_v32 = vrot.slane %v9584_v27, %v9498_v56  ;;  %v4203_v35 = vcombine.high %v7985_v19, %v7985_v19  ;;  %v4120_v6 = vcombine.high %v4112_v33, %v4112_v33 }
 0x69d   : > { %4804 = vrot.lane.b32.xlu0 %v4587_v50, %s8088_s24  ;;  %v9608_v7 = vcombine.high %v9564_v23, %v9564_v23  ;;  %v9611_v39 = vrot.slane %v4112_v33, %v9490_v44  ;;  %v4539_v53 = vrot.slane %v9600_v55, %v9498_v56  ;;  %v9625_v41 = vcombine.high %v9584_v27, %v9584_v27 }
 0x69e   : > { %v4615_v1 = vrot.slane %v9591_v20, %v9498_v56  ;;  %v4217_v40 = vrot.slane %v4203_v35, %v9490_v44  ;;  %v9619_v13 = vrot.slane %v4120_v6, %v9490_v44  ;;  %v4105_v45 = vcombine.high %v4020_v28, %v4020_v28 }
 0x69f   : > { %4806 = vrot.lane.b32.xlu1 %v4591_v15, %s8088_s24  ;;  %v4543_v51 = vrot.slane %v9608_v7, %v9498_v56  ;;  %v4547_v36 = vrot.slane %v9611_v39, %v9498_v56  ;;  %v9635_v9 = vcombine.high %v9591_v20, %v9591_v20  ;;  %v4619_v49 = vrot.slane %v9625_v41, %v9498_v56 }
 0x6a0   : > { %v4219_v42 = vcombine.high %v4217_v40, %v4217_v40  ;;  %v4551_v48 = vrot.slane %v9619_v13, %v9498_v56  ;;  %v9638_v38 = vrot.slane %v4217_v40, %v9490_v44  ;;  %v4119_v60 = vrot.slane %v4105_v45, %v9490_v44 }
 0x6a1   : > { %4808 = vrot.lane.b32.xlu0 %v4595_v17, %s8088_s24  ;;  %v4623_v37 = vrot.slane %v9635_v9, %v9498_v56  ;;  %v9652_v0 = vcombine.high %v9611_v39, %v9611_v39  ;;  %v9662_v10 = vcombine.high %v9619_v13, %v9619_v13 }
 0x6a2   : > { %11275 = vst [vmem:[#allocation6_spill] sm:$0xff] %v9638_v38  ;;  %v9645_v58 = vrot.slane %v4219_v42, %v9490_v44  ;;  %v4627_v59 = vrot.slane %v9638_v38, %v9498_v56  ;;  %v4121_v4 = vcombine.high %v4119_v60, %v4119_v60  ;;  %v9665_v11 = vrot.slane %v4119_v60, %v9490_v44 }
 0x6a3   : > { %4810 = vrot.lane.b32.xlu1 %v4599_v31, %s8088_s24  ;;  %11277 = vst [vmem:[#allocation8_spill] sm:$0xff] %v9652_v0  ;;  %11278 = vst [vmem:[#allocation9_spill] sm:$0xff] %v9662_v10  ;;  %v4555_v46 = vrot.slane %v9652_v0, %v9498_v56  ;;  %v4559_v8 = vrot.slane %v9662_v10, %v9498_v56  ;;  %v9681_v19 = vcombine.high %v9638_v38, %v9638_v38 }
 0x6a4   : > { %11276 = vst [vmem:[#allocation7_spill] sm:$0xff] %v9645_v58  ;;  %v4631_v5 = vrot.slane %v9645_v58, %v9498_v56  ;;  %11279 = vst [vmem:[#allocation10_spill] sm:$0xff] %v9665_v11  ;;  %v9672_v15 = vrot.slane %v4121_v4, %v9490_v44  ;;  %v4563_v31 = vrot.slane %v9665_v11, %v9498_v56 }
 0x6a5   : > { %4772 = vrot.lane.b32.xlu0 %v4523_v30, %s8088_s24  ;;  %11281 = vst [vmem:[#allocation12_spill] sm:$0xff] %v9681_v19 }
 0x6a6   : > { %11280 = vst [vmem:[#allocation11_spill] sm:$0xff] %v9672_v15  ;;  %v4567_v54 = vrot.slane %v9672_v15, %v9498_v56 }
 0x6a7   : > { %4774 = vrot.lane.b32.xlu1 %v4527_v63, %s8088_s24  ;;  %v9689_v63 = vcombine.high %v9645_v58, %v9645_v58 }
 0x6a9   : > { %4776 = vrot.lane.b32.xlu0 %v4531_v24, %s8088_s24  ;;  %11282 = vst [vmem:[#allocation13_spill] sm:$0xff] %v9689_v63  ;;  %v4639_v33 = vrot.slane %v9689_v63, %v9498_v56 }
 0x6ab   : > { %4778 = vrot.lane.b32.xlu1 %v4535_v21, %s8088_s24  ;;  %v4635_v21 = vrot.slane %v9681_v19, %v9498_v56 }
 0x6ad   : > { %4812 = vrot.lane.b32.xlu0 %v4603_v29, %s8088_s24 }
 0x6af   : > { %4814 = vrot.lane.b32.xlu1 %v4607_v22, %s8088_s24 }
 0x6b1   : > { %4816 = vrot.lane.b32.xlu0 %v4611_v32, %s8088_s24  ;;  %v9708_v32 = vcombine.high %v9665_v11, %v9665_v11 }
 0x6b3   : > { %4818 = vrot.lane.b32.xlu1 %v4615_v1, %s8088_s24  ;;  %11285 = vst [vmem:[#allocation16_spill] sm:$0xff] %v9708_v32 }
 0x6b5   : > { %4780 = vrot.lane.b32.xlu0 %v4539_v53, %s8088_s24  ;;  %v9716_v53 = vcombine.high %v9672_v15, %v9672_v15 }
 0x6b7   : > { %4782 = vrot.lane.b32.xlu1 %v4543_v51, %s8088_s24  ;;  %v7988_v50 = vpop.f32.mrf.mxu1  ;;  %11286 = vst [vmem:[#allocation17_spill] sm:$0xff] %v9716_v53  ;;  %v4571_v51 = vrot.slane %v9708_v32, %v9498_v56  ;;  %v4575_v45 = vrot.slane %v9716_v53, %v9498_v56 }
 0x6b8   : > { %v4357_v17 = vrot.slane %v7988_v50, %v9490_v44  ;;  %v4350_v35 = vcombine.high %v7988_v50, %v7988_v50 }
 0x6b9   : > { %4784 = vrot.lane.b32.xlu0 %v4547_v36, %s8088_s24  ;;  %v4033_v26 = vpop.f32.mrf.mxu1 }
 0x6ba   : > { %v4365_v30 = vcombine.high %v4357_v17, %v4357_v17  ;;  %v9692_v24 = vrot.slane %v4357_v17, %v9490_v44  ;;  %v4259_v29 = vrot.slane %v4033_v26, %v9490_v44  ;;  %v4364_v36 = vrot.slane %v4350_v35, %v9490_v44 }
 0x6bb   : > { %4786 = vrot.lane.b32.xlu1 %v4551_v48, %s8088_s24 }
 0x6bc   : > { %11283 = vst [vmem:[#allocation14_spill] sm:$0xff] %v9692_v24  ;;  %v9699_v28 = vrot.slane %v4365_v30, %v9490_v44  ;;  %v4707_v22 = vrot.slane %v9692_v24, %v9498_v56  ;;  %v4267_v6 = vcombine.high %v4259_v29, %v4259_v29  ;;  %v9719_v40 = vrot.slane %v4259_v29, %v9490_v44 }
 0x6bd   : > { %4820 = vrot.lane.b32.xlu0 %v4619_v49, %s8088_s24  ;;  %v9733_v48 = vcombine.high %v9692_v24, %v9692_v24  ;;  %v4366_v60 = vcombine.high %v4364_v36, %v4364_v36 }
 0x6be   : > { %11284 = vst [vmem:[#allocation15_spill] sm:$0xff] %v9699_v28  ;;  %v4711_v1 = vrot.slane %v9699_v28, %v9498_v56  ;;  %11287 = vst [vmem:[#allocation18_spill] sm:$0xff] %v9719_v40  ;;  %v9727_v42 = vrot.slane %v4267_v6, %v9490_v44  ;;  %v4643_v49 = vrot.slane %v9719_v40, %v9498_v56 }
 0x6bf   : > { %4822 = vrot.lane.b32.xlu1 %v4623_v37, %s8088_s24  ;;  %11289 = vst [vmem:[#allocation20_spill] sm:$0xff] %v9733_v48  ;;  %v4252_v37 = vcombine.high %v4033_v26, %v4033_v26  ;;  %v9743_v4 = vcombine.high %v9699_v28, %v9699_v28  ;;  %v4715_v50 = vrot.slane %v9733_v48, %v9498_v56 }
 0x6c0   : > { %11288 = vst [vmem:[#allocation19_spill] sm:$0xff] %v9727_v42 }
 0x6c1   : > { %4824 = vrot.lane.b32.xlu0 %v4627_v59, %s8088_s24  ;;  %v4647_v59 = vrot.slane %v9727_v42, %v9498_v56  ;;  %11290 = vst [vmem:[#allocation21_spill] sm:$0xff] %v9743_v4  ;;  %v4266_v17 = vrot.slane %v4252_v37, %v9490_v44 }
 0x6c3   : > { %4826 = vrot.lane.b32.xlu1 %v4631_v5, %s8088_s24  ;;  %v9746_v5 = vrot.slane %v4364_v36, %v9490_v44  ;;  %v9773_v29 = vrot.slane %v4266_v17, %v9490_v44 }
 0x6c5   : > { %4788 = vrot.lane.b32.xlu0 %v4555_v46, %s8088_s24  ;;  %11291 = vst [vmem:[#allocation22_spill] sm:$0xff] %v9746_v5  ;;  %v9753_v46 = vrot.slane %v4366_v60, %v9490_v44  ;;  %v4723_v30 = vrot.slane %v9746_v5, %v9498_v56  ;;  %11295 = vst [vmem:[#allocation26_spill] sm:$0xff] %v9773_v29  ;;  %v4659_v36 = vrot.slane %v9773_v29, %v9498_v56 }
 0x6c7   : > { %4790 = vrot.lane.b32.xlu1 %v4559_v8, %s8088_s24  ;;  %11292 = vst [vmem:[#allocation23_spill] sm:$0xff] %v9753_v46  ;;  %v4719_v8 = vrot.slane %v9743_v4, %v9498_v56  ;;  %v4727_v26 = vrot.slane %v9753_v46, %v9498_v56 }
 0x6c9   : > { %4792 = vrot.lane.b32.xlu0 %v4563_v31, %s8088_s24  ;;  %v9760_v31 = vcombine.high %v9719_v40, %v9719_v40 }
 0x6cb   : > { %4794 = vrot.lane.b32.xlu1 %v4567_v54, %s8088_s24  ;;  %11293 = vst [vmem:[#allocation24_spill] sm:$0xff] %v9760_v31  ;;  %v4268_v54 = vcombine.high %v4266_v17, %v4266_v17 }
 0x6cd   : > { %4828 = vrot.lane.b32.xlu0 %v4635_v21, %s8088_s24  ;;  %v9770_v21 = vcombine.high %v9727_v42, %v9727_v42  ;;  %v9780_v35 = vrot.slane %v4268_v54, %v9490_v44 }
 0x6cf   : > { %4830 = vrot.lane.b32.xlu1 %v4639_v33, %s8088_s24  ;;  %11294 = vst [vmem:[#allocation25_spill] sm:$0xff] %v9770_v21  ;;  %v7989_v33 = vpop.f32.mrf.mxu1  ;;  %11296 = vst [vmem:[#allocation27_spill] sm:$0xff] %v9780_v35  ;;  %v4663_v37 = vrot.slane %v9780_v35, %v9498_v56 }
 0x6d0   : > { %v4406_v6 = vrot.slane %v7989_v33, %v9490_v44 }
 0x6d1   : > { %4864 = vrot.lane.b32.xlu0 %v4707_v22, %s8088_s24  ;;  %v4651_v22 = vrot.slane %v9760_v31, %v9498_v56 }
 0x6d3   : > { %4866 = vrot.lane.b32.xlu1 %v4711_v1, %s8088_s24  ;;  %v4655_v1 = vrot.slane %v9770_v21, %v9498_v56 }
 0x6d5   : > { %4796 = vrot.lane.b32.xlu0 %v4571_v51, %s8088_s24  ;;  %v7998_v51 = vpop.f32.mrf.mxu0 }
 0x6d6   : > { %v5844_v60 = vrot.slane %v7998_v51, %v9490_v44 }
 0x6d7   : > { %4798 = vrot.lane.b32.xlu1 %v4575_v45, %s8088_s24  ;;  %v9789_v45 = vcombine.high %v9746_v5, %v9746_v5 }
 0x6d9   : > { %4832 = vrot.lane.b32.xlu0 %v4643_v49, %s8088_s24  ;;  %11297 = vst [vmem:[#allocation28_spill] sm:$0xff] %v9789_v45  ;;  %v4414_v49 = vcombine.high %v4406_v6, %v4406_v6  ;;  %v4731_v17 = vrot.slane %v9789_v45, %v9498_v56 }
 0x6db   : > { %4834 = vrot.lane.b32.xlu1 %v4647_v59, %s8088_s24  ;;  %v9798_v59 = vcombine.high %v9753_v46, %v9753_v46 }
 0x6dd   : > { %4868 = vrot.lane.b32.xlu0 %v4715_v50, %s8088_s24  ;;  %11298 = vst [vmem:[#allocation29_spill] sm:$0xff] %v9798_v59  ;;  %v9801_v50 = vrot.slane %v4406_v6, %v9490_v44  ;;  %v4735_v54 = vrot.slane %v9798_v59, %v9498_v56 }
 0x6df   : > { %4870 = vrot.lane.b32.xlu1 %v4719_v8, %s8088_s24  ;;  %11299 = vst [vmem:[#allocation30_spill] sm:$0xff] %v9801_v50  ;;  %v9808_v8 = vrot.slane %v4414_v49, %v9490_v44  ;;  %v4739_v6 = vrot.slane %v9801_v50, %v9498_v56 }
 0x6e1   : > { %4872 = vrot.lane.b32.xlu0 %v4723_v30, %s8088_s24  ;;  %11300 = vst [vmem:[#allocation31_spill] sm:$0xff] %v9808_v8  ;;  %v5852_v30 = vcombine.high %v5844_v60, %v5844_v60  ;;  %v4743_v49 = vrot.slane %v9808_v8, %v9498_v56 }
 0x6e3   : > { %4874 = vrot.lane.b32.xlu1 %v4727_v26, %s8088_s24  ;;  %v9812_v26 = vpop.f32.mrf.mxu1 }
 0x6e5   : > { %4836 = vrot.lane.b32.xlu0 %v4651_v22, %s8088_s24  ;;  %v9815_v22 = vrot.slane %v5844_v60, %v9490_v44 }
 0x6e7   : > { %4838 = vrot.lane.b32.xlu1 %v4655_v1, %s8088_s24  ;;  %11301 = vst [vmem:[#allocation32_spill] sm:$0xff] %v9815_v22  ;;  %v4308_v1 = vrot.slane %v9812_v26, %v9490_v44  ;;  %v6262_v60 = vrot.slane %v9815_v22, %v9498_v56 }
 0x6e9   : > { %4840 = vrot.lane.b32.xlu0 %v4659_v36, %s8088_s24  ;;  %v9824_v36 = vrot.slane %v5852_v30, %v9490_v44  ;;  %v9843_v45 = vrot.slane %v4308_v1, %v9490_v44 }
 0x6eb   : > { %4842 = vrot.lane.b32.xlu1 %v4663_v37, %s8088_s24  ;;  %11302 = vst [vmem:[#allocation33_spill] sm:$0xff] %v9824_v36  ;;  %v9832_v37 = vcombine.high %v9773_v29, %v9773_v29  ;;  %v6266_v30 = vrot.slane %v9824_v36, %v9498_v56  ;;  %11305 = vst [vmem:[#allocation36_spill] sm:$0xff] %v9843_v45 }
 0x6ed   : > { %4876 = vrot.lane.b32.xlu0 %v4731_v17, %s8088_s24  ;;  %11303 = vst [vmem:[#allocation34_spill] sm:$0xff] %v9832_v37  ;;  %v4399_v17 = vcombine.high %v7989_v33, %v7989_v33  ;;  %v4667_v29 = vrot.slane %v9832_v37, %v9498_v56  ;;  %v4675_v37 = vrot.slane %v9843_v45, %v9498_v56 }
 0x6ef   : > { %4878 = vrot.lane.b32.xlu1 %v4735_v54, %s8088_s24  ;;  %v4316_v54 = vcombine.high %v4308_v1, %v4308_v1  ;;  %v4413_v33 = vrot.slane %v4399_v17, %v9490_v44  ;;  %v9859_v1 = vpop.f32.mrf.mxu0 }
 0x6f0   : > { %v5746_v17 = vrot.slane %v9859_v1, %v9490_v44  ;;  %v5739_v24 = vcombine.high %v9859_v1, %v9859_v1 }
 0x6f1   : > { %4880 = vrot.lane.b32.xlu0 %v4739_v6, %s8088_s24  ;;  %v9840_v6 = vcombine.high %v9780_v35, %v9780_v35  ;;  %v9857_v35 = vcombine.high %v9801_v50, %v9801_v50  ;;  %v9874_v50 = vrot.slane %v4413_v33, %v9490_v44  ;;  %v7999_v28 = vpop.f32.mrf.mxu0 }
 0x6f2   : > { %v5754_v5 = vcombine.high %v5746_v17, %v5746_v17  ;;  %v5753_v1 = vrot.slane %v5739_v24, %v9490_v44 }
 0x6f3   : > { %4882 = vrot.lane.b32.xlu1 %v4743_v49, %s8088_s24  ;;  %11304 = vst [vmem:[#allocation35_spill] sm:$0xff] %v9840_v6  ;;  %v9851_v49 = vrot.slane %v4316_v54, %v9490_v44  ;;  %11307 = vst [vmem:[#allocation38_spill] sm:$0xff] %v9857_v35  ;;  %v5703_v15 = vpop.f32.mrf.mxu0 }
 0x6f4   : > { %11309 = vst [vmem:[#allocation40_spill] sm:$0xff] %v9874_v50  ;;  %v5755_v24 = vcombine.high %v5753_v1, %v5753_v1 }
 0x6f5   : > { %6483 = vrot.lane.b32.xlu0 %v6262_v60, %s8088_s24  ;;  %11306 = vst [vmem:[#allocation37_spill] sm:$0xff] %v9851_v49  ;;  %v4671_v60 = vrot.slane %v9840_v6, %v9498_v56  ;;  %v4679_v54 = vrot.slane %v9851_v49, %v9498_v56  ;;  %v4747_v6 = vrot.slane %v9857_v35, %v9498_v56 }
 0x6f7   : > { %6485 = vrot.lane.b32.xlu1 %v6266_v30, %s8088_s24  ;;  %v9871_v30 = vcombine.high %v9808_v8, %v9808_v8  ;;  %v9886_v8 = vrot.slane %v5746_v17, %v9490_v44 }
 0x6f9   : > { %4844 = vrot.lane.b32.xlu0 %v4667_v29, %s8088_s24  ;;  %v4415_v29 = vcombine.high %v4413_v33, %v4413_v33  ;;  %11308 = vst [vmem:[#allocation39_spill] sm:$0xff] %v9871_v30  ;;  %v4751_v40 = vrot.slane %v9871_v30, %v9498_v56  ;;  %11311 = vst [vmem:[#allocation42_spill] sm:$0xff] %v9886_v8  ;;  %v4755_v33 = vrot.slane %v9874_v50, %v9498_v56 }
 0x6fa   : > { %v6198_v35 = vrot.slane %v9886_v8, %v9498_v56  ;;  %v9992_v21 = vcombine.high %v9886_v8, %v9886_v8  ;;  %v10009_v8 = vrot.slane %v5753_v1, %v9490_v44 }
 0x6fb   : > { %4846 = vrot.lane.b32.xlu1 %v4671_v60, %s8088_s24  ;;  %v5837_v60 = vcombine.high %v7998_v51, %v7998_v51 }
 0x6fc   : > { %11323 = vst [vmem:[#allocation54_spill] sm:$0xff] %v9992_v21  ;;  %11325 = vst [vmem:[#allocation56_spill] sm:$0xff] %v10009_v8  ;;  %v6214_v11 = vrot.slane %v10009_v8, %v9498_v56 }
 0x6fd   : > { %4848 = vrot.lane.b32.xlu0 %v4675_v37, %s8088_s24  ;;  %v9881_v37 = vrot.slane %v4415_v29, %v9490_v44  ;;  %v9894_v29 = vrot.slane %v5754_v5, %v9490_v44 }
 0x6ff   : > { %4850 = vrot.lane.b32.xlu1 %v4679_v54, %s8088_s24  ;;  %11310 = vst [vmem:[#allocation41_spill] sm:$0xff] %v9881_v37  ;;  %11312 = vst [vmem:[#allocation43_spill] sm:$0xff] %v9894_v29  ;;  %v4759_v51 = vrot.slane %v9881_v37, %v9498_v56  ;;  %v9900_v54 = vcombine.high %v9815_v22, %v9815_v22  ;;  %v9916_v22 = vcombine.high %v9824_v36, %v9824_v36 }
 0x700   : > { %v9937_v36 = vcombine.high %v9843_v45, %v9843_v45  ;;  %v10006_v48 = vcombine.high %v9894_v29, %v9894_v29 }
 0x701   : > { %4884 = vrot.lane.b32.xlu0 %v4747_v6, %s8088_s24  ;;  %v5851_v6 = vrot.slane %v5837_v60, %v9490_v44  ;;  %11313 = vst [vmem:[#allocation44_spill] sm:$0xff] %v9900_v54  ;;  %11314 = vst [vmem:[#allocation45_spill] sm:$0xff] %v9916_v22 }
 0x702   : > { %11317 = vst [vmem:[#allocation48_spill] sm:$0xff] %v9937_v36  ;;  %11324 = vst [vmem:[#allocation55_spill] sm:$0xff] %v10006_v48  ;;  %v6210_v1 = vrot.slane %v10006_v48, %v9498_v56 }
 0x703   : > { %4886 = vrot.lane.b32.xlu1 %v4751_v40, %s8088_s24  ;;  %v4301_v40 = vcombine.high %v9812_v26, %v9812_v26  ;;  %v5853_v5 = vcombine.high %v5851_v6, %v5851_v6  ;;  %v9919_v30 = vrot.slane %v5851_v6, %v9490_v44  ;;  %v6274_v6 = vrot.slane %v9916_v22, %v9498_v56 }
 0x705   : > { %4888 = vrot.lane.b32.xlu0 %v4755_v33, %s8088_s24  ;;  %v6202_v33 = vrot.slane %v9894_v29, %v9498_v56  ;;  %11315 = vst [vmem:[#allocation46_spill] sm:$0xff] %v9919_v30  ;;  %v4315_v26 = vrot.slane %v4301_v40, %v9490_v44 }
 0x707   : > { %v9902_v17 = vpop.permute.xlu0 %4800  ;;  %4890 = vrot.lane.b32.xlu1 %v4759_v51, %s8088_s24  ;;  %v9929_v51 = vrot.slane %v5853_v5, %v9490_v44  ;;  %v4317_v40 = vcombine.high %v4315_v26, %v4315_v26  ;;  %v9954_v45 = vrot.slane %v4315_v26, %v9490_v44 }
 0x709   : > { %6451 = vrot.lane.b32.xlu0 %v6198_v35, %s8088_s24  ;;  %v9910_v60 = vpop.permute.xlu1 %4802  ;;  %v6270_v35 = vrot.slane %v9900_v54, %v9498_v56  ;;  %11316 = vst [vmem:[#allocation47_spill] sm:$0xff] %v9929_v51  ;;  %v9951_v54 = vcombine.high %v9851_v49, %v9851_v49  ;;  %11319 = vst [vmem:[#allocation50_spill] sm:$0xff] %v9954_v45  ;;  %v10041_v48 = vcombine.high %v9929_v51, %v9929_v51 }
 0x70b   : > { %v9921_v59 = vpop.permute.xlu0 %4768  ;;  %6453 = vrot.lane.b32.xlu1 %v6202_v33, %s8088_s24  ;;  %v6278_v33 = vrot.slane %v9919_v30, %v9498_v56  ;;  %11318 = vst [vmem:[#allocation49_spill] sm:$0xff] %v9951_v54  ;;  %v4687_v26 = vrot.slane %v9951_v54, %v9498_v56  ;;  %v9988_v54 = vcombine.high %v9881_v37, %v9881_v37  ;;  %11328 = vst [vmem:[#allocation59_spill] sm:$0xff] %v10041_v48 }
 0x70d   : > { %6487 = vrot.lane.b32.xlu0 %v6270_v35, %s8088_s24  ;;  %v9931_v31 = vpop.permute.xlu1 %4770  ;;  %v6282_v35 = vrot.slane %v9929_v51, %v9498_v56  ;;  %11322 = vst [vmem:[#allocation53_spill] sm:$0xff] %v9988_v54  ;;  %v4767_v37 = vrot.slane %v9988_v54, %v9498_v56  ;;  %v6290_v51 = vrot.slane %v10041_v48, %v9498_v56 }
 0x70f   : > { %v9939_v46 = vpop.permute.xlu0 %4804  ;;  %6489 = vrot.lane.b32.xlu1 %v6274_v6, %s8088_s24  ;;  %v4683_v6 = vrot.slane %v9937_v36, %v9498_v56  ;;  %v4691_v36 = vrot.slane %v9954_v45, %v9498_v56 }
 0x711   : > { %6491 = vrot.lane.b32.xlu0 %v6278_v33, %s8088_s24  ;;  %v9945_v5 = vpop.permute.xlu1 %4806  ;;  %v9963_v33 = vrot.slane %v4317_v40, %v9490_v44 }
 0x713   : > { %v9956_v22 = vpop.permute.xlu0 %4808  ;;  %6493 = vrot.lane.b32.xlu1 %v6282_v35, %s8088_s24  ;;  %11320 = vst [vmem:[#allocation51_spill] sm:$0xff] %v9963_v33  ;;  %v9977_v35 = vcombine.high %v9874_v50, %v9874_v50  ;;  %v10076_v48 = vcombine.high %v9963_v33, %v9963_v33 }
 0x715   : > { %4852 = vrot.lane.b32.xlu0 %v4683_v6, %s8088_s24  ;;  %v9967_v49 = vpop.permute.xlu1 %4810  ;;  %11321 = vst [vmem:[#allocation52_spill] sm:$0xff] %v9977_v35  ;;  %v4695_v6 = vrot.slane %v9963_v33, %v9498_v56  ;;  %11332 = vst [vmem:[#allocation63_spill] sm:$0xff] %v10076_v48  ;;  %v4703_v33 = vrot.slane %v10076_v48, %v9498_v56 }
 0x717   : > { %v9971_v42 = vpop.permute.xlu0 %4772  ;;  %4854 = vrot.lane.b32.xlu1 %v4687_v26, %s8088_s24 }
 0x719   : > { %4856 = vrot.lane.b32.xlu0 %v4691_v36, %s8088_s24  ;;  %v9982_v40 = vpop.permute.xlu1 %4774  ;;  %v4763_v36 = vrot.slane %v9977_v35, %v9498_v56  ;;  %v5893_v35 = vrot.slane %v7999_v28, %v9490_v44 }
 0x71b   : > { %v9994_v50 = vpop.permute.xlu0 %4776  ;;  %4858 = vrot.lane.b32.xlu1 %v4695_v6, %s8088_s24  ;;  %v6206_v6 = vrot.slane %v9992_v21, %v9498_v56  ;;  %v10044_v4 = vrot.slane %v5893_v35, %v9490_v44 }
 0x71d   : > { %4892 = vrot.lane.b32.xlu0 %v4763_v36, %s8088_s24  ;;  %v10000_v26 = vpop.permute.xlu1 %4778  ;;  %v10018_v36 = vrot.slane %v5755_v24, %v9490_v44  ;;  %v5901_v24 = vcombine.high %v5893_v35, %v5893_v35  ;;  %11329 = vst [vmem:[#allocation60_spill] sm:$0xff] %v10044_v4  ;;  %v6294_v53 = vrot.slane %v10044_v4, %v9498_v56 }
 0x71f   : > { %v10011_v32 = vpop.permute.xlu0 %4812  ;;  %4894 = vrot.lane.b32.xlu1 %v4767_v37, %s8088_s24  ;;  %11326 = vst [vmem:[#allocation57_spill] sm:$0xff] %v10018_v36  ;;  %v10031_v37 = vcombine.high %v9919_v30, %v9919_v30  ;;  %v6218_v21 = vrot.slane %v10018_v36, %v9498_v56  ;;  %v10094_v58 = vcombine.high %v10018_v36, %v10018_v36 }
 0x720   : > { %v10115_v36 = vcombine.high %v10044_v4, %v10044_v4 }
 0x721   : > { %6455 = vrot.lane.b32.xlu0 %v6206_v6, %s8088_s24  ;;  %v10021_v29 = vpop.permute.xlu1 %4814  ;;  %11327 = vst [vmem:[#allocation58_spill] sm:$0xff] %v10031_v37  ;;  %11334 = vst [vmem:[#allocation65_spill] sm:$0xff] %v10094_v58 }
 0x722   : > { %11339 = vst [vmem:[#allocation70_spill] sm:$0xff] %v10115_v36 }
 0x723   : > { %v10025_v54 = vpop.permute.xlu0 %4816  ;;  %6457 = vrot.lane.b32.xlu1 %v6210_v1, %s8088_s24  ;;  %v6286_v1 = vrot.slane %v10031_v37, %v9498_v56  ;;  %v10065_v37 = vcombine.high %v9954_v45, %v9954_v45 }
 0x725   : > { %6459 = vrot.lane.b32.xlu0 %v6214_v11, %s8088_s24  ;;  %v10035_v6 = vpop.permute.xlu1 %4818  ;;  %v10053_v11 = vrot.slane %v5901_v24, %v9490_v44  ;;  %11331 = vst [vmem:[#allocation62_spill] sm:$0xff] %v10065_v37  ;;  %v4699_v45 = vrot.slane %v10065_v37, %v9498_v56 }
 0x727   : > { %v10046_v19 = vpop.permute.xlu0 %4780  ;;  %6461 = vrot.lane.b32.xlu1 %v6218_v21, %s8088_s24  ;;  %11330 = vst [vmem:[#allocation61_spill] sm:$0xff] %v10053_v11  ;;  %v5795_v21 = vrot.slane %v5703_v15, %v9490_v44  ;;  %v10129_v4 = vcombine.high %v10053_v11, %v10053_v11 }
 0x729   : > { %6495 = vrot.lane.b32.xlu0 %v6286_v1, %s8088_s24  ;;  %v10055_v30 = vpop.permute.xlu1 %4782  ;;  %v6298_v1 = vrot.slane %v10053_v11, %v9498_v56  ;;  %v5803_v63 = vcombine.high %v5795_v21, %v5795_v21  ;;  %v10097_v37 = vrot.slane %v5795_v21, %v9490_v44  ;;  %v6226_v21 = vrot.slane %v10094_v58, %v9498_v56 }
 0x72a   : > { %11342 = vst [vmem:[#allocation73_spill] sm:$0xff] %v10129_v4 }
 0x72b   : > { %v10059_v35 = vpop.permute.xlu0 %4784  ;;  %6497 = vrot.lane.b32.xlu1 %v6290_v51, %s8088_s24  ;;  %v10084_v51 = vcombine.high %v10009_v8, %v10009_v8  ;;  %11335 = vst [vmem:[#allocation66_spill] sm:$0xff] %v10097_v37  ;;  %v10150_v11 = vcombine.high %v10097_v37, %v10097_v37 }
 0x72d   : > { %6499 = vrot.lane.b32.xlu0 %v6294_v53, %s8088_s24  ;;  %v10070_v24 = vpop.permute.xlu1 %4786  ;;  %11333 = vst [vmem:[#allocation64_spill] sm:$0xff] %v10084_v51  ;;  %v5886_v53 = vcombine.high %v7999_v28, %v7999_v28  ;;  %11347 = vst [vmem:[#allocation78_spill] sm:$0xff] %v10150_v11 }
 0x72f   : > { %v10078_v38 = vpop.permute.xlu0 %4820  ;;  %6501 = vrot.lane.b32.xlu1 %v6298_v1, %s8088_s24  ;;  %v6222_v1 = vrot.slane %v10084_v51, %v9498_v56  ;;  %v5900_v28 = vrot.slane %v5886_v53, %v9490_v44  ;;  %v6230_v51 = vrot.slane %v10097_v37, %v9498_v56  ;;  %v5788_v53 = vcombine.high %v5703_v15, %v5703_v15 }
 0x731   : > { %4860 = vrot.lane.b32.xlu0 %v4699_v45, %s8088_s24  ;;  %v10088_v0 = vpop.permute.xlu1 %4822  ;;  %v10107_v45 = vrot.slane %v5803_v63, %v9490_v44  ;;  %v5902_v63 = vcombine.high %v5900_v28, %v5900_v28 }
 0x733   : > { %v10099_v8 = vpop.permute.xlu0 %4824  ;;  %4862 = vrot.lane.b32.xlu1 %v4703_v33, %s8088_s24  ;;  %11337 = vst [vmem:[#allocation68_spill] sm:$0xff] %v10107_v45  ;;  %v6234_v58 = vrot.slane %v10107_v45, %v9498_v56  ;;  %v10141_v15 = vrot.slane %v5902_v63, %v9490_v44 }
 0x734   : > { %11336 = vst [vmem:[#allocation67_spill] sm:$0xff] %v10099_v8  ;;  %v10132_v8 = vrot.slane %v5900_v28, %v9490_v44  ;;  %v6306_v28 = vrot.slane %v10129_v4, %v9498_v56  ;;  %v8002_v4 = vpop.f32.mrf.mxu1 }
 0x735   : > { %6463 = vrot.lane.b32.xlu0 %v6222_v1, %s8088_s24  ;;  %v10109_v48 = vpop.permute.xlu1 %4826  ;;  %11345 = vst [vmem:[#allocation76_spill] sm:$0xff] %v10141_v15  ;;  %v6314_v37 = vrot.slane %v10141_v15, %v9498_v56 }
 0x736   : > { %11338 = vst [vmem:[#allocation69_spill] sm:$0xff] %v10109_v48  ;;  %11343 = vst [vmem:[#allocation74_spill] sm:$0xff] %v10132_v8 }
 0x737   : > { %v10119_v33 = vpop.permute.xlu0 %4788  ;;  %6465 = vrot.lane.b32.xlu1 %v6226_v21, %s8088_s24  ;;  %v6302_v21 = vrot.slane %v10115_v36, %v9498_v56 }
 0x738   : > { %11340 = vst [vmem:[#allocation71_spill] sm:$0xff] %v10119_v33 }
 0x739   : > { %6467 = vrot.lane.b32.xlu0 %v6230_v51, %s8088_s24  ;;  %v10123_v1 = vpop.permute.xlu1 %4790  ;;  %v5802_v51 = vrot.slane %v5788_v53, %v9490_v44  ;;  %v10160_v53 = vcombine.high %v10107_v45, %v10107_v45 }
 0x73a   : > { %11341 = vst [vmem:[#allocation72_spill] sm:$0xff] %v10123_v1 }
 0x73b   : > { %v10134_v48 = vpop.permute.xlu0 %4792  ;;  %6469 = vrot.lane.b32.xlu1 %v6234_v58, %s8088_s24  ;;  %v6310_v58 = vrot.slane %v10132_v8, %v9498_v56  ;;  %v5804_v63 = vcombine.high %v5802_v51, %v5802_v51  ;;  %11349 = vst [vmem:[#allocation80_spill] sm:$0xff] %v10160_v53  ;;  %v10167_v36 = vrot.slane %v5802_v51, %v9490_v44 }
 0x73c   : > { %11344 = vst [vmem:[#allocation75_spill] sm:$0xff] %v10134_v48  ;;  %v6242_v51 = vrot.slane %v10160_v53, %v9498_v56  ;;  %v10199_v53 = vcombine.high %v10141_v15, %v10141_v15 }
 0x73d   : > { %6503 = vrot.lane.b32.xlu0 %v6302_v21, %s8088_s24  ;;  %v10144_v33 = vpop.permute.xlu1 %4794  ;;  %11351 = vst [vmem:[#allocation82_spill] sm:$0xff] %v10167_v36  ;;  %v10177_v45 = vrot.slane %v5804_v63, %v9490_v44 }
 0x73e   : > { %11346 = vst [vmem:[#allocation77_spill] sm:$0xff] %v10144_v33  ;;  %11358 = vst [vmem:[#allocation89_spill] sm:$0xff] %v10199_v53 }
 0x73f   : > { %v10152_v48 = vpop.permute.xlu0 %4828  ;;  %6505 = vrot.lane.b32.xlu1 %v6306_v28, %s8088_s24  ;;  %v6238_v28 = vrot.slane %v10150_v11, %v9498_v56  ;;  %11353 = vst [vmem:[#allocation84_spill] sm:$0xff] %v10177_v45  ;;  %v6250_v11 = vrot.slane %v10177_v45, %v9498_v56 }
 0x740   : > { %11348 = vst [vmem:[#allocation79_spill] sm:$0xff] %v10152_v48 }
 0x741   : > { %6507 = vrot.lane.b32.xlu0 %v6310_v58, %s8088_s24  ;;  %v10162_v21 = vpop.permute.xlu1 %4830  ;;  %v6040_v58 = vrot.slane %v8002_v4, %v9490_v44 }
 0x742   : > { %11350 = vst [vmem:[#allocation81_spill] sm:$0xff] %v10162_v21 }
 0x743   : > { %v10169_v48 = vpop.permute.xlu0 %4864  ;;  %6509 = vrot.lane.b32.xlu1 %v6314_v37, %s8088_s24  ;;  %v10189_v37 = vcombine.high %v10132_v8, %v10132_v8  ;;  %v6048_v63 = vcombine.high %v6040_v58, %v6040_v58 }
 0x744   : > { %11352 = vst [vmem:[#allocation83_spill] sm:$0xff] %v10169_v48  ;;  %v6246_v48 = vrot.slane %v10167_v36, %v9498_v56 }
 0x745   : > { %6471 = vrot.lane.b32.xlu0 %v6238_v28, %s8088_s24  ;;  %v10179_v33 = vpop.permute.xlu1 %4866  ;;  %11356 = vst [vmem:[#allocation87_spill] sm:$0xff] %v10189_v37 }
 0x746   : > { %11354 = vst [vmem:[#allocation85_spill] sm:$0xff] %v10179_v33  ;;  %v10202_v33 = vrot.slane %v6040_v58, %v9490_v44  ;;  %v6322_v58 = vrot.slane %v10199_v53, %v9498_v56 }
 0x747   : > { %v10183_v21 = vpop.permute.xlu0 %4796  ;;  %6473 = vrot.lane.b32.xlu1 %v6242_v51, %s8088_s24  ;;  %v6318_v51 = vrot.slane %v10189_v37, %v9498_v56 }
 0x748   : > { %11355 = vst [vmem:[#allocation86_spill] sm:$0xff] %v10183_v21  ;;  %11359 = vst [vmem:[#allocation90_spill] sm:$0xff] %v10202_v33  ;;  %v5716_v21 = vpop.f32.mrf.mxu1 }
 0x749   : > { %6475 = vrot.lane.b32.xlu0 %v6246_v48, %s8088_s24  ;;  %v10193_v28 = vpop.permute.xlu1 %4798  ;;  %v10211_v48 = vrot.slane %v6048_v63, %v9490_v44  ;;  %v6033_v63 = vcombine.high %v8002_v4, %v8002_v4 }
 0x74a   : > { %11357 = vst [vmem:[#allocation88_spill] sm:$0xff] %v10193_v28  ;;  %v5942_v28 = vrot.slane %v5716_v21, %v9490_v44 }
 0x74b   : > { %v10204_v8 = vpop.permute.xlu0 %4832  ;;  %6477 = vrot.lane.b32.xlu1 %v6250_v11, %s8088_s24  ;;  %11361 = vst [vmem:[#allocation92_spill] sm:$0xff] %v10211_v48  ;;  %v6390_v11 = vrot.slane %v10202_v33, %v9498_v56  ;;  %v6394_v53 = vrot.slane %v10211_v48, %v9498_v56  ;;  %v6047_v4 = vrot.slane %v6033_v63, %v9490_v44 }
 0x74c   : > { %11360 = vst [vmem:[#allocation91_spill] sm:$0xff] %v10204_v8  ;;  %v10220_v8 = vcombine.high %v10167_v36, %v10167_v36  ;;  %v10234_v36 = vcombine.high %v10177_v45, %v10177_v45  ;;  %v10255_v45 = vcombine.high %v10202_v33, %v10202_v33  ;;  %v10269_v33 = vcombine.high %v10211_v48, %v10211_v48 }
 0x74d   : > { %6511 = vrot.lane.b32.xlu0 %v6318_v51, %s8088_s24  ;;  %v10214_v15 = vpop.permute.xlu1 %4834  ;;  %v5950_v51 = vcombine.high %v5942_v28, %v5942_v28  ;;  %v6049_v63 = vcombine.high %v6047_v4, %v6047_v4 }
 0x74e   : > { %11362 = vst [vmem:[#allocation93_spill] sm:$0xff] %v10214_v15  ;;  %11363 = vst [vmem:[#allocation94_spill] sm:$0xff] %v10220_v8  ;;  %v10237_v15 = vrot.slane %v5942_v28, %v9490_v44  ;;  %v6258_v28 = vrot.slane %v10234_v36, %v9498_v56 }
 0x74f   : > { %v10222_v10 = vpop.permute.xlu0 %4868  ;;  %6513 = vrot.lane.b32.xlu1 %v6322_v58, %s8088_s24  ;;  %11366 = vst [vmem:[#allocation97_spill] sm:$0xff] %v10234_v36  ;;  %v6254_v58 = vrot.slane %v10220_v8, %v9498_v56  ;;  %11371 = vst [vmem:[#allocation102_spill] sm:$0xff] %v10255_v45  ;;  %v10272_v8 = vrot.slane %v6047_v4, %v9490_v44  ;;  %v6402_v4 = vrot.slane %v10269_v33, %v9498_v56 }
 0x750   : > { %11364 = vst [vmem:[#allocation95_spill] sm:$0xff] %v10222_v10  ;;  %11367 = vst [vmem:[#allocation98_spill] sm:$0xff] %v10237_v15  ;;  %v10290_v48 = vcombine.high %v10237_v15, %v10237_v15 }
 0x751   : > { %6547 = vrot.lane.b32.xlu0 %v6390_v11, %s8088_s24  ;;  %v10228_v37 = vpop.permute.xlu1 %4870  ;;  %v10247_v11 = vrot.slane %v5950_v51, %v9490_v44  ;;  %v5935_v51 = vcombine.high %v5716_v21, %v5716_v21  ;;  %11374 = vst [vmem:[#allocation105_spill] sm:$0xff] %v10269_v33  ;;  %11375 = vst [vmem:[#allocation106_spill] sm:$0xff] %v10272_v8  ;;  %v10281_v21 = vrot.slane %v6049_v63, %v9490_v44 }
 0x752   : > { %11365 = vst [vmem:[#allocation96_spill] sm:$0xff] %v10228_v37  ;;  %11379 = vst [vmem:[#allocation110_spill] sm:$0xff] %v10290_v48 }
 0x753   : > { %v10239_v10 = vpop.permute.xlu0 %4872  ;;  %6549 = vrot.lane.b32.xlu1 %v6394_v53, %s8088_s24  ;;  %11369 = vst [vmem:[#allocation100_spill] sm:$0xff] %v10247_v11  ;;  %v6326_v53 = vrot.slane %v10237_v15, %v9498_v56  ;;  %v6330_v36 = vrot.slane %v10247_v11, %v9498_v56  ;;  %11377 = vst [vmem:[#allocation108_spill] sm:$0xff] %v10281_v21  ;;  %v10304_v33 = vcombine.high %v10247_v11, %v10247_v11 }
 0x754   : > { %11368 = vst [vmem:[#allocation99_spill] sm:$0xff] %v10239_v10 }
 0x755   : > { %6479 = vrot.lane.b32.xlu0 %v6254_v58, %s8088_s24  ;;  %v10249_v37 = vpop.permute.xlu1 %4874  ;;  %11382 = vst [vmem:[#allocation113_spill] sm:$0xff] %v10304_v33 }
 0x756   : > { %11370 = vst [vmem:[#allocation101_spill] sm:$0xff] %v10249_v37 }
 0x757   : > { %v10257_v10 = vpop.permute.xlu0 %4836  ;;  %6481 = vrot.lane.b32.xlu1 %v6258_v28, %s8088_s24  ;;  %v6398_v28 = vrot.slane %v10255_v45, %v9498_v56  ;;  %v8003_v45 = vpop.f32.mrf.mxu1 }
 0x758   : > { %11372 = vst [vmem:[#allocation103_spill] sm:$0xff] %v10257_v10 }
 0x759   : > { %6515 = vrot.lane.b32.xlu0 %v6326_v53, %s8088_s24  ;;  %v10263_v58 = vpop.permute.xlu1 %4838  ;;  %v5949_v53 = vrot.slane %v5935_v51, %v9490_v44 }
 0x75a   : > { %11373 = vst [vmem:[#allocation104_spill] sm:$0xff] %v10263_v58 }
 0x75b   : > { %v10274_v10 = vpop.permute.xlu0 %4840  ;;  %6517 = vrot.lane.b32.xlu1 %v6330_v36, %s8088_s24  ;;  %v6406_v36 = vrot.slane %v10272_v8, %v9498_v56  ;;  %v5951_v63 = vcombine.high %v5949_v53, %v5949_v53  ;;  %v10307_v15 = vrot.slane %v5949_v53, %v9490_v44  ;;  %v6338_v53 = vrot.slane %v10304_v33, %v9498_v56 }
 0x75c   : > { %11376 = vst [vmem:[#allocation107_spill] sm:$0xff] %v10274_v10  ;;  %v10339_v33 = vcombine.high %v10281_v21, %v10281_v21 }
 0x75d   : > { %6551 = vrot.lane.b32.xlu0 %v6398_v28, %s8088_s24  ;;  %v10284_v37 = vpop.permute.xlu1 %4842  ;;  %v6410_v28 = vrot.slane %v10281_v21, %v9498_v56  ;;  %11383 = vst [vmem:[#allocation114_spill] sm:$0xff] %v10307_v15 }
 0x75e   : > { %11378 = vst [vmem:[#allocation109_spill] sm:$0xff] %v10284_v37  ;;  %11390 = vst [vmem:[#allocation121_spill] sm:$0xff] %v10339_v33 }
 0x75f   : > { %v10292_v10 = vpop.permute.xlu0 %4876  ;;  %6553 = vrot.lane.b32.xlu1 %v6402_v4, %s8088_s24  ;;  %v6334_v4 = vrot.slane %v10290_v48, %v9498_v56 }
 0x760   : > { %11380 = vst [vmem:[#allocation111_spill] sm:$0xff] %v10292_v10  ;;  %v6089_v10 = vrot.slane %v8003_v45, %v9490_v44 }
 0x761   : > { %6555 = vrot.lane.b32.xlu0 %v6406_v36, %s8088_s24  ;;  %v10298_v51 = vpop.permute.xlu1 %4878  ;;  %v10316_v36 = vrot.slane %v5951_v63, %v9490_v44 }
 0x762   : > { %11381 = vst [vmem:[#allocation112_spill] sm:$0xff] %v10298_v51  ;;  %v6097_v63 = vcombine.high %v6089_v10, %v6089_v10 }
 0x763   : > { %v10309_v37 = vpop.permute.xlu0 %4880  ;;  %6557 = vrot.lane.b32.xlu1 %v6410_v28, %s8088_s24  ;;  %11385 = vst [vmem:[#allocation116_spill] sm:$0xff] %v10316_v36  ;;  %v10329_v28 = vcombine.high %v10272_v8, %v10272_v8  ;;  %v6346_v48 = vrot.slane %v10316_v36, %v9498_v56 }
 0x764   : > { %11384 = vst [vmem:[#allocation115_spill] sm:$0xff] %v10309_v37  ;;  %v6342_v37 = vrot.slane %v10307_v15, %v9498_v56 }
 0x765   : > { %6519 = vrot.lane.b32.xlu0 %v6334_v4, %s8088_s24  ;;  %v10319_v11 = vpop.permute.xlu1 %4882  ;;  %11388 = vst [vmem:[#allocation119_spill] sm:$0xff] %v10329_v28 }
 0x766   : > { %11386 = vst [vmem:[#allocation117_spill] sm:$0xff] %v10319_v11  ;;  %v5719_v11 = vpop.f32.mrf.mxu1 }
 0x767   : > { %v10323_v51 = vpop.permute.xlu0 %6483  ;;  %6521 = vrot.lane.b32.xlu1 %v6338_v53, %s8088_s24  ;;  %v6414_v53 = vrot.slane %v10329_v28, %v9498_v56 }
 0x768   : > { %11387 = vst [vmem:[#allocation118_spill] sm:$0xff] %v10323_v51  ;;  %v10342_v51 = vrot.slane %v6089_v10, %v9490_v44  ;;  %v6418_v10 = vrot.slane %v10339_v33, %v9498_v56 }
 0x769   : > { %6523 = vrot.lane.b32.xlu0 %v6342_v37, %s8088_s24  ;;  %v10333_v4 = vpop.permute.xlu1 %6485  ;;  %v10351_v37 = vrot.slane %v6097_v63, %v9490_v44  ;;  %v6082_v63 = vcombine.high %v8003_v45, %v8003_v45 }
 0x76a   : > { %11389 = vst [vmem:[#allocation120_spill] sm:$0xff] %v10333_v4  ;;  %11391 = vst [vmem:[#allocation122_spill] sm:$0xff] %v10342_v51  ;;  %v5991_v4 = vrot.slane %v5719_v11, %v9490_v44 }
 0x76b   : > { %v10344_v8 = vpop.permute.xlu0 %4844  ;;  %6525 = vrot.lane.b32.xlu1 %v6346_v48, %s8088_s24  ;;  %11393 = vst [vmem:[#allocation124_spill] sm:$0xff] %v10351_v37  ;;  %v10364_v48 = vcombine.high %v10307_v15, %v10307_v15  ;;  %v6426_v33 = vrot.slane %v10351_v37, %v9498_v56  ;;  %v6096_v45 = vrot.slane %v6082_v63, %v9490_v44 }
 0x76c   : > { %11392 = vst [vmem:[#allocation123_spill] sm:$0xff] %v10344_v8  ;;  %v6422_v8 = vrot.slane %v10342_v51, %v9498_v56  ;;  %v10377_v1 = vrot.slane %v5991_v4, %v9490_v44 }
 0x76d   : > { %6559 = vrot.lane.b32.xlu0 %v6414_v53, %s8088_s24  ;;  %v10354_v21 = vpop.permute.xlu1 %4846  ;;  %11396 = vst [vmem:[#allocation127_spill] sm:$0xff] %v10364_v48  ;;  %v5999_v53 = vcombine.high %v5991_v4, %v5991_v4  ;;  %v10395_v4 = vcombine.high %v10342_v51, %v10342_v51  ;;  %v6098_v63 = vcombine.high %v6096_v45, %v6096_v45 }
 0x76e   : > { %11394 = vst [vmem:[#allocation125_spill] sm:$0xff] %v10354_v21  ;;  %v5984_v21 = vcombine.high %v5719_v11, %v5719_v11  ;;  %11399 = vst [vmem:[#allocation130_spill] sm:$0xff] %v10377_v1  ;;  %v10410_v51 = vcombine.high %v10351_v37, %v10351_v37 }
 0x76f   : > { %v10358_v58 = vpop.permute.xlu0 %4848  ;;  %6561 = vrot.lane.b32.xlu1 %v6418_v10, %s8088_s24  ;;  %v10387_v10 = vrot.slane %v5999_v53, %v9490_v44  ;;  %11403 = vst [vmem:[#allocation134_spill] sm:$0xff] %v10395_v4  ;;  %v10425_v37 = vrot.slane %v6098_v63, %v9490_v44 }
 0x770   : > { %11395 = vst [vmem:[#allocation126_spill] sm:$0xff] %v10358_v58  ;;  %v10374_v58 = vcombine.high %v10316_v36, %v10316_v36  ;;  %11406 = vst [vmem:[#allocation137_spill] sm:$0xff] %v10410_v51 }
 0x771   : > { %6563 = vrot.lane.b32.xlu0 %v6422_v8, %s8088_s24  ;;  %v10368_v28 = vpop.permute.xlu1 %4850  ;;  %v6350_v8 = vrot.slane %v10364_v48, %v9498_v56  ;;  %11401 = vst [vmem:[#allocation132_spill] sm:$0xff] %v10387_v10  ;;  %v5998_v48 = vrot.slane %v5984_v21, %v9490_v44  ;;  %v10413_v21 = vrot.slane %v6096_v45, %v9490_v44 }
 0x772   : > { %11397 = vst [vmem:[#allocation128_spill] sm:$0xff] %v10368_v28  ;;  %11398 = vst [vmem:[#allocation129_spill] sm:$0xff] %v10374_v58  ;;  %v6354_v11 = vrot.slane %v10374_v58, %v9498_v56  ;;  %v6362_v58 = vrot.slane %v10387_v10, %v9498_v56  ;;  %v10444_v63 = vcombine.high %v10387_v10, %v10387_v10 }
 0x773   : > { %v10379_v15 = vpop.permute.xlu0 %4884  ;;  %6565 = vrot.lane.b32.xlu1 %v6426_v33, %s8088_s24  ;;  %v6358_v33 = vrot.slane %v10377_v1, %v9498_v56  ;;  %11407 = vst [vmem:[#allocation138_spill] sm:$0xff] %v10413_v21  ;;  %v6000_v28 = vcombine.high %v5998_v48, %v5998_v48 }
 0x774   : > { %11400 = vst [vmem:[#allocation131_spill] sm:$0xff] %v10379_v15  ;;  %v6370_v10 = vrot.slane %v10444_v63, %v9498_v56 }
 0x775   : > { %6527 = vrot.lane.b32.xlu0 %v6350_v8, %s8088_s24  ;;  %v10389_v36 = vpop.permute.xlu1 %4886 }
 0x776   : > { %11402 = vst [vmem:[#allocation133_spill] sm:$0xff] %v10389_v36  ;;  %v10432_v36 = vrot.slane %v6000_v28, %v9490_v44 }
 0x777   : > { %v10400_v8 = vpop.permute.xlu0 %4888  ;;  %6529 = vrot.lane.b32.xlu1 %v6354_v11, %s8088_s24  ;;  %v6430_v11 = vrot.slane %v10395_v4, %v9498_v56  ;;  %v6442_v4 = vrot.slane %v10425_v37, %v9498_v56 }
 0x778   : > { %11404 = vst [vmem:[#allocation135_spill] sm:$0xff] %v10400_v8 }
 0x779   : > { %6531 = vrot.lane.b32.xlu0 %v6358_v33, %s8088_s24  ;;  %v10404_v53 = vpop.permute.xlu1 %4890  ;;  %v8089_v33 = vmov 1983009808  }
 0x77a   : > { %11405 = vst [vmem:[#allocation136_spill] sm:$0xff] %v10404_v53  ;;  %v6903_v8 = vunpack.c.l.s4 %v8089_v33  ;;  %v10421_v53 = vrot.slane %v5998_v48, %v9490_v44  ;;  %v10436_v33 = vcombine.high %v10377_v1, %v10377_v1  ;;  %v6438_v48 = vrot.slane %v10413_v21, %v9498_v56 }
 0x77b   : > { %v10415_v15 = vpop.permute.xlu0 %6451  ;;  %6533 = vrot.lane.b32.xlu1 %v6362_v58, %s8088_s24 }
 0x77c   : > { %11408 = vst [vmem:[#allocation139_spill] sm:$0xff] %v10415_v15  ;;  %v6434_v15 = vrot.slane %v10410_v51, %v9498_v56  ;;  %11410 = vst [vmem:[#allocation141_spill] sm:$0xff] %v10436_v33  ;;  %v10449_v44 = vcombine.high %v10421_v53, %v10421_v53 }
 0x77d   : > { %6567 = vrot.lane.b32.xlu0 %v6430_v11, %s8088_s24  ;;  %v10427_v45 = vpop.permute.xlu1 %6453  ;;  %v6904_v11 = vunpack.c.0.s8 %v6903_v8  ;;  %v6366_v8 = vrot.slane %v10436_v33, %v9498_v56  ;;  %v6374_v33 = vrot.slane %v10421_v53, %v9498_v56 }
 0x77e   : > { %11409 = vst [vmem:[#allocation140_spill] sm:$0xff] %v10427_v45  ;;  %11411 = vst [vmem:[#allocation142_spill] sm:$0xff] %v10449_v44  ;;  %v6378_v45 = vrot.slane %v10432_v36, %v9498_v56 }
 0x77f   : > { %v10438_v58 = vpop.permute.xlu0 %6487  ;;  %6569 = vrot.lane.b32.xlu1 %v6434_v15, %s8088_s24  ;;  %v10462_v15 = vcombine.high %v10432_v36, %v10432_v36  ;;  %v10465_v1 = vsub.s32 %v6904_v11, %v9487_v43  ;;  %v6382_v43 = vrot.slane %v10449_v44, %v9498_v56  ;;  %v4964_v11 = vsel %vm4960_vm10, %v9554_v62, %v9982_v40 }
 0x780   : > { %v10500_v44 = vcombine.high %v10425_v37, %v10425_v37  ;;  %v4979_v40 = vsel %vm4960_vm10, %v9517_v16, %v9939_v46  ;;  %v4982_v16 = vsel %vm4960_vm10, %v9537_v14, %v9967_v49  ;;  %v4967_v14 = vsel %vm4960_vm10, %v9600_v55, %v10046_v19  ;;  %v6707_v19 = vld [vmem:[%s10529_s6] sm:$0xff] }
 0x781   : > { %6571 = vrot.lane.b32.xlu0 %v6438_v48, %s8088_s24  ;;  %v10452_v28 = vpop.permute.xlu1 %6489  ;;  %v10470_v48 = vsel %vm4960_vm10, %v9501_v57, %v9910_v60  ;;  %v10484_v57 = vcombine.high %v10413_v21, %v10413_v21  ;;  %v4977_v60 = vsel %vm4960_vm10, %v9495_v52, %v9902_v17  ;;  %v4961_v52 = vsel %vm4960_vm10, %v9504_v61, %v9921_v59 }
 0x782   : > { %v7036_v21 = vcombine.low %v4977_v60, %v10470_v48  ;;  %v6386_v62 = vrot.slane %v10462_v15, %v9498_v56  ;;  %v4963_v61 = vsel %vm4960_vm10, %v9544_v47, %v9971_v42  ;;  %v4983_v47 = vsel %vm4960_vm10, %v9573_v25, %v10011_v32  ;;  %6740 = vst.msk [vmem:[%s10541_s9] sm:$0xff] %vm6739_vm15, %v6707_v19  ;;  %v11422_v19 = vld [vmem:[#allocation88_spill] sm:$0xff] }
 0x783   : > { %v10456_v51 = vpop.permute.xlu0 %6491  ;;  %6573 = vrot.lane.b32.xlu1 %v6442_v4, %s8088_s24  ;;  %v4980_v4 = vsel %vm4960_vm10, %v9527_v12, %v9945_v5  ;;  %v4984_v12 = vsel %vm4960_vm10, %v9581_v34, %v10021_v29  ;;  %v4962_v5 = vsel %vm4960_vm10, %v9511_v2, %v9931_v31  ;;  %v4968_v34 = vsel %vm4960_vm10, %v9608_v7, %v10055_v30 }
 0x784   : > { %v7037_v2 = vcombine.low %v4979_v40, %v4980_v4  ;;  %v6901_v46 = vcombine.low %v4963_v61, %v4964_v11  ;;  %v4966_v7 = vsel %vm4960_vm10, %v9564_v23, %v10000_v26  ;;  %v7054_v42 = vcombine.low %v4983_v47, %v4984_v12  ;;  %v6708_v26 = vld [vmem:[%s10529_s6 + $0x8] sm:$0xff]  ;;  %v11415_v47 = vld [vmem:[#allocation7_spill] sm:$0xff] }
 0x785   : > { %6535 = vrot.lane.b32.xlu0 %v6366_v8, %s8088_s24  ;;  %v10496_v8 = vpop.permute.xlu1 %6493  ;;  %v4988_v25 = vsel %vm4960_vm10, %v9635_v9, %v10088_v0  ;;  %v6900_v31 = vcombine.low %v4961_v52, %v4962_v5  ;;  %v4981_v59 = vsel %vm4960_vm10, %v9530_v3, %v9956_v22  ;;  %v4986_v23 = vsel %vm4960_vm10, %v9591_v20, %v10035_v6  ;;  %v6715_v3 = vld [vmem:[%s10529_s6 + $0x40] sm:$0xff]  ;;  %v6716_v20 = vld [vmem:[%s10529_s6 + $0x48] sm:$0xff] }
 0x786   : > { %v6918_v49 = vcombine.low %v4967_v14, %v4968_v34  ;;  %v7053_v55 = vcombine.low %v4981_v59, %v4982_v16  ;;  %v4965_v9 = vsel %vm4960_vm10, %v9557_v18, %v9994_v50  ;;  %v4987_v0 = vsel %vm4960_vm10, %v9625_v41, %v10078_v38  ;;  %6748 = vst.msk [vmem:[%s10541_s9 + $0x40] sm:$0xff] %vm6739_vm15, %v6715_v3  ;;  %v11412_v52 = vld [vmem:[#allocation72_spill] sm:$0xff]  ;;  %v11413_v12 = vld [vmem:[#allocation9_spill] sm:$0xff] }
 0x787   : > { %v10509_v17 = vpop.permute.xlu0 %4852  ;;  %6537 = vrot.lane.b32.xlu1 %v6370_v10, %s8088_s24  ;;  %v6917_v22 = vcombine.low %v4965_v9, %v4966_v7  ;;  %v4985_v29 = vsel %vm4960_vm10, %v9584_v27, %v10025_v54  ;;  %v4970_v18 = vsel %vm4960_vm10, %v9619_v13, %v10070_v24  ;;  %v7105_v50 = vcombine.low %v4987_v0, %v4988_v25  ;;  %v11416_v7 = vld [vmem:[#allocation71_spill] sm:$0xff]  ;;  %v11418_v25 = vld [vmem:[#allocation81_spill] sm:$0xff]  ;;  %v11421_v0 = vld [vmem:[#allocation6_spill] sm:$0xff] }
 0x788   : > { %6749 = vst.msk [vmem:[%s10541_s9 + $0x48] sm:$0xff] %vm6739_vm15, %v6716_v20  ;;  %v7051_v41 = vrot.slane %v7037_v2, %v10465_v1  ;;  %v10587_v38 = vrot.slane %v6901_v46, %v10465_v1  ;;  %v10590_v27 = vrot.slane %v7054_v42, %v10465_v1  ;;  %v7104_v13 = vcombine.low %v4985_v29, %v4986_v23  ;;  %v11414_v46 = vld [vmem:[#allocation69_spill] sm:$0xff]  ;;  %v11417_v42 = vld [vmem:[#allocation8_spill] sm:$0xff]  ;;  %v11420_v9 = vld [vmem:[#allocation67_spill] sm:$0xff] }
 0x789   : > { %6539 = vrot.lane.b32.xlu0 %v6374_v33, %s8088_s24  ;;  %v10552_v32 = vpop.permute.xlu1 %4854  ;;  %v10596_v6 = vrot.slane %v6918_v49, %v10465_v1  ;;  %v4969_v24 = vsel %vm4960_vm10, %v9611_v39, %v10059_v35  ;;  %6741 = vst.msk [vmem:[%s10541_s9 + $0x8] sm:$0xff] %vm6739_vm15, %v6708_v26  ;;  %v6719_v33 = vld [vmem:[%s10529_s6 + $0x60] sm:$0xff]  ;;  %v7044_v48 = vrot.slane %v7036_v21, %v10465_v1  ;;  %v6720_v39 = vld [vmem:[%s10529_s6 + $0x68] sm:$0xff] }
 0x78a   : > { %v7061_v60 = vrot.slane %v7053_v55, %v10465_v1  ;;  %v6968_v4 = vcombine.low %v4969_v24, %v4970_v18  ;;  %6752 = vst.msk [vmem:[%s10541_s9 + $0x60] sm:$0xff] %vm6739_vm15, %v6719_v33  ;;  %v10616_v35 = vrot.slane %v6917_v22, %v10465_v1  ;;  %v10619_v11 = vrot.slane %v7105_v50, %v10465_v1  ;;  %v6711_v49 = vld [vmem:[%s10529_s6 + $0x20] sm:$0xff]  ;;  %v11423_v22 = vld [vmem:[#allocation17_spill] sm:$0xff] }
 0x78b   : > { %v10560_v30 = vpop.permute.xlu0 %4856  ;;  %6541 = vrot.lane.b32.xlu1 %v6378_v45, %s8088_s24  ;;  %v6446_v45 = vrot.slane %v10484_v57, %v9498_v56  ;;  %v4972_v21 = vsel %vm4960_vm10, %v11413_v12, %v11412_v52  ;;  %v6450_v5 = vrot.slane %v10500_v44, %v9498_v56  ;;  %6753 = vst.msk [vmem:[%s10541_s9 + $0x68] sm:$0xff] %vm6739_vm15, %v6720_v39  ;;  %6744 = vst.msk [vmem:[%s10541_s9 + $0x20] sm:$0xff] %vm6739_vm15, %v6711_v49  ;;  %v6712_v18 = vld [vmem:[%s10529_s6 + $0x28] sm:$0xff]  ;;  %v11427_v26 = vld [vmem:[#allocation12_spill] sm:$0xff] }
 0x78c   : > { %v7069_v61 = vcombine.low %v7061_v60, %v10590_v27  ;;  %v10632_v34 = vrot.slane %v7104_v13, %v10465_v1  ;;  %v6933_v16 = vcombine.low %v10616_v35, %v10596_v6  ;;  %v4990_v56 = vsel %vm4960_vm10, %v11415_v47, %v11414_v46  ;;  %v11426_v13 = vld [vmem:[#allocation79_spill] sm:$0xff]  ;;  %v11428_v24 = vld [vmem:[#allocation96_spill] sm:$0xff]  ;;  %6745 = vst.msk [vmem:[%s10541_s9 + $0x28] sm:$0xff] %vm6739_vm15, %v6712_v18  ;;  %v11431_v60 = vld [vmem:[#allocation10_spill] sm:$0xff] }
 0x78d   : > { %6543 = vrot.lane.b32.xlu0 %v6382_v43, %s8088_s24  ;;  %v10592_v54 = vpop.permute.xlu1 %4858  ;;  %v6908_v43 = vrot.slane %v6900_v31, %v10465_v1  ;;  %v4971_v14 = vsel %vm4960_vm10, %v11417_v42, %v11416_v7  ;;  %v11419_v31 = vld [vmem:[#allocation13_spill] sm:$0xff]  ;;  %v10651_v55 = vrot.slane %v6968_v4, %v10465_v1  ;;  %v4989_v3 = vsel %vm4960_vm10, %v11421_v0, %v11420_v9  ;;  %v11432_v35 = vld [vmem:[#allocation86_spill] sm:$0xff]  ;;  %v11436_v46 = vld [vmem:[#allocation95_spill] sm:$0xff] }
 0x78e   : > { %v4992_v59 = vsel %vm4960_vm10, %v11419_v31, %v11418_v25  ;;  %v6969_v20 = vcombine.low %v4971_v14, %v4972_v21  ;;  %v4976_v29 = vsel %vm4960_vm10, %v11423_v22, %v11422_v19  ;;  %v7120_v50 = vcombine.low %v10632_v34, %v10619_v11  ;;  %v11433_v11 = vld [vmem:[#allocation16_spill] sm:$0xff]  ;;  %v11434_v21 = vld [vmem:[#allocation85_spill] sm:$0xff]  ;;  %v11441_v0 = vld [vmem:[#allocation19_spill] sm:$0xff] }
 0x78f   : > { %v10601_v10 = vpop.permute.xlu0 %4892  ;;  %6545 = vrot.lane.b32.xlu1 %v6386_v62, %s8088_s24  ;;  %v7052_v62 = vcombine.low %v7044_v48, %v7051_v41  ;;  %v6916_v40 = vcombine.low %v6908_v43, %v10587_v38  ;;  %v11424_v41 = vld [vmem:[#allocation77_spill] sm:$0xff]  ;;  %v11425_v38 = vld [vmem:[#allocation11_spill] sm:$0xff]  ;;  %v4991_v6 = vsel %vm4960_vm10, %v11427_v26, %v11426_v13  ;;  %v7121_v48 = vcombine.low %v4989_v3, %v4990_v56  ;;  %v11437_v47 = vld [vmem:[#allocation20_spill] sm:$0xff] }
 0x790   : > { %v4974_v27 = vsel %vm4960_vm10, %v11425_v38, %v11424_v41  ;;  %v11430_v43 = vld [vmem:[#allocation75_spill] sm:$0xff]  ;;  %v7122_v39 = vcombine.low %v4991_v6, %v4992_v59  ;;  %v4975_v52 = vsel %vm4960_vm10, %v11433_v11, %v11432_v35  ;;  %v5011_v56 = vsel %vm4960_vm10, %v11437_v47, %v11436_v46  ;;  %v11438_v7 = vld [vmem:[#allocation104_spill] sm:$0xff]  ;;  %v11439_v42 = vld [vmem:[#allocation25_spill] sm:$0xff] }
 0x791   : > { %6575 = vrot.lane.b32.xlu0 %v6446_v45, %s8088_s24  ;;  %v10634_v2 = vpop.permute.xlu1 %4894  ;;  %v11429_v45 = vld [vmem:[#allocation21_spill] sm:$0xff]  ;;  %v4973_v4 = vsel %vm4960_vm10, %v11431_v60, %v11430_v43  ;;  %v6986_v34 = vcombine.low %v4975_v52, %v4976_v29  ;;  %v4996_v14 = vsel %vm4960_vm10, %v11439_v42, %v11438_v7  ;;  %v6731_v31 = vld [vmem:[%s10529_s6 + $0xc0] sm:$0xff]  ;;  %v6983_v59 = vrot.slane %v6969_v20, %v10465_v1  ;;  %v11442_v29 = vld [vmem:[#allocation83_spill] sm:$0xff] }
 0x792   : > { %v5012_v33 = vsel %vm4960_vm10, %v11429_v45, %v11428_v24  ;;  %v6985_v49 = vcombine.low %v4973_v4, %v4974_v27  ;;  %v11440_v9 = vld [vmem:[#allocation93_spill] sm:$0xff]  ;;  %6764 = vst.msk [vmem:[%s10541_s9 + $0xc0] sm:$0xff] %vm6739_vm15, %v6731_v31  ;;  %v11443_v18 = vld [vmem:[#allocation14_spill] sm:$0xff]  ;;  %v11445_v13 = vld [vmem:[#allocation23_spill] sm:$0xff]  ;;  %v7129_v31 = vrot.slane %v7121_v48, %v10465_v1 }
 0x793   : > { %v10647_v23 = vpop.permute.xlu0 %6455  ;;  %6577 = vrot.lane.b32.xlu1 %v6450_v5, %s8088_s24  ;;  %v11435_v5 = vld [vmem:[#allocation15_spill] sm:$0xff]  ;;  %v4994_v3 = vsel %vm4960_vm10, %v11441_v0, %v11440_v9  ;;  %v7309_v19 = vcombine.low %v5011_v56, %v5012_v33  ;;  %v6732_v22 = vld [vmem:[%s10529_s6 + $0xc8] sm:$0xff]  ;;  %v5009_v41 = vsel %vm4960_vm10, %v11443_v18, %v11442_v29  ;;  %v11447_v26 = vld [vmem:[#allocation24_spill] sm:$0xff]  ;;  %v7136_v33 = vrot.slane %v7122_v39, %v10465_v1 }
 0x794   : > { %v11444_v38 = vld [vmem:[#allocation101_spill] sm:$0xff]  ;;  %v11446_v27 = vld [vmem:[#allocation103_spill] sm:$0xff]  ;;  %v11448_v24 = vld [vmem:[#allocation112_spill] sm:$0xff]  ;;  %6765 = vst.msk [vmem:[%s10541_s9 + $0xc8] sm:$0xff] %vm6739_vm15, %v6732_v22  ;;  %v6984_v22 = vcombine.low %v10651_v55, %v6983_v59 }
 0x795   : > { %7460 = vrot.lane.b32.xlu0 %v7052_v62, %s8090_s15  ;;  %v10683_v12 = vpop.permute.xlu1 %6457  ;;  %v5010_v62 = vsel %vm4960_vm10, %v11435_v5, %v11434_v21  ;;  %v5014_v20 = vsel %vm4960_vm10, %v11445_v13, %v11444_v38  ;;  %v4995_v6 = vsel %vm4960_vm10, %v11447_v26, %v11446_v27  ;;  %v11449_v45 = vld [vmem:[#allocation29_spill] sm:$0xff]  ;;  %v11450_v60 = vld [vmem:[#allocation91_spill] sm:$0xff]  ;;  %v11451_v4 = vld [vmem:[#allocation18_spill] sm:$0xff]  ;;  %v7000_v21 = vrot.slane %v6986_v34, %v10465_v1 }
 0x796   : > { %v7308_v43 = vcombine.low %v5009_v41, %v5010_v62  ;;  %v4993_v35 = vsel %vm4960_vm10, %v11451_v4, %v11450_v60  ;;  %v7173_v11 = vcombine.low %v4995_v6, %v4996_v14  ;;  %v11452_v46 = vld [vmem:[#allocation99_spill] sm:$0xff]  ;;  %v11455_v39 = vld [vmem:[#allocation28_spill] sm:$0xff]  ;;  %v7323_v14 = vrot.slane %v7309_v19, %v10465_v1  ;;  %v6724_v34 = vld [vmem:[%s10529_s6 + $0x88] sm:$0xff] }
 0x797   : > { %v10694_v25 = vpop.permute.xlu0 %6459  ;;  %7462 = vrot.lane.b32.xlu1 %v7069_v61, %s8090_s15  ;;  %v5016_v61 = vsel %vm4960_vm10, %v11449_v45, %v11448_v24  ;;  %v7172_v5 = vcombine.low %v4993_v35, %v4994_v3  ;;  %v11454_v56 = vld [vmem:[#allocation111_spill] sm:$0xff]  ;;  %v6723_v42 = vld [vmem:[%s10529_s6 + $0x80] sm:$0xff]  ;;  %v6993_v3 = vrot.slane %v6985_v49, %v10465_v1  ;;  %6757 = vst.msk [vmem:[%s10541_s9 + $0x88] sm:$0xff] %vm6739_vm15, %v6724_v34  ;;  %v11456_v49 = vld [vmem:[#allocation109_spill] sm:$0xff] }
 0x798   : > { %v5015_v62 = vsel %vm4960_vm10, %v11455_v39, %v11454_v56  ;;  %6756 = vst.msk [vmem:[%s10541_s9 + $0x80] sm:$0xff] %vm6739_vm15, %v6723_v42  ;;  %v7137_v48 = vcombine.low %v7129_v31, %v7136_v33  ;;  %v7316_v19 = vrot.slane %v7308_v43, %v10465_v1  ;;  %v10749_v29 = vrot.slane %v7173_v11, %v10465_v1  ;;  %v11457_v38 = vld [vmem:[#allocation27_spill] sm:$0xff]  ;;  %v11458_v13 = vld [vmem:[#allocation125_spill] sm:$0xff]  ;;  %v6735_v27 = vld [vmem:[%s10529_s6 + $0xe0] sm:$0xff] }
 0x799   : > { %7444 = vrot.lane.b32.xlu0 %v6916_v40, %s8090_s15  ;;  %v10724_v52 = vpop.permute.xlu1 %6461  ;;  %v11453_v40 = vld [vmem:[#allocation22_spill] sm:$0xff]  ;;  %v7326_v0 = vcombine.low %v5015_v62, %v5016_v61  ;;  %v7001_v18 = vcombine.low %v6993_v3, %v7000_v21  ;;  %v10752_v41 = vrot.slane %v7172_v5, %v10465_v1  ;;  %v11460_v45 = vld [vmem:[#allocation133_spill] sm:$0xff]  ;;  %v11461_v61 = vld [vmem:[#allocation39_spill] sm:$0xff]  ;;  %6768 = vst.msk [vmem:[%s10541_s9 + $0xe0] sm:$0xff] %vm6739_vm15, %v6735_v27 }
 0x79a   : > { %v5013_v47 = vsel %vm4960_vm10, %v11453_v40, %v11452_v46  ;;  %v7324_v26 = vcombine.low %v7316_v19, %v7323_v14  ;;  %v5020_v33 = vsel %vm4960_vm10, %v11461_v61, %v11460_v45  ;;  %v6736_v43 = vld [vmem:[%s10529_s6 + $0xe8] sm:$0xff]  ;;  %v11462_v60 = vld [vmem:[#allocation107_spill] sm:$0xff]  ;;  %v11463_v4 = vld [vmem:[#allocation26_spill] sm:$0xff] }
 0x79b   : > { %v10733_v7 = vpop.permute.xlu0 %6495  ;;  %v7325_v9 = vcombine.low %v5013_v47, %v5014_v20  ;;  %7446 = vrot.lane.b32.xlu1 %v6933_v16, %s8090_s15  ;;  %v11459_v20 = vld [vmem:[#allocation35_spill] sm:$0xff]  ;;  %v7340_v24 = vrot.slane %v7326_v0, %v10465_v1  ;;  %v4997_v35 = vsel %vm4960_vm10, %v11463_v4, %v11462_v60  ;;  %v11464_v11 = vld [vmem:[#allocation117_spill] sm:$0xff]  ;;  %v11466_v46 = vld [vmem:[#allocation120_spill] sm:$0xff]  ;;  %6769 = vst.msk [vmem:[%s10541_s9 + $0xe8] sm:$0xff] %vm6739_vm15, %v6736_v43 }
 0x79c   : > { %v5000_v55 = vsel %vm4960_vm10, %v11459_v20, %v11458_v13  ;;  %v11465_v21 = vld [vmem:[#allocation31_spill] sm:$0xff]  ;;  %v11467_v40 = vld [vmem:[#allocation33_spill] sm:$0xff]  ;;  %v11469_v39 = vld [vmem:[#allocation34_spill] sm:$0xff]  ;;  %v7188_v42 = vcombine.low %v10752_v41, %v10749_v29 }
 0x79d   : > { %7468 = vrot.lane.b32.xlu0 %v7120_v50, %s8090_s15  ;;  %v6498_v16 = vpop.permute.xlu1 %6497  ;;  %v4998_v50 = vsel %vm4960_vm10, %v11457_v38, %v11456_v49  ;;  %v7333_v6 = vrot.slane %v7325_v9, %v10465_v1  ;;  %v5018_v5 = vsel %vm4960_vm10, %v11465_v21, %v11464_v11  ;;  %v6660_v47 = vsel %vm4960_vm10, %v11467_v40, %v11466_v46  ;;  %v11468_v56 = vld [vmem:[#allocation123_spill] sm:$0xff]  ;;  %v11471_v0 = vld [vmem:[#allocation38_spill] sm:$0xff]  ;;  %v11475_v38 = vld [vmem:[#allocation32_spill] sm:$0xff] }
 0x79e   : > { %v4999_v62 = vsel %vm4960_vm10, %v11469_v39, %v11468_v56  ;;  %v7189_v31 = vcombine.low %v4997_v35, %v4998_v50  ;;  %v11470_v9 = vld [vmem:[#allocation131_spill] sm:$0xff]  ;;  %v11473_v19 = vld [vmem:[#allocation30_spill] sm:$0xff]  ;;  %v11476_v29 = vld [vmem:[#allocation53_spill] sm:$0xff] }
 0x79f   : > { %v10760_v59 = vpop.permute.xlu0 %6499  ;;  %7470 = vrot.lane.b32.xlu1 %v7137_v48, %s8090_s15  ;;  %v7190_v14 = vcombine.low %v4999_v62, %v5000_v55  ;;  %v5019_v34 = vsel %vm4960_vm10, %v11471_v0, %v11470_v9  ;;  %v11472_v48 = vld [vmem:[#allocation115_spill] sm:$0xff]  ;;  %v5024_v41 = vsel %vm4960_vm10, %v11476_v29, %v10634_v2  ;;  %v6717_v55 = vld [vmem:[%s10529_s6 + $0x50] sm:$0xff]  ;;  %v7341_v27 = vcombine.low %v7333_v6, %v7340_v24  ;;  %v11477_v43 = vld [vmem:[#allocation45_spill] sm:$0xff] }
 0x7a0   : > { %v5017_v49 = vsel %vm4960_vm10, %v11473_v19, %v11472_v48  ;;  %v7377_v20 = vcombine.low %v5019_v34, %v5020_v33  ;;  %v6662_v60 = vsel %vm4960_vm10, %v11477_v43, %v10452_v28  ;;  %6750 = vst.msk [vmem:[%s10541_s9 + $0x50] sm:$0xff] %vm6739_vm15, %v6717_v55  ;;  %v6718_v4 = vld [vmem:[%s10529_s6 + $0x58] sm:$0xff]  ;;  %v11478_v33 = vld [vmem:[#allocation126_spill] sm:$0xff]  ;;  %v11479_v35 = vld [vmem:[#allocation36_spill] sm:$0xff] }
 0x7a1   : > { %7452 = vrot.lane.b32.xlu0 %v6984_v22, %s8090_s15  ;;  %v10792_v3 = vpop.permute.xlu1 %6501  ;;  %v11474_v22 = vld [vmem:[#allocation118_spill] sm:$0xff]  ;;  %v7376_v45 = vcombine.low %v5017_v49, %v5018_v5  ;;  %v5001_v11 = vsel %vm4960_vm10, %v11479_v35, %v11478_v33  ;;  %v11480_v21 = vld [vmem:[#allocation128_spill] sm:$0xff]  ;;  %v11481_v2 = vld [vmem:[#allocation37_spill] sm:$0xff]  ;;  %6751 = vst.msk [vmem:[%s10541_s9 + $0x58] sm:$0xff] %vm6739_vm15, %v6718_v4  ;;  %v7204_v40 = vrot.slane %v7190_v14, %v10465_v1 }
 0x7a2   : > { %v6659_v13 = vsel %vm4960_vm10, %v11475_v38, %v11474_v22  ;;  %v5002_v6 = vsel %vm4960_vm10, %v11481_v2, %v11480_v21  ;;  %v11482_v24 = vld [vmem:[#allocation136_spill] sm:$0xff]  ;;  %v11483_v5 = vld [vmem:[#allocation41_spill] sm:$0xff]  ;;  %v11487_v34 = vld [vmem:[#allocation135_spill] sm:$0xff]  ;;  %v7197_v38 = vrot.slane %v7189_v31, %v10465_v1 }
 0x7a3   : > { %v4861_v50 = vpop.permute.xlu0 %4860  ;;  %v7070_v61 = vcombine.low %v6659_v13, %v6660_v47  ;;  %7454 = vrot.lane.b32.xlu1 %v7001_v18, %s8090_s15  ;;  %v5022_v46 = vsel %vm4960_vm10, %v11483_v5, %v11482_v24  ;;  %v11484_v28 = vld [vmem:[#allocation52_spill] sm:$0xff]  ;;  %v11486_v39 = vld [vmem:[#allocation49_spill] sm:$0xff]  ;;  %v11489_v14 = vld [vmem:[#allocation59_spill] sm:$0xff]  ;;  %v7240_v13 = vcombine.low %v5001_v11, %v5002_v6  ;;  %v7384_v55 = vrot.slane %v7376_v45, %v10465_v1 }
 0x7a4   : > { %v5023_v18 = vsel %vm4960_vm10, %v11484_v28, %v10601_v10  ;;  %v11485_v47 = vld [vmem:[#allocation44_spill] sm:$0xff]  ;;  %v5004_v62 = vsel %vm4960_vm10, %v11486_v39, %v10552_v32  ;;  %v7391_v10 = vrot.slane %v7377_v20, %v10465_v1  ;;  %v6666_v49 = vsel %vm4960_vm10, %v11489_v14, %v6498_v16  ;;  %v6728_v20 = vld [vmem:[%s10529_s6 + $0xa8] sm:$0xff]  ;;  %v11491_v43 = vld [vmem:[#allocation47_spill] sm:$0xff] }
 0x7a5   : > { %7492 = vrot.lane.b32.xlu0 %v7324_v26, %s8090_s15  ;;  %v6661_v56 = vsel %vm4960_vm10, %v11485_v47, %v10438_v58  ;;  %v7394_v9 = vcombine.low %v5023_v18, %v5024_v41  ;;  %v4863_v0 = vpop.permute.xlu1 %4862  ;;  %v11488_v26 = vld [vmem:[#allocation40_spill] sm:$0xff]  ;;  %v6664_v16 = vsel %vm4960_vm10, %v11491_v43, %v10496_v8  ;;  %v11492_v31 = vld [vmem:[#allocation58_spill] sm:$0xff]  ;;  %6761 = vst.msk [vmem:[%s10541_s9 + $0xa8] sm:$0xff] %vm6739_vm15, %v6728_v20  ;;  %v11494_v2 = vld [vmem:[#allocation63_spill] sm:$0xff] }
 0x7a6   : > { %v5021_v48 = vsel %vm4960_vm10, %v11488_v26, %v11487_v34  ;;  %v7071_v19 = vcombine.low %v6661_v56, %v6662_v60  ;;  %v6727_v58 = vld [vmem:[%s10529_s6 + $0xa0] sm:$0xff]  ;;  %v6665_v4 = vsel %vm4960_vm10, %v11492_v31, %v10733_v7  ;;  %v7392_v11 = vcombine.low %v7384_v55, %v7391_v10  ;;  %v11493_v21 = vld [vmem:[#allocation46_spill] sm:$0xff]  ;;  %v11495_v28 = vld [vmem:[#allocation55_spill] sm:$0xff] }
 0x7a7   : > { %v6464_v22 = vpop.permute.xlu0 %6463  ;;  %v7393_v29 = vcombine.low %v5021_v48, %v5022_v46  ;;  %v11490_v32 = vld [vmem:[#allocation48_spill] sm:$0xff]  ;;  %7494 = vrot.lane.b32.xlu1 %v7341_v27, %s8090_s15  ;;  %6760 = vst.msk [vmem:[%s10541_s9 + $0xa0] sm:$0xff] %vm6739_vm15, %v6727_v58  ;;  %v7205_v27 = vcombine.low %v7197_v38, %v7204_v40  ;;  %v7408_v45 = vrot.slane %v7394_v9, %v10465_v1  ;;  %v11497_v47 = vld [vmem:[#allocation43_spill] sm:$0xff]  ;;  %v11500_v34 = vld [vmem:[#allocation54_spill] sm:$0xff] }
 0x7a8   : > { %v5003_v41 = vsel %vm4960_vm10, %v11490_v32, %v10509_v17  ;;  %v7078_v17 = vrot.slane %v7070_v61, %v10465_v1  ;;  %v7088_v33 = vcombine.low %v6665_v4, %v6666_v49  ;;  %v7085_v8 = vrot.slane %v7071_v19, %v10465_v1  ;;  %v6709_v61 = vld [vmem:[%s10529_s6 + $0x10] sm:$0xff]  ;;  %v11496_v40 = vld [vmem:[#allocation140_spill] sm:$0xff]  ;;  %v11502_v38 = vld [vmem:[#allocation65_spill] sm:$0xff] }
 0x7a9   : > { %v7241_v60 = vcombine.low %v5003_v41, %v5004_v62  ;;  %7476 = vrot.lane.b32.xlu0 %v7188_v42, %s8090_s15  ;;  %v6466_v35 = vpop.permute.xlu1 %6465  ;;  %v6663_v7 = vsel %vm4960_vm10, %v11493_v21, %v10456_v51  ;;  %v5008_v42 = vsel %vm4960_vm10, %v11494_v2, %v4863_v0  ;;  %v7248_v24 = vrot.slane %v7240_v13, %v10465_v1  ;;  %v6710_v51 = vld [vmem:[%s10529_s6 + $0x18] sm:$0xff]  ;;  %v11499_v0 = vld [vmem:[#allocation62_spill] sm:$0xff]  ;;  %v11505_v31 = vld [vmem:[#allocation57_spill] sm:$0xff] }
 0x7aa   : > { %v7401_v5 = vrot.slane %v7393_v29, %v10465_v1  ;;  %v7087_v46 = vcombine.low %v6663_v7, %v6664_v16  ;;  %v6646_v18 = vsel %vm4960_vm10, %v11495_v28, %v10683_v12  ;;  %6742 = vst.msk [vmem:[%s10541_s9 + $0x10] sm:$0xff] %vm6739_vm15, %v6709_v61  ;;  %v6644_v56 = vsel %vm4960_vm10, %v11497_v47, %v11496_v40  ;;  %v11498_v62 = vld [vmem:[#allocation51_spill] sm:$0xff]  ;;  %v6721_v32 = vld [vmem:[%s10529_s6 + $0x70] sm:$0xff]  ;;  %v11510_v61 = vld [vmem:[#allocation73_spill] sm:$0xff] }
 0x7ab   : > { %v10866_v6 = vpop.permute.xlu0 %6467  ;;  %7478 = vrot.lane.b32.xlu1 %v7205_v27, %s8090_s15  ;;  %v7255_v39 = vrot.slane %v7241_v60, %v10465_v1  ;;  %v5006_v9 = vsel %vm4960_vm10, %v11498_v62, %v10592_v54  ;;  %v5007_v10 = vsel %vm4960_vm10, %v11499_v0, %v4861_v50  ;;  %6743 = vst.msk [vmem:[%s10541_s9 + $0x18] sm:$0xff] %vm6739_vm15, %v6710_v51  ;;  %v11501_v54 = vld [vmem:[#allocation50_spill] sm:$0xff]  ;;  %v11503_v41 = vld [vmem:[#allocation139_spill] sm:$0xff]  ;;  %6754 = vst.msk [vmem:[%s10541_s9 + $0x70] sm:$0xff] %vm6739_vm15, %v6721_v32 }
 0x7ac   : > { %v7409_v12 = vcombine.low %v7401_v5, %v7408_v45  ;;  %v6645_v26 = vsel %vm4960_vm10, %v11500_v34, %v10647_v23  ;;  %v7102_v48 = vrot.slane %v7088_v33, %v10465_v1  ;;  %v7258_v19 = vcombine.low %v5007_v10, %v5008_v42  ;;  %v11504_v20 = vld [vmem:[#allocation42_spill] sm:$0xff]  ;;  %v11507_v33 = vld [vmem:[#allocation61_spill] sm:$0xff]  ;;  %v11511_v28 = vld [vmem:[#allocation60_spill] sm:$0xff] }
 0x7ad   : > { %7500 = vrot.lane.b32.xlu0 %v7392_v11, %s8090_s15  ;;  %v6470_v14 = vpop.permute.xlu1 %6469  ;;  %v7086_v49 = vcombine.low %v7078_v17, %v7085_v8  ;;  %v5005_v50 = vsel %vm4960_vm10, %v11501_v54, %v10560_v30  ;;  %v6935_v58 = vcombine.low %v6645_v26, %v6646_v18  ;;  %v6650_v13 = vsel %vm4960_vm10, %v11502_v38, %v6466_v35  ;;  %v6713_v16 = vld [vmem:[%s10529_s6 + $0x30] sm:$0xff]  ;;  %v11506_v17 = vld [vmem:[#allocation64_spill] sm:$0xff]  ;;  %v6722_v47 = vld [vmem:[%s10529_s6 + $0x78] sm:$0xff] }
 0x7ae   : > { %v6643_v23 = vsel %vm4960_vm10, %v11504_v20, %v11503_v41  ;;  %v7095_v55 = vrot.slane %v7087_v46, %v10465_v1  ;;  %v7257_v43 = vcombine.low %v5005_v50, %v5006_v9  ;;  %v7256_v60 = vcombine.low %v7248_v24, %v7255_v39  ;;  %6746 = vst.msk [vmem:[%s10541_s9 + $0x30] sm:$0xff] %vm6739_vm15, %v6713_v16  ;;  %v11509_v2 = vld [vmem:[#allocation70_spill] sm:$0xff]  ;;  %v11512_v0 = vld [vmem:[#allocation68_spill] sm:$0xff] }
 0x7af   : > { %v6504_v29 = vpop.permute.xlu0 %6503  ;;  %7502 = vrot.lane.b32.xlu1 %v7409_v12, %s8090_s15  ;;  %v6934_v30 = vcombine.low %v6643_v23, %v6644_v56  ;;  %v6648_v4 = vsel %vm4960_vm10, %v11505_v31, %v10724_v52  ;;  %v6649_v27 = vsel %vm4960_vm10, %v11506_v17, %v6464_v22  ;;  %v6668_v35 = vsel %vm4960_vm10, %v11507_v33, %v10792_v3  ;;  %v11508_v52 = vld [vmem:[#allocation56_spill] sm:$0xff]  ;;  %v11517_v31 = vld [vmem:[#allocation74_spill] sm:$0xff] }
 0x7b0   : > { %v7103_v45 = vcombine.low %v7095_v55, %v7102_v48  ;;  %v7272_v11 = vrot.slane %v7258_v19, %v10465_v1  ;;  %v6952_v8 = vcombine.low %v6649_v27, %v6650_v13  ;;  %v6949_v7 = vrot.slane %v6935_v58, %v10465_v1  ;;  %6755 = vst.msk [vmem:[%s10541_s9 + $0x78] sm:$0xff] %vm6739_vm15, %v6722_v47  ;;  %v11513_v48 = vld [vmem:[#allocation66_spill] sm:$0xff]  ;;  %v11515_v13 = vld [vmem:[#allocation80_spill] sm:$0xff] }
 0x7b1   : > { %7464 = vrot.lane.b32.xlu0 %v7086_v49, %s8090_s15  ;;  %v6506_v21 = vpop.permute.xlu1 %6505  ;;  %v6647_v22 = vsel %vm4960_vm10, %v11508_v52, %v10694_v25  ;;  %v6669_v42 = vsel %vm4960_vm10, %v11509_v2, %v6504_v29  ;;  %v7265_v3 = vrot.slane %v7257_v43, %v10465_v1  ;;  %v6667_v18 = vsel %vm4960_vm10, %v11511_v28, %v10760_v59  ;;  %v11514_v58 = vld [vmem:[#allocation78_spill] sm:$0xff]  ;;  %v11516_v43 = vld [vmem:[#allocation76_spill] sm:$0xff] }
 0x7b2   : > { %v6670_v24 = vsel %vm4960_vm10, %v11510_v61, %v6506_v21  ;;  %v6951_v46 = vcombine.low %v6647_v22, %v6648_v4  ;;  %v6942_v25 = vrot.slane %v6934_v30, %v10465_v1  ;;  %v7138_v40 = vcombine.low %v6667_v18, %v6668_v35  ;;  %v11519_v35 = vld [vmem:[#allocation89_spill] sm:$0xff] }
 0x7b3   : > { %v6508_v5 = vpop.permute.xlu0 %6507  ;;  %v7139_v51 = vcombine.low %v6669_v42, %v6670_v24  ;;  %7466 = vrot.lane.b32.xlu1 %v7103_v45, %s8090_s15  ;;  %v7273_v56 = vcombine.low %v7265_v3, %v7272_v11  ;;  %v6966_v39 = vrot.slane %v6952_v8, %v10465_v1  ;;  %v6652_v10 = vsel %vm4960_vm10, %v11512_v0, %v6470_v14  ;;  %v11518_v45 = vld [vmem:[#allocation87_spill] sm:$0xff]  ;;  %v11520_v42 = vld [vmem:[#allocation84_spill] sm:$0xff]  ;;  %v11521_v3 = vld [vmem:[#allocation82_spill] sm:$0xff] }
 0x7b4   : > { %v6950_v9 = vcombine.low %v6942_v25, %v6949_v7  ;;  %v6959_v34 = vrot.slane %v6951_v46, %v10465_v1  ;;  %v7146_v26 = vrot.slane %v7138_v40, %v10465_v1  ;;  %v6651_v19 = vsel %vm4960_vm10, %v11513_v48, %v10866_v6  ;;  %v6714_v6 = vld [vmem:[%s10529_s6 + $0x38] sm:$0xff]  ;;  %v6733_v7 = vld [vmem:[%s10529_s6 + $0xd0] sm:$0xff]  ;;  %v11523_v40 = vld [vmem:[#allocation97_spill] sm:$0xff] }
 0x7b5   : > { %7484 = vrot.lane.b32.xlu0 %v7256_v60, %s8090_s15  ;;  %v6510_v62 = vpop.permute.xlu1 %6509  ;;  %v7153_v59 = vrot.slane %v7139_v51, %v10465_v1  ;;  %v7002_v54 = vcombine.low %v6651_v19, %v6652_v10  ;;  %6747 = vst.msk [vmem:[%s10541_s9 + $0x38] sm:$0xff] %vm6739_vm15, %v6714_v6  ;;  %v6671_v4 = vsel %vm4960_vm10, %v11517_v31, %v6508_v5  ;;  %6766 = vst.msk [vmem:[%s10541_s9 + $0xd0] sm:$0xff] %vm6739_vm15, %v6733_v7  ;;  %v11522_v51 = vld [vmem:[#allocation94_spill] sm:$0xff] }
 0x7b6   : > { %v6967_v49 = vcombine.low %v6959_v34, %v6966_v39  ;;  %v6672_v16 = vsel %vm4960_vm10, %v11516_v43, %v6510_v62  ;;  %v6725_v62 = vld [vmem:[%s10529_s6 + $0x90] sm:$0xff] }
 0x7b7   : > { %v6472_v12 = vpop.permute.xlu0 %6471  ;;  %7486 = vrot.lane.b32.xlu1 %v7273_v56, %s8090_s15  ;;  %v7154_v50 = vcombine.low %v7146_v26, %v7153_v59  ;;  %v7010_v20 = vrot.slane %v7002_v54, %v10465_v1  ;;  %v7155_v17 = vcombine.low %v6671_v4, %v6672_v16  ;;  %6758 = vst.msk [vmem:[%s10541_s9 + $0x90] sm:$0xff] %vm6739_vm15, %v6725_v62  ;;  %v11524_v59 = vld [vmem:[#allocation92_spill] sm:$0xff]  ;;  %v11525_v48 = vld [vmem:[#allocation90_spill] sm:$0xff] }
 0x7b8   : > { %v6653_v38 = vsel %vm4960_vm10, %v11514_v58, %v6472_v12  ;;  %v11527_v58 = vld [vmem:[#allocation105_spill] sm:$0xff] }
 0x7b9   : > { %7448 = vrot.lane.b32.xlu0 %v6950_v9, %s8090_s15  ;;  %v6474_v14 = vpop.permute.xlu1 %6473  ;;  %v7163_v52 = vrot.slane %v7155_v17, %v10465_v1  ;;  %v11530_v17 = vld [vmem:[#allocation110_spill] sm:$0xff] }
 0x7ba   : > { %v6654_v29 = vsel %vm4960_vm10, %v11515_v13, %v6474_v14  ;;  %v11526_v14 = vld [vmem:[#allocation102_spill] sm:$0xff] }
 0x7bb   : > { %v6476_v32 = vpop.permute.xlu0 %6475  ;;  %v7003_v41 = vcombine.low %v6653_v38, %v6654_v29  ;;  %7450 = vrot.lane.b32.xlu1 %v6967_v49, %s8090_s15 }
 0x7bc   : > { %v6655_v46 = vsel %vm4960_vm10, %v11521_v3, %v6476_v32  ;;  %v6734_v32 = vld [vmem:[%s10529_s6 + $0xd8] sm:$0xff] }
 0x7bd   : > { %7472 = vrot.lane.b32.xlu0 %v7154_v50, %s8090_s15  ;;  %v7017_v23 = vrot.slane %v7003_v41, %v10465_v1  ;;  %v6478_v55 = vpop.permute.xlu1 %6477  ;;  %6767 = vst.msk [vmem:[%s10541_s9 + $0xd8] sm:$0xff] %vm6739_vm15, %v6734_v32 }
 0x7be   : > { %v6656_v61 = vsel %vm4960_vm10, %v11520_v42, %v6478_v55 }
 0x7bf   : > { %v6512_v30 = vpop.permute.xlu0 %6511  ;;  %v7018_v60 = vcombine.low %v7010_v20, %v7017_v23  ;;  %v7019_v28 = vcombine.low %v6655_v46, %v6656_v61  ;;  %v11528_v23 = vld [vmem:[#allocation100_spill] sm:$0xff] }
 0x7c0   : > { %v6673_v33 = vsel %vm4960_vm10, %v11518_v45, %v6512_v30  ;;  %v11529_v30 = vld [vmem:[#allocation98_spill] sm:$0xff]  ;;  %v11531_v45 = vld [vmem:[#allocation113_spill] sm:$0xff] }
 0x7c1   : > { %7456 = vrot.lane.b32.xlu0 %v7018_v60, %s8090_s15  ;;  %v6514_v27 = vpop.permute.xlu1 %6513  ;;  %v7027_v9 = vrot.slane %v7019_v28, %v10465_v1  ;;  %v11534_v28 = vld [vmem:[#allocation119_spill] sm:$0xff] }
 0x7c2   : > { %v6674_v11 = vsel %vm4960_vm10, %v11519_v35, %v6514_v27 }
 0x7c3   : > { %v6548_v8 = vpop.permute.xlu0 %6547  ;;  %v7156_v21 = vcombine.low %v6673_v33, %v6674_v11 }
 0x7c4   : > { %v6691_v19 = vsel %vm4960_vm10, %v11525_v48, %v6548_v8  ;;  %v6726_v8 = vld [vmem:[%s10529_s6 + $0x98] sm:$0xff] }
 0x7c5   : > { %v7170_v22 = vrot.slane %v7156_v21, %v10465_v1  ;;  %v6550_v2 = vpop.permute.xlu1 %6549  ;;  %6759 = vst.msk [vmem:[%s10541_s9 + $0x98] sm:$0xff] %vm6739_vm15, %v6726_v8 }
 0x7c6   : > { %v6692_v12 = vsel %vm4960_vm10, %v11524_v59, %v6550_v2 }
 0x7c7   : > { %v6480_v24 = vpop.permute.xlu0 %6479  ;;  %v7171_v5 = vcombine.low %v7163_v52, %v7170_v22  ;;  %v7342_v49 = vcombine.low %v6691_v19, %v6692_v12  ;;  %v11532_v22 = vld [vmem:[#allocation108_spill] sm:$0xff] }
 0x7c8   : > { %v6657_v25 = vsel %vm4960_vm10, %v11522_v51, %v6480_v24  ;;  %v11533_v24 = vld [vmem:[#allocation106_spill] sm:$0xff]  ;;  %v11535_v51 = vld [vmem:[#allocation121_spill] sm:$0xff] }
 0x7c9   : > { %7474 = vrot.lane.b32.xlu1 %v7171_v5, %s8090_s15  ;;  %v6482_v18 = vpop.permute.xlu1 %6481  ;;  %v7350_v41 = vrot.slane %v7342_v49, %v10465_v1  ;;  %v11538_v49 = vld [vmem:[#allocation127_spill] sm:$0xff] }
 0x7ca   : > { %v6658_v47 = vsel %vm4960_vm10, %v11523_v40, %v6482_v18 }
 0x7cb   : > { %v6516_v56 = vpop.permute.xlu0 %6515  ;;  %v7020_v39 = vcombine.low %v6657_v25, %v6658_v47 }
 0x7cc   : > { %v6675_v60 = vsel %vm4960_vm10, %v11529_v30, %v6516_v56  ;;  %v6729_v56 = vld [vmem:[%s10529_s6 + $0xb0] sm:$0xff] }
 0x7cd   : > { %v7034_v0 = vrot.slane %v7020_v39, %v10465_v1  ;;  %v6518_v10 = vpop.permute.xlu1 %6517  ;;  %6762 = vst.msk [vmem:[%s10541_s9 + $0xb0] sm:$0xff] %vm6739_vm15, %v6729_v56 }
 0x7ce   : > { %v6676_v55 = vsel %vm4960_vm10, %v11528_v23, %v6518_v10 }
 0x7cf   : > { %v6552_v34 = vpop.permute.xlu0 %6551  ;;  %v7035_v26 = vcombine.low %v7027_v9, %v7034_v0  ;;  %v7206_v31 = vcombine.low %v6675_v60, %v6676_v55  ;;  %v11536_v0 = vld [vmem:[#allocation116_spill] sm:$0xff]  ;;  %v6737_v55 = vld [vmem:[%s10529_s6 + $0xf0] sm:$0xff] }
 0x7d0   : > { %v6693_v50 = vsel %vm4960_vm10, %v11526_v14, %v6552_v34  ;;  %v11537_v34 = vld [vmem:[#allocation114_spill] sm:$0xff]  ;;  %v11539_v14 = vld [vmem:[#allocation129_spill] sm:$0xff]  ;;  %6770 = vst.msk [vmem:[%s10541_s9 + $0xf0] sm:$0xff] %vm6739_vm15, %v6737_v55 }
 0x7d1   : > { %7458 = vrot.lane.b32.xlu1 %v7035_v26, %s8090_s15  ;;  %v6554_v54 = vpop.permute.xlu1 %6553  ;;  %v7214_v21 = vrot.slane %v7206_v31, %v10465_v1  ;;  %v11541_v31 = vld [vmem:[#allocation130_spill] sm:$0xff] }
 0x7d2   : > { %v6694_v38 = vsel %vm4960_vm10, %v11527_v58, %v6554_v54 }
 0x7d3   : > { %v6556_v13 = vpop.permute.xlu0 %6555  ;;  %v7343_v29 = vcombine.low %v6693_v50, %v6694_v38 }
 0x7d4   : > { %v6695_v5 = vsel %vm4960_vm10, %v11533_v24, %v6556_v13 }
 0x7d5   : > { %v7357_v6 = vrot.slane %v7343_v29, %v10465_v1  ;;  %v6558_v20 = vpop.permute.xlu1 %6557 }
 0x7d6   : > { %v6696_v2 = vsel %vm4960_vm10, %v11532_v22, %v6558_v20 }
 0x7d7   : > { %v6520_v43 = vpop.permute.xlu0 %6519  ;;  %v7358_v16 = vcombine.low %v7350_v41, %v7357_v6  ;;  %v7359_v3 = vcombine.low %v6695_v5, %v6696_v2  ;;  %v11546_v5 = vld [vmem:[#allocation122_spill] sm:$0xff] }
 0x7d8   : > { %v6677_v27 = vsel %vm4960_vm10, %v11530_v17, %v6520_v43  ;;  %v11542_v17 = vld [vmem:[#allocation137_spill] sm:$0xff] }
 0x7d9   : > { %7496 = vrot.lane.b32.xlu0 %v7358_v16, %s8090_s15  ;;  %v6522_v4 = vpop.permute.xlu1 %6521  ;;  %v7367_v39 = vrot.slane %v7359_v3, %v10465_v1  ;;  %v11540_v16 = vld [vmem:[#allocation132_spill] sm:$0xff] }
 0x7da   : > { %v6678_v33 = vsel %vm4960_vm10, %v11531_v45, %v6522_v4  ;;  %v6730_v45 = vld [vmem:[%s10529_s6 + $0xb8] sm:$0xff] }
 0x7db   : > { %v6524_v35 = vpop.permute.xlu0 %6523  ;;  %v7207_v11 = vcombine.low %v6677_v27, %v6678_v33  ;;  %6763 = vst.msk [vmem:[%s10541_s9 + $0xb8] sm:$0xff] %vm6739_vm15, %v6730_v45 }
 0x7dc   : > { %v6679_v26 = vsel %vm4960_vm10, %v11537_v34, %v6524_v35 }
 0x7dd   : > { %v7221_v7 = vrot.slane %v7207_v11, %v10465_v1  ;;  %v6526_v52 = vpop.permute.xlu1 %6525  ;;  %v11543_v11 = vld [vmem:[#allocation124_spill] sm:$0xff] }
 0x7de   : > { %v6680_v10 = vsel %vm4960_vm10, %v11536_v0, %v6526_v52  ;;  %v11545_v52 = vld [vmem:[#allocation141_spill] sm:$0xff] }
 0x7df   : > { %v6560_v42 = vpop.permute.xlu0 %6559  ;;  %v7222_v61 = vcombine.low %v7214_v21, %v7221_v7  ;;  %v7223_v48 = vcombine.low %v6679_v26, %v6680_v10  ;;  %v11544_v21 = vld [vmem:[#allocation134_spill] sm:$0xff] }
 0x7e0   : > { %v6697_v18 = vsel %vm4960_vm10, %v11534_v28, %v6560_v42 }
 0x7e1   : > { %7480 = vrot.lane.b32.xlu0 %v7222_v61, %s8090_s15  ;;  %v6562_v46 = vpop.permute.xlu1 %6561  ;;  %v7231_v13 = vrot.slane %v7223_v48, %v10465_v1 }
 0x7e2   : > { %v6698_v25 = vsel %vm4960_vm10, %v11535_v51, %v6562_v46  ;;  %v6738_v46 = vld [vmem:[%s10529_s6 + $0xf8] sm:$0xff] }
 0x7e3   : > { %v6564_v40 = vpop.permute.xlu0 %6563  ;;  %v7360_v47 = vcombine.low %v6697_v18, %v6698_v25  ;;  %6771 = vst.msk [vmem:[%s10541_s9 + $0xf8] sm:$0xff] %vm6739_vm15, %v6738_v46 }
 0x7e4   : > { %v6699_v3 = vsel %vm4960_vm10, %v11546_v5, %v6564_v40 }
 0x7e5   : > { %v7374_v62 = vrot.slane %v7360_v47, %v10465_v1  ;;  %v6566_v9 = vpop.permute.xlu1 %6565 }
 0x7e6   : > { %v6700_v8 = vsel %vm4960_vm10, %v11543_v11, %v6566_v9 }
 0x7e7   : > { %v6528_v59 = vpop.permute.xlu0 %6527  ;;  %v7375_v12 = vcombine.low %v7367_v39, %v7374_v62  ;;  %v7410_v28 = vcombine.low %v6699_v3, %v6700_v8 }
 0x7e8   : > { %v6681_v54 = vsel %vm4960_vm10, %v11538_v49, %v6528_v59  ;;  %v11547_v59 = vld [vmem:[#allocation142_spill] sm:$0xff] }
 0x7e9   : > { %7498 = vrot.lane.b32.xlu1 %v7375_v12, %s8090_s15  ;;  %v6530_v19 = vpop.permute.xlu1 %6529  ;;  %v7418_v40 = vrot.slane %v7410_v28, %v10465_v1 }
 0x7ea   : > { %v6682_v50 = vsel %vm4960_vm10, %v11539_v14, %v6530_v19 }
 0x7eb   : > { %v6532_v58 = vpop.permute.xlu0 %6531  ;;  %v7224_v38 = vcombine.low %v6681_v54, %v6682_v50 }
 0x7ec   : > { %v6683_v4 = vsel %vm4960_vm10, %v11541_v31, %v6532_v58 }
 0x7ed   : > { %v7238_v29 = vrot.slane %v7224_v38, %v10465_v1  ;;  %v6534_v32 = vpop.permute.xlu1 %6533 }
 0x7ee   : > { %v6684_v30 = vsel %vm4960_vm10, %v11540_v16, %v6534_v32 }
 0x7ef   : > { %v6568_v41 = vpop.permute.xlu0 %6567  ;;  %v7239_v6 = vcombine.low %v7231_v13, %v7238_v29  ;;  %v7274_v33 = vcombine.low %v6683_v4, %v6684_v30 }
 0x7f0   : > { %v6701_v7 = vsel %vm4960_vm10, %v11544_v21, %v6568_v41 }
 0x7f1   : > { %7482 = vrot.lane.b32.xlu1 %v7239_v6, %s8090_s15  ;;  %v6570_v20 = vpop.permute.xlu1 %6569  ;;  %v7282_v18 = vrot.slane %v7274_v33, %v10465_v1 }
 0x7f2   : > { %v6702_v27 = vsel %vm4960_vm10, %v11542_v17, %v6570_v20 }
 0x7f3   : > { %v6572_v23 = vpop.permute.xlu0 %6571  ;;  %v7411_v61 = vcombine.low %v6701_v7, %v6702_v27 }
 0x7f5   : > { %v6574_v43 = vpop.permute.xlu1 %6573 }
 0x7f6   : > { %v6704_v10 = vsel %vm4960_vm10, %v10425_v37, %v6574_v43 }
 0x7f7   : > { %v6536_v60 = vpop.permute.xlu0 %6535 }
 0x7f8   : > { %v6685_v22 = vsel %vm4960_vm10, %v11545_v52, %v6536_v60 }
 0x7f9   : > { %v6538_v35 = vpop.permute.xlu1 %6537 }
 0x7fa   : > { %v6686_v2 = vsel %vm4960_vm10, %v10444_v63, %v6538_v35  ;;  %v7425_v63 = vrot.slane %v7411_v61, %v10465_v1 }
 0x7fb   : > { %v6540_v42 = vpop.permute.xlu0 %6539  ;;  %v7275_v24 = vcombine.low %v6685_v22, %v6686_v2 }
 0x7fc   : > { %v6687_v62 = vsel %vm4960_vm10, %v10421_v53, %v6540_v42  ;;  %v7426_v26 = vcombine.low %v7418_v40, %v7425_v63  ;;  %v11548_v53 = vld [vmem:[#allocation138_spill] sm:$0xff] }
 0x7fd   : > { %v7289_v51 = vrot.slane %v7275_v24, %v10465_v1  ;;  %v6542_v25 = vpop.permute.xlu1 %6541  ;;  %v6703_v19 = vsel %vm4960_vm10, %v11548_v53, %v6572_v23 }
 0x7fe   : > { %v6688_v47 = vsel %vm4960_vm10, %v10432_v36, %v6542_v25  ;;  %v7427_v49 = vcombine.low %v6703_v19, %v6704_v10 }
 0x7ff   : > { %v6544_v56 = vpop.permute.xlu0 %6543  ;;  %v7290_v39 = vcombine.low %v7282_v18, %v7289_v51  ;;  %v7291_v9 = vcombine.low %v6687_v62, %v6688_v47 }
 0x800   : > { %v6689_v12 = vsel %vm4960_vm10, %v11547_v59, %v6544_v56  ;;  %v7435_v29 = vrot.slane %v7427_v49, %v10465_v1 }
 0x801   : > { %7488 = vrot.lane.b32.xlu0 %v7290_v39, %s8090_s15  ;;  %v6546_v0 = vpop.permute.xlu1 %6545  ;;  %v7299_v54 = vrot.slane %v7291_v9, %v10465_v1 }
 0x802   : > { %v6690_v36 = vsel %vm4960_vm10, %v10462_v15, %v6546_v0 }
 0x803   : > { %v6576_v34 = vpop.permute.xlu0 %6575  ;;  %v7292_v48 = vcombine.low %v6689_v12, %v6690_v36 }
 0x804   : > { %v6705_v15 = vsel %vm4960_vm10, %v10484_v57, %v6576_v34 }
 0x805   : > { %v7306_v37 = vrot.slane %v7292_v48, %v10465_v1  ;;  %7504 = vrot.lane.b32.xlu0 %v7426_v26, %s8090_s15  ;;  %v6578_v14 = vpop.permute.xlu1 %6577 }
 0x806   : > { %v6706_v50 = vsel %vm4960_vm10, %v10500_v44, %v6578_v14 }
 0x807   : > { %v7461_v58 = vpop.permute.xlu0 %7460  ;;  %v7307_v38 = vcombine.low %v7299_v54, %v7306_v37  ;;  %v7428_v13 = vcombine.low %v6705_v15, %v6706_v50 }
 0x808   : > { %7549 = vst.msk [vmem:[%s10541_s9 + $0x40] sm:$0xff] %vm7540_vm1, %v7461_v58 }
 0x809   : > { %v7442_v32 = vrot.slane %v7428_v13, %v10465_v1  ;;  %7490 = vrot.lane.b32.xlu1 %v7307_v38, %s8090_s15  ;;  %v7463_v57 = vpop.permute.xlu1 %7462 }
 0x80a   : > { %7550 = vst.msk [vmem:[%s10541_s9 + $0x48] sm:$0xff] %vm7540_vm1, %v7463_v57 }
 0x80b   : > { %v7445_v44 = vpop.permute.xlu0 %7444  ;;  %v7443_v41 = vcombine.low %v7435_v29, %v7442_v32 }
 0x80c   : > { %7541 = vst.msk [vmem:[%s10541_s9] sm:$0xff] %vm7540_vm1, %v7445_v44 }
 0x80d   : > { %7506 = vrot.lane.b32.xlu1 %v7443_v41, %s8090_s15  ;;  %v7447_v6 = vpop.permute.xlu1 %7446 }
 0x80e   : > { %7542 = vst.msk [vmem:[%s10541_s9 + $0x8] sm:$0xff] %vm7540_vm1, %v7447_v6 }
 0x80f   : > { %v7469_v1 = vpop.permute.xlu0 %7468 }
 0x810   : > { %7553 = vst.msk [vmem:[%s10541_s9 + $0x60] sm:$0xff] %vm7540_vm1, %v7469_v1 }
 0x811   : > { %v7471_v20 = vpop.permute.xlu1 %7470 }
 0x812   : > { %7554 = vst.msk [vmem:[%s10541_s9 + $0x68] sm:$0xff] %vm7540_vm1, %v7471_v20 }
 0x813   : > { %v7453_v23 = vpop.permute.xlu0 %7452 }
 0x814   : > { %7545 = vst.msk [vmem:[%s10541_s9 + $0x20] sm:$0xff] %vm7540_vm1, %v7453_v23 }
 0x815   : > { %v7455_v55 = vpop.permute.xlu1 %7454 }
 0x816   : > { %7546 = vst.msk [vmem:[%s10541_s9 + $0x28] sm:$0xff] %vm7540_vm1, %v7455_v55 }
 0x817   : > { %v7493_v43 = vpop.permute.xlu0 %7492 }
 0x818   : > { %7565 = vst.msk [vmem:[%s10541_s9 + $0xc0] sm:$0xff] %vm7540_vm1, %v7493_v43 }
 0x819   : > { %v7495_v16 = vpop.permute.xlu1 %7494 }
 0x81a   : > { %7566 = vst.msk [vmem:[%s10541_s9 + $0xc8] sm:$0xff] %vm7540_vm1, %v7495_v16 }
 0x81b   : > { %v7477_v30 = vpop.permute.xlu0 %7476 }
 0x81c   : > { %7557 = vst.msk [vmem:[%s10541_s9 + $0x80] sm:$0xff] %vm7540_vm1, %v7477_v30 }
 0x81d   : > { %v7479_v60 = vpop.permute.xlu1 %7478 }
 0x81e   : > { %7558 = vst.msk [vmem:[%s10541_s9 + $0x88] sm:$0xff] %vm7540_vm1, %v7479_v60 }
 0x81f   : > { %v7501_v31 = vpop.permute.xlu0 %7500 }
 0x820   : > { %7569 = vst.msk [vmem:[%s10541_s9 + $0xe0] sm:$0xff] %vm7540_vm1, %v7501_v31 }
 0x821   : > { %v7503_v4 = vpop.permute.xlu1 %7502 }
 0x822   : > { %7570 = vst.msk [vmem:[%s10541_s9 + $0xe8] sm:$0xff] %vm7540_vm1, %v7503_v4 }
 0x823   : > { %v7465_v17 = vpop.permute.xlu0 %7464 }
 0x824   : > { %7551 = vst.msk [vmem:[%s10541_s9 + $0x50] sm:$0xff] %vm7540_vm1, %v7465_v17 }
 0x825   : > { %v7467_v27 = vpop.permute.xlu1 %7466 }
 0x826   : > { %7552 = vst.msk [vmem:[%s10541_s9 + $0x58] sm:$0xff] %vm7540_vm1, %v7467_v27 }
 0x827   : > { %v7485_v45 = vpop.permute.xlu0 %7484 }
 0x828   : > { %7561 = vst.msk [vmem:[%s10541_s9 + $0xa0] sm:$0xff] %vm7540_vm1, %v7485_v45 }
 0x829   : > { %v7487_v33 = vpop.permute.xlu1 %7486 }
 0x82a   : > { %7562 = vst.msk [vmem:[%s10541_s9 + $0xa8] sm:$0xff] %vm7540_vm1, %v7487_v33 }
 0x82b   : > { %v7449_v35 = vpop.permute.xlu0 %7448 }
 0x82c   : > { %7543 = vst.msk [vmem:[%s10541_s9 + $0x10] sm:$0xff] %vm7540_vm1, %v7449_v35 }
 0x82d   : > { %v7451_v11 = vpop.permute.xlu1 %7450 }
 0x82e   : > { %7544 = vst.msk [vmem:[%s10541_s9 + $0x18] sm:$0xff] %vm7540_vm1, %v7451_v11 }
 0x82f   : > { %v7473_v8 = vpop.permute.xlu0 %7472 }
 0x830   : > { %7555 = vst.msk [vmem:[%s10541_s9 + $0x70] sm:$0xff] %vm7540_vm1, %v7473_v8 }
 0x833   : > { %v7457_v21 = vpop.permute.xlu0 %7456 }
 0x834   : > { %7547 = vst.msk [vmem:[%s10541_s9 + $0x30] sm:$0xff] %vm7540_vm1, %v7457_v21 }
 0x83b   : > { %v7475_v7 = vpop.permute.xlu1 %7474 }
 0x83c   : > { %7556 = vst.msk [vmem:[%s10541_s9 + $0x78] sm:$0xff] %vm7540_vm1, %v7475_v7 }
 0x843   : > { %v7459_v52 = vpop.permute.xlu1 %7458 }
 0x844   : > { %7548 = vst.msk [vmem:[%s10541_s9 + $0x38] sm:$0xff] %vm7540_vm1, %v7459_v52 }
 0x84b   : > { %v7497_v22 = vpop.permute.xlu0 %7496 }
 0x84c   : > { %7567 = vst.msk [vmem:[%s10541_s9 + $0xd0] sm:$0xff] %vm7540_vm1, %v7497_v22 }
 0x853   : > { %v7481_v2 = vpop.permute.xlu0 %7480 }
 0x854   : > { %7559 = vst.msk [vmem:[%s10541_s9 + $0x90] sm:$0xff] %vm7540_vm1, %v7481_v2 }
 0x85b   : > { %v7499_v42 = vpop.permute.xlu1 %7498 }
 0x85c   : > { %7568 = vst.msk [vmem:[%s10541_s9 + $0xd8] sm:$0xff] %vm7540_vm1, %v7499_v42 }
 0x863   : > { %v7483_v61 = vpop.permute.xlu1 %7482 }
 0x864   : > { %7560 = vst.msk [vmem:[%s10541_s9 + $0x98] sm:$0xff] %vm7540_vm1, %v7483_v61 }
 0x873   : > { %v7489_v24 = vpop.permute.xlu0 %7488 }
 0x874   : > { %7563 = vst.msk [vmem:[%s10541_s9 + $0xb0] sm:$0xff] %vm7540_vm1, %v7489_v24 }
 0x877   : > { %v7505_v5 = vpop.permute.xlu0 %7504 }
 0x878   : > { %7571 = vst.msk [vmem:[%s10541_s9 + $0xf0] sm:$0xff] %vm7540_vm1, %v7505_v5 }
 0x87b   : > { %v7491_v3 = vpop.permute.xlu1 %7490 }
 0x87c   : > { %7564 = vst.msk [vmem:[%s10541_s9 + $0xb8] sm:$0xff] %vm7540_vm1, %v7491_v3 }
 0x87f   : > { %v7507_v46 = vpop.permute.xlu1 %7506 }
 0x880   : > { %7572 = vst.msk [vmem:[%s10541_s9 + $0xf8] sm:$0xff] %vm7540_vm1, %v7507_v46 }
 0x881 PF: > { %s15_s18 = sadd.s32 1, %s8076_s18  }
 0x882   : > { %p12_p4 = scmp.ge.s32.totalorder %s15_s18, 4  }
 0x884   :  { %14 = sbr.rel (!%p12_p4) target bundleno = 1 (0x1), region = 76 }

</bundles_post_ra>
